<compile_context>
chip_gen: v7x
topology: tpu7x:2x2x1
jax: 0.10.0
libtpu: 0.0.40
codegen_flags: <defaults>
</compile_context>

<pallas_src>
import functools

import jax
import jax.numpy as jnp
from jax import lax
from jax.experimental import pallas as pl
from jax.experimental.pallas import tpu as pltpu

# ----- module hyper-parameters (small but consistent with the PyTorch module) -----
NOISE_DIM = 16          # constructor arg noise_dim
NUM_CLASSES = 2
IMG_SIZE = 32           # constructor arg img_size (must be divisible by 16)
EMB_DIM = 50
INITIAL_DIM = 256
INITIAL_SIZE = IMG_SIZE // 16
BN_EPS = 1e-5


def _vmem():
    # whole array resident in VMEM (no grid -> full-array block)
    return pl.BlockSpec(memory_space=pltpu.MemorySpace.VMEM)


# --------------------------- Pallas kernels ---------------------------

def _fc_relu_kernel(x_ref, w_ref, b_ref, o_ref):
    """out = relu(x @ w + b); output (B, 1024) is lane-dense."""
    y = jnp.dot(x_ref[...], w_ref[...], preferred_element_type=jnp.float32)
    o_ref[...] = jnp.maximum(y + b_ref[...], 0.0)


def pallas_fc_relu(x, w, b):
    m, n = x.shape[0], w.shape[1]
    return pl.pallas_call(
        _fc_relu_kernel,
        out_shape=jax.ShapeDtypeStruct((m, n), jnp.float32),
        in_specs=[_vmem(), _vmem(), _vmem()],
        out_specs=_vmem(),
    )(x, w, b)


def _convt_bn_relu_cmajor_kernel(p_ref, w_ref, g_ref, b_ref, o_ref, *, eps):
    """Channel-major sub-pixel ConvT(4,2,1) + training-mode BN + ReLU (ct2/ct3).

    p_ref : (4, Cin*4, M)   bf16 -- one 2x2-tap patch matrix per output parity
    w_ref : (4, Cout, Cin*4) bf16
    g_ref, b_ref : (Cout, 1) f32 -- BN gamma / beta
    o_ref : (Cout, 4*M) f32      -- parity-major spatial columns (lane-dense)

    Single-pass stats: each parity result is staged into o_ref as it is
    produced (only one (Cout, M) tile live at a time -> no vreg spills), then
    one full-block pass normalizes (broadcasts of inv/shift happen once).
    """
    m = p_ref.shape[2]
    cout = w_ref.shape[1]
    s = jnp.zeros((cout, 1), jnp.float32)
    ss = jnp.zeros((cout, 1), jnp.float32)
    for p in range(4):
        y = jnp.dot(w_ref[p], p_ref[p], preferred_element_type=jnp.float32)  # (Cout, M)
        o_ref[:, p * m:(p + 1) * m] = y
        s = s + y.sum(axis=1, keepdims=True)
        ss = ss + jnp.square(y).sum(axis=1, keepdims=True)
    cnt = 4.0 * m
    mean = s / cnt
    var = ss / cnt - jnp.square(mean)          # biased batch variance, f32
    inv = lax.rsqrt(var + eps) * g_ref[...]    # (Cout, 1)
    shift = b_ref[...] - mean * inv            # (Cout, 1)
    o_ref[...] = jnp.maximum(o_ref[...] * inv + shift, 0.0)


def pallas_convt_bn_relu_cmajor(patches, wmat, gamma, beta):
    cout = wmat.shape[1]
    m = patches.shape[2]
    return pl.pallas_call(
        functools.partial(_convt_bn_relu_cmajor_kernel, eps=BN_EPS),
        out_shape=jax.ShapeDtypeStruct((cout, 4 * m), jnp.float32),
        in_specs=[_vmem()] * 4,
        out_specs=_vmem(),
    )(patches, wmat, gamma, beta)


def _convt_bn_relu_smajor_kernel(p_ref, w_ref, g_ref, b_ref, o_ref, *, eps):
    """Spatial-major sub-pixel ConvT(4,2,1) + BN + ReLU for small-M layers (ct0/ct1).

    p_ref : (4, M, Cin*4)  bf16 -- rows (b,h,w), cols (cin, tap); Cin*4 on lanes
    w_ref : (4, Cin*4, Cout) bf16
    g_ref, b_ref : (1, Cout) f32
    o_ref : (4*M, Cout) f32     -- parity blocks at sublane offsets p*M
    """
    m = p_ref.shape[1]
    cout = w_ref.shape[2]
    s = jnp.zeros((1, cout), jnp.float32)
    ss = jnp.zeros((1, cout), jnp.float32)
    for p in range(4):
        y = jnp.dot(p_ref[p], w_ref[p], preferred_element_type=jnp.float32)  # (M, Cout)
        o_ref[p * m:(p + 1) * m, :] = y
        s = s + y.sum(axis=0, keepdims=True)
        ss = ss + jnp.square(y).sum(axis=0, keepdims=True)
    cnt = 4.0 * m
    mean = s / cnt
    var = ss / cnt - jnp.square(mean)
    inv = lax.rsqrt(var + eps) * g_ref[...]    # (1, Cout)
    shift = b_ref[...] - mean * inv            # (1, Cout)
    o_ref[...] = jnp.maximum(o_ref[...] * inv + shift, 0.0)


def pallas_convt_bn_relu_smajor(patches, wmat, gamma, beta):
    cout = wmat.shape[2]
    m = patches.shape[1]
    return pl.pallas_call(
        functools.partial(_convt_bn_relu_smajor_kernel, eps=BN_EPS),
        out_shape=jax.ShapeDtypeStruct((4 * m, cout), jnp.float32),
        in_specs=[_vmem()] * 4,
        out_specs=_vmem(),
    )(patches, wmat, gamma, beta)


def _heads_kernel(p_ref, w_ref, b_ref, o_ref):
    """Fused image/mask 3x3 conv heads: one bf16 matmul over the shared patches,
    tanh on row 0 (image), sigmoid on row 1 (mask) -- no iota/select filler."""
    y = jnp.dot(w_ref[...], p_ref[...], preferred_element_type=jnp.float32)  # (2, M)
    y = y + b_ref[...]
    o_ref[0:1, :] = jnp.tanh(y[0:1, :])
    o_ref[1:2, :] = jax.nn.sigmoid(y[1:2, :])


def pallas_heads(patches, wmat, bias):
    _, m = patches.shape
    # single full-array call: (144, B*1024) bf16 patches are trivially VMEM-resident
    # TODO(synk): on v7x a 2-step "parallel" lane-tiled grid would use both TCs.
    return pl.pallas_call(
        _heads_kernel,
        out_shape=jax.ShapeDtypeStruct((2, m), jnp.float32),
        in_specs=[_vmem()] * 3,
        out_specs=_vmem(),
    )(patches, wmat, bias)


# --------------------------- patch / weight glue (plain JAX) ---------------------------
# ConvTranspose(4,2,1) sub-pixel decomposition: output parity (py, px) is a 2x2-tap
# conv over the input, with kernel taps ky = 3 - py - 2*dy, kx = 3 - px - 2*dx.
# TODO(synk): remaining perf-review item -- pull this patch extraction / parity
# interleave into the kernels (or fuse the whole net into one VMEM-resident
# pallas_call) to remove the inter-layer XLA glue and HBM round trips.

def _convt_parity_patches(x):
    """x: (Cin, B, H, W) -> (4, Cin*4, B*H*W); rows (cin, tap), cols (b,h,w)."""
    c, b, h, w = x.shape
    xp = jnp.pad(x, ((0, 0), (0, 0), (1, 1), (1, 1)))
    planes = []
    for py in range(2):
        for px in range(2):
            taps = [xp[:, :, py + dy:py + dy + h, px + dx:px + dx + w]
                    for dy in range(2) for dx in range(2)]
            planes.append(jnp.stack(taps, axis=1).reshape(c * 4, b * h * w))
    return jnp.stack(planes, axis=0)


def _convt_parity_patches_T(x):
    """x: (Cin, B, H, W) -> (4, B*H*W, Cin*4); rows (b,h,w), cols (cin, tap)."""
    c, b, h, w = x.shape
    xp = jnp.pad(x, ((0, 0), (0, 0), (1, 1), (1, 1)))
    planes = []
    for py in range(2):
        for px in range(2):
            taps = [xp[:, :, py + dy:py + dy + h, px + dx:px + dx + w]
                    for dy in range(2) for dx in range(2)]
            t = jnp.stack(taps, axis=-1)                       # (C, B, H, W, 4)
            planes.append(t.transpose(1, 2, 3, 0, 4).reshape(b * h * w, c * 4))
    return jnp.stack(planes, axis=0)


def _convt_parity_weights(w):
    """PyTorch ConvTranspose2d weight (Cin, Cout, 4, 4) -> (4, Cout, Cin*4)."""
    cin, cout = w.shape[:2]
    mats = []
    for py in range(2):
        for px in range(2):
            sub = w[:, :, 3 - py::-2, 3 - px::-2]          # (Cin, Cout, 2, 2), tap order (dy, dx)
            mats.append(sub.transpose(1, 0, 2, 3).reshape(cout, cin * 4))
    return jnp.stack(mats, axis=0)


def _conv3_patches(x):
    """x: (C, B, H, W) -> (C*9, B*H*W) im2col for 3x3 / pad 1 / stride 1 conv."""
    c, b, h, w = x.shape
    xp = jnp.pad(x, ((0, 0), (0, 0), (1, 1), (1, 1)))
    taps = [xp[:, :, ky:ky + h, kx:kx + w] for ky in range(3) for kx in range(3)]
    return jnp.stack(taps, axis=1).reshape(c * 9, b * h * w)


# --------------------------- forward pass ---------------------------

def generator_forward(params, noise, class_labels):
    b = noise.shape[0]
    # TODO(synk): embedding row gather kept in plain JAX (pure indexing, not hot path).
    emb = params["emb"][class_labels]                        # (B, 50)
    x = jnp.concatenate([noise, emb], axis=1)                # (B, noise_dim + 50)
    x = pallas_fc_relu(x, params["fc_w"], params["fc_b"])    # (B, 1024), lane-dense
    # to channels-first (C, B, H, W); fc column order is (c, h, w) as in PyTorch .view
    x = x.reshape(b, INITIAL_DIM, INITIAL_SIZE, INITIAL_SIZE).transpose(1, 0, 2, 3)

    for i in range(4):                                       # 4 x [ConvT + BN + ReLU]
        c, bsz, h, w = x.shape
        m = bsz * h * w
        # cast fuses into the XLA patch-building fusion; only MXU operands are bf16
        xb = x.astype(jnp.bfloat16)
        if m < 128:
            # small-M layers: spatial-major orientation (lane axis = Cin*4 / Cout,
            # parity blocks at sublane offsets -> no masked sub-128 lane stores)
            patches = _convt_parity_patches_T(xb)                          # (4, M, Cin*4)
            y = pallas_convt_bn_relu_smajor(
                patches, params[f"ct{i}_wmat_s"],
                params[f"bn{i}_g_s"], params[f"bn{i}_b_s"])                # (4M, Cout)
            cout = y.shape[1]
            x = (y.reshape(2, 2, bsz, h, w, cout)
                   .transpose(5, 2, 3, 0, 4, 1)
                   .reshape(cout, bsz, 2 * h, 2 * w))                      # (Cout, B, 2H, 2W)
        else:
            patches = _convt_parity_patches(xb)                            # (4, Cin*4, M)
            y = pallas_convt_bn_relu_cmajor(
                patches, params[f"ct{i}_wmat_c"],
                params[f"bn{i}_g_c"], params[f"bn{i}_b_c"])                # (Cout, 4M)
            cout = y.shape[0]
            x = (y.reshape(cout, 2, 2, bsz, h, w)
                   .transpose(0, 3, 4, 1, 5, 2)
                   .reshape(cout, bsz, 2 * h, 2 * w))                      # (Cout, B, 2H, 2W)

    patches = _conv3_patches(x.astype(jnp.bfloat16))         # (144, B*32*32) bf16 (shared)
    out = pallas_heads(patches, params["head_wmat"], params["head_b"])   # (2, B*32*32)
    out = out.reshape(2, b, IMG_SIZE, IMG_SIZE)
    image = out[0][:, None]                                  # (B, 1, 32, 32)
    mask = out[1][:, None]                                   # (B, 1, 32, 32)
    return image, mask


# --------------------------- parameter construction ---------------------------

def init_params(key):
    """Raw parameters in PyTorch layout (used by the reference)."""
    ks = jax.random.split(key, 11)

    def nrm(k, shape, scale):
        return scale * jax.random.normal(k, shape, jnp.float32)

    fc_out = INITIAL_DIM * INITIAL_SIZE * INITIAL_SIZE
    p = {
        "emb": nrm(ks[0], (NUM_CLASSES, EMB_DIM), 1.0),
        "fc_w": nrm(ks[1], (NOISE_DIM + EMB_DIM, fc_out), 0.05),
        "fc_b": nrm(ks[2], (1, fc_out), 0.01),
        "img_w": nrm(ks[7], (1, 16, 3, 3), 0.05),
        "img_b": nrm(ks[8], (1, 1), 0.01),
        "mask_w": nrm(ks[9], (1, 16, 3, 3), 0.05),
        "mask_b": nrm(ks[10], (1, 1), 0.01),
    }
    chans = [INITIAL_DIM, 128, 64, 32, 16]
    for i in range(4):
        cin, cout = chans[i], chans[i + 1]
        p[f"ct{i}_w"] = nrm(ks[3 + i], (cin, cout, 4, 4), 0.05)
        p[f"bn{i}_g"] = jnp.ones((1, cout), jnp.float32)     # PyTorch BN default init
        p[f"bn{i}_b"] = jnp.zeros((1, cout), jnp.float32)
    return p


def prepare_params(p):
    """One-time conversion of raw params into kernel-ready matrices."""
    kp = {
        "emb": p["emb"],
        "fc_w": p["fc_w"],
        "fc_b": p["fc_b"],
        # fused img/mask head: (2, Cin*9) bf16 weight, (2, 1) f32 bias
        "head_wmat": jnp.concatenate(
            [p["img_w"].reshape(1, -1), p["mask_w"].reshape(1, -1)],
            axis=0).astype(jnp.bfloat16),
        "head_b": jnp.concatenate(
            [p["img_b"].reshape(1, 1), p["mask_b"].reshape(1, 1)], axis=0),
    }
    for i in range(4):
        wm = _convt_parity_weights(p[f"ct{i}_w"])                          # (4, Cout, Cin*4)
        kp[f"ct{i}_wmat_c"] = wm.astype(jnp.bfloat16)                      # channel-major
        kp[f"ct{i}_wmat_s"] = wm.transpose(0, 2, 1).astype(jnp.bfloat16)   # spatial-major
        kp[f"bn{i}_g_c"] = p[f"bn{i}_g"].reshape(-1, 1)
        kp[f"bn{i}_b_c"] = p[f"bn{i}_b"].reshape(-1, 1)
        kp[f"bn{i}_g_s"] = p[f"bn{i}_g"].reshape(1, -1)
        kp[f"bn{i}_b_s"] = p[f"bn{i}_b"].reshape(1, -1)
    return kp


# --------------------------- pure-JAX f32 reference (for validation) ---------------------------

def reference_forward(params, noise, class_labels):
    hp = lax.Precision.HIGHEST
    b = noise.shape[0]
    emb = params["emb"][class_labels]
    x = jnp.concatenate([noise, emb], axis=1)
    x = jax.nn.relu(jnp.dot(x, params["fc_w"], precision=hp) + params["fc_b"])
    x = x.reshape(b, INITIAL_DIM, INITIAL_SIZE, INITIAL_SIZE)
    for i in range(4):
        w = params[f"ct{i}_w"]
        w_conv = jnp.flip(w, axis=(2, 3)).transpose(1, 0, 2, 3)   # (Cout, Cin, 4, 4)
        y = lax.conv_general_dilated(
            x, w_conv, (1, 1), [(2, 2), (2, 2)], lhs_dilation=(2, 2),
            dimension_numbers=("NCHW", "OIHW", "NCHW"), precision=hp)
        mean = y.mean(axis=(0, 2, 3), keepdims=True)
        var = ((y - mean) ** 2).mean(axis=(0, 2, 3), keepdims=True)
        g = params[f"bn{i}_g"].reshape(1, -1, 1, 1)
        be = params[f"bn{i}_b"].reshape(1, -1, 1, 1)
        x = jax.nn.relu((y - mean) * lax.rsqrt(var + BN_EPS) * g + be)

    def head(wk, bk, act):
        y = lax.conv_general_dilated(
            x, params[wk], (1, 1), [(1, 1), (1, 1)],
            dimension_numbers=("NCHW", "OIHW", "NCHW"), precision=hp)
        return act(y + params[bk].reshape(1, -1, 1, 1))

    return head("img_w", "img_b", jnp.tanh), head("mask_w", "mask_b", jax.nn.sigmoid)


# --------------------------- main ---------------------------

if __name__ == "__main__":
    key = jax.random.PRNGKey(0)
    k_noise, k_params = jax.random.split(key)

    B = 2
    noise = jax.random.normal(k_noise, (B, NOISE_DIM), jnp.float32)
    class_labels = jnp.array([0, 1], dtype=jnp.int32)
    raw_params = init_params(k_params)
    params = prepare_params(raw_params)

    fwd = jax.jit(generator_forward)
    image, mask = fwd(params, noise, class_labels)
    jax.block_until_ready((image, mask))

    assert image.shape == (B, 1, IMG_SIZE, IMG_SIZE), image.shape
    assert mask.shape == (B, 1, IMG_SIZE, IMG_SIZE), mask.shape

    ref_img, ref_mask = reference_forward(raw_params, noise, class_labels)
    # ConvT and head matmuls use bf16 operands (f32 accumulation), so allow a
    # slightly looser tolerance than the pure-f32 reference.
    assert jnp.allclose(image, ref_img, atol=3e-2, rtol=3e-2), "image mismatch vs reference"
    assert jnp.allclose(mask, ref_mask, atol=3e-2, rtol=3e-2), "mask mismatch vs reference"

    print("KERNEL_OK")
</pallas_src>

<mosaic_0001>
module attributes {stable_mosaic.version = 11 : i64} {
  func.func @_fc_relu_kernel(%arg0: memref<2x66xf32, #tpu.memory_space<vmem>>, %arg1: memref<66x1024xf32, #tpu.memory_space<vmem>>, %arg2: memref<1x1024xf32, #tpu.memory_space<vmem>>, %arg3: memref<2x1024xf32, #tpu.memory_space<vmem>>) attributes {dimension_semantics = [], scalar_prefetch = 0 : i64, scratch_operands = 0 : i64, tpu.core_type = #tpu.core_type<tc>} {
    %c0 = arith.constant 0 : index
    %c0_0 = arith.constant 0 : index
    %0 = vector.load %arg0[%c0, %c0_0] : memref<2x66xf32, #tpu.memory_space<vmem>>, vector<2x66xf32>
    %c0_1 = arith.constant 0 : index
    %c0_2 = arith.constant 0 : index
    %1 = vector.load %arg1[%c0_1, %c0_2] : memref<66x1024xf32, #tpu.memory_space<vmem>>, vector<66x1024xf32>
    %cst = arith.constant dense<0.000000e+00> : vector<2x1024xf32>
    %2 = tpu.matmul %0, %1, %cst {dimension_numbers = #tpu.dot_dimension_numbers<[1], [0], [0], [1], [0, 0, 1, 1], [], []>} : vector<2x66xf32>, vector<66x1024xf32>, vector<2x1024xf32> -> vector<2x1024xf32>
    %c0_3 = arith.constant 0 : index
    %c0_4 = arith.constant 0 : index
    %3 = vector.load %arg2[%c0_3, %c0_4] : memref<1x1024xf32, #tpu.memory_space<vmem>>, vector<1x1024xf32>
    %4 = vector.broadcast %3 : vector<1x1024xf32> to vector<2x1024xf32>
    %5 = arith.addf %2, %4 : vector<2x1024xf32>
    %cst_5 = arith.constant 0.000000e+00 : f32
    %6 = vector.broadcast %cst_5 : f32 to vector<2x1024xf32>
    %7 = arith.maximumf %5, %6 : vector<2x1024xf32>
    %c0_6 = arith.constant 0 : index
    %c0_7 = arith.constant 0 : index
    %8 = vector.load %arg3[%c0_6, %c0_7] : memref<2x1024xf32, #tpu.memory_space<vmem>>, vector<2x1024xf32>
    tpu.vector_store %arg3[%c0_6, %c0_7], %7 {strides = array<i32>} : memref<2x1024xf32, #tpu.memory_space<vmem>>, vector<2x1024xf32>,
    return
  }
}

module attributes {stable_mosaic.version = 11 : i64} {
  func.func @_convt_bn_relu_smajor_kernel(%arg0: memref<4x8x1024xbf16, #tpu.memory_space<vmem>>, %arg1: memref<4x1024x128xbf16, #tpu.memory_space<vmem>>, %arg2: memref<1x128xf32, #tpu.memory_space<vmem>>, %arg3: memref<1x128xf32, #tpu.memory_space<vmem>>, %arg4: memref<32x128xf32, #tpu.memory_space<vmem>>) attributes {dimension_semantics = [], scalar_prefetch = 0 : i64, scratch_operands = 0 : i64, tpu.core_type = #tpu.core_type<tc>} {
    %cst = arith.constant 0.000000e+00 : f32
    %0 = vector.broadcast %cst : f32 to vector<1x128xf32>
    %cst_0 = arith.constant 0.000000e+00 : f32
    %1 = vector.broadcast %cst_0 : f32 to vector<1x128xf32>
    %c0 = arith.constant 0 : index
    %c0_1 = arith.constant 0 : index
    %c0_2 = arith.constant 0 : index
    %2 = vector.load %arg0[%c0, %c0_1, %c0_2] : memref<4x8x1024xbf16, #tpu.memory_space<vmem>>, vector<1x8x1024xbf16>
    %3 = vector.shape_cast %2 : vector<1x8x1024xbf16> to vector<8x1024xbf16>
    %c0_3 = arith.constant 0 : index
    %c0_4 = arith.constant 0 : index
    %c0_5 = arith.constant 0 : index
    %4 = vector.load %arg1[%c0_3, %c0_4, %c0_5] : memref<4x1024x128xbf16, #tpu.memory_space<vmem>>, vector<1x1024x128xbf16>
    %5 = vector.shape_cast %4 : vector<1x1024x128xbf16> to vector<1024x128xbf16>
    %cst_6 = arith.constant dense<0.000000e+00> : vector<8x128xf32>
    %6 = tpu.matmul %3, %5, %cst_6 {dimension_numbers = #tpu.dot_dimension_numbers<[1], [0], [0], [1], [0, 0, 1, 1], [], []>} : vector<8x1024xbf16>, vector<1024x128xbf16>, vector<8x128xf32> -> vector<8x128xf32>
    %c0_7 = arith.constant 0 : index
    %c0_8 = arith.constant 0 : index
    %7 = vector.load %arg4[%c0_7, %c0_8] : memref<32x128xf32, #tpu.memory_space<vmem>>, vector<8x128xf32>
    tpu.vector_store %arg4[%c0_7, %c0_8], %6 {strides = array<i32>} : memref<32x128xf32, #tpu.memory_space<vmem>>, vector<8x128xf32>,
    %cst_9 = arith.constant dense<0.000000e+00> : vector<128xf32>
    %8 = vector.multi_reduction <add>, %6, %cst_9 [0] : vector<8x128xf32> to vector<128xf32>
    %9 = vector.shape_cast %8 : vector<128xf32> to vector<1x128xf32>
    %10 = arith.addf %0, %9 : vector<1x128xf32>
    %11 = arith.mulf %6, %6 : vector<8x128xf32>
    %cst_10 = arith.constant dense<0.000000e+00> : vector<128xf32>
    %12 = vector.multi_reduction <add>, %11, %cst_10 [0] : vector<8x128xf32> to vector<128xf32>
    %13 = vector.shape_cast %12 : vector<128xf32> to vector<1x128xf32>
    %14 = arith.addf %1, %13 : vector<1x128xf32>
    %c1 = arith.constant 1 : index
    %c0_11 = arith.constant 0 : index
    %c0_12 = arith.constant 0 : index
    %15 = vector.load %arg0[%c1, %c0_11, %c0_12] : memref<4x8x1024xbf16, #tpu.memory_space<vmem>>, vector<1x8x1024xbf16>
    %16 = vector.shape_cast %15 : vector<1x8x1024xbf16> to vector<8x1024xbf16>
    %c1_13 = arith.constant 1 : index
    %c0_14 = arith.constant 0 : index
    %c0_15 = arith.constant 0 : index
    %17 = vector.load %arg1[%c1_13, %c0_14, %c0_15] : memref<4x1024x128xbf16, #tpu.memory_space<vmem>>, vector<1x1024x128xbf16>
    %18 = vector.shape_cast %17 : vector<1x1024x128xbf16> to vector<1024x128xbf16>
    %cst_16 = arith.constant dense<0.000000e+00> : vector<8x128xf32>
    %19 = tpu.matmul %16, %18, %cst_16 {dimension_numbers = #tpu.dot_dimension_numbers<[1], [0], [0], [1], [0, 0, 1, 1], [], []>} : vector<8x1024xbf16>, vector<1024x128xbf16>, vector<8x128xf32> -> vector<8x128xf32>
    %c8 = arith.constant 8 : index
    %c0_17 = arith.constant 0 : index
    %20 = vector.load %arg4[%c8, %c0_17] : memref<32x128xf32, #tpu.memory_space<vmem>>, vector<8x128xf32>
    tpu.vector_store %arg4[%c8, %c0_17], %19 {strides = array<i32>} : memref<32x128xf32, #tpu.memory_space<vmem>>, vector<8x128xf32>,
    %cst_18 = arith.constant dense<0.000000e+00> : vector<128xf32>
    %21 = vector.multi_reduction <add>, %19, %cst_18 [0] : vector<8x128xf32> to vector<128xf32>
    %22 = vector.shape_cast %21 : vector<128xf32> to vector<1x128xf32>
    %23 = arith.addf %10, %22 : vector<1x128xf32>
    %24 = arith.mulf %19, %19 : vector<8x128xf32>
    %cst_19 = arith.constant dense<0.000000e+00> : vector<128xf32>
    %25 = vector.multi_reduction <add>, %24, %cst_19 [0] : vector<8x128xf32> to vector<128xf32>
    %26 = vector.shape_cast %25 : vector<128xf32> to vector<1x128xf32>
    %27 = arith.addf %14, %26 : vector<1x128xf32>
    %c2 = arith.constant 2 : index
    %c0_20 = arith.constant 0 : index
    %c0_21 = arith.constant 0 : index
    %28 = vector.load %arg0[%c2, %c0_20, %c0_21] : memref<4x8x1024xbf16, #tpu.memory_space<vmem>>, vector<1x8x1024xbf16>
    %29 = vector.shape_cast %28 : vector<1x8x1024xbf16> to vector<8x1024xbf16>
    %c2_22 = arith.constant 2 : index
    %c0_23 = arith.constant 0 : index
    %c0_24 = arith.constant 0 : index
    %30 = vector.load %arg1[%c2_22, %c0_23, %c0_24] : memref<4x1024x128xbf16, #tpu.memory_space<vmem>>, vector<1x1024x128xbf16>
    %31 = vector.shape_cast %30 : vector<1x1024x128xbf16> to vector<1024x128xbf16>
    %cst_25 = arith.constant dense<0.000000e+00> : vector<8x128xf32>
    %32 = tpu.matmul %29, %31, %cst_25 {dimension_numbers = #tpu.dot_dimension_numbers<[1], [0], [0], [1], [0, 0, 1, 1], [], []>} : vector<8x1024xbf16>, vector<1024x128xbf16>, vector<8x128xf32> -> vector<8x128xf32>
    %c16 = arith.constant 16 : index
    %c0_26 = arith.constant 0 : index
    %33 = vector.load %arg4[%c16, %c0_26] : memref<32x128xf32, #tpu.memory_space<vmem>>, vector<8x128xf32>
    tpu.vector_store %arg4[%c16, %c0_26], %32 {strides = array<i32>} : memref<32x128xf32, #tpu.memory_space<vmem>>, vector<8x128xf32>,
    %cst_27 = arith.constant dense<0.000000e+00> : vector<128xf32>
    %34 = vector.multi_reduction <add>, %32, %cst_27 [0] : vector<8x128xf32> to vector<128xf32>
    %35 = vector.shape_cast %34 : vector<128xf32> to vector<1x128xf32>
    %36 = arith.addf %23, %35 : vector<1x128xf32>
    %37 = arith.mulf %32, %32 : vector<8x128xf32>
    %cst_28 = arith.constant dense<0.000000e+00> : vector<128xf32>
    %38 = vector.multi_reduction <add>, %37, %cst_28 [0] : vector<8x128xf32> to vector<128xf32>
    %39 = vector.shape_cast %38 : vector<128xf32> to vector<1x128xf32>
    %40 = arith.addf %27, %39 : vector<1x128xf32>
    %c3 = arith.constant 3 : index
    %c0_29 = arith.constant 0 : index
    %c0_30 = arith.constant 0 : index
    %41 = vector.load %arg0[%c3, %c0_29, %c0_30] : memref<4x8x1024xbf16, #tpu.memory_space<vmem>>, vector<1x8x1024xbf16>
    %42 = vector.shape_cast %41 : vector<1x8x1024xbf16> to vector<8x1024xbf16>
    %c3_31 = arith.constant 3 : index
    %c0_32 = arith.constant 0 : index
    %c0_33 = arith.constant 0 : index
    %43 = vector.load %arg1[%c3_31, %c0_32, %c0_33] : memref<4x1024x128xbf16, #tpu.memory_space<vmem>>, vector<1x1024x128xbf16>
    %44 = vector.shape_cast %43 : vector<1x1024x128xbf16> to vector<1024x128xbf16>
    %cst_34 = arith.constant dense<0.000000e+00> : vector<8x128xf32>
    %45 = tpu.matmul %42, %44, %cst_34 {dimension_numbers = #tpu.dot_dimension_numbers<[1], [0], [0], [1], [0, 0, 1, 1], [], []>} : vector<8x1024xbf16>, vector<1024x128xbf16>, vector<8x128xf32> -> vector<8x128xf32>
    %c24 = arith.constant 24 : index
    %c0_35 = arith.constant 0 : index
    %46 = vector.load %arg4[%c24, %c0_35] : memref<32x128xf32, #tpu.memory_space<vmem>>, vector<8x128xf32>
    tpu.vector_store %arg4[%c24, %c0_35], %45 {strides = array<i32>} : memref<32x128xf32, #tpu.memory_space<vmem>>, vector<8x128xf32>,
    %cst_36 = arith.constant dense<0.000000e+00> : vector<128xf32>
    %47 = vector.multi_reduction <add>, %45, %cst_36 [0] : vector<8x128xf32> to vector<128xf32>
    %48 = vector.shape_cast %47 : vector<128xf32> to vector<1x128xf32>
    %49 = arith.addf %36, %48 : vector<1x128xf32>
    %50 = arith.mulf %45, %45 : vector<8x128xf32>
    %cst_37 = arith.constant dense<0.000000e+00> : vector<128xf32>
    %51 = vector.multi_reduction <add>, %50, %cst_37 [0] : vector<8x128xf32> to vector<128xf32>
    %52 = vector.shape_cast %51 : vector<128xf32> to vector<1x128xf32>
    %53 = arith.addf %40, %52 : vector<1x128xf32>
    %cst_38 = arith.constant 3.200000e+01 : f32
    %54 = vector.broadcast %cst_38 : f32 to vector<1x128xf32>
    %55 = arith.divf %49, %54 : vector<1x128xf32>
    %cst_39 = arith.constant 3.200000e+01 : f32
    %56 = vector.broadcast %cst_39 : f32 to vector<1x128xf32>
    %57 = arith.divf %53, %56 : vector<1x128xf32>
    %58 = arith.mulf %55, %55 : vector<1x128xf32>
    %59 = arith.subf %57, %58 : vector<1x128xf32>
    %cst_40 = arith.constant 9.99999974E-6 : f32
    %60 = vector.broadcast %cst_40 : f32 to vector<1x128xf32>
    %61 = arith.addf %59, %60 : vector<1x128xf32>
    %62 = math.rsqrt %61 : vector<1x128xf32>
    %c0_41 = arith.constant 0 : index
    %c0_42 = arith.constant 0 : index
    %63 = vector.load %arg2[%c0_41, %c0_42] : memref<1x128xf32, #tpu.memory_space<vmem>>, vector<1x128xf32>
    %64 = arith.mulf %62, %63 : vector<1x128xf32>
    %c0_43 = arith.constant 0 : index
    %c0_44 = arith.constant 0 : index
    %65 = vector.load %arg3[%c0_43, %c0_44] : memref<1x128xf32, #tpu.memory_space<vmem>>, vector<1x128xf32>
    %66 = arith.mulf %55, %64 : vector<1x128xf32>
    %67 = arith.subf %65, %66 : vector<1x128xf32>
    %c0_45 = arith.constant 0 : index
    %c0_46 = arith.constant 0 : index
    %68 = vector.load %arg4[%c0_45, %c0_46] : memref<32x128xf32, #tpu.memory_space<vmem>>, vector<32x128xf32>
    %69 = vector.broadcast %64 : vector<1x128xf32> to vector<32x128xf32>
    %70 = arith.mulf %68, %69 : vector<32x128xf32>
    %71 = vector.broadcast %67 : vector<1x128xf32> to vector<32x128xf32>
    %72 = arith.addf %70, %71 : vector<32x128xf32>
    %cst_47 = arith.constant 0.000000e+00 : f32
    %73 = vector.broadcast %cst_47 : f32 to vector<32x128xf32>
    %74 = arith.maximumf %72, %73 : vector<32x128xf32>
    %c0_48 = arith.constant 0 : index
    %c0_49 = arith.constant 0 : index
    %75 = vector.load %arg4[%c0_48, %c0_49] : memref<32x128xf32, #tpu.memory_space<vmem>>, vector<32x128xf32>
    tpu.vector_store %arg4[%c0_48, %c0_49], %74 {strides = array<i32>} : memref<32x128xf32, #tpu.memory_space<vmem>>, vector<32x128xf32>,
    return
  }
}

module attributes {stable_mosaic.version = 11 : i64} {
  func.func @_convt_bn_relu_smajor_kernel(%arg0: memref<4x32x512xbf16, #tpu.memory_space<vmem>>, %arg1: memref<4x512x64xbf16, #tpu.memory_space<vmem>>, %arg2: memref<1x64xf32, #tpu.memory_space<vmem>>, %arg3: memref<1x64xf32, #tpu.memory_space<vmem>>, %arg4: memref<128x64xf32, #tpu.memory_space<vmem>>) attributes {dimension_semantics = [], scalar_prefetch = 0 : i64, scratch_operands = 0 : i64, tpu.core_type = #tpu.core_type<tc>} {
    %cst = arith.constant 0.000000e+00 : f32
    %0 = vector.broadcast %cst : f32 to vector<1x64xf32>
    %cst_0 = arith.constant 0.000000e+00 : f32
    %1 = vector.broadcast %cst_0 : f32 to vector<1x64xf32>
    %c0 = arith.constant 0 : index
    %c0_1 = arith.constant 0 : index
    %c0_2 = arith.constant 0 : index
    %2 = vector.load %arg0[%c0, %c0_1, %c0_2] : memref<4x32x512xbf16, #tpu.memory_space<vmem>>, vector<1x32x512xbf16>
    %3 = vector.shape_cast %2 : vector<1x32x512xbf16> to vector<32x512xbf16>
    %c0_3 = arith.constant 0 : index
    %c0_4 = arith.constant 0 : index
    %c0_5 = arith.constant 0 : index
    %4 = vector.load %arg1[%c0_3, %c0_4, %c0_5] : memref<4x512x64xbf16, #tpu.memory_space<vmem>>, vector<1x512x64xbf16>
    %5 = vector.shape_cast %4 : vector<1x512x64xbf16> to vector<512x64xbf16>
    %cst_6 = arith.constant dense<0.000000e+00> : vector<32x64xf32>
    %6 = tpu.matmul %3, %5, %cst_6 {dimension_numbers = #tpu.dot_dimension_numbers<[1], [0], [0], [1], [0, 0, 1, 1], [], []>} : vector<32x512xbf16>, vector<512x64xbf16>, vector<32x64xf32> -> vector<32x64xf32>
    %c0_7 = arith.constant 0 : index
    %c0_8 = arith.constant 0 : index
    %7 = vector.load %arg4[%c0_7, %c0_8] : memref<128x64xf32, #tpu.memory_space<vmem>>, vector<32x64xf32>
    tpu.vector_store %arg4[%c0_7, %c0_8], %6 {strides = array<i32>} : memref<128x64xf32, #tpu.memory_space<vmem>>, vector<32x64xf32>,
    %cst_9 = arith.constant dense<0.000000e+00> : vector<64xf32>
    %8 = vector.multi_reduction <add>, %6, %cst_9 [0] : vector<32x64xf32> to vector<64xf32>
    %9 = vector.shape_cast %8 : vector<64xf32> to vector<1x64xf32>
    %10 = arith.addf %0, %9 : vector<1x64xf32>
    %11 = arith.mulf %6, %6 : vector<32x64xf32>
    %cst_10 = arith.constant dense<0.000000e+00> : vector<64xf32>
    %12 = vector.multi_reduction <add>, %11, %cst_10 [0] : vector<32x64xf32> to vector<64xf32>
    %13 = vector.shape_cast %12 : vector<64xf32> to vector<1x64xf32>
    %14 = arith.addf %1, %13 : vector<1x64xf32>
    %c1 = arith.constant 1 : index
    %c0_11 = arith.constant 0 : index
    %c0_12 = arith.constant 0 : index
    %15 = vector.load %arg0[%c1, %c0_11, %c0_12] : memref<4x32x512xbf16, #tpu.memory_space<vmem>>, vector<1x32x512xbf16>
    %16 = vector.shape_cast %15 : vector<1x32x512xbf16> to vector<32x512xbf16>
    %c1_13 = arith.constant 1 : index
    %c0_14 = arith.constant 0 : index
    %c0_15 = arith.constant 0 : index
    %17 = vector.load %arg1[%c1_13, %c0_14, %c0_15] : memref<4x512x64xbf16, #tpu.memory_space<vmem>>, vector<1x512x64xbf16>
    %18 = vector.shape_cast %17 : vector<1x512x64xbf16> to vector<512x64xbf16>
    %cst_16 = arith.constant dense<0.000000e+00> : vector<32x64xf32>
    %19 = tpu.matmul %16, %18, %cst_16 {dimension_numbers = #tpu.dot_dimension_numbers<[1], [0], [0], [1], [0, 0, 1, 1], [], []>} : vector<32x512xbf16>, vector<512x64xbf16>, vector<32x64xf32> -> vector<32x64xf32>
    %c32 = arith.constant 32 : index
    %c0_17 = arith.constant 0 : index
    %20 = vector.load %arg4[%c32, %c0_17] : memref<128x64xf32, #tpu.memory_space<vmem>>, vector<32x64xf32>
    tpu.vector_store %arg4[%c32, %c0_17], %19 {strides = array<i32>} : memref<128x64xf32, #tpu.memory_space<vmem>>, vector<32x64xf32>,
    %cst_18 = arith.constant dense<0.000000e+00> : vector<64xf32>
    %21 = vector.multi_reduction <add>, %19, %cst_18 [0] : vector<32x64xf32> to vector<64xf32>
    %22 = vector.shape_cast %21 : vector<64xf32> to vector<1x64xf32>
    %23 = arith.addf %10, %22 : vector<1x64xf32>
    %24 = arith.mulf %19, %19 : vector<32x64xf32>
    %cst_19 = arith.constant dense<0.000000e+00> : vector<64xf32>
    %25 = vector.multi_reduction <add>, %24, %cst_19 [0] : vector<32x64xf32> to vector<64xf32>
    %26 = vector.shape_cast %25 : vector<64xf32> to vector<1x64xf32>
    %27 = arith.addf %14, %26 : vector<1x64xf32>
    %c2 = arith.constant 2 : index
    %c0_20 = arith.constant 0 : index
    %c0_21 = arith.constant 0 : index
    %28 = vector.load %arg0[%c2, %c0_20, %c0_21] : memref<4x32x512xbf16, #tpu.memory_space<vmem>>, vector<1x32x512xbf16>
    %29 = vector.shape_cast %28 : vector<1x32x512xbf16> to vector<32x512xbf16>
    %c2_22 = arith.constant 2 : index
    %c0_23 = arith.constant 0 : index
    %c0_24 = arith.constant 0 : index
    %30 = vector.load %arg1[%c2_22, %c0_23, %c0_24] : memref<4x512x64xbf16, #tpu.memory_space<vmem>>, vector<1x512x64xbf16>
    %31 = vector.shape_cast %30 : vector<1x512x64xbf16> to vector<512x64xbf16>
    %cst_25 = arith.constant dense<0.000000e+00> : vector<32x64xf32>
    %32 = tpu.matmul %29, %31, %cst_25 {dimension_numbers = #tpu.dot_dimension_numbers<[1], [0], [0], [1], [0, 0, 1, 1], [], []>} : vector<32x512xbf16>, vector<512x64xbf16>, vector<32x64xf32> -> vector<32x64xf32>
    %c64 = arith.constant 64 : index
    %c0_26 = arith.constant 0 : index
    %33 = vector.load %arg4[%c64, %c0_26] : memref<128x64xf32, #tpu.memory_space<vmem>>, vector<32x64xf32>
    tpu.vector_store %arg4[%c64, %c0_26], %32 {strides = array<i32>} : memref<128x64xf32, #tpu.memory_space<vmem>>, vector<32x64xf32>,
    %cst_27 = arith.constant dense<0.000000e+00> : vector<64xf32>
    %34 = vector.multi_reduction <add>, %32, %cst_27 [0] : vector<32x64xf32> to vector<64xf32>
    %35 = vector.shape_cast %34 : vector<64xf32> to vector<1x64xf32>
    %36 = arith.addf %23, %35 : vector<1x64xf32>
    %37 = arith.mulf %32, %32 : vector<32x64xf32>
    %cst_28 = arith.constant dense<0.000000e+00> : vector<64xf32>
    %38 = vector.multi_reduction <add>, %37, %cst_28 [0] : vector<32x64xf32> to vector<64xf32>
    %39 = vector.shape_cast %38 : vector<64xf32> to vector<1x64xf32>
    %40 = arith.addf %27, %39 : vector<1x64xf32>
    %c3 = arith.constant 3 : index
    %c0_29 = arith.constant 0 : index
    %c0_30 = arith.constant 0 : index
    %41 = vector.load %arg0[%c3, %c0_29, %c0_30] : memref<4x32x512xbf16, #tpu.memory_space<vmem>>, vector<1x32x512xbf16>
    %42 = vector.shape_cast %41 : vector<1x32x512xbf16> to vector<32x512xbf16>
    %c3_31 = arith.constant 3 : index
    %c0_32 = arith.constant 0 : index
    %c0_33 = arith.constant 0 : index
    %43 = vector.load %arg1[%c3_31, %c0_32, %c0_33] : memref<4x512x64xbf16, #tpu.memory_space<vmem>>, vector<1x512x64xbf16>
    %44 = vector.shape_cast %43 : vector<1x512x64xbf16> to vector<512x64xbf16>
    %cst_34 = arith.constant dense<0.000000e+00> : vector<32x64xf32>
    %45 = tpu.matmul %42, %44, %cst_34 {dimension_numbers = #tpu.dot_dimension_numbers<[1], [0], [0], [1], [0, 0, 1, 1], [], []>} : vector<32x512xbf16>, vector<512x64xbf16>, vector<32x64xf32> -> vector<32x64xf32>
    %c96 = arith.constant 96 : index
    %c0_35 = arith.constant 0 : index
    %46 = vector.load %arg4[%c96, %c0_35] : memref<128x64xf32, #tpu.memory_space<vmem>>, vector<32x64xf32>
    tpu.vector_store %arg4[%c96, %c0_35], %45 {strides = array<i32>} : memref<128x64xf32, #tpu.memory_space<vmem>>, vector<32x64xf32>,
    %cst_36 = arith.constant dense<0.000000e+00> : vector<64xf32>
    %47 = vector.multi_reduction <add>, %45, %cst_36 [0] : vector<32x64xf32> to vector<64xf32>
    %48 = vector.shape_cast %47 : vector<64xf32> to vector<1x64xf32>
    %49 = arith.addf %36, %48 : vector<1x64xf32>
    %50 = arith.mulf %45, %45 : vector<32x64xf32>
    %cst_37 = arith.constant dense<0.000000e+00> : vector<64xf32>
    %51 = vector.multi_reduction <add>, %50, %cst_37 [0] : vector<32x64xf32> to vector<64xf32>
    %52 = vector.shape_cast %51 : vector<64xf32> to vector<1x64xf32>
    %53 = arith.addf %40, %52 : vector<1x64xf32>
    %cst_38 = arith.constant 1.280000e+02 : f32
    %54 = vector.broadcast %cst_38 : f32 to vector<1x64xf32>
    %55 = arith.divf %49, %54 : vector<1x64xf32>
    %cst_39 = arith.constant 1.280000e+02 : f32
    %56 = vector.broadcast %cst_39 : f32 to vector<1x64xf32>
    %57 = arith.divf %53, %56 : vector<1x64xf32>
    %58 = arith.mulf %55, %55 : vector<1x64xf32>
    %59 = arith.subf %57, %58 : vector<1x64xf32>
    %cst_40 = arith.constant 9.99999974E-6 : f32
    %60 = vector.broadcast %cst_40 : f32 to vector<1x64xf32>
    %61 = arith.addf %59, %60 : vector<1x64xf32>
    %62 = math.rsqrt %61 : vector<1x64xf32>
    %c0_41 = arith.constant 0 : index
    %c0_42 = arith.constant 0 : index
    %63 = vector.load %arg2[%c0_41, %c0_42] : memref<1x64xf32, #tpu.memory_space<vmem>>, vector<1x64xf32>
    %64 = arith.mulf %62, %63 : vector<1x64xf32>
    %c0_43 = arith.constant 0 : index
    %c0_44 = arith.constant 0 : index
    %65 = vector.load %arg3[%c0_43, %c0_44] : memref<1x64xf32, #tpu.memory_space<vmem>>, vector<1x64xf32>
    %66 = arith.mulf %55, %64 : vector<1x64xf32>
    %67 = arith.subf %65, %66 : vector<1x64xf32>
    %c0_45 = arith.constant 0 : index
    %c0_46 = arith.constant 0 : index
    %68 = vector.load %arg4[%c0_45, %c0_46] : memref<128x64xf32, #tpu.memory_space<vmem>>, vector<128x64xf32>
    %69 = vector.broadcast %64 : vector<1x64xf32> to vector<128x64xf32>
    %70 = arith.mulf %68, %69 : vector<128x64xf32>
    %71 = vector.broadcast %67 : vector<1x64xf32> to vector<128x64xf32>
    %72 = arith.addf %70, %71 : vector<128x64xf32>
    %cst_47 = arith.constant 0.000000e+00 : f32
    %73 = vector.broadcast %cst_47 : f32 to vector<128x64xf32>
    %74 = arith.maximumf %72, %73 : vector<128x64xf32>
    %c0_48 = arith.constant 0 : index
    %c0_49 = arith.constant 0 : index
    %75 = vector.load %arg4[%c0_48, %c0_49] : memref<128x64xf32, #tpu.memory_space<vmem>>, vector<128x64xf32>
    tpu.vector_store %arg4[%c0_48, %c0_49], %74 {strides = array<i32>} : memref<128x64xf32, #tpu.memory_space<vmem>>, vector<128x64xf32>,
    return
  }
}

module attributes {stable_mosaic.version = 11 : i64} {
  func.func @_convt_bn_relu_cmajor_kernel(%arg0: memref<4x256x128xbf16, #tpu.memory_space<vmem>>, %arg1: memref<4x32x256xbf16, #tpu.memory_space<vmem>>, %arg2: memref<32x1xf32, #tpu.memory_space<vmem>>, %arg3: memref<32x1xf32, #tpu.memory_space<vmem>>, %arg4: memref<32x512xf32, #tpu.memory_space<vmem>>) attributes {dimension_semantics = [], scalar_prefetch = 0 : i64, scratch_operands = 0 : i64, tpu.core_type = #tpu.core_type<tc>} {
    %cst = arith.constant 0.000000e+00 : f32
    %0 = vector.broadcast %cst : f32 to vector<32x1xf32>
    %cst_0 = arith.constant 0.000000e+00 : f32
    %1 = vector.broadcast %cst_0 : f32 to vector<32x1xf32>
    %c0 = arith.constant 0 : index
    %c0_1 = arith.constant 0 : index
    %c0_2 = arith.constant 0 : index
    %2 = vector.load %arg1[%c0, %c0_1, %c0_2] : memref<4x32x256xbf16, #tpu.memory_space<vmem>>, vector<1x32x256xbf16>
    %3 = vector.shape_cast %2 : vector<1x32x256xbf16> to vector<32x256xbf16>
    %c0_3 = arith.constant 0 : index
    %c0_4 = arith.constant 0 : index
    %c0_5 = arith.constant 0 : index
    %4 = vector.load %arg0[%c0_3, %c0_4, %c0_5] : memref<4x256x128xbf16, #tpu.memory_space<vmem>>, vector<1x256x128xbf16>
    %5 = vector.shape_cast %4 : vector<1x256x128xbf16> to vector<256x128xbf16>
    %cst_6 = arith.constant dense<0.000000e+00> : vector<32x128xf32>
    %6 = tpu.matmul %3, %5, %cst_6 {dimension_numbers = #tpu.dot_dimension_numbers<[1], [0], [0], [1], [0, 0, 1, 1], [], []>} : vector<32x256xbf16>, vector<256x128xbf16>, vector<32x128xf32> -> vector<32x128xf32>
    %c0_7 = arith.constant 0 : index
    %c0_8 = arith.constant 0 : index
    %7 = vector.load %arg4[%c0_7, %c0_8] : memref<32x512xf32, #tpu.memory_space<vmem>>, vector<32x128xf32>
    tpu.vector_store %arg4[%c0_7, %c0_8], %6 {strides = array<i32>} : memref<32x512xf32, #tpu.memory_space<vmem>>, vector<32x128xf32>,
    %cst_9 = arith.constant dense<0.000000e+00> : vector<32xf32>
    %8 = vector.multi_reduction <add>, %6, %cst_9 [1] : vector<32x128xf32> to vector<32xf32>
    %9 = vector.shape_cast %8 : vector<32xf32> to vector<32x1xf32>
    %10 = arith.addf %0, %9 : vector<32x1xf32>
    %11 = arith.mulf %6, %6 : vector<32x128xf32>
    %cst_10 = arith.constant dense<0.000000e+00> : vector<32xf32>
    %12 = vector.multi_reduction <add>, %11, %cst_10 [1] : vector<32x128xf32> to vector<32xf32>
    %13 = vector.shape_cast %12 : vector<32xf32> to vector<32x1xf32>
    %14 = arith.addf %1, %13 : vector<32x1xf32>
    %c1 = arith.constant 1 : index
    %c0_11 = arith.constant 0 : index
    %c0_12 = arith.constant 0 : index
    %15 = vector.load %arg1[%c1, %c0_11, %c0_12] : memref<4x32x256xbf16, #tpu.memory_space<vmem>>, vector<1x32x256xbf16>
    %16 = vector.shape_cast %15 : vector<1x32x256xbf16> to vector<32x256xbf16>
    %c1_13 = arith.constant 1 : index
    %c0_14 = arith.constant 0 : index
    %c0_15 = arith.constant 0 : index
    %17 = vector.load %arg0[%c1_13, %c0_14, %c0_15] : memref<4x256x128xbf16, #tpu.memory_space<vmem>>, vector<1x256x128xbf16>
    %18 = vector.shape_cast %17 : vector<1x256x128xbf16> to vector<256x128xbf16>
    %cst_16 = arith.constant dense<0.000000e+00> : vector<32x128xf32>
    %19 = tpu.matmul %16, %18, %cst_16 {dimension_numbers = #tpu.dot_dimension_numbers<[1], [0], [0], [1], [0, 0, 1, 1], [], []>} : vector<32x256xbf16>, vector<256x128xbf16>, vector<32x128xf32> -> vector<32x128xf32>
    %c0_17 = arith.constant 0 : index
    %c128 = arith.constant 128 : index
    %20 = vector.load %arg4[%c0_17, %c128] : memref<32x512xf32, #tpu.memory_space<vmem>>, vector<32x128xf32>
    tpu.vector_store %arg4[%c0_17, %c128], %19 {strides = array<i32>} : memref<32x512xf32, #tpu.memory_space<vmem>>, vector<32x128xf32>,
    %cst_18 = arith.constant dense<0.000000e+00> : vector<32xf32>
    %21 = vector.multi_reduction <add>, %19, %cst_18 [1] : vector<32x128xf32> to vector<32xf32>
    %22 = vector.shape_cast %21 : vector<32xf32> to vector<32x1xf32>
    %23 = arith.addf %10, %22 : vector<32x1xf32>
    %24 = arith.mulf %19, %19 : vector<32x128xf32>
    %cst_19 = arith.constant dense<0.000000e+00> : vector<32xf32>
    %25 = vector.multi_reduction <add>, %24, %cst_19 [1] : vector<32x128xf32> to vector<32xf32>
    %26 = vector.shape_cast %25 : vector<32xf32> to vector<32x1xf32>
    %27 = arith.addf %14, %26 : vector<32x1xf32>
    %c2 = arith.constant 2 : index
    %c0_20 = arith.constant 0 : index
    %c0_21 = arith.constant 0 : index
    %28 = vector.load %arg1[%c2, %c0_20, %c0_21] : memref<4x32x256xbf16, #tpu.memory_space<vmem>>, vector<1x32x256xbf16>
    %29 = vector.shape_cast %28 : vector<1x32x256xbf16> to vector<32x256xbf16>
    %c2_22 = arith.constant 2 : index
    %c0_23 = arith.constant 0 : index
    %c0_24 = arith.constant 0 : index
    %30 = vector.load %arg0[%c2_22, %c0_23, %c0_24] : memref<4x256x128xbf16, #tpu.memory_space<vmem>>, vector<1x256x128xbf16>
    %31 = vector.shape_cast %30 : vector<1x256x128xbf16> to vector<256x128xbf16>
    %cst_25 = arith.constant dense<0.000000e+00> : vector<32x128xf32>
    %32 = tpu.matmul %29, %31, %cst_25 {dimension_numbers = #tpu.dot_dimension_numbers<[1], [0], [0], [1], [0, 0, 1, 1], [], []>} : vector<32x256xbf16>, vector<256x128xbf16>, vector<32x128xf32> -> vector<32x128xf32>
    %c0_26 = arith.constant 0 : index
    %c256 = arith.constant 256 : index
    %33 = vector.load %arg4[%c0_26, %c256] : memref<32x512xf32, #tpu.memory_space<vmem>>, vector<32x128xf32>
    tpu.vector_store %arg4[%c0_26, %c256], %32 {strides = array<i32>} : memref<32x512xf32, #tpu.memory_space<vmem>>, vector<32x128xf32>,
    %cst_27 = arith.constant dense<0.000000e+00> : vector<32xf32>
    %34 = vector.multi_reduction <add>, %32, %cst_27 [1] : vector<32x128xf32> to vector<32xf32>
    %35 = vector.shape_cast %34 : vector<32xf32> to vector<32x1xf32>
    %36 = arith.addf %23, %35 : vector<32x1xf32>
    %37 = arith.mulf %32, %32 : vector<32x128xf32>
    %cst_28 = arith.constant dense<0.000000e+00> : vector<32xf32>
    %38 = vector.multi_reduction <add>, %37, %cst_28 [1] : vector<32x128xf32> to vector<32xf32>
    %39 = vector.shape_cast %38 : vector<32xf32> to vector<32x1xf32>
    %40 = arith.addf %27, %39 : vector<32x1xf32>
    %c3 = arith.constant 3 : index
    %c0_29 = arith.constant 0 : index
    %c0_30 = arith.constant 0 : index
    %41 = vector.load %arg1[%c3, %c0_29, %c0_30] : memref<4x32x256xbf16, #tpu.memory_space<vmem>>, vector<1x32x256xbf16>
    %42 = vector.shape_cast %41 : vector<1x32x256xbf16> to vector<32x256xbf16>
    %c3_31 = arith.constant 3 : index
    %c0_32 = arith.constant 0 : index
    %c0_33 = arith.constant 0 : index
    %43 = vector.load %arg0[%c3_31, %c0_32, %c0_33] : memref<4x256x128xbf16, #tpu.memory_space<vmem>>, vector<1x256x128xbf16>
    %44 = vector.shape_cast %43 : vector<1x256x128xbf16> to vector<256x128xbf16>
    %cst_34 = arith.constant dense<0.000000e+00> : vector<32x128xf32>
    %45 = tpu.matmul %42, %44, %cst_34 {dimension_numbers = #tpu.dot_dimension_numbers<[1], [0], [0], [1], [0, 0, 1, 1], [], []>} : vector<32x256xbf16>, vector<256x128xbf16>, vector<32x128xf32> -> vector<32x128xf32>
    %c0_35 = arith.constant 0 : index
    %c384 = arith.constant 384 : index
    %46 = vector.load %arg4[%c0_35, %c384] : memref<32x512xf32, #tpu.memory_space<vmem>>, vector<32x128xf32>
    tpu.vector_store %arg4[%c0_35, %c384], %45 {strides = array<i32>} : memref<32x512xf32, #tpu.memory_space<vmem>>, vector<32x128xf32>,
    %cst_36 = arith.constant dense<0.000000e+00> : vector<32xf32>
    %47 = vector.multi_reduction <add>, %45, %cst_36 [1] : vector<32x128xf32> to vector<32xf32>
    %48 = vector.shape_cast %47 : vector<32xf32> to vector<32x1xf32>
    %49 = arith.addf %36, %48 : vector<32x1xf32>
    %50 = arith.mulf %45, %45 : vector<32x128xf32>
    %cst_37 = arith.constant dense<0.000000e+00> : vector<32xf32>
    %51 = vector.multi_reduction <add>, %50, %cst_37 [1] : vector<32x128xf32> to vector<32xf32>
    %52 = vector.shape_cast %51 : vector<32xf32> to vector<32x1xf32>
    %53 = arith.addf %40, %52 : vector<32x1xf32>
    %cst_38 = arith.constant 5.120000e+02 : f32
    %54 = vector.broadcast %cst_38 : f32 to vector<32x1xf32>
    %55 = arith.divf %49, %54 : vector<32x1xf32>
    %cst_39 = arith.constant 5.120000e+02 : f32
    %56 = vector.broadcast %cst_39 : f32 to vector<32x1xf32>
    %57 = arith.divf %53, %56 : vector<32x1xf32>
    %58 = arith.mulf %55, %55 : vector<32x1xf32>
    %59 = arith.subf %57, %58 : vector<32x1xf32>
    %cst_40 = arith.constant 9.99999974E-6 : f32
    %60 = vector.broadcast %cst_40 : f32 to vector<32x1xf32>
    %61 = arith.addf %59, %60 : vector<32x1xf32>
    %62 = math.rsqrt %61 : vector<32x1xf32>
    %c0_41 = arith.constant 0 : index
    %c0_42 = arith.constant 0 : index
    %63 = vector.load %arg2[%c0_41, %c0_42] : memref<32x1xf32, #tpu.memory_space<vmem>>, vector<32x1xf32>
    %64 = arith.mulf %62, %63 : vector<32x1xf32>
    %c0_43 = arith.constant 0 : index
    %c0_44 = arith.constant 0 : index
    %65 = vector.load %arg3[%c0_43, %c0_44] : memref<32x1xf32, #tpu.memory_space<vmem>>, vector<32x1xf32>
    %66 = arith.mulf %55, %64 : vector<32x1xf32>
    %67 = arith.subf %65, %66 : vector<32x1xf32>
    %c0_45 = arith.constant 0 : index
    %c0_46 = arith.constant 0 : index
    %68 = vector.load %arg4[%c0_45, %c0_46] : memref<32x512xf32, #tpu.memory_space<vmem>>, vector<32x512xf32>
    %69 = vector.broadcast %64 : vector<32x1xf32> to vector<32x512xf32>
    %70 = arith.mulf %68, %69 : vector<32x512xf32>
    %71 = vector.broadcast %67 : vector<32x1xf32> to vector<32x512xf32>
    %72 = arith.addf %70, %71 : vector<32x512xf32>
    %cst_47 = arith.constant 0.000000e+00 : f32
    %73 = vector.broadcast %cst_47 : f32 to vector<32x512xf32>
    %74 = arith.maximumf %72, %73 : vector<32x512xf32>
    %c0_48 = arith.constant 0 : index
    %c0_49 = arith.constant 0 : index
    %75 = vector.load %arg4[%c0_48, %c0_49] : memref<32x512xf32, #tpu.memory_space<vmem>>, vector<32x512xf32>
    tpu.vector_store %arg4[%c0_48, %c0_49], %74 {strides = array<i32>} : memref<32x512xf32, #tpu.memory_space<vmem>>, vector<32x512xf32>,
    return
  }
}

module attributes {stable_mosaic.version = 11 : i64} {
  func.func @_convt_bn_relu_cmajor_kernel(%arg0: memref<4x128x512xbf16, #tpu.memory_space<vmem>>, %arg1: memref<4x16x128xbf16, #tpu.memory_space<vmem>>, %arg2: memref<16x1xf32, #tpu.memory_space<vmem>>, %arg3: memref<16x1xf32, #tpu.memory_space<vmem>>, %arg4: memref<16x2048xf32, #tpu.memory_space<vmem>>) attributes {dimension_semantics = [], scalar_prefetch = 0 : i64, scratch_operands = 0 : i64, tpu.core_type = #tpu.core_type<tc>} {
    %cst = arith.constant 0.000000e+00 : f32
    %0 = vector.broadcast %cst : f32 to vector<16x1xf32>
    %cst_0 = arith.constant 0.000000e+00 : f32
    %1 = vector.broadcast %cst_0 : f32 to vector<16x1xf32>
    %c0 = arith.constant 0 : index
    %c0_1 = arith.constant 0 : index
    %c0_2 = arith.constant 0 : index
    %2 = vector.load %arg1[%c0, %c0_1, %c0_2] : memref<4x16x128xbf16, #tpu.memory_space<vmem>>, vector<1x16x128xbf16>
    %3 = vector.shape_cast %2 : vector<1x16x128xbf16> to vector<16x128xbf16>
    %c0_3 = arith.constant 0 : index
    %c0_4 = arith.constant 0 : index
    %c0_5 = arith.constant 0 : index
    %4 = vector.load %arg0[%c0_3, %c0_4, %c0_5] : memref<4x128x512xbf16, #tpu.memory_space<vmem>>, vector<1x128x512xbf16>
    %5 = vector.shape_cast %4 : vector<1x128x512xbf16> to vector<128x512xbf16>
    %cst_6 = arith.constant dense<0.000000e+00> : vector<16x512xf32>
    %6 = tpu.matmul %3, %5, %cst_6 {dimension_numbers = #tpu.dot_dimension_numbers<[1], [0], [0], [1], [0, 0, 1, 1], [], []>} : vector<16x128xbf16>, vector<128x512xbf16>, vector<16x512xf32> -> vector<16x512xf32>
    %c0_7 = arith.constant 0 : index
    %c0_8 = arith.constant 0 : index
    %7 = vector.load %arg4[%c0_7, %c0_8] : memref<16x2048xf32, #tpu.memory_space<vmem>>, vector<16x512xf32>
    tpu.vector_store %arg4[%c0_7, %c0_8], %6 {strides = array<i32>} : memref<16x2048xf32, #tpu.memory_space<vmem>>, vector<16x512xf32>,
    %cst_9 = arith.constant dense<0.000000e+00> : vector<16xf32>
    %8 = vector.multi_reduction <add>, %6, %cst_9 [1] : vector<16x512xf32> to vector<16xf32>
    %9 = vector.shape_cast %8 : vector<16xf32> to vector<16x1xf32>
    %10 = arith.addf %0, %9 : vector<16x1xf32>
    %11 = arith.mulf %6, %6 : vector<16x512xf32>
    %cst_10 = arith.constant dense<0.000000e+00> : vector<16xf32>
    %12 = vector.multi_reduction <add>, %11, %cst_10 [1] : vector<16x512xf32> to vector<16xf32>
    %13 = vector.shape_cast %12 : vector<16xf32> to vector<16x1xf32>
    %14 = arith.addf %1, %13 : vector<16x1xf32>
    %c1 = arith.constant 1 : index
    %c0_11 = arith.constant 0 : index
    %c0_12 = arith.constant 0 : index
    %15 = vector.load %arg1[%c1, %c0_11, %c0_12] : memref<4x16x128xbf16, #tpu.memory_space<vmem>>, vector<1x16x128xbf16>
    %16 = vector.shape_cast %15 : vector<1x16x128xbf16> to vector<16x128xbf16>
    %c1_13 = arith.constant 1 : index
    %c0_14 = arith.constant 0 : index
    %c0_15 = arith.constant 0 : index
    %17 = vector.load %arg0[%c1_13, %c0_14, %c0_15] : memref<4x128x512xbf16, #tpu.memory_space<vmem>>, vector<1x128x512xbf16>
    %18 = vector.shape_cast %17 : vector<1x128x512xbf16> to vector<128x512xbf16>
    %cst_16 = arith.constant dense<0.000000e+00> : vector<16x512xf32>
    %19 = tpu.matmul %16, %18, %cst_16 {dimension_numbers = #tpu.dot_dimension_numbers<[1], [0], [0], [1], [0, 0, 1, 1], [], []>} : vector<16x128xbf16>, vector<128x512xbf16>, vector<16x512xf32> -> vector<16x512xf32>
    %c0_17 = arith.constant 0 : index
    %c512 = arith.constant 512 : index
    %20 = vector.load %arg4[%c0_17, %c512] : memref<16x2048xf32, #tpu.memory_space<vmem>>, vector<16x512xf32>
    tpu.vector_store %arg4[%c0_17, %c512], %19 {strides = array<i32>} : memref<16x2048xf32, #tpu.memory_space<vmem>>, vector<16x512xf32>,
    %cst_18 = arith.constant dense<0.000000e+00> : vector<16xf32>
    %21 = vector.multi_reduction <add>, %19, %cst_18 [1] : vector<16x512xf32> to vector<16xf32>
    %22 = vector.shape_cast %21 : vector<16xf32> to vector<16x1xf32>
    %23 = arith.addf %10, %22 : vector<16x1xf32>
    %24 = arith.mulf %19, %19 : vector<16x512xf32>
    %cst_19 = arith.constant dense<0.000000e+00> : vector<16xf32>
    %25 = vector.multi_reduction <add>, %24, %cst_19 [1] : vector<16x512xf32> to vector<16xf32>
    %26 = vector.shape_cast %25 : vector<16xf32> to vector<16x1xf32>
    %27 = arith.addf %14, %26 : vector<16x1xf32>
    %c2 = arith.constant 2 : index
    %c0_20 = arith.constant 0 : index
    %c0_21 = arith.constant 0 : index
    %28 = vector.load %arg1[%c2, %c0_20, %c0_21] : memref<4x16x128xbf16, #tpu.memory_space<vmem>>, vector<1x16x128xbf16>
    %29 = vector.shape_cast %28 : vector<1x16x128xbf16> to vector<16x128xbf16>
    %c2_22 = arith.constant 2 : index
    %c0_23 = arith.constant 0 : index
    %c0_24 = arith.constant 0 : index
    %30 = vector.load %arg0[%c2_22, %c0_23, %c0_24] : memref<4x128x512xbf16, #tpu.memory_space<vmem>>, vector<1x128x512xbf16>
    %31 = vector.shape_cast %30 : vector<1x128x512xbf16> to vector<128x512xbf16>
    %cst_25 = arith.constant dense<0.000000e+00> : vector<16x512xf32>
    %32 = tpu.matmul %29, %31, %cst_25 {dimension_numbers = #tpu.dot_dimension_numbers<[1], [0], [0], [1], [0, 0, 1, 1], [], []>} : vector<16x128xbf16>, vector<128x512xbf16>, vector<16x512xf32> -> vector<16x512xf32>
    %c0_26 = arith.constant 0 : index
    %c1024 = arith.constant 1024 : index
    %33 = vector.load %arg4[%c0_26, %c1024] : memref<16x2048xf32, #tpu.memory_space<vmem>>, vector<16x512xf32>
    tpu.vector_store %arg4[%c0_26, %c1024], %32 {strides = array<i32>} : memref<16x2048xf32, #tpu.memory_space<vmem>>, vector<16x512xf32>,
    %cst_27 = arith.constant dense<0.000000e+00> : vector<16xf32>
    %34 = vector.multi_reduction <add>, %32, %cst_27 [1] : vector<16x512xf32> to vector<16xf32>
    %35 = vector.shape_cast %34 : vector<16xf32> to vector<16x1xf32>
    %36 = arith.addf %23, %35 : vector<16x1xf32>
    %37 = arith.mulf %32, %32 : vector<16x512xf32>
    %cst_28 = arith.constant dense<0.000000e+00> : vector<16xf32>
    %38 = vector.multi_reduction <add>, %37, %cst_28 [1] : vector<16x512xf32> to vector<16xf32>
    %39 = vector.shape_cast %38 : vector<16xf32> to vector<16x1xf32>
    %40 = arith.addf %27, %39 : vector<16x1xf32>
    %c3 = arith.constant 3 : index
    %c0_29 = arith.constant 0 : index
    %c0_30 = arith.constant 0 : index
    %41 = vector.load %arg1[%c3, %c0_29, %c0_30] : memref<4x16x128xbf16, #tpu.memory_space<vmem>>, vector<1x16x128xbf16>
    %42 = vector.shape_cast %41 : vector<1x16x128xbf16> to vector<16x128xbf16>
    %c3_31 = arith.constant 3 : index
    %c0_32 = arith.constant 0 : index
    %c0_33 = arith.constant 0 : index
    %43 = vector.load %arg0[%c3_31, %c0_32, %c0_33] : memref<4x128x512xbf16, #tpu.memory_space<vmem>>, vector<1x128x512xbf16>
    %44 = vector.shape_cast %43 : vector<1x128x512xbf16> to vector<128x512xbf16>
    %cst_34 = arith.constant dense<0.000000e+00> : vector<16x512xf32>
    %45 = tpu.matmul %42, %44, %cst_34 {dimension_numbers = #tpu.dot_dimension_numbers<[1], [0], [0], [1], [0, 0, 1, 1], [], []>} : vector<16x128xbf16>, vector<128x512xbf16>, vector<16x512xf32> -> vector<16x512xf32>
    %c0_35 = arith.constant 0 : index
    %c1536 = arith.constant 1536 : index
    %46 = vector.load %arg4[%c0_35, %c1536] : memref<16x2048xf32, #tpu.memory_space<vmem>>, vector<16x512xf32>
    tpu.vector_store %arg4[%c0_35, %c1536], %45 {strides = array<i32>} : memref<16x2048xf32, #tpu.memory_space<vmem>>, vector<16x512xf32>,
    %cst_36 = arith.constant dense<0.000000e+00> : vector<16xf32>
    %47 = vector.multi_reduction <add>, %45, %cst_36 [1] : vector<16x512xf32> to vector<16xf32>
    %48 = vector.shape_cast %47 : vector<16xf32> to vector<16x1xf32>
    %49 = arith.addf %36, %48 : vector<16x1xf32>
    %50 = arith.mulf %45, %45 : vector<16x512xf32>
    %cst_37 = arith.constant dense<0.000000e+00> : vector<16xf32>
    %51 = vector.multi_reduction <add>, %50, %cst_37 [1] : vector<16x512xf32> to vector<16xf32>
    %52 = vector.shape_cast %51 : vector<16xf32> to vector<16x1xf32>
    %53 = arith.addf %40, %52 : vector<16x1xf32>
    %cst_38 = arith.constant 2.048000e+03 : f32
    %54 = vector.broadcast %cst_38 : f32 to vector<16x1xf32>
    %55 = arith.divf %49, %54 : vector<16x1xf32>
    %cst_39 = arith.constant 2.048000e+03 : f32
    %56 = vector.broadcast %cst_39 : f32 to vector<16x1xf32>
    %57 = arith.divf %53, %56 : vector<16x1xf32>
    %58 = arith.mulf %55, %55 : vector<16x1xf32>
    %59 = arith.subf %57, %58 : vector<16x1xf32>
    %cst_40 = arith.constant 9.99999974E-6 : f32
    %60 = vector.broadcast %cst_40 : f32 to vector<16x1xf32>
    %61 = arith.addf %59, %60 : vector<16x1xf32>
    %62 = math.rsqrt %61 : vector<16x1xf32>
    %c0_41 = arith.constant 0 : index
    %c0_42 = arith.constant 0 : index
    %63 = vector.load %arg2[%c0_41, %c0_42] : memref<16x1xf32, #tpu.memory_space<vmem>>, vector<16x1xf32>
    %64 = arith.mulf %62, %63 : vector<16x1xf32>
    %c0_43 = arith.constant 0 : index
    %c0_44 = arith.constant 0 : index
    %65 = vector.load %arg3[%c0_43, %c0_44] : memref<16x1xf32, #tpu.memory_space<vmem>>, vector<16x1xf32>
    %66 = arith.mulf %55, %64 : vector<16x1xf32>
    %67 = arith.subf %65, %66 : vector<16x1xf32>
    %c0_45 = arith.constant 0 : index
    %c0_46 = arith.constant 0 : index
    %68 = vector.load %arg4[%c0_45, %c0_46] : memref<16x2048xf32, #tpu.memory_space<vmem>>, vector<16x2048xf32>
    %69 = vector.broadcast %64 : vector<16x1xf32> to vector<16x2048xf32>
    %70 = arith.mulf %68, %69 : vector<16x2048xf32>
    %71 = vector.broadcast %67 : vector<16x1xf32> to vector<16x2048xf32>
    %72 = arith.addf %70, %71 : vector<16x2048xf32>
    %cst_47 = arith.constant 0.000000e+00 : f32
    %73 = vector.broadcast %cst_47 : f32 to vector<16x2048xf32>
    %74 = arith.maximumf %72, %73 : vector<16x2048xf32>
    %c0_48 = arith.constant 0 : index
    %c0_49 = arith.constant 0 : index
    %75 = vector.load %arg4[%c0_48, %c0_49] : memref<16x2048xf32, #tpu.memory_space<vmem>>, vector<16x2048xf32>
    tpu.vector_store %arg4[%c0_48, %c0_49], %74 {strides = array<i32>} : memref<16x2048xf32, #tpu.memory_space<vmem>>, vector<16x2048xf32>,
    return
  }
}

module attributes {stable_mosaic.version = 11 : i64} {
  func.func @_heads_kernel(%arg0: memref<144x2048xbf16, #tpu.memory_space<vmem>>, %arg1: memref<2x144xbf16, #tpu.memory_space<vmem>>, %arg2: memref<2x1xf32, #tpu.memory_space<vmem>>, %arg3: memref<2x2048xf32, #tpu.memory_space<vmem>>) attributes {dimension_semantics = [], scalar_prefetch = 0 : i64, scratch_operands = 0 : i64, tpu.core_type = #tpu.core_type<tc>} {
    %c0 = arith.constant 0 : index
    %c0_0 = arith.constant 0 : index
    %0 = vector.load %arg1[%c0, %c0_0] : memref<2x144xbf16, #tpu.memory_space<vmem>>, vector<2x144xbf16>
    %c0_1 = arith.constant 0 : index
    %c0_2 = arith.constant 0 : index
    %1 = vector.load %arg0[%c0_1, %c0_2] : memref<144x2048xbf16, #tpu.memory_space<vmem>>, vector<144x2048xbf16>
    %cst = arith.constant dense<0.000000e+00> : vector<2x2048xf32>
    %2 = tpu.matmul %0, %1, %cst {dimension_numbers = #tpu.dot_dimension_numbers<[1], [0], [0], [1], [0, 0, 1, 1], [], []>} : vector<2x144xbf16>, vector<144x2048xbf16>, vector<2x2048xf32> -> vector<2x2048xf32>
    %c0_3 = arith.constant 0 : index
    %c0_4 = arith.constant 0 : index
    %3 = vector.load %arg2[%c0_3, %c0_4] : memref<2x1xf32, #tpu.memory_space<vmem>>, vector<2x1xf32>
    %4 = vector.broadcast %3 : vector<2x1xf32> to vector<2x2048xf32>
    %5 = arith.addf %2, %4 : vector<2x2048xf32>
    %6 = vector.extract_strided_slice %5 {offsets = [0, 0], sizes = [1, 2048], strides = [1, 1]} : vector<2x2048xf32> to vector<1x2048xf32>
    %7 = math.tanh %6 : vector<1x2048xf32>
    %c0_5 = arith.constant 0 : index
    %c0_6 = arith.constant 0 : index
    %8 = vector.load %arg3[%c0_5, %c0_6] : memref<2x2048xf32, #tpu.memory_space<vmem>>, vector<1x2048xf32>
    tpu.vector_store %arg3[%c0_5, %c0_6], %7 {strides = array<i32>} : memref<2x2048xf32, #tpu.memory_space<vmem>>, vector<1x2048xf32>,
    %9 = vector.extract_strided_slice %5 {offsets = [1, 0], sizes = [1, 2048], strides = [1, 1]} : vector<2x2048xf32> to vector<1x2048xf32>
    %10 = arith.negf %9 : vector<1x2048xf32>
    %11 = math.exp %10 : vector<1x2048xf32>
    %cst_7 = arith.constant 1.000000e+00 : f32
    %12 = vector.broadcast %cst_7 : f32 to vector<1x2048xf32>
    %13 = arith.addf %12, %11 : vector<1x2048xf32>
    %14 = arith.divf %12, %13 : vector<1x2048xf32>
    %c1 = arith.constant 1 : index
    %c0_8 = arith.constant 0 : index
    %15 = vector.load %arg3[%c1, %c0_8] : memref<2x2048xf32, #tpu.memory_space<vmem>>, vector<1x2048xf32>
    tpu.vector_store %arg3[%c1, %c0_8], %14 {strides = array<i32>} : memref<2x2048xf32, #tpu.memory_space<vmem>>, vector<1x2048xf32>,
    return
  }
}

</mosaic_0001>

<bundles_post_ra>
// kernel: generator_forward.6
= control target key start
LH: loop header
LB: loop body
LE: loop exit
PB: predicated region body
PF: predicated region fallthrough
CT: control target
= control target key end

     0   :  { %8 = vsyncpa [#allocation3], 0  ;;  %s739_s0 = inlined_call_operand.vmem [shape: f32[2,66], index: 0, kind: input, shape index: {}]   ;;  %s740_s1 = inlined_call_operand.hbm [shape: f32[66,1024], index: 1, kind: input, shape index: {}]   ;;  %s741_s2 = inlined_call_operand.hbm [shape: f32[1,1024], index: 2, kind: input, shape index: {}]   ;;  %s742_s3 = inlined_call_operand.vmem [shape: f32[2,1024], index: 3, kind: output, shape index: {}]  }
   0x1   :  { %9 = vsyncpa [#allocation5], 0  ;;  %s658_s12 = smov [#allocation2]   ;;  %s610_s16 = scalar_lea.hbm %s740_s1, 9216 }
   0x2   :  { %s17_s13 = sshll.u32 %s658_s12, 4  ;;  %p611_p0 = scmp.ne.s32.totalorder %s740_s1, %s610_s16  ;;  %s18_s13 = int_to_ptr.vmem [resolvable:$true] %s17_s13 }
   0x3   :  { %p614_p1 = scmp.lt.u32.totalorder %s610_s16, %s740_s1 }
   0x5   :  { %p616_p2 = pnand %p614_p1, %p611_p0 }
   0x7   :  { %619 = shalt.err (!%p616_p2)
}
   0x8   :  { %s620_s21 = scalar_lea.vmem %s18_s13, 9216  ;;  %p625_p4 = scmp.lt.s32.totalorder %s18_s13, %s18_s13 }
   0x9   :  { %p621_p3 = scmp.ne.s32.totalorder %s18_s13, %s620_s21  ;;  %p626_p5 = scmp.lt.s32.totalorder %s620_s21, %s620_s21 }
   0xb   :  { %p627_p6 = por %p626_p5, %p625_p4 }
   0xd   :  { %p628_p7 = pnand %p627_p6, %p621_p3 }
   0xf   :  { %631 = shalt.err (!%p628_p7)
}
  0x10   :  { %s659_s22 = smov 1024   ;;  %s660_s23 = smov 64  }
  0x11   :  { %23 = dma.hbm_to_vmem [thread:$0]  %s740_s1, 9216, %s18_s13, [#allocation3], %s659_s22, %s659_s22, %s660_s23  }
  0x12   :  { %s661_s26 = smov [#allocation4]   ;;  %s632_s30 = scalar_lea.hbm %s741_s2, 128 }
  0x13   :  { %s30_s27 = sshll.u32 %s661_s26, 4  ;;  %p633_p8 = scmp.ne.s32.totalorder %s741_s2, %s632_s30  ;;  %s31_s27 = int_to_ptr.vmem [resolvable:$true] %s30_s27 }
  0x14   :  { %p636_p9 = scmp.lt.u32.totalorder %s632_s30, %s741_s2 }
  0x16   :  { %p638_p10 = pnand %p636_p9, %p633_p8 }
  0x18   :  { %641 = shalt.err (!%p638_p10)
}
  0x19   :  { %s642_s8 = scalar_lea.vmem %s31_s27, 128  ;;  %p647_p12 = scmp.lt.s32.totalorder %s31_s27, %s31_s27 }
  0x1a   :  { %p643_p11 = scmp.ne.s32.totalorder %s31_s27, %s642_s8  ;;  %p648_p13 = scmp.lt.s32.totalorder %s642_s8, %s642_s8 }
  0x1c   :  { %p649_p0 = por %p648_p13, %p647_p12 }
  0x1e   :  { %p650_p1 = pnand %p649_p0, %p643_p11 }
  0x20   :  { %653 = shalt.err (!%p650_p1)
}
  0x21   :  { %33 = dma.hbm_to_vmem [thread:$0]  %s741_s2, 128, %s31_s27, [#allocation5]  }
  0x22   :  { %654 = dma.done.wait [#allocation3], 9216  }
  0x23   :  { %655 = vsyncadd [#allocation3], 4294958080 }
  0x24   :  { %656 = dma.done.wait [#allocation5], 128  }
  0x25   :  { %657 = vsyncadd [#allocation5], 4294967168  ;;  %v662_v0 = vmov 0.0   ;;  %v42_v1 = vld [vmem:[#allocation2 + $0x8] sm:$0xff]  ;;  %v44_v3 = vld [vmem:[#allocation2 + $0x18] sm:$0xff]  ;;  %vm159_vm0 = vcmask 1041408  }
  0x26   :  { %248 = vmatprep.mubr.f32.mxu0 %v662_v0  ;;  %319 = vmatprep.mubr.f32.mxu1 %v662_v0  ;;  %v50_v2 = vld [vmem:[#allocation2 + $0x48] sm:$0xff]  ;;  %v52_v5 = vld [vmem:[#allocation2 + $0x58] sm:$0xff]  ;;  %v41_v6 = vld [vmem:[#allocation2] sm:$0xff]  ;;  %vm155_vm1 = vcmask 539648  }
  0x27   :  { %v540_v4 = vpack.c.bf16 %v50_v2, %v42_v1  ;;  %v49_v7 = vld [vmem:[#allocation2 + $0x40] sm:$0xff]  ;;  %v556_v8 = vpack.c.bf16 %v52_v5, %v44_v3  ;;  %v43_v10 = vld [vmem:[#allocation2 + $0x10] sm:$0xff]  ;;  %v58_v12 = vld [vmem:[#allocation2 + $0x88] sm:$0xff] }
  0x28   :  { %v542_v9 = vpack.c.bf16 %v49_v7, %v41_v6  ;;  %v51_v11 = vld [vmem:[#allocation2 + $0x50] sm:$0xff]  ;;  %v66_v14 = vld [vmem:[#allocation2 + $0xc8] sm:$0xff]  ;;  %v60_v15 = vld [vmem:[#allocation2 + $0x98] sm:$0xff] }
  0x29   :  { %541 = vmatprep.subr.bf16.mxu0 %v540_v4  ;;  %v558_v13 = vpack.c.bf16 %v51_v11, %v43_v10  ;;  %v68_v16 = vld [vmem:[#allocation2 + $0xd8] sm:$0xff]  ;;  %557 = vmatprep.subr.bf16.mxu1 %v556_v8  ;;  %v544_v17 = vpack.c.bf16 %v66_v14, %v58_v12  ;;  %v57_v19 = vld [vmem:[#allocation2 + $0x80] sm:$0xff]  ;;  %v59_v21 = vld [vmem:[#allocation2 + $0x90] sm:$0xff] }
  0x2a   :  { %543 = vmatpush1.bf16.msra.mxu0 %v542_v9  ;;  %v560_v18 = vpack.c.bf16 %v68_v16, %v60_v15  ;;  %v65_v20 = vld [vmem:[#allocation2 + $0xc0] sm:$0xff]  ;;  %v67_v23 = vld [vmem:[#allocation2 + $0xd0] sm:$0xff]  ;;  %v74_v24 = vld [vmem:[#allocation2 + $0x108] sm:$0xff] }
  0x2b   :  { %559 = vmatpush1.bf16.msra.mxu1 %v558_v13  ;;  %v546_v22 = vpack.c.bf16 %v65_v20, %v57_v19  ;;  %v82_v25 = vld [vmem:[#allocation2 + $0x148] sm:$0xff]  ;;  %545 = vmatprep.subr.bf16.mxu0 %v544_v17  ;;  %v562_v26 = vpack.c.bf16 %v67_v23, %v59_v21  ;;  %v76_v28 = vld [vmem:[#allocation2 + $0x118] sm:$0xff]  ;;  %v73_v30 = vld [vmem:[#allocation2 + $0x100] sm:$0xff] }
  0x2c   :  { %561 = vmatprep.subr.bf16.mxu1 %v560_v18  ;;  %v548_v27 = vpack.c.bf16 %v82_v25, %v74_v24  ;;  %v84_v29 = vld [vmem:[#allocation2 + $0x158] sm:$0xff]  ;;  %v81_v32 = vld [vmem:[#allocation2 + $0x140] sm:$0xff]  ;;  %v75_v33 = vld [vmem:[#allocation2 + $0x110] sm:$0xff] }
  0x2d   :  { %v564_v31 = vpack.c.bf16 %v84_v29, %v76_v28  ;;  %v83_v34 = vld [vmem:[#allocation2 + $0x150] sm:$0xff]  ;;  %v550_v35 = vpack.c.bf16 %v81_v32, %v73_v30  ;;  %v90_v36 = vld [vmem:[#allocation2 + $0x188] sm:$0xff]  ;;  %v92_v38 = vld [vmem:[#allocation2 + $0x198] sm:$0xff] }
  0x2e   :  { %547 = vmatpush1.bf16.msra.mxu0 %v546_v22  ;;  %v98_v37 = vld [vmem:[#allocation2 + $0x1c8] sm:$0xff]  ;;  %v566_v39 = vpack.c.bf16 %v83_v34, %v75_v33  ;;  %v100_v41 = vld [vmem:[#allocation2 + $0x1d8] sm:$0xff]  ;;  %v89_v42 = vld [vmem:[#allocation2 + $0x180] sm:$0xff] }
  0x2f   :  { %563 = vmatpush1.bf16.msra.mxu1 %v562_v26  ;;  %549 = vmatprep.subr.bf16.mxu0 %v548_v27  ;;  %v552_v40 = vpack.c.bf16 %v98_v37, %v90_v36  ;;  %v97_v43 = vld [vmem:[#allocation2 + $0x1c0] sm:$0xff]  ;;  %v568_v44 = vpack.c.bf16 %v100_v41, %v92_v38  ;;  %v91_v45 = vld [vmem:[#allocation2 + $0x190] sm:$0xff]  ;;  %v106_v49 = vld [vmem:[#allocation2 + $0x208] sm:$0x3] }
  0x30   :  { %565 = vmatprep.subr.bf16.mxu1 %v564_v31  ;;  %v99_v46 = vld [vmem:[#allocation2 + $0x1d0] sm:$0xff]  ;;  %v554_v47 = vpack.c.bf16 %v97_v43, %v89_v42  ;;  %v108_v50 = vld [vmem:[#allocation2 + $0x218] sm:$0x3]  ;;  %v46_v51 = vld [vmem:[#allocation2 + $0x28] sm:$0xff]  ;;  %v115_v42 = vlaneseq }
  0x31   :  { %v570_v48 = vpack.c.bf16 %v99_v46, %v91_v45  ;;  %v105_v52 = vld [vmem:[#allocation2 + $0x200] sm:$0x3]  ;;  %v54_v53 = vld [vmem:[#allocation2 + $0x68] sm:$0xff]  ;;  %v48_v54 = vld [vmem:[#allocation2 + $0x38] sm:$0xff] }
  0x32   :  { %551 = vmatpush1.bf16.msra.mxu0 %v550_v35  ;;  %v56_v55 = vld [vmem:[#allocation2 + $0x78] sm:$0xff]  ;;  %v107_v56 = vld [vmem:[#allocation2 + $0x210] sm:$0x3]  ;;  %v45_v57 = vld [vmem:[#allocation2 + $0x20] sm:$0xff]  ;;  %v572_v1 = vpack.c.bf16 %v54_v53, %v46_v51  ;;  %v116_v43 = vshrl.u32 %v115_v42, 7 }
  0x33   :  { %567 = vmatpush1.bf16.msra.mxu1 %v566_v39  ;;  %553 = vmatprep.subr.bf16.mxu0 %v552_v40  ;;  %v53_v58 = vld [vmem:[#allocation2 + $0x60] sm:$0xff]  ;;  %v47_v59 = vld [vmem:[#allocation2 + $0x30] sm:$0xff]  ;;  %v62_v61 = vld [vmem:[#allocation2 + $0xa8] sm:$0xff]  ;;  %v588_v4 = vpack.c.bf16 %v56_v55, %v48_v54 }
  0x34   :  { %569 = vmatprep.subr.bf16.mxu1 %v568_v44  ;;  %v55_v60 = vld [vmem:[#allocation2 + $0x70] sm:$0xff]  ;;  %v70_v62 = vld [vmem:[#allocation2 + $0xe8] sm:$0xff]  ;;  %v715_v63 = vld [vmem:[%s739_s0] sm:$0x3]  ;;  %v574_v5 = vpack.c.bf16 %v53_v58, %v45_v57  ;;  %v117_v44 = vsub.s32 0, %v116_v43  ;;  %v125_v46 = vsub.s32 2, %v116_v43 }
  0x35   :  { %v64_v2 = vld [vmem:[#allocation2 + $0xb8] sm:$0xff]  ;;  %v590_v6 = vpack.c.bf16 %v55_v60, %v47_v59  ;;  %v576_v7 = vpack.c.bf16 %v70_v62, %v62_v61  ;;  %v61_v8 = vld [vmem:[#allocation2 + $0xa0] sm:$0xff]  ;;  %v63_v10 = vld [vmem:[#allocation2 + $0xb0] sm:$0xff] }
  0x36   :  { %555 = vmatpush1.bf16.msra.mxu0 %v554_v47  ;;  %v72_v3 = vld [vmem:[#allocation2 + $0xf8] sm:$0xff]  ;;  %v69_v9 = vld [vmem:[#allocation2 + $0xe0] sm:$0xff]  ;;  %v71_v12 = vld [vmem:[#allocation2 + $0xf0] sm:$0xff]  ;;  %v121_v47 = vsub.s32 1, %v116_v43 }
  0x37   :  { %571 = vmatpush1.bf16.msra.mxu1 %v570_v48  ;;  %528 = vmatprep.subr.msk.mxu0 %vm159_vm0, %v106_v49  ;;  %v592_v11 = vpack.c.bf16 %v72_v3, %v64_v2  ;;  %v78_v13 = vld [vmem:[#allocation2 + $0x128] sm:$0xff]  ;;  %v80_v15 = vld [vmem:[#allocation2 + $0x138] sm:$0xff]  ;;  %v578_v17 = vpack.c.bf16 %v69_v9, %v61_v8  ;;  %v594_v18 = vpack.c.bf16 %v71_v12, %v63_v10  ;;  %v77_v20 = vld [vmem:[#allocation2 + $0x120] sm:$0xff]  ;;  %v129_v48 = vsub.s32 3, %v116_v43 }
  0x38   :  { %531 = vmatprep.subr.msk.mxu1 %vm159_vm0, %v108_v50  ;;  %v86_v14 = vld [vmem:[#allocation2 + $0x168] sm:$0xff]  ;;  %v88_v16 = vld [vmem:[#allocation2 + $0x178] sm:$0xff]  ;;  %v85_v21 = vld [vmem:[#allocation2 + $0x160] sm:$0xff]  ;;  %v663_v49 = vmov 1983009808   ;;  %v141_v12 = vsub.s32 6, %v116_v43 }
  0x39   :  { %v580_v19 = vpack.c.bf16 %v86_v14, %v78_v13  ;;  %v79_v22 = vld [vmem:[#allocation2 + $0x130] sm:$0xff]  ;;  %v596_v23 = vpack.c.bf16 %v88_v16, %v80_v15  ;;  %v94_v25 = vld [vmem:[#allocation2 + $0x1a8] sm:$0xff]  ;;  %v96_v27 = vld [vmem:[#allocation2 + $0x1b8] sm:$0xff]  ;;  %v582_v29 = vpack.c.bf16 %v85_v21, %v77_v20  ;;  %v487_v50 = vunpack.c.l.s4 %v663_v49 }
  0x3a   :  { %529 = vmatpush1.msk.msra.mxu0 %vm159_vm0, %v105_v52  ;;  %v87_v24 = vld [vmem:[#allocation2 + $0x170] sm:$0xff]  ;;  %v102_v26 = vld [vmem:[#allocation2 + $0x1e8] sm:$0xff]  ;;  %v104_v28 = vld [vmem:[#allocation2 + $0x1f8] sm:$0xff]  ;;  %v137_v13 = vsub.s32 5, %v116_v43  ;;  %v145_v14 = vsub.s32 7, %v116_v43 }
  0x3b   :  { %532 = vmatpush1.msk.msra.mxu1 %vm159_vm0, %v107_v56  ;;  %530 = vmatmul.mubr.msk.f32.vlgmr.msra.gmra.mrb[0].mxu0 %vm155_vm1, %v715_v63  ;;  %v598_v30 = vpack.c.bf16 %v87_v24, %v79_v22  ;;  %v584_v31 = vpack.c.bf16 %v102_v26, %v94_v25  ;;  %v93_v32 = vld [vmem:[#allocation2 + $0x1a0] sm:$0xff]  ;;  %v600_v34 = vpack.c.bf16 %v104_v28, %v96_v27  ;;  %v95_v35 = vld [vmem:[#allocation2 + $0x1b0] sm:$0xff]  ;;  %v110_v39 = vld [vmem:[#allocation2 + $0x228] sm:$0x3]  ;;  %v488_v56 = vunpack.c.0.s8 %v487_v50 }
  0x3c   :  { %533 = vmatmul.mubr.msk.f32.vlgmr.msra.gmra.mrb[0].mxu1 %vm155_vm1, %v715_v63  ;;  %573 = vmatprep.subr.bf16.mxu0 %v572_v1  ;;  %v101_v33 = vld [vmem:[#allocation2 + $0x1e0] sm:$0xff]  ;;  %v103_v36 = vld [vmem:[#allocation2 + $0x1f0] sm:$0xff] }
  0x3d   :  { %589 = vmatprep.subr.bf16.mxu1 %v588_v4  ;;  %575 = vmatpush1.bf16.msra.mxu0 %v574_v5  ;;  %v586_v37 = vpack.c.bf16 %v101_v33, %v93_v32  ;;  %v602_v38 = vpack.c.bf16 %v103_v36, %v95_v35  ;;  %v109_v40 = vld [vmem:[#allocation2 + $0x220] sm:$0x3]  ;;  %v111_v41 = vld [vmem:[#allocation2 + $0x230] sm:$0x3]  ;;  %v491_v4 = vsub.s32 %v488_v56, %v116_v43 }
  0x3e   :  { %591 = vmatpush1.bf16.msra.mxu1 %v590_v6  ;;  %577 = vmatprep.subr.bf16.mxu0 %v576_v7  ;;  %v113_v45 = vld [vmem:[#allocation4] sm:$0xff] }
  0x3f   :  { %593 = vmatprep.subr.bf16.mxu1 %v592_v11  ;;  %390 = vmatprep.mubr.f32.mxu0 %v662_v0  ;;  %v118_v51 = vrot.slane %v113_v45, %v117_v44  ;;  %v126_v52 = vrot.slane %v113_v45, %v125_v46  ;;  %v122_v53 = vrot.slane %v113_v45, %v121_v47  ;;  %v133_v11 = vsub.s32 4, %v116_v43 }
  0x40   :  { %461 = vmatprep.mubr.f32.mxu1 %v662_v0  ;;  %v112_v0 = vld [vmem:[#allocation2 + $0x238] sm:$0x3]  ;;  %v130_v54 = vrot.slane %v113_v45, %v129_v48  ;;  %v142_v16 = vrot.slane %v113_v45, %v141_v12 }
  0x41   :  { %579 = vmatpush1.bf16.msra.mxu0 %v578_v17  ;;  %v134_v15 = vrot.slane %v113_v45, %v133_v11  ;;  %v138_v17 = vrot.slane %v113_v45, %v137_v13 }
  0x42   :  { %595 = vmatpush1.bf16.msra.mxu1 %v594_v18  ;;  %581 = vmatprep.subr.bf16.mxu0 %v580_v19  ;;  %v146_v18 = vrot.slane %v113_v45, %v145_v14 }
  0x43   :  { %597 = vmatprep.subr.bf16.mxu1 %v596_v23 }
  0x45   :  { %583 = vmatpush1.bf16.msra.mxu0 %v582_v29 }
  0x46   :  { %599 = vmatpush1.bf16.msra.mxu1 %v598_v30  ;;  %585 = vmatprep.subr.bf16.mxu0 %v584_v31 }
  0x47   :  { %601 = vmatprep.subr.bf16.mxu1 %v600_v34 }
  0x49   :  { %587 = vmatpush1.bf16.msra.mxu0 %v586_v37 }
  0x4a   :  { %603 = vmatpush1.bf16.msra.mxu1 %v602_v38  ;;  %534 = vmatprep.subr.msk.mxu0 %vm159_vm0, %v110_v39 }
  0x4b   :  { %537 = vmatprep.subr.msk.mxu1 %vm159_vm0, %v112_v0 }
  0x4d   :  { %535 = vmatpush1.msk.msra.mxu0 %vm159_vm0, %v109_v40 }
  0x4e   :  { %538 = vmatpush1.msk.msra.mxu1 %vm159_vm0, %v111_v41  ;;  %536 = vmatmul.mubr.msk.f32.vlgmr.msra.gmra.mrb[2].mxu0 %vm155_vm1, %v715_v63 }
  0x4f   :  { %539 = vmatmul.mubr.msk.f32.vlgmr.msra.gmra.mrb[2].mxu1 %vm155_vm1, %v715_v63 }
 0x10e   :  { %v250_v55 = vpop.f32.mrb[0].mxu0 }
 0x10f   :  { %v251_v57 = vadd.f32 %v250_v55, %v118_v51  ;;  %v321_v58 = vpop.f32.mrb[0].mxu1  ;;  %v252_v59 = vpop.f32.mrb[1].mxu0 }
 0x110   :  { %v322_v60 = vadd.f32 %v321_v58, %v126_v52  ;;  %v253_v61 = vadd.f32 %v252_v59, %v122_v53  ;;  %v323_v62 = vpop.f32.mrb[1].mxu1 }
 0x111   :  { %v468_v63 = vmax.f32 %v251_v57, 0.0  ;;  %v324_v1 = vadd.f32 %v323_v62, %v130_v54 }
 0x112   :  { %v470_v2 = vmax.f32 %v322_v60, 0.0  ;;  %v469_v3 = vmax.f32 %v253_v61, 0.0 }
 0x113   :  { %v471_v5 = vmax.f32 %v324_v1, 0.0 }
 0x114   :  { %v484_v6 = vcombine.low %v468_v63, %v469_v3 }
 0x115   :  { %v485_v7 = vcombine.low %v470_v2, %v471_v5 }
 0x116   :  { %v492_v8 = vrot.slane %v484_v6, %v491_v4 }
 0x117   :  { %v499_v9 = vrot.slane %v485_v7, %v491_v4 }
 0x119   :  { %v500_v10 = vcombine.low %v492_v8, %v499_v9 }
 0x11b   :  { %520 = vst [vmem:[%s742_s3] sm:$0xff] %v500_v10 }
 0x121   :  { %v392_v19 = vpop.f32.mrb[2].mxu0 }
 0x122   :  { %v393_v20 = vadd.f32 %v392_v19, %v134_v15  ;;  %v463_v21 = vpop.f32.mrb[2].mxu1  ;;  %v394_v22 = vpop.f32.mrb[3].mxu0 }
 0x123   :  { %v464_v23 = vadd.f32 %v463_v21, %v142_v16  ;;  %v395_v24 = vadd.f32 %v394_v22, %v138_v17  ;;  %v465_v25 = vpop.f32.mrb[3].mxu1 }
 0x124   :  { %v472_v26 = vmax.f32 %v393_v20, 0.0  ;;  %v466_v27 = vadd.f32 %v465_v25, %v146_v18 }
 0x125   :  { %v474_v28 = vmax.f32 %v464_v23, 0.0  ;;  %v473_v29 = vmax.f32 %v395_v24, 0.0 }
 0x126   :  { %v475_v30 = vmax.f32 %v466_v27, 0.0 }
 0x127   :  { %v501_v31 = vcombine.low %v472_v26, %v473_v29 }
 0x128   :  { %v502_v32 = vcombine.low %v474_v28, %v475_v30 }
 0x129   :  { %v509_v33 = vrot.slane %v501_v31, %v491_v4 }
 0x12a   :  { %v516_v34 = vrot.slane %v502_v32, %v491_v4 }
 0x12c   :  { %v517_v35 = vcombine.low %v509_v33, %v516_v34 }
 0x12e   :  { %521 = vst [vmem:[%s742_s3 + $0x8] sm:$0xff] %v517_v35 }
 0x12f   :  { %526 = vsyncpa [#allocation3], 1 }
 0x130   :  { %527 = vsyncpa [#allocation5], 1 }

// kernel: generator_forward.7
= control target key start
LH: loop header
LB: loop body
LE: loop exit
PB: predicated region body
PF: predicated region fallthrough
CT: control target
= control target key end

     0   :  { %s5156_s1 = inlined_call_operand.vmem [shape: bf16[4,1024,128], index: 1, kind: input, shape index: {}]   ;;  %s5157_s0 = inlined_call_operand.vmem [shape: bf16[4,8,1024], index: 0, kind: input, shape index: {}]   ;;  %s5158_s2 = inlined_call_operand.vmem [shape: f32[1,128], index: 2, kind: input, shape index: {}]   ;;  %s5159_s3 = inlined_call_operand.vmem [shape: f32[1,128], index: 3, kind: input, shape index: {}]   ;;  %s5160_s4 = inlined_call_operand.vmem [shape: f32[32,128], index: 4, kind: output, shape index: {}]  }
   0x1   :  { %v3986_v0 = vld [vmem:[%s5156_s1 + $0x40] sm:$0xff]   ;;  %v3990_v4 = vld [vmem:[%s5156_s1 + $0x48] sm:$0xff]   ;;  %v3994_v8 = vld [vmem:[%s5156_s1 + $0x50] sm:$0xff]  }
   0x2   :  { %v3987_v1 = vld [vmem:[%s5156_s1 + $0xc0] sm:$0xff]   ;;  %3634 = vmatprep.subr.bf16.mxu0 %v3986_v0  ;;  %v3991_v5 = vld [vmem:[%s5156_s1 + $0xc8] sm:$0xff]   ;;  %v3995_v9 = vld [vmem:[%s5156_s1 + $0xd0] sm:$0xff]  }
   0x3   :  { %v3988_v2 = vld [vmem:[%s5156_s1] sm:$0xff]   ;;  %3656 = vmatprep.subr.bf16.mxu1 %v3987_v1  ;;  %v3992_v6 = vld [vmem:[%s5156_s1 + $0x8] sm:$0xff]   ;;  %v3996_v10 = vld [vmem:[%s5156_s1 + $0x10] sm:$0xff]  }
   0x4   :  { %v3989_v3 = vld [vmem:[%s5156_s1 + $0x80] sm:$0xff]   ;;  %3635 = vmatpush3.bf16.msra.mxu0 %v3988_v2  ;;  %v3993_v7 = vld [vmem:[%s5156_s1 + $0x88] sm:$0xff]   ;;  %v3997_v11 = vld [vmem:[%s5156_s1 + $0x90] sm:$0xff]  }
   0x5   :  { %3657 = vmatpush3.bf16.msra.mxu1 %v3989_v3  ;;  %3636 = vmatprep.subr.bf16.mxu0 %v3990_v4  ;;  %v3998_v12 = vld [vmem:[%s5156_s1 + $0x58] sm:$0xff]   ;;  %v4002_v16 = vld [vmem:[%s5156_s1 + $0x60] sm:$0xff]   ;;  %v4006_v20 = vld [vmem:[%s5156_s1 + $0x68] sm:$0xff]  }
   0x6   :  { %3658 = vmatprep.subr.bf16.mxu1 %v3991_v5  ;;  %v3999_v13 = vld [vmem:[%s5156_s1 + $0xd8] sm:$0xff]   ;;  %v4003_v17 = vld [vmem:[%s5156_s1 + $0xe0] sm:$0xff]   ;;  %v4007_v21 = vld [vmem:[%s5156_s1 + $0xe8] sm:$0xff]  }
   0x7   :  { %v4000_v14 = vld [vmem:[%s5156_s1 + $0x18] sm:$0xff]   ;;  %v4004_v18 = vld [vmem:[%s5156_s1 + $0x20] sm:$0xff]   ;;  %v4008_v22 = vld [vmem:[%s5156_s1 + $0x28] sm:$0xff]  }
   0x8   :  { %3637 = vmatpush3.bf16.msra.mxu0 %v3992_v6  ;;  %v4001_v15 = vld [vmem:[%s5156_s1 + $0x98] sm:$0xff]   ;;  %v4005_v19 = vld [vmem:[%s5156_s1 + $0xa0] sm:$0xff]   ;;  %v4009_v23 = vld [vmem:[%s5156_s1 + $0xa8] sm:$0xff]  }
   0x9   :  { %3659 = vmatpush3.bf16.msra.mxu1 %v3993_v7  ;;  %3638 = vmatprep.subr.bf16.mxu0 %v3994_v8  ;;  %v4010_v24 = vld [vmem:[%s5156_s1 + $0x70] sm:$0xff]   ;;  %v4014_v28 = vld [vmem:[%s5156_s1 + $0x78] sm:$0xff]   ;;  %v18_v32 = vld [vmem:[%s5157_s0] sm:$0xff] }
   0xa   :  { %3660 = vmatprep.subr.bf16.mxu1 %v3995_v9  ;;  %v4011_v25 = vld [vmem:[%s5156_s1 + $0xf0] sm:$0xff]   ;;  %v4015_v29 = vld [vmem:[%s5156_s1 + $0xf8] sm:$0xff]   ;;  %v19_v33 = vld [vmem:[%s5157_s0 + $0x8] sm:$0xff]  ;;  %v2950_v34 = vcombine.low %v18_v32, %v18_v32  ;;  %v2951_v35 = vcombine.high %v18_v32, %v18_v32 }
   0xb   :  { %v4012_v26 = vld [vmem:[%s5156_s1 + $0x30] sm:$0xff]   ;;  %v4016_v30 = vld [vmem:[%s5156_s1 + $0x38] sm:$0xff]   ;;  %v2952_v36 = vcombine.low %v19_v33, %v19_v33  ;;  %v2953_v37 = vcombine.high %v19_v33, %v19_v33  ;;  %v4022_v38 = vld [vmem:[%s5156_s1 + $0x140] sm:$0xff]  }
   0xc   :  { %3639 = vmatpush3.bf16.msra.mxu0 %v3996_v10  ;;  %v4013_v27 = vld [vmem:[%s5156_s1 + $0xb0] sm:$0xff]   ;;  %v4017_v31 = vld [vmem:[%s5156_s1 + $0xb8] sm:$0xff]   ;;  %v4023_v39 = vld [vmem:[%s5156_s1 + $0x1c0] sm:$0xff]   ;;  %594 = vmatprep.mubr.bf16.mxu0 %v2951_v35 }
   0xd   :  { %3661 = vmatpush3.bf16.msra.mxu1 %v3997_v11  ;;  %3640 = vmatprep.subr.bf16.mxu0 %v3998_v12  ;;  %v4024_v40 = vld [vmem:[%s5156_s1 + $0x100] sm:$0xff]   ;;  %v4026_v42 = vld [vmem:[%s5156_s1 + $0x148] sm:$0xff]   ;;  %v4030_v46 = vld [vmem:[%s5156_s1 + $0x150] sm:$0xff]  }
   0xe   :  { %3662 = vmatprep.subr.bf16.mxu1 %v3999_v13  ;;  %634 = vmatprep.mubr.bf16.mxu1 %v2953_v37  ;;  %v4025_v41 = vld [vmem:[%s5156_s1 + $0x180] sm:$0xff]   ;;  %v4027_v43 = vld [vmem:[%s5156_s1 + $0x1c8] sm:$0xff]   ;;  %v4031_v47 = vld [vmem:[%s5156_s1 + $0x1d0] sm:$0xff]  }
   0xf   :  { %v4028_v44 = vld [vmem:[%s5156_s1 + $0x108] sm:$0xff]   ;;  %v4032_v48 = vld [vmem:[%s5156_s1 + $0x110] sm:$0xff]   ;;  %v4034_v50 = vld [vmem:[%s5156_s1 + $0x158] sm:$0xff]  }
  0x10   :  { %3641 = vmatpush3.bf16.msra.mxu0 %v4000_v14  ;;  %v4029_v45 = vld [vmem:[%s5156_s1 + $0x188] sm:$0xff]   ;;  %v4033_v49 = vld [vmem:[%s5156_s1 + $0x190] sm:$0xff]   ;;  %v4035_v51 = vld [vmem:[%s5156_s1 + $0x1d8] sm:$0xff]  }
  0x11   :  { %3663 = vmatpush3.bf16.msra.mxu1 %v4001_v15  ;;  %3642 = vmatprep.subr.bf16.mxu0 %v4002_v16  ;;  %v4036_v52 = vld [vmem:[%s5156_s1 + $0x118] sm:$0xff]   ;;  %v4038_v54 = vld [vmem:[%s5156_s1 + $0x160] sm:$0xff]   ;;  %v4042_v58 = vld [vmem:[%s5156_s1 + $0x168] sm:$0xff]  }
  0x12   :  { %3664 = vmatprep.subr.bf16.mxu1 %v4003_v17  ;;  %v4037_v53 = vld [vmem:[%s5156_s1 + $0x198] sm:$0xff]   ;;  %v4039_v55 = vld [vmem:[%s5156_s1 + $0x1e0] sm:$0xff]   ;;  %v4043_v59 = vld [vmem:[%s5156_s1 + $0x1e8] sm:$0xff]  }
  0x13   :  { %v4040_v56 = vld [vmem:[%s5156_s1 + $0x120] sm:$0xff]   ;;  %v4044_v60 = vld [vmem:[%s5156_s1 + $0x128] sm:$0xff]   ;;  %v4046_v62 = vld [vmem:[%s5156_s1 + $0x170] sm:$0xff]  }
  0x14   :  { %3643 = vmatpush3.bf16.msra.mxu0 %v4004_v18  ;;  %v4041_v57 = vld [vmem:[%s5156_s1 + $0x1a0] sm:$0xff]   ;;  %v4045_v61 = vld [vmem:[%s5156_s1 + $0x1a8] sm:$0xff]   ;;  %v4047_v63 = vld [vmem:[%s5156_s1 + $0x1f0] sm:$0xff]  }
  0x15   :  { %3665 = vmatpush3.bf16.msra.mxu1 %v4005_v19  ;;  %3644 = vmatprep.subr.bf16.mxu0 %v4006_v20  ;;  %v4048_v0 = vld [vmem:[%s5156_s1 + $0x130] sm:$0xff]   ;;  %v4050_v2 = vld [vmem:[%s5156_s1 + $0x178] sm:$0xff]   ;;  %v4058_v12 = vld [vmem:[%s5156_s1 + $0x240] sm:$0xff]  }
  0x16   :  { %3666 = vmatprep.subr.bf16.mxu1 %v4007_v21  ;;  %v4049_v1 = vld [vmem:[%s5156_s1 + $0x1b0] sm:$0xff]   ;;  %v4051_v3 = vld [vmem:[%s5156_s1 + $0x1f8] sm:$0xff]   ;;  %v4059_v13 = vld [vmem:[%s5156_s1 + $0x2c0] sm:$0xff]  }
  0x17   :  { %v4052_v4 = vld [vmem:[%s5156_s1 + $0x138] sm:$0xff]   ;;  %v20_v6 = vld [vmem:[%s5157_s0 + $0x10] sm:$0xff]  ;;  %v4060_v14 = vld [vmem:[%s5156_s1 + $0x200] sm:$0xff]  }
  0x18   :  { %3645 = vmatpush3.bf16.msra.mxu0 %v4008_v22  ;;  %v4053_v5 = vld [vmem:[%s5156_s1 + $0x1b8] sm:$0xff]   ;;  %v2954_v7 = vcombine.low %v20_v6, %v20_v6  ;;  %v2955_v8 = vcombine.high %v20_v6, %v20_v6  ;;  %v4061_v15 = vld [vmem:[%s5156_s1 + $0x280] sm:$0xff]   ;;  %v4062_v16 = vld [vmem:[%s5156_s1 + $0x248] sm:$0xff]  }
  0x19   :  { %3667 = vmatpush3.bf16.msra.mxu1 %v4009_v23  ;;  %3646 = vmatprep.subr.bf16.mxu0 %v4010_v24  ;;  %v21_v9 = vld [vmem:[%s5157_s0 + $0x18] sm:$0xff]  ;;  %v4063_v17 = vld [vmem:[%s5156_s1 + $0x2c8] sm:$0xff]   ;;  %v4066_v20 = vld [vmem:[%s5156_s1 + $0x250] sm:$0xff]  }
  0x1a   :  { %3668 = vmatprep.subr.bf16.mxu1 %v4011_v25  ;;  %v2956_v10 = vcombine.low %v21_v9, %v21_v9  ;;  %v2957_v11 = vcombine.high %v21_v9, %v21_v9  ;;  %v4064_v18 = vld [vmem:[%s5156_s1 + $0x208] sm:$0xff]   ;;  %v4067_v21 = vld [vmem:[%s5156_s1 + $0x2d0] sm:$0xff]   ;;  %v4070_v24 = vld [vmem:[%s5156_s1 + $0x258] sm:$0xff]  }
  0x1b   :  { %v4065_v19 = vld [vmem:[%s5156_s1 + $0x288] sm:$0xff]   ;;  %v4068_v22 = vld [vmem:[%s5156_s1 + $0x210] sm:$0xff]   ;;  %v4071_v25 = vld [vmem:[%s5156_s1 + $0x2d8] sm:$0xff]  }
  0x1c   :  { %3647 = vmatpush3.bf16.msra.mxu0 %v4012_v26  ;;  %v4069_v23 = vld [vmem:[%s5156_s1 + $0x290] sm:$0xff]   ;;  %v4072_v26 = vld [vmem:[%s5156_s1 + $0x218] sm:$0xff]   ;;  %v4078_v32 = vld [vmem:[%s5156_s1 + $0x268] sm:$0xff]  }
  0x1d   :  { %3669 = vmatpush3.bf16.msra.mxu1 %v4013_v27  ;;  %3648 = vmatprep.subr.bf16.mxu0 %v4014_v28  ;;  %v4073_v27 = vld [vmem:[%s5156_s1 + $0x298] sm:$0xff]   ;;  %v4074_v28 = vld [vmem:[%s5156_s1 + $0x260] sm:$0xff]   ;;  %v4079_v33 = vld [vmem:[%s5156_s1 + $0x2e8] sm:$0xff]  }
  0x1e   :  { %3670 = vmatprep.subr.bf16.mxu1 %v4015_v29  ;;  %v4075_v29 = vld [vmem:[%s5156_s1 + $0x2e0] sm:$0xff]   ;;  %v4081_v35 = vld [vmem:[%s5156_s1 + $0x2a8] sm:$0xff]   ;;  %v4083_v37 = vld [vmem:[%s5156_s1 + $0x2f0] sm:$0xff]  }
  0x1f   :  { %v4114_v6 = vld [vmem:[%s5156_s1 + $0x368] sm:$0xff]  }
  0x20   :  { %3649 = vmatpush3.bf16.msra.mxu0 %v4016_v30  ;;  %v4076_v30 = vld [vmem:[%s5156_s1 + $0x220] sm:$0xff]   ;;  %v4117_v9 = vld [vmem:[%s5156_s1 + $0x3a8] sm:$0xff]  }
  0x21   :  { %3671 = vmatpush3.bf16.msra.mxu1 %v4017_v31  ;;  %3678 = vmatprep.subr.bf16.mxu0 %v4022_v38  ;;  %v4077_v31 = vld [vmem:[%s5156_s1 + $0x2a0] sm:$0xff]   ;;  %v4084_v38 = vld [vmem:[%s5156_s1 + $0x230] sm:$0xff]  }
  0x22   :  { %3700 = vmatprep.subr.bf16.mxu1 %v4023_v39  ;;  %v4085_v39 = vld [vmem:[%s5156_s1 + $0x2b0] sm:$0xff]  }
  0x23   :  { %595 = vmatmul.mubr.bf16.vlgmr.msra.gmra.mrb[0].mxu0 %v2950_v34  ;;  %v4080_v34 = vld [vmem:[%s5156_s1 + $0x228] sm:$0xff]  }
  0x24   :  { %635 = vmatmul.mubr.bf16.vlgmr.msra.gmra.mrb[0].mxu1 %v2952_v36  ;;  %3679 = vmatpush3.bf16.msra.mxu0 %v4024_v40  ;;  %v4082_v36 = vld [vmem:[%s5156_s1 + $0x270] sm:$0xff]   ;;  %v4086_v40 = vld [vmem:[%s5156_s1 + $0x278] sm:$0xff]  }
  0x25   :  { %3701 = vmatpush3.bf16.msra.mxu1 %v4025_v41  ;;  %3680 = vmatprep.subr.bf16.mxu0 %v4026_v42  ;;  %v4087_v41 = vld [vmem:[%s5156_s1 + $0x2f8] sm:$0xff]  }
  0x26   :  { %3702 = vmatprep.subr.bf16.mxu1 %v4027_v43  ;;  %674 = vmatprep.mubr.bf16.mxu0 %v2955_v8  ;;  %v4088_v42 = vld [vmem:[%s5156_s1 + $0x238] sm:$0xff]   ;;  %v4116_v8 = vld [vmem:[%s5156_s1 + $0x328] sm:$0xff]  }
  0x27   :  { %714 = vmatprep.mubr.bf16.mxu1 %v2957_v11  ;;  %v4089_v43 = vld [vmem:[%s5156_s1 + $0x2b8] sm:$0xff]   ;;  %v4119_v11 = vld [vmem:[%s5156_s1 + $0x3f0] sm:$0xff]  }
  0x28   :  { %3681 = vmatpush3.bf16.msra.mxu0 %v4028_v44  ;;  %v3022_v44 = vld [vmem:[%s5157_s0 + $0x20] sm:$0xff] }
  0x29   :  { %3703 = vmatpush3.bf16.msra.mxu1 %v4029_v45  ;;  %3682 = vmatprep.subr.bf16.mxu0 %v4030_v46  ;;  %v3023_v45 = vld [vmem:[%s5157_s0 + $0x28] sm:$0xff]  ;;  %v3154_v46 = vcombine.low %v3022_v44, %v3022_v44 }
  0x2a   :  { %3704 = vmatprep.subr.bf16.mxu1 %v4031_v47  ;;  %v3155_v47 = vcombine.high %v3022_v44, %v3022_v44  ;;  %v4150_v44 = vld [vmem:[%s5156_s1 + $0x468] sm:$0xff]  }
  0x2c   :  { %3683 = vmatpush3.bf16.msra.mxu0 %v4032_v48  ;;  %v3156_v48 = vcombine.low %v3023_v45, %v3023_v45 }
  0x2d   :  { %3705 = vmatpush3.bf16.msra.mxu1 %v4033_v49  ;;  %3684 = vmatprep.subr.bf16.mxu0 %v4034_v50  ;;  %v3157_v49 = vcombine.high %v3023_v45, %v3023_v45  ;;  %v4094_v50 = vld [vmem:[%s5156_s1 + $0x340] sm:$0xff]   ;;  %v4151_v45 = vld [vmem:[%s5156_s1 + $0x4e8] sm:$0xff]  }
  0x2e   :  { %3706 = vmatprep.subr.bf16.mxu1 %v4035_v51  ;;  %v4095_v51 = vld [vmem:[%s5156_s1 + $0x3c0] sm:$0xff]  }
  0x30   :  { %3685 = vmatpush3.bf16.msra.mxu0 %v4036_v52  ;;  %v4096_v52 = vld [vmem:[%s5156_s1 + $0x300] sm:$0xff]  }
  0x31   :  { %3707 = vmatpush3.bf16.msra.mxu1 %v4037_v53  ;;  %3686 = vmatprep.subr.bf16.mxu0 %v4038_v54  ;;  %v4097_v53 = vld [vmem:[%s5156_s1 + $0x380] sm:$0xff]   ;;  %v4098_v54 = vld [vmem:[%s5156_s1 + $0x348] sm:$0xff]  }
  0x32   :  { %3708 = vmatprep.subr.bf16.mxu1 %v4039_v55  ;;  %v4099_v55 = vld [vmem:[%s5156_s1 + $0x3c8] sm:$0xff]  }
  0x34   :  { %3687 = vmatpush3.bf16.msra.mxu0 %v4040_v56  ;;  %v4100_v56 = vld [vmem:[%s5156_s1 + $0x308] sm:$0xff]  }
  0x35   :  { %3709 = vmatpush3.bf16.msra.mxu1 %v4041_v57  ;;  %3688 = vmatprep.subr.bf16.mxu0 %v4042_v58  ;;  %v4101_v57 = vld [vmem:[%s5156_s1 + $0x388] sm:$0xff]   ;;  %v4102_v58 = vld [vmem:[%s5156_s1 + $0x350] sm:$0xff]  }
  0x36   :  { %3710 = vmatprep.subr.bf16.mxu1 %v4043_v59  ;;  %v4103_v59 = vld [vmem:[%s5156_s1 + $0x3d0] sm:$0xff]  }
  0x38   :  { %3689 = vmatpush3.bf16.msra.mxu0 %v4044_v60  ;;  %v4104_v60 = vld [vmem:[%s5156_s1 + $0x310] sm:$0xff]  }
  0x39   :  { %3711 = vmatpush3.bf16.msra.mxu1 %v4045_v61  ;;  %3690 = vmatprep.subr.bf16.mxu0 %v4046_v62  ;;  %v4105_v61 = vld [vmem:[%s5156_s1 + $0x390] sm:$0xff]   ;;  %v4106_v62 = vld [vmem:[%s5156_s1 + $0x358] sm:$0xff]  }
  0x3a   :  { %3712 = vmatprep.subr.bf16.mxu1 %v4047_v63  ;;  %v4107_v63 = vld [vmem:[%s5156_s1 + $0x3d8] sm:$0xff]  }
  0x3c   :  { %3691 = vmatpush3.bf16.msra.mxu0 %v4048_v0  ;;  %v4108_v0 = vld [vmem:[%s5156_s1 + $0x318] sm:$0xff]  }
  0x3d   :  { %3713 = vmatpush3.bf16.msra.mxu1 %v4049_v1  ;;  %3692 = vmatprep.subr.bf16.mxu0 %v4050_v2  ;;  %v4109_v1 = vld [vmem:[%s5156_s1 + $0x398] sm:$0xff]   ;;  %v4110_v2 = vld [vmem:[%s5156_s1 + $0x360] sm:$0xff]  }
  0x3e   :  { %3714 = vmatprep.subr.bf16.mxu1 %v4051_v3  ;;  %v4111_v3 = vld [vmem:[%s5156_s1 + $0x3e0] sm:$0xff]  }
  0x40   :  { %3693 = vmatpush3.bf16.msra.mxu0 %v4052_v4  ;;  %v4112_v4 = vld [vmem:[%s5156_s1 + $0x320] sm:$0xff]  }
  0x41   :  { %3715 = vmatpush3.bf16.msra.mxu1 %v4053_v5  ;;  %3722 = vmatprep.subr.bf16.mxu0 %v4058_v12  ;;  %v4113_v5 = vld [vmem:[%s5156_s1 + $0x3a0] sm:$0xff]   ;;  %v4120_v12 = vld [vmem:[%s5156_s1 + $0x330] sm:$0xff]  }
  0x42   :  { %3744 = vmatprep.subr.bf16.mxu1 %v4059_v13  ;;  %v4121_v13 = vld [vmem:[%s5156_s1 + $0x3b0] sm:$0xff]  }
  0x43   :  { %675 = vmatmul.mubr.bf16.vlgmr.msra.gmra.mrb[4].mxu0 %v2954_v7  ;;  %v4115_v7 = vld [vmem:[%s5156_s1 + $0x3e8] sm:$0xff]  }
  0x44   :  { %715 = vmatmul.mubr.bf16.vlgmr.msra.gmra.mrb[4].mxu1 %v2956_v10  ;;  %3723 = vmatpush3.bf16.msra.mxu0 %v4060_v14  ;;  %v4118_v10 = vld [vmem:[%s5156_s1 + $0x370] sm:$0xff]   ;;  %v4122_v14 = vld [vmem:[%s5156_s1 + $0x378] sm:$0xff]  }
  0x45   :  { %3745 = vmatpush3.bf16.msra.mxu1 %v4061_v15  ;;  %3724 = vmatprep.subr.bf16.mxu0 %v4062_v16  ;;  %v4123_v15 = vld [vmem:[%s5156_s1 + $0x3f8] sm:$0xff]  }
  0x46   :  { %3746 = vmatprep.subr.bf16.mxu1 %v4063_v17  ;;  %1316 = vmatprep.mubr.bf16.mxu0 %v3155_v47  ;;  %v4124_v16 = vld [vmem:[%s5156_s1 + $0x338] sm:$0xff]   ;;  %v4153_v47 = vld [vmem:[%s5156_s1 + $0x4a8] sm:$0xff]  }
  0x47   :  { %1356 = vmatprep.mubr.bf16.mxu1 %v3157_v49  ;;  %v4125_v17 = vld [vmem:[%s5156_s1 + $0x3b8] sm:$0xff]   ;;  %v4155_v49 = vld [vmem:[%s5156_s1 + $0x4f0] sm:$0xff]  }
  0x48   :  { %3725 = vmatpush3.bf16.msra.mxu0 %v4064_v18  ;;  %v3024_v18 = vld [vmem:[%s5157_s0 + $0x30] sm:$0xff] }
  0x49   :  { %3747 = vmatpush3.bf16.msra.mxu1 %v4065_v19  ;;  %3726 = vmatprep.subr.bf16.mxu0 %v4066_v20  ;;  %v3025_v19 = vld [vmem:[%s5157_s0 + $0x38] sm:$0xff]  ;;  %v3158_v20 = vcombine.low %v3024_v18, %v3024_v18 }
  0x4a   :  { %3748 = vmatprep.subr.bf16.mxu1 %v4067_v21  ;;  %v3159_v21 = vcombine.high %v3024_v18, %v3024_v18  ;;  %v4186_v18 = vld [vmem:[%s5156_s1 + $0x568] sm:$0xff]  }
  0x4c   :  { %3727 = vmatpush3.bf16.msra.mxu0 %v4068_v22  ;;  %v3160_v22 = vcombine.low %v3025_v19, %v3025_v19 }
  0x4d   :  { %3749 = vmatpush3.bf16.msra.mxu1 %v4069_v23  ;;  %3728 = vmatprep.subr.bf16.mxu0 %v4070_v24  ;;  %v4130_v23 = vld [vmem:[%s5156_s1 + $0x440] sm:$0xff]   ;;  %v3161_v24 = vcombine.high %v3025_v19, %v3025_v19  ;;  %v4187_v19 = vld [vmem:[%s5156_s1 + $0x5e8] sm:$0xff]  }
  0x4e   :  { %3750 = vmatprep.subr.bf16.mxu1 %v4071_v25  ;;  %v4131_v25 = vld [vmem:[%s5156_s1 + $0x4c0] sm:$0xff]  }
  0x50   :  { %3729 = vmatpush3.bf16.msra.mxu0 %v4072_v26  ;;  %v4132_v26 = vld [vmem:[%s5156_s1 + $0x400] sm:$0xff]  }
  0x51   :  { %3751 = vmatpush3.bf16.msra.mxu1 %v4073_v27  ;;  %3730 = vmatprep.subr.bf16.mxu0 %v4074_v28  ;;  %v4133_v27 = vld [vmem:[%s5156_s1 + $0x480] sm:$0xff]   ;;  %v4134_v28 = vld [vmem:[%s5156_s1 + $0x448] sm:$0xff]  }
  0x52   :  { %3752 = vmatprep.subr.bf16.mxu1 %v4075_v29  ;;  %v4135_v29 = vld [vmem:[%s5156_s1 + $0x4c8] sm:$0xff]  }
  0x54   :  { %3731 = vmatpush3.bf16.msra.mxu0 %v4076_v30  ;;  %v4136_v30 = vld [vmem:[%s5156_s1 + $0x408] sm:$0xff]  }
  0x55   :  { %3753 = vmatpush3.bf16.msra.mxu1 %v4077_v31  ;;  %3732 = vmatprep.subr.bf16.mxu0 %v4078_v32  ;;  %v4137_v31 = vld [vmem:[%s5156_s1 + $0x488] sm:$0xff]   ;;  %v4138_v32 = vld [vmem:[%s5156_s1 + $0x450] sm:$0xff]  }
  0x56   :  { %3754 = vmatprep.subr.bf16.mxu1 %v4079_v33  ;;  %v4139_v33 = vld [vmem:[%s5156_s1 + $0x4d0] sm:$0xff]  }
  0x58   :  { %3733 = vmatpush3.bf16.msra.mxu0 %v4080_v34  ;;  %v4140_v34 = vld [vmem:[%s5156_s1 + $0x410] sm:$0xff]  }
  0x59   :  { %3755 = vmatpush3.bf16.msra.mxu1 %v4081_v35  ;;  %3734 = vmatprep.subr.bf16.mxu0 %v4082_v36  ;;  %v4141_v35 = vld [vmem:[%s5156_s1 + $0x490] sm:$0xff]   ;;  %v4142_v36 = vld [vmem:[%s5156_s1 + $0x458] sm:$0xff]  }
  0x5a   :  { %3756 = vmatprep.subr.bf16.mxu1 %v4083_v37  ;;  %v4143_v37 = vld [vmem:[%s5156_s1 + $0x4d8] sm:$0xff]  }
  0x5c   :  { %3735 = vmatpush3.bf16.msra.mxu0 %v4084_v38  ;;  %v4144_v38 = vld [vmem:[%s5156_s1 + $0x418] sm:$0xff]  }
  0x5d   :  { %3757 = vmatpush3.bf16.msra.mxu1 %v4085_v39  ;;  %3736 = vmatprep.subr.bf16.mxu0 %v4086_v40  ;;  %v4145_v39 = vld [vmem:[%s5156_s1 + $0x498] sm:$0xff]   ;;  %v4146_v40 = vld [vmem:[%s5156_s1 + $0x460] sm:$0xff]  }
  0x5e   :  { %3758 = vmatprep.subr.bf16.mxu1 %v4087_v41  ;;  %v4147_v41 = vld [vmem:[%s5156_s1 + $0x4e0] sm:$0xff]  }
  0x60   :  { %3737 = vmatpush3.bf16.msra.mxu0 %v4088_v42  ;;  %v4148_v42 = vld [vmem:[%s5156_s1 + $0x420] sm:$0xff]  }
  0x61   :  { %3759 = vmatpush3.bf16.msra.mxu1 %v4089_v43  ;;  %3766 = vmatprep.subr.bf16.mxu0 %v4094_v50  ;;  %v4149_v43 = vld [vmem:[%s5156_s1 + $0x4a0] sm:$0xff]   ;;  %v4156_v50 = vld [vmem:[%s5156_s1 + $0x430] sm:$0xff]  }
  0x62   :  { %3788 = vmatprep.subr.bf16.mxu1 %v4095_v51  ;;  %v4157_v51 = vld [vmem:[%s5156_s1 + $0x4b0] sm:$0xff]  }
  0x63   :  { %1317 = vmatmul.mubr.bf16.vlgmr.msra.gmra.mrb[8].mxu0 %v3154_v46  ;;  %v4152_v46 = vld [vmem:[%s5156_s1 + $0x428] sm:$0xff]  }
  0x64   :  { %1357 = vmatmul.mubr.bf16.vlgmr.msra.gmra.mrb[8].mxu1 %v3156_v48  ;;  %3767 = vmatpush3.bf16.msra.mxu0 %v4096_v52  ;;  %v4154_v48 = vld [vmem:[%s5156_s1 + $0x470] sm:$0xff]   ;;  %v4158_v52 = vld [vmem:[%s5156_s1 + $0x478] sm:$0xff]  }
  0x65   :  { %3789 = vmatpush3.bf16.msra.mxu1 %v4097_v53  ;;  %3768 = vmatprep.subr.bf16.mxu0 %v4098_v54  ;;  %v4159_v53 = vld [vmem:[%s5156_s1 + $0x4f8] sm:$0xff]  }
  0x66   :  { %3790 = vmatprep.subr.bf16.mxu1 %v4099_v55  ;;  %1396 = vmatprep.mubr.bf16.mxu0 %v3159_v21  ;;  %v4160_v54 = vld [vmem:[%s5156_s1 + $0x438] sm:$0xff]   ;;  %v4189_v21 = vld [vmem:[%s5156_s1 + $0x5a8] sm:$0xff]  }
  0x67   :  { %1436 = vmatprep.mubr.bf16.mxu1 %v3161_v24  ;;  %v4161_v55 = vld [vmem:[%s5156_s1 + $0x4b8] sm:$0xff]   ;;  %v4192_v24 = vld [vmem:[%s5156_s1 + $0x530] sm:$0xff]  }
  0x68   :  { %3769 = vmatpush3.bf16.msra.mxu0 %v4100_v56  ;;  %v3226_v56 = vld [vmem:[%s5157_s0 + $0x40] sm:$0xff] }
  0x69   :  { %3791 = vmatpush3.bf16.msra.mxu1 %v4101_v57  ;;  %3770 = vmatprep.subr.bf16.mxu0 %v4102_v58  ;;  %v3358_v57 = vcombine.low %v3226_v56, %v3226_v56  ;;  %v3359_v58 = vcombine.high %v3226_v56, %v3226_v56  ;;  %v4222_v56 = vld [vmem:[%s5156_s1 + $0x668] sm:$0xff]  }
  0x6a   :  { %3792 = vmatprep.subr.bf16.mxu1 %v4103_v59  ;;  %v3227_v59 = vld [vmem:[%s5157_s0 + $0x48] sm:$0xff] }
  0x6c   :  { %3771 = vmatpush3.bf16.msra.mxu0 %v4104_v60  ;;  %v3360_v60 = vcombine.low %v3227_v59, %v3227_v59 }
  0x6d   :  { %3793 = vmatpush3.bf16.msra.mxu1 %v4105_v61  ;;  %3772 = vmatprep.subr.bf16.mxu0 %v4106_v62  ;;  %v3361_v61 = vcombine.high %v3227_v59, %v3227_v59  ;;  %v4166_v62 = vld [vmem:[%s5156_s1 + $0x540] sm:$0xff]   ;;  %v4225_v59 = vld [vmem:[%s5156_s1 + $0x6a8] sm:$0xff]  }
  0x6e   :  { %3794 = vmatprep.subr.bf16.mxu1 %v4107_v63  ;;  %v4167_v63 = vld [vmem:[%s5156_s1 + $0x5c0] sm:$0xff]  }
  0x70   :  { %3773 = vmatpush3.bf16.msra.mxu0 %v4108_v0  ;;  %v4168_v0 = vld [vmem:[%s5156_s1 + $0x500] sm:$0xff]  }
  0x71   :  { %3795 = vmatpush3.bf16.msra.mxu1 %v4109_v1  ;;  %3774 = vmatprep.subr.bf16.mxu0 %v4110_v2  ;;  %v4169_v1 = vld [vmem:[%s5156_s1 + $0x580] sm:$0xff]   ;;  %v4170_v2 = vld [vmem:[%s5156_s1 + $0x548] sm:$0xff]  }
  0x72   :  { %3796 = vmatprep.subr.bf16.mxu1 %v4111_v3  ;;  %v4171_v3 = vld [vmem:[%s5156_s1 + $0x5c8] sm:$0xff]  }
  0x74   :  { %3775 = vmatpush3.bf16.msra.mxu0 %v4112_v4  ;;  %v4172_v4 = vld [vmem:[%s5156_s1 + $0x508] sm:$0xff]  }
  0x75   :  { %3797 = vmatpush3.bf16.msra.mxu1 %v4113_v5  ;;  %3776 = vmatprep.subr.bf16.mxu0 %v4114_v6  ;;  %v4173_v5 = vld [vmem:[%s5156_s1 + $0x588] sm:$0xff]   ;;  %v4174_v6 = vld [vmem:[%s5156_s1 + $0x550] sm:$0xff]  }
  0x76   :  { %3798 = vmatprep.subr.bf16.mxu1 %v4115_v7  ;;  %v4175_v7 = vld [vmem:[%s5156_s1 + $0x5d0] sm:$0xff]  }
  0x78   :  { %3777 = vmatpush3.bf16.msra.mxu0 %v4116_v8  ;;  %v4176_v8 = vld [vmem:[%s5156_s1 + $0x510] sm:$0xff]  }
  0x79   :  { %3799 = vmatpush3.bf16.msra.mxu1 %v4117_v9  ;;  %3778 = vmatprep.subr.bf16.mxu0 %v4118_v10  ;;  %v4177_v9 = vld [vmem:[%s5156_s1 + $0x590] sm:$0xff]   ;;  %v4178_v10 = vld [vmem:[%s5156_s1 + $0x558] sm:$0xff]  }
  0x7a   :  { %3800 = vmatprep.subr.bf16.mxu1 %v4119_v11  ;;  %v4179_v11 = vld [vmem:[%s5156_s1 + $0x5d8] sm:$0xff]  }
  0x7c   :  { %3779 = vmatpush3.bf16.msra.mxu0 %v4120_v12  ;;  %v4180_v12 = vld [vmem:[%s5156_s1 + $0x518] sm:$0xff]  }
  0x7d   :  { %3801 = vmatpush3.bf16.msra.mxu1 %v4121_v13  ;;  %3780 = vmatprep.subr.bf16.mxu0 %v4122_v14  ;;  %v4181_v13 = vld [vmem:[%s5156_s1 + $0x598] sm:$0xff]   ;;  %v4182_v14 = vld [vmem:[%s5156_s1 + $0x560] sm:$0xff]  }
  0x7e   :  { %3802 = vmatprep.subr.bf16.mxu1 %v4123_v15  ;;  %v4183_v15 = vld [vmem:[%s5156_s1 + $0x5e0] sm:$0xff]  }
  0x80   :  { %3781 = vmatpush3.bf16.msra.mxu0 %v4124_v16  ;;  %v4184_v16 = vld [vmem:[%s5156_s1 + $0x520] sm:$0xff]  }
  0x81   :  { %3803 = vmatpush3.bf16.msra.mxu1 %v4125_v17  ;;  %3810 = vmatprep.subr.bf16.mxu0 %v4130_v23  ;;  %v4185_v17 = vld [vmem:[%s5156_s1 + $0x5a0] sm:$0xff]   ;;  %v4191_v23 = vld [vmem:[%s5156_s1 + $0x5f0] sm:$0xff]  }
  0x82   :  { %3832 = vmatprep.subr.bf16.mxu1 %v4131_v25  ;;  %v4193_v25 = vld [vmem:[%s5156_s1 + $0x5b0] sm:$0xff]  }
  0x83   :  { %1397 = vmatmul.mubr.bf16.vlgmr.msra.gmra.mrb[12].mxu0 %v3158_v20  ;;  %v4188_v20 = vld [vmem:[%s5156_s1 + $0x528] sm:$0xff]  }
  0x84   :  { %1437 = vmatmul.mubr.bf16.vlgmr.msra.gmra.mrb[12].mxu1 %v3160_v22  ;;  %3811 = vmatpush3.bf16.msra.mxu0 %v4132_v26  ;;  %v4190_v22 = vld [vmem:[%s5156_s1 + $0x570] sm:$0xff]   ;;  %v4194_v26 = vld [vmem:[%s5156_s1 + $0x578] sm:$0xff]  }
  0x85   :  { %3833 = vmatpush3.bf16.msra.mxu1 %v4133_v27  ;;  %3812 = vmatprep.subr.bf16.mxu0 %v4134_v28  ;;  %v4195_v27 = vld [vmem:[%s5156_s1 + $0x5f8] sm:$0xff]  }
  0x86   :  { %3834 = vmatprep.subr.bf16.mxu1 %v4135_v29  ;;  %2038 = vmatprep.mubr.bf16.mxu0 %v3359_v58  ;;  %v4196_v28 = vld [vmem:[%s5156_s1 + $0x538] sm:$0xff]   ;;  %v4224_v58 = vld [vmem:[%s5156_s1 + $0x628] sm:$0xff]  }
  0x87   :  { %2078 = vmatprep.mubr.bf16.mxu1 %v3361_v61  ;;  %v4197_v29 = vld [vmem:[%s5156_s1 + $0x5b8] sm:$0xff]   ;;  %v4227_v61 = vld [vmem:[%s5156_s1 + $0x6f0] sm:$0xff]  }
  0x88   :  { %3813 = vmatpush3.bf16.msra.mxu0 %v4136_v30  ;;  %v3228_v30 = vld [vmem:[%s5157_s0 + $0x50] sm:$0xff] }
  0x89   :  { %3835 = vmatpush3.bf16.msra.mxu1 %v4137_v31  ;;  %3814 = vmatprep.subr.bf16.mxu0 %v4138_v32  ;;  %v3229_v31 = vld [vmem:[%s5157_s0 + $0x58] sm:$0xff]  ;;  %v3362_v32 = vcombine.low %v3228_v30, %v3228_v30 }
  0x8a   :  { %3836 = vmatprep.subr.bf16.mxu1 %v4139_v33  ;;  %v3363_v33 = vcombine.high %v3228_v30, %v3228_v30  ;;  %v4257_v30 = vld [vmem:[%s5156_s1 + $0x7a0] sm:$0xff]  }
  0x8c   :  { %3815 = vmatpush3.bf16.msra.mxu0 %v4140_v34  ;;  %v3364_v34 = vcombine.low %v3229_v31, %v3229_v31 }
  0x8d   :  { %3837 = vmatpush3.bf16.msra.mxu1 %v4141_v35  ;;  %3816 = vmatprep.subr.bf16.mxu0 %v4142_v36  ;;  %v3365_v35 = vcombine.high %v3229_v31, %v3229_v31  ;;  %v4202_v36 = vld [vmem:[%s5156_s1 + $0x640] sm:$0xff]  }
  0x8e   :  { %3838 = vmatprep.subr.bf16.mxu1 %v4143_v37  ;;  %v4203_v37 = vld [vmem:[%s5156_s1 + $0x6c0] sm:$0xff]  }
  0x90   :  { %3817 = vmatpush3.bf16.msra.mxu0 %v4144_v38  ;;  %v4204_v38 = vld [vmem:[%s5156_s1 + $0x600] sm:$0xff]  }
  0x91   :  { %3839 = vmatpush3.bf16.msra.mxu1 %v4145_v39  ;;  %3818 = vmatprep.subr.bf16.mxu0 %v4146_v40  ;;  %v4205_v39 = vld [vmem:[%s5156_s1 + $0x680] sm:$0xff]   ;;  %v4206_v40 = vld [vmem:[%s5156_s1 + $0x648] sm:$0xff]  }
  0x92   :  { %3840 = vmatprep.subr.bf16.mxu1 %v4147_v41  ;;  %v4207_v41 = vld [vmem:[%s5156_s1 + $0x6c8] sm:$0xff]  }
  0x94   :  { %3819 = vmatpush3.bf16.msra.mxu0 %v4148_v42  ;;  %v4208_v42 = vld [vmem:[%s5156_s1 + $0x608] sm:$0xff]  }
  0x95   :  { %3841 = vmatpush3.bf16.msra.mxu1 %v4149_v43  ;;  %3820 = vmatprep.subr.bf16.mxu0 %v4150_v44  ;;  %v4209_v43 = vld [vmem:[%s5156_s1 + $0x688] sm:$0xff]   ;;  %v4210_v44 = vld [vmem:[%s5156_s1 + $0x650] sm:$0xff]  }
  0x96   :  { %3842 = vmatprep.subr.bf16.mxu1 %v4151_v45  ;;  %v4211_v45 = vld [vmem:[%s5156_s1 + $0x6d0] sm:$0xff]  }
  0x98   :  { %3821 = vmatpush3.bf16.msra.mxu0 %v4152_v46  ;;  %v4212_v46 = vld [vmem:[%s5156_s1 + $0x610] sm:$0xff]  }
  0x99   :  { %3843 = vmatpush3.bf16.msra.mxu1 %v4153_v47  ;;  %3822 = vmatprep.subr.bf16.mxu0 %v4154_v48  ;;  %v4213_v47 = vld [vmem:[%s5156_s1 + $0x690] sm:$0xff]   ;;  %v4214_v48 = vld [vmem:[%s5156_s1 + $0x658] sm:$0xff]  }
  0x9a   :  { %3844 = vmatprep.subr.bf16.mxu1 %v4155_v49  ;;  %v4215_v49 = vld [vmem:[%s5156_s1 + $0x6d8] sm:$0xff]  }
  0x9c   :  { %3823 = vmatpush3.bf16.msra.mxu0 %v4156_v50  ;;  %v4216_v50 = vld [vmem:[%s5156_s1 + $0x618] sm:$0xff]  }
  0x9d   :  { %3845 = vmatpush3.bf16.msra.mxu1 %v4157_v51  ;;  %3824 = vmatprep.subr.bf16.mxu0 %v4158_v52  ;;  %v4217_v51 = vld [vmem:[%s5156_s1 + $0x698] sm:$0xff]   ;;  %v4218_v52 = vld [vmem:[%s5156_s1 + $0x660] sm:$0xff]  }
  0x9e   :  { %3846 = vmatprep.subr.bf16.mxu1 %v4159_v53  ;;  %v4219_v53 = vld [vmem:[%s5156_s1 + $0x6e0] sm:$0xff]  }
  0xa0   :  { %3825 = vmatpush3.bf16.msra.mxu0 %v4160_v54  ;;  %v4220_v54 = vld [vmem:[%s5156_s1 + $0x620] sm:$0xff]  }
  0xa1   :  { %3847 = vmatpush3.bf16.msra.mxu1 %v4161_v55  ;;  %3854 = vmatprep.subr.bf16.mxu0 %v4166_v62  ;;  %v4221_v55 = vld [vmem:[%s5156_s1 + $0x6a0] sm:$0xff]   ;;  %v4228_v62 = vld [vmem:[%s5156_s1 + $0x630] sm:$0xff]  }
  0xa2   :  { %3876 = vmatprep.subr.bf16.mxu1 %v4167_v63  ;;  %v4229_v63 = vld [vmem:[%s5156_s1 + $0x6b0] sm:$0xff]  }
  0xa3   :  { %2039 = vmatmul.mubr.bf16.vlgmr.msra.gmra.mrb[16].mxu0 %v3358_v57  ;;  %v4223_v57 = vld [vmem:[%s5156_s1 + $0x6e8] sm:$0xff]  }
  0xa4   :  { %2079 = vmatmul.mubr.bf16.vlgmr.msra.gmra.mrb[16].mxu1 %v3360_v60  ;;  %3855 = vmatpush3.bf16.msra.mxu0 %v4168_v0  ;;  %v4226_v60 = vld [vmem:[%s5156_s1 + $0x670] sm:$0xff]   ;;  %v4230_v0 = vld [vmem:[%s5156_s1 + $0x678] sm:$0xff]  }
  0xa5   :  { %3877 = vmatpush3.bf16.msra.mxu1 %v4169_v1  ;;  %3856 = vmatprep.subr.bf16.mxu0 %v4170_v2  ;;  %v4231_v1 = vld [vmem:[%s5156_s1 + $0x6f8] sm:$0xff]  }
  0xa6   :  { %3878 = vmatprep.subr.bf16.mxu1 %v4171_v3  ;;  %2118 = vmatprep.mubr.bf16.mxu0 %v3363_v33  ;;  %v4232_v2 = vld [vmem:[%s5156_s1 + $0x638] sm:$0xff]   ;;  %v4258_v33 = vld [vmem:[%s5156_s1 + $0x768] sm:$0xff]  }
  0xa7   :  { %2158 = vmatprep.mubr.bf16.mxu1 %v3365_v35  ;;  %v4233_v3 = vld [vmem:[%s5156_s1 + $0x6b8] sm:$0xff]  }
  0xa8   :  { %3857 = vmatpush3.bf16.msra.mxu0 %v4172_v4  ;;  %v3430_v4 = vld [vmem:[%s5157_s0 + $0x60] sm:$0xff] }
  0xa9   :  { %3879 = vmatpush3.bf16.msra.mxu1 %v4173_v5  ;;  %3858 = vmatprep.subr.bf16.mxu0 %v4174_v6  ;;  %v3431_v5 = vld [vmem:[%s5157_s0 + $0x68] sm:$0xff]  ;;  %v3562_v6 = vcombine.low %v3430_v4, %v3430_v4 }
  0xaa   :  { %3880 = vmatprep.subr.bf16.mxu1 %v4175_v7  ;;  %v3563_v7 = vcombine.high %v3430_v4, %v3430_v4 }
  0xac   :  { %3859 = vmatpush3.bf16.msra.mxu0 %v4176_v8  ;;  %v3564_v8 = vcombine.low %v3431_v5, %v3431_v5 }
  0xad   :  { %3881 = vmatpush3.bf16.msra.mxu1 %v4177_v9  ;;  %3860 = vmatprep.subr.bf16.mxu0 %v4178_v10  ;;  %v4238_v9 = vld [vmem:[%s5156_s1 + $0x740] sm:$0xff]   ;;  %v3565_v10 = vcombine.high %v3431_v5, %v3431_v5 }
  0xae   :  { %3882 = vmatprep.subr.bf16.mxu1 %v4179_v11  ;;  %v4239_v11 = vld [vmem:[%s5156_s1 + $0x7c0] sm:$0xff]  }
  0xb0   :  { %3861 = vmatpush3.bf16.msra.mxu0 %v4180_v12  ;;  %v4240_v12 = vld [vmem:[%s5156_s1 + $0x700] sm:$0xff]  }
  0xb1   :  { %3883 = vmatpush3.bf16.msra.mxu1 %v4181_v13  ;;  %3862 = vmatprep.subr.bf16.mxu0 %v4182_v14  ;;  %v4241_v13 = vld [vmem:[%s5156_s1 + $0x780] sm:$0xff]   ;;  %v4242_v14 = vld [vmem:[%s5156_s1 + $0x748] sm:$0xff]  }
  0xb2   :  { %3884 = vmatprep.subr.bf16.mxu1 %v4183_v15  ;;  %v4243_v15 = vld [vmem:[%s5156_s1 + $0x7c8] sm:$0xff]  }
  0xb4   :  { %3863 = vmatpush3.bf16.msra.mxu0 %v4184_v16  ;;  %v4244_v16 = vld [vmem:[%s5156_s1 + $0x708] sm:$0xff]  }
  0xb5   :  { %3885 = vmatpush3.bf16.msra.mxu1 %v4185_v17  ;;  %3864 = vmatprep.subr.bf16.mxu0 %v4186_v18  ;;  %v4245_v17 = vld [vmem:[%s5156_s1 + $0x788] sm:$0xff]   ;;  %v4246_v18 = vld [vmem:[%s5156_s1 + $0x750] sm:$0xff]  }
  0xb6   :  { %3886 = vmatprep.subr.bf16.mxu1 %v4187_v19  ;;  %v4247_v19 = vld [vmem:[%s5156_s1 + $0x7d0] sm:$0xff]  }
  0xb8   :  { %3865 = vmatpush3.bf16.msra.mxu0 %v4188_v20  ;;  %v4248_v20 = vld [vmem:[%s5156_s1 + $0x710] sm:$0xff]  }
  0xb9   :  { %3887 = vmatpush3.bf16.msra.mxu1 %v4189_v21  ;;  %3866 = vmatprep.subr.bf16.mxu0 %v4190_v22  ;;  %v4249_v21 = vld [vmem:[%s5156_s1 + $0x790] sm:$0xff]   ;;  %v4250_v22 = vld [vmem:[%s5156_s1 + $0x758] sm:$0xff]  }
  0xba   :  { %3888 = vmatprep.subr.bf16.mxu1 %v4191_v23  ;;  %v4251_v23 = vld [vmem:[%s5156_s1 + $0x7d8] sm:$0xff]  }
  0xbc   :  { %3867 = vmatpush3.bf16.msra.mxu0 %v4192_v24  ;;  %v4252_v24 = vld [vmem:[%s5156_s1 + $0x718] sm:$0xff]  }
  0xbd   :  { %3889 = vmatpush3.bf16.msra.mxu1 %v4193_v25  ;;  %3868 = vmatprep.subr.bf16.mxu0 %v4194_v26  ;;  %v4253_v25 = vld [vmem:[%s5156_s1 + $0x798] sm:$0xff]   ;;  %v4254_v26 = vld [vmem:[%s5156_s1 + $0x760] sm:$0xff]  }
  0xbe   :  { %3890 = vmatprep.subr.bf16.mxu1 %v4195_v27  ;;  %v4255_v27 = vld [vmem:[%s5156_s1 + $0x7e0] sm:$0xff]  }
  0xc0   :  { %3869 = vmatpush3.bf16.msra.mxu0 %v4196_v28  ;;  %v4256_v28 = vld [vmem:[%s5156_s1 + $0x720] sm:$0xff]  }
  0xc1   :  { %3891 = vmatpush3.bf16.msra.mxu1 %v4197_v29  ;;  %3898 = vmatprep.subr.bf16.mxu0 %v4202_v36  ;;  %v4259_v36 = vld [vmem:[%s5156_s1 + $0x7e8] sm:$0xff]  }
  0xc2   :  { %3920 = vmatprep.subr.bf16.mxu1 %v4203_v37 }
  0xc3   :  { %2119 = vmatmul.mubr.bf16.vlgmr.msra.gmra.mrb[20].mxu0 %v3362_v32 }
  0xc4   :  { %2159 = vmatmul.mubr.bf16.vlgmr.msra.gmra.mrb[20].mxu1 %v3364_v34  ;;  %3899 = vmatpush3.bf16.msra.mxu0 %v4204_v38 }
  0xc5   :  { %3921 = vmatpush3.bf16.msra.mxu1 %v4205_v39  ;;  %3900 = vmatprep.subr.bf16.mxu0 %v4206_v40  ;;  %v4260_v40 = vld [vmem:[%s5156_s1 + $0x728] sm:$0xff]  }
  0xc6   :  { %3922 = vmatprep.subr.bf16.mxu1 %v4207_v41  ;;  %2760 = vmatprep.mubr.bf16.mxu0 %v3563_v7 }
  0xc7   :  { %2800 = vmatprep.mubr.bf16.mxu1 %v3565_v10 }
  0xc8   :  { %3901 = vmatpush3.bf16.msra.mxu0 %v4208_v42 }
  0xc9   :  { %3923 = vmatpush3.bf16.msra.mxu1 %v4209_v43  ;;  %3902 = vmatprep.subr.bf16.mxu0 %v4210_v44  ;;  %v4261_v43 = vld [vmem:[%s5156_s1 + $0x7a8] sm:$0xff]  }
  0xca   :  { %3924 = vmatprep.subr.bf16.mxu1 %v4211_v45  ;;  %v4262_v45 = vld [vmem:[%s5156_s1 + $0x770] sm:$0xff]  }
  0xcc   :  { %3903 = vmatpush3.bf16.msra.mxu0 %v4212_v46  ;;  %v4263_v46 = vld [vmem:[%s5156_s1 + $0x7f0] sm:$0xff]  }
  0xcd   :  { %3925 = vmatpush3.bf16.msra.mxu1 %v4213_v47  ;;  %3904 = vmatprep.subr.bf16.mxu0 %v4214_v48  ;;  %v4264_v47 = vld [vmem:[%s5156_s1 + $0x730] sm:$0xff]  }
  0xce   :  { %3926 = vmatprep.subr.bf16.mxu1 %v4215_v49  ;;  %v4265_v48 = vld [vmem:[%s5156_s1 + $0x7b0] sm:$0xff]   ;;  %v4266_v49 = vld [vmem:[%s5156_s1 + $0x778] sm:$0xff]  }
  0xd0   :  { %3905 = vmatpush3.bf16.msra.mxu0 %v4216_v50  ;;  %v4267_v50 = vld [vmem:[%s5156_s1 + $0x7f8] sm:$0xff]  }
  0xd1   :  { %3927 = vmatpush3.bf16.msra.mxu1 %v4217_v51  ;;  %3906 = vmatprep.subr.bf16.mxu0 %v4218_v52  ;;  %v4268_v51 = vld [vmem:[%s5156_s1 + $0x738] sm:$0xff]  }
  0xd2   :  { %3928 = vmatprep.subr.bf16.mxu1 %v4219_v53  ;;  %v4269_v52 = vld [vmem:[%s5156_s1 + $0x7b8] sm:$0xff]   ;;  %v3432_v53 = vld [vmem:[%s5157_s0 + $0x70] sm:$0xff] }
  0xd4   :  { %3907 = vmatpush3.bf16.msra.mxu0 %v4220_v54  ;;  %v3433_v54 = vld [vmem:[%s5157_s0 + $0x78] sm:$0xff] }
  0xd5   :  { %3929 = vmatpush3.bf16.msra.mxu1 %v4221_v55  ;;  %3908 = vmatprep.subr.bf16.mxu0 %v4222_v56  ;;  %v3566_v55 = vcombine.low %v3432_v53, %v3432_v53  ;;  %v3567_v56 = vcombine.high %v3432_v53, %v3432_v53 }
  0xd6   :  { %3930 = vmatprep.subr.bf16.mxu1 %v4223_v57  ;;  %v3568_v57 = vcombine.low %v3433_v54, %v3433_v54 }
  0xd8   :  { %3909 = vmatpush3.bf16.msra.mxu0 %v4224_v58  ;;  %v3569_v58 = vcombine.high %v3433_v54, %v3433_v54 }
  0xd9   :  { %3931 = vmatpush3.bf16.msra.mxu1 %v4225_v59  ;;  %3910 = vmatprep.subr.bf16.mxu0 %v4226_v60 }
  0xda   :  { %3932 = vmatprep.subr.bf16.mxu1 %v4227_v61 }
  0xdc   :  { %3911 = vmatpush3.bf16.msra.mxu0 %v4228_v62 }
  0xdd   :  { %3933 = vmatpush3.bf16.msra.mxu1 %v4229_v63  ;;  %3912 = vmatprep.subr.bf16.mxu0 %v4230_v0 }
  0xde   :  { %3934 = vmatprep.subr.bf16.mxu1 %v4231_v1 }
  0xe0   :  { %3913 = vmatpush3.bf16.msra.mxu0 %v4232_v2 }
  0xe1   :  { %3935 = vmatpush3.bf16.msra.mxu1 %v4233_v3  ;;  %3942 = vmatprep.subr.bf16.mxu0 %v4238_v9 }
  0xe2   :  { %3964 = vmatprep.subr.bf16.mxu1 %v4239_v11 }
  0xe3   :  { %2761 = vmatmul.mubr.bf16.vlgmr.msra.gmra.mrb[24].mxu0 %v3562_v6 }
  0xe4   :  { %2801 = vmatmul.mubr.bf16.vlgmr.msra.gmra.mrb[24].mxu1 %v3564_v8  ;;  %3943 = vmatpush3.bf16.msra.mxu0 %v4240_v12 }
  0xe5   :  { %3965 = vmatpush3.bf16.msra.mxu1 %v4241_v13  ;;  %3944 = vmatprep.subr.bf16.mxu0 %v4242_v14 }
  0xe6   :  { %3966 = vmatprep.subr.bf16.mxu1 %v4243_v15  ;;  %2840 = vmatprep.mubr.bf16.mxu0 %v3567_v56 }
  0xe7   :  { %2880 = vmatprep.mubr.bf16.mxu1 %v3569_v58 }
  0xe8   :  { %3945 = vmatpush3.bf16.msra.mxu0 %v4244_v16 }
  0xe9   :  { %3967 = vmatpush3.bf16.msra.mxu1 %v4245_v17  ;;  %3946 = vmatprep.subr.bf16.mxu0 %v4246_v18 }
  0xea   :  { %3968 = vmatprep.subr.bf16.mxu1 %v4247_v19 }
  0xec   :  { %3947 = vmatpush3.bf16.msra.mxu0 %v4248_v20 }
  0xed   :  { %3969 = vmatpush3.bf16.msra.mxu1 %v4249_v21  ;;  %3948 = vmatprep.subr.bf16.mxu0 %v4250_v22 }
  0xee   :  { %3970 = vmatprep.subr.bf16.mxu1 %v4251_v23 }
  0xf0   :  { %3949 = vmatpush3.bf16.msra.mxu0 %v4252_v24 }
  0xf1   :  { %3971 = vmatpush3.bf16.msra.mxu1 %v4253_v25  ;;  %3950 = vmatprep.subr.bf16.mxu0 %v4254_v26 }
  0xf2   :  { %3972 = vmatprep.subr.bf16.mxu1 %v4255_v27 }
  0xf4   :  { %3951 = vmatpush3.bf16.msra.mxu0 %v4256_v28 }
  0xf5   :  { %3973 = vmatpush3.bf16.msra.mxu1 %v4257_v30  ;;  %3952 = vmatprep.subr.bf16.mxu0 %v4258_v33 }
  0xf6   :  { %v3650_v29 = vpop.f32.mrb[0].mxu0  ;;  %3974 = vmatprep.subr.bf16.mxu1 %v4259_v36 }
  0xf7   :  { %v3672_v31 = vpop.f32.mrb[0].mxu1  ;;  %v3651_v32 = vpop.f32.mrb[1].mxu0 }
  0xf8   :  { %v3652_v34 = vadd.f32 %v3651_v32, %v3650_v29  ;;  %v3673_v35 = vpop.f32.mrb[1].mxu1  ;;  %v3653_v38 = vpop.f32.mrb[2].mxu0  ;;  %3953 = vmatpush3.bf16.msra.mxu0 %v4260_v40 }
  0xf9   :  { %v3674_v37 = vadd.f32 %v3673_v35, %v3672_v31  ;;  %v3675_v39 = vpop.f32.mrb[2].mxu1  ;;  %v3654_v41 = vpop.f32.mrb[3].mxu0  ;;  %3975 = vmatpush3.bf16.msra.mxu1 %v4261_v43  ;;  %3954 = vmatprep.subr.bf16.mxu0 %v4262_v45 }
  0xfa   :  { %v3676_v44 = vpop.f32.mrb[3].mxu1  ;;  %3976 = vmatprep.subr.bf16.mxu1 %v4263_v46 }
  0xfb   :  { %v637_v42 = vadd.f32 %v3674_v37, %v3652_v34 }
  0xfc   :  { %3955 = vmatpush3.bf16.msra.mxu0 %v4264_v47 }
  0xfd   :  { %3977 = vmatpush3.bf16.msra.mxu1 %v4265_v48  ;;  %3956 = vmatprep.subr.bf16.mxu0 %v4266_v49 }
  0xfe   :  { %3978 = vmatprep.subr.bf16.mxu1 %v4267_v50 }
 0x100   :  { %3957 = vmatpush3.bf16.msra.mxu0 %v4268_v51 }
 0x101   :  { %3979 = vmatpush3.bf16.msra.mxu1 %v4269_v52 }
 0x103   :  { %2841 = vmatmul.mubr.bf16.vlgmr.msra.gmra.mrb[28].mxu0 %v3566_v55 }
 0x104   :  { %2881 = vmatmul.mubr.bf16.vlgmr.msra.gmra.mrb[28].mxu1 %v3568_v57 }
 0x116   :  { %v3694_v59 = vpop.f32.mrb[4].mxu0 }
 0x117   :  { %v3716_v60 = vpop.f32.mrb[4].mxu1  ;;  %v3695_v61 = vpop.f32.mrb[5].mxu0 }
 0x118   :  { %v3717_v62 = vpop.f32.mrb[5].mxu1  ;;  %v3696_v63 = vadd.f32 %v3695_v61, %v3694_v59  ;;  %v3697_v1 = vpop.f32.mrb[6].mxu0 }
 0x119   :  { %v3718_v0 = vadd.f32 %v3717_v62, %v3716_v60  ;;  %v3719_v2 = vpop.f32.mrb[6].mxu1  ;;  %v3698_v3 = vpop.f32.mrb[7].mxu0 }
 0x11a   :  { %v3720_v4 = vpop.f32.mrb[7].mxu1  ;;  %v677_v5 = vadd.f32 %v3696_v63, %v637_v42 }
 0x11c   :  { %v5117_v6 = vadd.f32 %v3718_v0, %v677_v5 }
 0x11e   :  { %v730_v18 = vmul.f32 %v5117_v6, %v5117_v6  ;;  %v723_v19 = vrot.slane %v5117_v6, 4 }
 0x120   :  { %v731_v20 = vrot.slane %v730_v18, 4  ;;  %v724_v24 = vadd.f32 %v723_v19, %v5117_v6 }
 0x122   :  { %v732_v31 = vadd.f32 %v731_v20, %v730_v18  ;;  %v725_v34 = vrot.slane %v724_v24, 2 }
 0x124   :  { %v733_v36 = vrot.slane %v732_v31, 2  ;;  %v726_v39 = vadd.f32 %v725_v34, %v724_v24 }
 0x126   :  { %v734_v42 = vadd.f32 %v733_v36, %v732_v31  ;;  %v727_v45 = vrot.slane %v726_v39, 1 }
 0x128   :  { %v735_v48 = vrot.slane %v734_v42, 1  ;;  %v728_v51 = vadd.f32 %v727_v45, %v726_v39 }
 0x12a   :  { %v736_v54 = vadd.f32 %v735_v48, %v734_v42 }
 0x136   :  { %v3738_v7 = vpop.f32.mrb[8].mxu0 }
 0x137   :  { %v3760_v8 = vpop.f32.mrb[8].mxu1  ;;  %v3739_v9 = vpop.f32.mrb[9].mxu0 }
 0x138   :  { %v3740_v10 = vadd.f32 %v3739_v9, %v3738_v7  ;;  %v3761_v11 = vpop.f32.mrb[9].mxu1  ;;  %v3741_v12 = vpop.f32.mrb[10].mxu0 }
 0x139   :  { %v3762_v13 = vadd.f32 %v3761_v11, %v3760_v8  ;;  %v3763_v14 = vpop.f32.mrb[10].mxu1  ;;  %v3742_v15 = vpop.f32.mrb[11].mxu0 }
 0x13a   :  { %v3764_v16 = vpop.f32.mrb[11].mxu1 }
 0x13b   :  { %v1359_v17 = vadd.f32 %v3762_v13, %v3740_v10 }
 0x156   :  { %v3782_v21 = vpop.f32.mrb[12].mxu0 }
 0x157   :  { %v3804_v22 = vpop.f32.mrb[12].mxu1  ;;  %v3783_v23 = vpop.f32.mrb[13].mxu0 }
 0x158   :  { %v3784_v25 = vadd.f32 %v3783_v23, %v3782_v21  ;;  %v3805_v26 = vpop.f32.mrb[13].mxu1  ;;  %v3785_v27 = vpop.f32.mrb[14].mxu0 }
 0x159   :  { %v3806_v28 = vadd.f32 %v3805_v26, %v3804_v22  ;;  %v3807_v29 = vpop.f32.mrb[14].mxu1  ;;  %v3786_v30 = vpop.f32.mrb[15].mxu0 }
 0x15a   :  { %v1399_v32 = vadd.f32 %v3784_v25, %v1359_v17  ;;  %v3808_v33 = vpop.f32.mrb[15].mxu1 }
 0x15c   :  { %v5123_v35 = vadd.f32 %v3806_v28, %v1399_v32 }
 0x15e   :  { %v1445_v37 = vrot.slane %v5123_v35, 4  ;;  %v1452_v38 = vmul.f32 %v5123_v35, %v5123_v35 }
 0x160   :  { %v1446_v40 = vadd.f32 %v1445_v37, %v5123_v35  ;;  %v1453_v41 = vrot.slane %v1452_v38, 4 }
 0x162   :  { %v1447_v43 = vrot.slane %v1446_v40, 2  ;;  %v1454_v44 = vadd.f32 %v1453_v41, %v1452_v38 }
 0x164   :  { %v1448_v46 = vadd.f32 %v1447_v43, %v1446_v40  ;;  %v1455_v47 = vrot.slane %v1454_v44, 2 }
 0x166   :  { %v1449_v49 = vrot.slane %v1448_v46, 1  ;;  %v1456_v50 = vadd.f32 %v1455_v47, %v1454_v44 }
 0x168   :  { %v1450_v52 = vadd.f32 %v1449_v49, %v1448_v46  ;;  %v1457_v53 = vrot.slane %v1456_v50, 1 }
 0x16a   :  { %v1451_v55 = vadd.f32 %v1450_v52, %v728_v51  ;;  %v1458_v56 = vadd.f32 %v1457_v53, %v1456_v50 }
 0x16c   :  { %v1459_v57 = vadd.f32 %v1458_v56, %v736_v54 }
 0x176   :  { %v3826_v58 = vpop.f32.mrb[16].mxu0 }
 0x177   :  { %v3848_v59 = vpop.f32.mrb[16].mxu1  ;;  %v3827_v60 = vpop.f32.mrb[17].mxu0 }
 0x178   :  { %v3849_v61 = vpop.f32.mrb[17].mxu1  ;;  %v3828_v62 = vadd.f32 %v3827_v60, %v3826_v58  ;;  %v3829_v0 = vpop.f32.mrb[18].mxu0 }
 0x179   :  { %v3850_v63 = vadd.f32 %v3849_v61, %v3848_v59  ;;  %v3851_v1 = vpop.f32.mrb[18].mxu1  ;;  %v3830_v2 = vpop.f32.mrb[19].mxu0 }
 0x17a   :  { %v3852_v3 = vpop.f32.mrb[19].mxu1 }
 0x17b   :  { %v2081_v4 = vadd.f32 %v3850_v63, %v3828_v62 }
 0x196   :  { %v3870_v5 = vpop.f32.mrb[20].mxu0 }
 0x197   :  { %v3892_v7 = vpop.f32.mrb[20].mxu1  ;;  %v3871_v8 = vpop.f32.mrb[21].mxu0 }
 0x198   :  { %v3872_v9 = vadd.f32 %v3871_v8, %v3870_v5  ;;  %v3893_v10 = vpop.f32.mrb[21].mxu1  ;;  %v3873_v11 = vpop.f32.mrb[22].mxu0 }
 0x199   :  { %v3894_v12 = vadd.f32 %v3893_v10, %v3892_v7  ;;  %v3895_v13 = vpop.f32.mrb[22].mxu1  ;;  %v3874_v14 = vpop.f32.mrb[23].mxu0 }
 0x19a   :  { %v2121_v15 = vadd.f32 %v3872_v9, %v2081_v4  ;;  %v3896_v16 = vpop.f32.mrb[23].mxu1  ;;  %v2920_v14 = vlaneseq }
 0x19b   :  { %v2911_v16 = vld [vmem:[%s5158_s2] sm:$0x1] }
 0x19c   :  { %v5129_v17 = vadd.f32 %v3894_v12, %v2121_v15  ;;  %v2921_v15 = vshrl.u32 %v2920_v14, 7 }
 0x19e   :  { %v2167_v18 = vrot.slane %v5129_v17, 4  ;;  %v2174_v19 = vmul.f32 %v5129_v17, %v5129_v17 }
 0x1a0   :  { %v2168_v20 = vadd.f32 %v2167_v18, %v5129_v17  ;;  %v2175_v21 = vrot.slane %v2174_v19, 4  ;;  %v2922_v18 = vsub.s32 0, %v2921_v15 }
 0x1a2   :  { %v2169_v22 = vrot.slane %v2168_v20, 2  ;;  %v2176_v23 = vadd.f32 %v2175_v21, %v2174_v19  ;;  %v2913_v21 = vld [vmem:[%s5159_s3] sm:$0x1] }
 0x1a4   :  { %v2170_v24 = vadd.f32 %v2169_v22, %v2168_v20  ;;  %v2177_v25 = vrot.slane %v2176_v23, 2 }
 0x1a6   :  { %v2171_v26 = vrot.slane %v2170_v24, 1  ;;  %v2178_v27 = vadd.f32 %v2177_v25, %v2176_v23 }
 0x1a8   :  { %v2172_v28 = vadd.f32 %v2171_v26, %v2170_v24  ;;  %v2179_v29 = vrot.slane %v2178_v27, 1 }
 0x1aa   :  { %v2173_v30 = vadd.f32 %v2172_v28, %v1451_v55  ;;  %v2180_v31 = vadd.f32 %v2179_v29, %v2178_v27 }
 0x1ac   :  { %v2181_v32 = vadd.f32 %v2180_v31, %v1459_v57 }
 0x1b6   :  { %v3914_v33 = vpop.f32.mrb[24].mxu0 }
 0x1b7   :  { %v3936_v34 = vpop.f32.mrb[24].mxu1  ;;  %v3915_v36 = vpop.f32.mrb[25].mxu0 }
 0x1b8   :  { %v3916_v37 = vadd.f32 %v3915_v36, %v3914_v33  ;;  %v3937_v38 = vpop.f32.mrb[25].mxu1  ;;  %v3917_v39 = vpop.f32.mrb[26].mxu0 }
 0x1b9   :  { %v3938_v40 = vadd.f32 %v3937_v38, %v3936_v34  ;;  %v3939_v41 = vpop.f32.mrb[26].mxu1  ;;  %v3918_v42 = vpop.f32.mrb[27].mxu0 }
 0x1ba   :  { %v3940_v43 = vpop.f32.mrb[27].mxu1 }
 0x1bb   :  { %v2803_v44 = vadd.f32 %v3938_v40, %v3916_v37 }
 0x1d6   :  { %v3958_v45 = vpop.f32.mrb[28].mxu0 }
 0x1d7   :  { %v3980_v46 = vpop.f32.mrb[28].mxu1  ;;  %v3959_v47 = vpop.f32.mrb[29].mxu0 }
 0x1d8   :  { %v3960_v48 = vadd.f32 %v3959_v47, %v3958_v45  ;;  %v3981_v49 = vpop.f32.mrb[29].mxu1  ;;  %v3961_v50 = vpop.f32.mrb[30].mxu0 }
 0x1d9   :  { %v3982_v51 = vadd.f32 %v3981_v49, %v3980_v46  ;;  %v3983_v52 = vpop.f32.mrb[30].mxu1  ;;  %v3962_v53 = vpop.f32.mrb[31].mxu0 }
 0x1da   :  { %v2843_v54 = vadd.f32 %v3960_v48, %v2803_v44  ;;  %v3984_v55 = vpop.f32.mrb[31].mxu1 }
 0x1dc   :  { %v2883_v56 = vadd.f32 %v3982_v51, %v2843_v54 }
 0x1de   :  { %v2889_v57 = vrot.slane %v2883_v56, 4  ;;  %v2896_v58 = vmul.f32 %v2883_v56, %v2883_v56 }
 0x1e0   :  { %v2890_v59 = vadd.f32 %v2889_v57, %v2883_v56  ;;  %v2897_v60 = vrot.slane %v2896_v58, 4 }
 0x1e2   :  { %v2891_v61 = vrot.slane %v2890_v59, 2  ;;  %v2898_v62 = vadd.f32 %v2897_v60, %v2896_v58 }
 0x1e4   :  { %v2892_v63 = vadd.f32 %v2891_v61, %v2890_v59  ;;  %v2899_v0 = vrot.slane %v2898_v62, 2 }
 0x1e6   :  { %v2893_v1 = vrot.slane %v2892_v63, 1  ;;  %v2900_v2 = vadd.f32 %v2899_v0, %v2898_v62 }
 0x1e8   :  { %v2894_v3 = vadd.f32 %v2893_v1, %v2892_v63  ;;  %v2901_v4 = vrot.slane %v2900_v2, 1 }
 0x1ea   :  { %v2895_v5 = vadd.f32 %v2894_v3, %v2173_v30  ;;  %v2902_v7 = vadd.f32 %v2901_v4, %v2900_v2 }
 0x1ec   :  { %v2903_v8 = vadd.f32 %v2902_v7, %v2181_v32  ;;  %v2905_v9 = vmul.f32 0.03125, %v2895_v5 }
 0x1ee   :  { %v2906_v10 = vmul.f32 0.03125, %v2903_v8  ;;  %v2907_v11 = vmul.f32 %v2905_v9, %v2905_v9 }
 0x1f0   :  { %v2908_v12 = vsub.f32 %v2906_v10, %v2907_v11 }
 0x1f2   :  { %v2909_v13 = vadd.f32 1e-05, %v2908_v12 }
 0x1f4   :  { %4274 = vrsqrt.f32 %v2909_v13 }
 0x1fe   :  { %v4275_v19 = vpop.eup %4274 }
 0x1ff   :  { %v2912_v20 = vmul.f32 %v4275_v19, %v2911_v16 }
 0x201   :  { %v2914_v22 = vmul.f32 %v2912_v20, %v2905_v9  ;;  %v2923_v23 = vrot.slane %v2912_v20, %v2922_v18 }
 0x203   :  { %v2915_v24 = vsub.f32 %v2913_v21, %v2914_v22  ;;  %v2924_v25 = vmul.f32 %v2923_v23, %v5117_v6  ;;  %v2925_v26 = vmul.f32 %v2923_v23, %v5123_v35  ;;  %v2926_v27 = vmul.f32 %v2923_v23, %v5129_v17 }
 0x204   :  { %v2927_v28 = vmul.f32 %v2923_v23, %v2883_v56 }
 0x205   :  { %v2932_v29 = vrot.slane %v2915_v24, %v2922_v18 }
 0x207   :  { %v2934_v30 = vadd.f32 %v2932_v29, %v2924_v25  ;;  %v2935_v31 = vadd.f32 %v2932_v29, %v2925_v26  ;;  %v2936_v32 = vadd.f32 %v2932_v29, %v2926_v27  ;;  %v2937_v33 = vadd.f32 %v2932_v29, %v2927_v28 }
 0x209   :  { %v2938_v34 = vmax.f32 %v2934_v30, 0.0  ;;  %v2939_v36 = vmax.f32 %v2935_v31, 0.0  ;;  %v2940_v37 = vmax.f32 %v2936_v32, 0.0  ;;  %v2941_v38 = vmax.f32 %v2937_v33, 0.0 }
 0x20b   :  { %2942 = vst [vmem:[%s5160_s4] sm:$0xff] %v2938_v34  ;;  %2943 = vst [vmem:[%s5160_s4 + $0x8] sm:$0xff] %v2939_v36 }
 0x20c   :  { %2944 = vst [vmem:[%s5160_s4 + $0x10] sm:$0xff] %v2940_v37  ;;  %2945 = vst [vmem:[%s5160_s4 + $0x18] sm:$0xff] %v2941_v38 }

// kernel: generator_forward.8
= control target key start
LH: loop header
LB: loop body
LE: loop exit
PB: predicated region body
PF: predicated region fallthrough
CT: control target
= control target key end

     0   :  { %vm420_vm0 = vcmask 523264   ;;  %s3392_s1 = inlined_call_operand.vmem [shape: bf16[4,512,64], index: 1, kind: input, shape index: {}]   ;;  %s3393_s0 = inlined_call_operand.vmem [shape: bf16[4,32,512], index: 0, kind: input, shape index: {}]   ;;  %s3394_s4 = inlined_call_operand.vmem [shape: f32[128,64], index: 4, kind: output, shape index: {}]   ;;  %s3395_s2 = inlined_call_operand.vmem [shape: f32[1,64], index: 2, kind: input, shape index: {}]   ;;  %s3396_s3 = inlined_call_operand.vmem [shape: f32[1,64], index: 3, kind: input, shape index: {}]  }
   0x1   :  { %v2483_v0 = vld [vmem:[%s3392_s1 + $0x40] sm:$0xff]   ;;  %v2487_v4 = vld [vmem:[%s3392_s1 + $0x48] sm:$0xff]   ;;  %v2491_v8 = vld [vmem:[%s3392_s1 + $0x50] sm:$0xff]  }
   0x2   :  { %v2484_v1 = vld [vmem:[%s3392_s1 + $0xc0] sm:$0xff]   ;;  %2259 = vmatprep.subr.bf16.mxu0 %v2483_v0  ;;  %v2488_v5 = vld [vmem:[%s3392_s1 + $0xc8] sm:$0xff]   ;;  %v2492_v9 = vld [vmem:[%s3392_s1 + $0xd0] sm:$0xff]  }
   0x3   :  { %v2485_v2 = vld [vmem:[%s3392_s1] sm:$0xff]   ;;  %2287 = vmatprep.subr.bf16.mxu1 %v2484_v1  ;;  %v2489_v6 = vld [vmem:[%s3392_s1 + $0x8] sm:$0xff]   ;;  %v2493_v10 = vld [vmem:[%s3392_s1 + $0x10] sm:$0xff]  }
   0x4   :  { %v2486_v3 = vld [vmem:[%s3392_s1 + $0x80] sm:$0xff]   ;;  %2260 = vmatpush3.bf16.msra.mxu0 %v2485_v2  ;;  %v2490_v7 = vld [vmem:[%s3392_s1 + $0x88] sm:$0xff]   ;;  %v2494_v11 = vld [vmem:[%s3392_s1 + $0x90] sm:$0xff]  }
   0x5   :  { %2288 = vmatpush3.bf16.msra.mxu1 %v2486_v3  ;;  %2261 = vmatprep.subr.bf16.mxu0 %v2487_v4  ;;  %v2495_v12 = vld [vmem:[%s3392_s1 + $0x58] sm:$0xff]   ;;  %v2499_v16 = vld [vmem:[%s3392_s1 + $0x60] sm:$0xff]   ;;  %v2503_v20 = vld [vmem:[%s3392_s1 + $0x68] sm:$0xff]  }
   0x6   :  { %2289 = vmatprep.subr.bf16.mxu1 %v2488_v5  ;;  %v2496_v13 = vld [vmem:[%s3392_s1 + $0xd8] sm:$0xff]   ;;  %v2500_v17 = vld [vmem:[%s3392_s1 + $0xe0] sm:$0xff]   ;;  %v2504_v21 = vld [vmem:[%s3392_s1 + $0xe8] sm:$0xff]  }
   0x7   :  { %v2497_v14 = vld [vmem:[%s3392_s1 + $0x18] sm:$0xff]   ;;  %v2501_v18 = vld [vmem:[%s3392_s1 + $0x20] sm:$0xff]   ;;  %v2505_v22 = vld [vmem:[%s3392_s1 + $0x28] sm:$0xff]  }
   0x8   :  { %2262 = vmatpush3.bf16.msra.mxu0 %v2489_v6  ;;  %v2498_v15 = vld [vmem:[%s3392_s1 + $0x98] sm:$0xff]   ;;  %v2502_v19 = vld [vmem:[%s3392_s1 + $0xa0] sm:$0xff]   ;;  %v2506_v23 = vld [vmem:[%s3392_s1 + $0xa8] sm:$0xff]  }
   0x9   :  { %2290 = vmatpush3.bf16.msra.mxu1 %v2490_v7  ;;  %2263 = vmatprep.subr.bf16.mxu0 %v2491_v8  ;;  %v2507_v24 = vld [vmem:[%s3392_s1 + $0x70] sm:$0xff]   ;;  %v2511_v28 = vld [vmem:[%s3392_s1 + $0x78] sm:$0xff]   ;;  %v2521_v36 = vld [vmem:[%s3392_s1 + $0x140] sm:$0xff]  }
   0xa   :  { %2291 = vmatprep.subr.bf16.mxu1 %v2492_v9  ;;  %v2508_v25 = vld [vmem:[%s3392_s1 + $0xf0] sm:$0xff]   ;;  %v2512_v29 = vld [vmem:[%s3392_s1 + $0xf8] sm:$0xff]   ;;  %v2522_v37 = vld [vmem:[%s3392_s1 + $0x1c0] sm:$0xff]  }
   0xb   :  { %v2509_v26 = vld [vmem:[%s3392_s1 + $0x30] sm:$0xff]   ;;  %v2513_v30 = vld [vmem:[%s3392_s1 + $0x38] sm:$0xff]   ;;  %v2523_v38 = vld [vmem:[%s3392_s1 + $0x100] sm:$0xff]  }
   0xc   :  { %2264 = vmatpush3.bf16.msra.mxu0 %v2493_v10  ;;  %v2510_v27 = vld [vmem:[%s3392_s1 + $0xb0] sm:$0xff]   ;;  %v2514_v31 = vld [vmem:[%s3392_s1 + $0xb8] sm:$0xff]   ;;  %v2524_v39 = vld [vmem:[%s3392_s1 + $0x180] sm:$0xff]  }
   0xd   :  { %2292 = vmatpush3.bf16.msra.mxu1 %v2494_v11  ;;  %2265 = vmatprep.subr.bf16.mxu0 %v2495_v12  ;;  %v2515_v32 = vld [vmem:[%s3393_s0] ss:$16 sps:$4 sm:$0xff]   ;;  %v2517_v33 = vld [vmem:[%s3393_s0 + $0x4] ss:$16 sps:$4 sm:$0xff]   ;;  %v2518_v34 = vld [vmem:[%s3393_s0 + $0x8] ss:$16 sps:$4 sm:$0xff]  }
   0xe   :  { %2293 = vmatprep.subr.bf16.mxu1 %v2496_v13  ;;  %v2520_v35 = vld [vmem:[%s3393_s0 + $0xc] ss:$16 sps:$4 sm:$0xff]   ;;  %354 = vmatprep.mubr.bf16.mxu0 %v2517_v33  ;;  %v2529_v44 = vld [vmem:[%s3393_s0 + $0x24] ss:$16 sps:$4 sm:$0xff]   ;;  %v2533_v46 = vld [vmem:[%s3393_s0 + $0x20] ss:$16 sps:$4 sm:$0xff]  }
   0xf   :  { %403 = vmatprep.mubr.bf16.mxu1 %v2520_v35  ;;  %v2525_v40 = vld [vmem:[%s3392_s1 + $0x148] sm:$0xff]   ;;  %v2535_v48 = vld [vmem:[%s3392_s1 + $0x150] sm:$0xff]   ;;  %v2539_v52 = vld [vmem:[%s3392_s1 + $0x158] sm:$0xff]  }
  0x10   :  { %2266 = vmatpush3.bf16.msra.mxu0 %v2497_v14  ;;  %v2526_v41 = vld [vmem:[%s3392_s1 + $0x1c8] sm:$0xff]   ;;  %v2536_v49 = vld [vmem:[%s3392_s1 + $0x1d0] sm:$0xff]   ;;  %v2540_v53 = vld [vmem:[%s3392_s1 + $0x1d8] sm:$0xff]  }
  0x11   :  { %2294 = vmatpush3.bf16.msra.mxu1 %v2498_v15  ;;  %2267 = vmatprep.subr.bf16.mxu0 %v2499_v16  ;;  %v2527_v42 = vld [vmem:[%s3392_s1 + $0x108] sm:$0xff]   ;;  %v2537_v50 = vld [vmem:[%s3392_s1 + $0x110] sm:$0xff]   ;;  %v2541_v54 = vld [vmem:[%s3392_s1 + $0x118] sm:$0xff]  }
  0x12   :  { %2295 = vmatprep.subr.bf16.mxu1 %v2500_v17  ;;  %v2528_v43 = vld [vmem:[%s3392_s1 + $0x188] sm:$0xff]   ;;  %v2538_v51 = vld [vmem:[%s3392_s1 + $0x190] sm:$0xff]   ;;  %v2542_v55 = vld [vmem:[%s3392_s1 + $0x198] sm:$0xff]  }
  0x13   :  { %v2531_v45 = vld [vmem:[%s3393_s0 + $0x2c] ss:$16 sps:$4 sm:$0xff]   ;;  %v2534_v47 = vld [vmem:[%s3393_s0 + $0x28] ss:$16 sps:$4 sm:$0xff]   ;;  %v2543_v56 = vld [vmem:[%s3392_s1 + $0x160] sm:$0xff]  }
  0x14   :  { %2268 = vmatpush3.bf16.msra.mxu0 %v2501_v18  ;;  %v2544_v57 = vld [vmem:[%s3392_s1 + $0x1e0] sm:$0xff]   ;;  %v2547_v60 = vld [vmem:[%s3392_s1 + $0x168] sm:$0xff]   ;;  %v2551_v0 = vld [vmem:[%s3392_s1 + $0x170] sm:$0xff]  }
  0x15   :  { %2296 = vmatpush3.bf16.msra.mxu1 %v2502_v19  ;;  %2269 = vmatprep.subr.bf16.mxu0 %v2503_v20  ;;  %v2545_v58 = vld [vmem:[%s3392_s1 + $0x120] sm:$0xff]   ;;  %v2548_v61 = vld [vmem:[%s3392_s1 + $0x1e8] sm:$0xff]   ;;  %v2552_v1 = vld [vmem:[%s3392_s1 + $0x1f0] sm:$0xff]  }
  0x16   :  { %2297 = vmatprep.subr.bf16.mxu1 %v2504_v21  ;;  %v2546_v59 = vld [vmem:[%s3392_s1 + $0x1a0] sm:$0xff]   ;;  %v2549_v62 = vld [vmem:[%s3392_s1 + $0x128] sm:$0xff]   ;;  %v2553_v2 = vld [vmem:[%s3392_s1 + $0x130] sm:$0xff]  }
  0x17   :  { %v2550_v63 = vld [vmem:[%s3392_s1 + $0x1a8] sm:$0xff]   ;;  %v2554_v3 = vld [vmem:[%s3392_s1 + $0x1b0] sm:$0xff]   ;;  %v2555_v4 = vld [vmem:[%s3392_s1 + $0x178] sm:$0xff]  }
  0x18   :  { %2270 = vmatpush3.bf16.msra.mxu0 %v2505_v22  ;;  %v2556_v5 = vld [vmem:[%s3392_s1 + $0x1f8] sm:$0xff]   ;;  %v2559_v8 = vld [vmem:[%s3393_s0 + $0x40] ss:$16 sps:$4 sm:$0xff]   ;;  %v2561_v9 = vld [vmem:[%s3393_s0 + $0x44] ss:$16 sps:$4 sm:$0xff]  }
  0x19   :  { %2298 = vmatpush3.bf16.msra.mxu1 %v2506_v23  ;;  %2271 = vmatprep.subr.bf16.mxu0 %v2507_v24  ;;  %v2557_v6 = vld [vmem:[%s3392_s1 + $0x138] sm:$0xff]   ;;  %v2565_v12 = vld [vmem:[%s3392_s1 + $0x240] sm:$0xff]   ;;  %v2569_v16 = vld [vmem:[%s3392_s1 + $0x248] sm:$0xff]  }
  0x1a   :  { %2299 = vmatprep.subr.bf16.mxu1 %v2508_v25  ;;  %v2558_v7 = vld [vmem:[%s3392_s1 + $0x1b8] sm:$0xff]   ;;  %v2566_v13 = vld [vmem:[%s3392_s1 + $0x2c0] sm:$0xff]   ;;  %v2570_v17 = vld [vmem:[%s3392_s1 + $0x2c8] sm:$0xff]  }
  0x1b   :  { %v2562_v10 = vld [vmem:[%s3393_s0 + $0x48] ss:$16 sps:$4 sm:$0xff]   ;;  %v2564_v11 = vld [vmem:[%s3393_s0 + $0x4c] ss:$16 sps:$4 sm:$0xff]   ;;  %v2567_v14 = vld [vmem:[%s3392_s1 + $0x200] sm:$0xff]  }
  0x1c   :  { %2272 = vmatpush3.bf16.msra.mxu0 %v2509_v26  ;;  %v2568_v15 = vld [vmem:[%s3392_s1 + $0x280] sm:$0xff]   ;;  %v2571_v18 = vld [vmem:[%s3392_s1 + $0x208] sm:$0xff]   ;;  %v2579_v24 = vld [vmem:[%s3392_s1 + $0x250] sm:$0xff]  }
  0x1d   :  { %2300 = vmatpush3.bf16.msra.mxu1 %v2510_v27  ;;  %2273 = vmatprep.subr.bf16.mxu0 %v2511_v28  ;;  %v2572_v19 = vld [vmem:[%s3392_s1 + $0x288] sm:$0xff]   ;;  %v2573_v20 = vld [vmem:[%s3393_s0 + $0x64] ss:$16 sps:$4 sm:$0xff]   ;;  %v2577_v22 = vld [vmem:[%s3393_s0 + $0x60] ss:$16 sps:$4 sm:$0xff]  }
  0x1e   :  { %2301 = vmatprep.subr.bf16.mxu1 %v2512_v29  ;;  %v2575_v21 = vld [vmem:[%s3393_s0 + $0x6c] ss:$16 sps:$4 sm:$0xff]   ;;  %v2578_v23 = vld [vmem:[%s3393_s0 + $0x68] ss:$16 sps:$4 sm:$0xff]   ;;  %v2580_v25 = vld [vmem:[%s3392_s1 + $0x2d0] sm:$0xff]  }
  0x1f   :  { %v2581_v26 = vld [vmem:[%s3392_s1 + $0x210] sm:$0xff]   ;;  %v2583_v28 = vld [vmem:[%s3392_s1 + $0x258] sm:$0xff]   ;;  %v2588_v33 = vld [vmem:[%s3392_s1 + $0x2e0] sm:$0xff]  }
  0x20   :  { %2274 = vmatpush3.bf16.msra.mxu0 %v2513_v30  ;;  %v2582_v27 = vld [vmem:[%s3392_s1 + $0x290] sm:$0xff]   ;;  %v2584_v29 = vld [vmem:[%s3392_s1 + $0x2d8] sm:$0xff]   ;;  %v2590_v35 = vld [vmem:[%s3392_s1 + $0x2a0] sm:$0xff]  }
  0x21   :  { %2302 = vmatpush3.bf16.msra.mxu1 %v2514_v31  ;;  %2315 = vmatprep.subr.bf16.mxu0 %v2521_v36  ;;  %v2585_v30 = vld [vmem:[%s3392_s1 + $0x218] sm:$0xff]   ;;  %v2591_v36 = vld [vmem:[%s3392_s1 + $0x268] sm:$0xff]  }
  0x22   :  { %2343 = vmatprep.subr.bf16.mxu1 %v2522_v37  ;;  %v2586_v31 = vld [vmem:[%s3392_s1 + $0x298] sm:$0xff]   ;;  %v2592_v37 = vld [vmem:[%s3392_s1 + $0x2e8] sm:$0xff]  }
  0x23   :  { %355 = vmatmul.mubr.bf16.vlgmr.msra.gmra.mrb[0].mxu0 %v2515_v32  ;;  %v2587_v32 = vld [vmem:[%s3392_s1 + $0x260] sm:$0xff]  }
  0x24   :  { %404 = vmatmul.mubr.bf16.vlgmr.msra.gmra.mrb[0].mxu1 %v2518_v34  ;;  %2316 = vmatpush3.bf16.msra.mxu0 %v2523_v38  ;;  %v2589_v34 = vld [vmem:[%s3392_s1 + $0x220] sm:$0xff]   ;;  %v2593_v38 = vld [vmem:[%s3392_s1 + $0x228] sm:$0xff]  }
  0x25   :  { %2344 = vmatpush3.bf16.msra.mxu1 %v2524_v39  ;;  %2317 = vmatprep.subr.bf16.mxu0 %v2525_v40  ;;  %v2594_v39 = vld [vmem:[%s3392_s1 + $0x2a8] sm:$0xff]   ;;  %v2595_v40 = vld [vmem:[%s3392_s1 + $0x270] sm:$0xff]  }
  0x26   :  { %2345 = vmatprep.subr.bf16.mxu1 %v2526_v41  ;;  %362 = vmatprep.mubr.bf16.mxu0 %v2529_v44  ;;  %v2596_v41 = vld [vmem:[%s3392_s1 + $0x2f0] sm:$0xff]   ;;  %v2599_v44 = vld [vmem:[%s3392_s1 + $0x278] sm:$0xff]  }
  0x27   :  { %411 = vmatprep.mubr.bf16.mxu1 %v2531_v45  ;;  %v2600_v45 = vld [vmem:[%s3392_s1 + $0x2f8] sm:$0xff]  }
  0x28   :  { %2318 = vmatpush3.bf16.msra.mxu0 %v2527_v42  ;;  %v2597_v42 = vld [vmem:[%s3392_s1 + $0x230] sm:$0xff]  }
  0x29   :  { %2346 = vmatpush3.bf16.msra.mxu1 %v2528_v43  ;;  %2319 = vmatprep.subr.bf16.mxu0 %v2535_v48  ;;  %v2598_v43 = vld [vmem:[%s3392_s1 + $0x2b0] sm:$0xff]  }
  0x2a   :  { %2347 = vmatprep.subr.bf16.mxu1 %v2536_v49  ;;  %v2603_v48 = vld [vmem:[%s3393_s0 + $0x80] ss:$16 sps:$4 sm:$0xff]   ;;  %v2605_v49 = vld [vmem:[%s3393_s0 + $0x84] ss:$16 sps:$4 sm:$0xff]  }
  0x2b   :  { %363 = vmatmul.mubr.bf16.gmra.mrb[4].mxu0 %v2533_v46  ;;  %v2601_v46 = vld [vmem:[%s3392_s1 + $0x238] sm:$0xff]  }
  0x2c   :  { %412 = vmatmul.mubr.bf16.gmra.mrb[4].mxu1 %v2534_v47  ;;  %2320 = vmatpush3.bf16.msra.mxu0 %v2537_v50  ;;  %v2602_v47 = vld [vmem:[%s3392_s1 + $0x2b8] sm:$0xff]  }
  0x2d   :  { %2348 = vmatpush3.bf16.msra.mxu1 %v2538_v51  ;;  %2321 = vmatprep.subr.bf16.mxu0 %v2539_v52  ;;  %v2606_v50 = vld [vmem:[%s3393_s0 + $0x88] ss:$16 sps:$4 sm:$0xff]   ;;  %v2608_v51 = vld [vmem:[%s3393_s0 + $0x8c] ss:$16 sps:$4 sm:$0xff]   ;;  %v2609_v52 = vld [vmem:[%s3392_s1 + $0x340] sm:$0xff]  }
  0x2e   :  { %2349 = vmatprep.subr.bf16.mxu1 %v2540_v53  ;;  %795 = vmatprep.mubr.bf16.mxu0 %v2561_v9  ;;  %v2610_v53 = vld [vmem:[%s3392_s1 + $0x3c0] sm:$0xff]  }
  0x2f   :  { %844 = vmatprep.mubr.bf16.mxu1 %v2564_v11  ;;  %v2632_v9 = vld [vmem:[%s3392_s1 + $0x3e0] sm:$0xff]  }
  0x30   :  { %2322 = vmatpush3.bf16.msra.mxu0 %v2541_v54  ;;  %v2611_v54 = vld [vmem:[%s3392_s1 + $0x300] sm:$0xff]  }
  0x31   :  { %2350 = vmatpush3.bf16.msra.mxu1 %v2542_v55  ;;  %2323 = vmatprep.subr.bf16.mxu0 %v2543_v56  ;;  %v2612_v55 = vld [vmem:[%s3392_s1 + $0x380] sm:$0xff]   ;;  %v2613_v56 = vld [vmem:[%s3392_s1 + $0x348] sm:$0xff]  }
  0x32   :  { %2351 = vmatprep.subr.bf16.mxu1 %v2544_v57  ;;  %v2614_v57 = vld [vmem:[%s3392_s1 + $0x3c8] sm:$0xff]   ;;  %v2634_v11 = vld [vmem:[%s3392_s1 + $0x3a0] sm:$0xff]  }
  0x34   :  { %2324 = vmatpush3.bf16.msra.mxu0 %v2545_v58  ;;  %v2615_v58 = vld [vmem:[%s3392_s1 + $0x308] sm:$0xff]  }
  0x35   :  { %2352 = vmatpush3.bf16.msra.mxu1 %v2546_v59  ;;  %2325 = vmatprep.subr.bf16.mxu0 %v2547_v60  ;;  %v2616_v59 = vld [vmem:[%s3392_s1 + $0x388] sm:$0xff]   ;;  %v2617_v60 = vld [vmem:[%s3393_s0 + $0xa4] ss:$16 sps:$4 sm:$0xff]  }
  0x36   :  { %2353 = vmatprep.subr.bf16.mxu1 %v2548_v61  ;;  %v2619_v61 = vld [vmem:[%s3393_s0 + $0xac] ss:$16 sps:$4 sm:$0xff]  }
  0x38   :  { %2326 = vmatpush3.bf16.msra.mxu0 %v2549_v62  ;;  %v2621_v62 = vld [vmem:[%s3393_s0 + $0xa0] ss:$16 sps:$4 sm:$0xff]  }
  0x39   :  { %2354 = vmatpush3.bf16.msra.mxu1 %v2550_v63  ;;  %2327 = vmatprep.subr.bf16.mxu0 %v2551_v0  ;;  %v2622_v63 = vld [vmem:[%s3393_s0 + $0xa8] ss:$16 sps:$4 sm:$0xff]   ;;  %v2623_v0 = vld [vmem:[%s3392_s1 + $0x350] sm:$0xff]  }
  0x3a   :  { %2355 = vmatprep.subr.bf16.mxu1 %v2552_v1  ;;  %v2624_v1 = vld [vmem:[%s3392_s1 + $0x3d0] sm:$0xff]  }
  0x3c   :  { %2328 = vmatpush3.bf16.msra.mxu0 %v2553_v2  ;;  %v2625_v2 = vld [vmem:[%s3392_s1 + $0x310] sm:$0xff]  }
  0x3d   :  { %2356 = vmatpush3.bf16.msra.mxu1 %v2554_v3  ;;  %2329 = vmatprep.subr.bf16.mxu0 %v2555_v4  ;;  %v2626_v3 = vld [vmem:[%s3392_s1 + $0x390] sm:$0xff]   ;;  %v2627_v4 = vld [vmem:[%s3392_s1 + $0x358] sm:$0xff]  }
  0x3e   :  { %2357 = vmatprep.subr.bf16.mxu1 %v2556_v5  ;;  %v2628_v5 = vld [vmem:[%s3392_s1 + $0x3d8] sm:$0xff]  }
  0x40   :  { %2330 = vmatpush3.bf16.msra.mxu0 %v2557_v6  ;;  %v2629_v6 = vld [vmem:[%s3392_s1 + $0x318] sm:$0xff]  }
  0x41   :  { %2358 = vmatpush3.bf16.msra.mxu1 %v2558_v7  ;;  %2371 = vmatprep.subr.bf16.mxu0 %v2565_v12  ;;  %v2630_v7 = vld [vmem:[%s3392_s1 + $0x398] sm:$0xff]   ;;  %v2635_v12 = vld [vmem:[%s3392_s1 + $0x368] sm:$0xff]  }
  0x42   :  { %2399 = vmatprep.subr.bf16.mxu1 %v2566_v13  ;;  %v2636_v13 = vld [vmem:[%s3392_s1 + $0x3e8] sm:$0xff]  }
  0x43   :  { %796 = vmatmul.mubr.bf16.vlgmr.msra.gmra.mrb[8].mxu0 %v2559_v8  ;;  %v2631_v8 = vld [vmem:[%s3392_s1 + $0x360] sm:$0xff]  }
  0x44   :  { %845 = vmatmul.mubr.bf16.vlgmr.msra.gmra.mrb[8].mxu1 %v2562_v10  ;;  %2372 = vmatpush3.bf16.msra.mxu0 %v2567_v14  ;;  %v2633_v10 = vld [vmem:[%s3392_s1 + $0x320] sm:$0xff]   ;;  %v2637_v14 = vld [vmem:[%s3392_s1 + $0x328] sm:$0xff]  }
  0x45   :  { %2400 = vmatpush3.bf16.msra.mxu1 %v2568_v15  ;;  %2373 = vmatprep.subr.bf16.mxu0 %v2569_v16  ;;  %v2638_v15 = vld [vmem:[%s3392_s1 + $0x3a8] sm:$0xff]   ;;  %v2639_v16 = vld [vmem:[%s3392_s1 + $0x370] sm:$0xff]  }
  0x46   :  { %2401 = vmatprep.subr.bf16.mxu1 %v2570_v17  ;;  %803 = vmatprep.mubr.bf16.mxu0 %v2573_v20  ;;  %v2640_v17 = vld [vmem:[%s3392_s1 + $0x3f0] sm:$0xff]   ;;  %v2643_v20 = vld [vmem:[%s3392_s1 + $0x378] sm:$0xff]  }
  0x47   :  { %852 = vmatprep.mubr.bf16.mxu1 %v2575_v21  ;;  %v2644_v21 = vld [vmem:[%s3392_s1 + $0x3f8] sm:$0xff]  }
  0x48   :  { %2374 = vmatpush3.bf16.msra.mxu0 %v2571_v18  ;;  %v2641_v18 = vld [vmem:[%s3392_s1 + $0x330] sm:$0xff]  }
  0x49   :  { %2402 = vmatpush3.bf16.msra.mxu1 %v2572_v19  ;;  %2375 = vmatprep.subr.bf16.mxu0 %v2579_v24  ;;  %v2642_v19 = vld [vmem:[%s3392_s1 + $0x3b0] sm:$0xff]  }
  0x4a   :  { %2403 = vmatprep.subr.bf16.mxu1 %v2580_v25  ;;  %v2647_v24 = vld [vmem:[%s3393_s0 + $0xc0] ss:$16 sps:$4 sm:$0xff]   ;;  %v2649_v25 = vld [vmem:[%s3393_s0 + $0xc4] ss:$16 sps:$4 sm:$0xff]  }
  0x4b   :  { %804 = vmatmul.mubr.bf16.gmra.mrb[12].mxu0 %v2577_v22  ;;  %v2645_v22 = vld [vmem:[%s3392_s1 + $0x338] sm:$0xff]  }
  0x4c   :  { %853 = vmatmul.mubr.bf16.gmra.mrb[12].mxu1 %v2578_v23  ;;  %2376 = vmatpush3.bf16.msra.mxu0 %v2581_v26  ;;  %v2646_v23 = vld [vmem:[%s3392_s1 + $0x3b8] sm:$0xff]  }
  0x4d   :  { %2404 = vmatpush3.bf16.msra.mxu1 %v2582_v27  ;;  %2377 = vmatprep.subr.bf16.mxu0 %v2583_v28  ;;  %v2650_v26 = vld [vmem:[%s3393_s0 + $0xc8] ss:$16 sps:$4 sm:$0xff]   ;;  %v2652_v27 = vld [vmem:[%s3393_s0 + $0xcc] ss:$16 sps:$4 sm:$0xff]   ;;  %v2653_v28 = vld [vmem:[%s3393_s0 + $0xe4] ss:$16 sps:$4 sm:$0xff]  }
  0x4e   :  { %2405 = vmatprep.subr.bf16.mxu1 %v2584_v29  ;;  %1235 = vmatprep.mubr.bf16.mxu0 %v2605_v49  ;;  %v2655_v29 = vld [vmem:[%s3393_s0 + $0xec] ss:$16 sps:$4 sm:$0xff]  }
  0x4f   :  { %1284 = vmatprep.mubr.bf16.mxu1 %v2608_v51 }
  0x50   :  { %2378 = vmatpush3.bf16.msra.mxu0 %v2585_v30  ;;  %v2657_v30 = vld [vmem:[%s3393_s0 + $0xe0] ss:$16 sps:$4 sm:$0xff]  }
  0x51   :  { %2406 = vmatpush3.bf16.msra.mxu1 %v2586_v31  ;;  %2379 = vmatprep.subr.bf16.mxu0 %v2587_v32  ;;  %v2658_v31 = vld [vmem:[%s3393_s0 + $0xe8] ss:$16 sps:$4 sm:$0xff]  }
  0x52   :  { %2407 = vmatprep.subr.bf16.mxu1 %v2588_v33 }
  0x54   :  { %2380 = vmatpush3.bf16.msra.mxu0 %v2589_v34 }
  0x55   :  { %2408 = vmatpush3.bf16.msra.mxu1 %v2590_v35  ;;  %2381 = vmatprep.subr.bf16.mxu0 %v2591_v36 }
  0x56   :  { %2409 = vmatprep.subr.bf16.mxu1 %v2592_v37 }
  0x58   :  { %2382 = vmatpush3.bf16.msra.mxu0 %v2593_v38 }
  0x59   :  { %2410 = vmatpush3.bf16.msra.mxu1 %v2594_v39  ;;  %2383 = vmatprep.subr.bf16.mxu0 %v2595_v40 }
  0x5a   :  { %2411 = vmatprep.subr.bf16.mxu1 %v2596_v41 }
  0x5c   :  { %2384 = vmatpush3.bf16.msra.mxu0 %v2597_v42 }
  0x5d   :  { %2412 = vmatpush3.bf16.msra.mxu1 %v2598_v43  ;;  %2385 = vmatprep.subr.bf16.mxu0 %v2599_v44 }
  0x5e   :  { %2413 = vmatprep.subr.bf16.mxu1 %v2600_v45 }
  0x60   :  { %2386 = vmatpush3.bf16.msra.mxu0 %v2601_v46 }
  0x61   :  { %2414 = vmatpush3.bf16.msra.mxu1 %v2602_v47  ;;  %2427 = vmatprep.subr.bf16.mxu0 %v2609_v52 }
  0x62   :  { %2455 = vmatprep.subr.bf16.mxu1 %v2610_v53 }
  0x63   :  { %1236 = vmatmul.mubr.bf16.vlgmr.msra.gmra.mrb[16].mxu0 %v2603_v48 }
  0x64   :  { %1285 = vmatmul.mubr.bf16.vlgmr.msra.gmra.mrb[16].mxu1 %v2606_v50  ;;  %2428 = vmatpush3.bf16.msra.mxu0 %v2611_v54 }
  0x65   :  { %2456 = vmatpush3.bf16.msra.mxu1 %v2612_v55  ;;  %2429 = vmatprep.subr.bf16.mxu0 %v2613_v56 }
  0x66   :  { %2457 = vmatprep.subr.bf16.mxu1 %v2614_v57  ;;  %1243 = vmatprep.mubr.bf16.mxu0 %v2617_v60 }
  0x67   :  { %1292 = vmatprep.mubr.bf16.mxu1 %v2619_v61 }
  0x68   :  { %2430 = vmatpush3.bf16.msra.mxu0 %v2615_v58 }
  0x69   :  { %2458 = vmatpush3.bf16.msra.mxu1 %v2616_v59  ;;  %2431 = vmatprep.subr.bf16.mxu0 %v2623_v0 }
  0x6a   :  { %2459 = vmatprep.subr.bf16.mxu1 %v2624_v1 }
  0x6b   :  { %1244 = vmatmul.mubr.bf16.gmra.mrb[20].mxu0 %v2621_v62 }
  0x6c   :  { %1293 = vmatmul.mubr.bf16.gmra.mrb[20].mxu1 %v2622_v63  ;;  %2432 = vmatpush3.bf16.msra.mxu0 %v2625_v2 }
  0x6d   :  { %2460 = vmatpush3.bf16.msra.mxu1 %v2626_v3  ;;  %2433 = vmatprep.subr.bf16.mxu0 %v2627_v4 }
  0x6e   :  { %2461 = vmatprep.subr.bf16.mxu1 %v2628_v5  ;;  %1675 = vmatprep.mubr.bf16.mxu0 %v2649_v25 }
  0x6f   :  { %1724 = vmatprep.mubr.bf16.mxu1 %v2652_v27 }
  0x70   :  { %2434 = vmatpush3.bf16.msra.mxu0 %v2629_v6 }
  0x71   :  { %2462 = vmatpush3.bf16.msra.mxu1 %v2630_v7  ;;  %2435 = vmatprep.subr.bf16.mxu0 %v2631_v8 }
  0x72   :  { %2463 = vmatprep.subr.bf16.mxu1 %v2632_v9 }
  0x74   :  { %2436 = vmatpush3.bf16.msra.mxu0 %v2633_v10 }
  0x75   :  { %2464 = vmatpush3.bf16.msra.mxu1 %v2634_v11  ;;  %2437 = vmatprep.subr.bf16.mxu0 %v2635_v12 }
  0x76   :  { %2465 = vmatprep.subr.bf16.mxu1 %v2636_v13 }
  0x78   :  { %2438 = vmatpush3.bf16.msra.mxu0 %v2637_v14 }
  0x79   :  { %2466 = vmatpush3.bf16.msra.mxu1 %v2638_v15  ;;  %2439 = vmatprep.subr.bf16.mxu0 %v2639_v16 }
  0x7a   :  { %2467 = vmatprep.subr.bf16.mxu1 %v2640_v17 }
  0x7c   :  { %2440 = vmatpush3.bf16.msra.mxu0 %v2641_v18 }
  0x7d   :  { %2468 = vmatpush3.bf16.msra.mxu1 %v2642_v19  ;;  %2441 = vmatprep.subr.bf16.mxu0 %v2643_v20 }
  0x7e   :  { %2469 = vmatprep.subr.bf16.mxu1 %v2644_v21 }
  0x80   :  { %2442 = vmatpush3.bf16.msra.mxu0 %v2645_v22 }
  0x81   :  { %2470 = vmatpush3.bf16.msra.mxu1 %v2646_v23 }
  0x83   :  { %1676 = vmatmul.mubr.bf16.vlgmr.msra.gmra.mrb[24].mxu0 %v2647_v24 }
  0x84   :  { %1725 = vmatmul.mubr.bf16.vlgmr.msra.gmra.mrb[24].mxu1 %v2650_v26  ;;  %1683 = vmatprep.mubr.bf16.mxu0 %v2653_v28 }
  0x85   :  { %1732 = vmatprep.mubr.bf16.mxu1 %v2655_v29 }
  0x8b   :  { %1684 = vmatmul.mubr.bf16.gmra.mrb[28].mxu0 %v2657_v30 }
  0x8c   :  { %1733 = vmatmul.mubr.bf16.gmra.mrb[28].mxu1 %v2658_v31 }
  0xf6   :  { %v2275_v32 = vpop.f32.mrb[0].mxu0 }
  0xf7   :  { %v2303_v33 = vpop.f32.mrb[0].mxu1  ;;  %v2276_v34 = vpop.f32.mrb[1].mxu0 }
  0xf8   :  { %v2277_v35 = vadd.f32 %v2276_v34, %v2275_v32  ;;  %v2304_v36 = vpop.f32.mrb[1].mxu1  ;;  %v2278_v37 = vpop.f32.mrb[2].mxu0 }
  0xf9   :  { %v2305_v38 = vadd.f32 %v2304_v36, %v2303_v33  ;;  %v2306_v39 = vpop.f32.mrb[2].mxu1  ;;  %v2279_v40 = vpop.f32.mrb[3].mxu0 }
  0xfa   :  { %v2280_v41 = vadd.f32 %v2279_v40, %v2278_v37  ;;  %v2307_v42 = vpop.f32.mrb[3].mxu1 }
  0xfb   :  { %v406_v43 = vadd.f32 %v2305_v38, %v2277_v35  ;;  %v2308_v44 = vadd.f32 %v2307_v42, %v2306_v39 }
  0xfd   :  { %421 = vst.msk [vmem:[%s3394_s4] sm:$0xff] %vm420_vm0, %v406_v43  ;;  %v439_v45 = vmul.f32 %v406_v43, %v406_v43  ;;  %v409_v46 = vadd.f32 %v2308_v44, %v2280_v41  ;;  %v425_v47 = vsel %vm420_vm0, %v406_v43, 0.0 }
  0xfe   :  { %v2281_v51 = vpop.f32.mrb[4].mxu0 }
  0xff   :  { %422 = vst.msk [vmem:[%s3394_s4 + $0x8] sm:$0xff] %vm420_vm0, %v409_v46  ;;  %v426_v48 = vsel %vm420_vm0, %v409_v46, 0.0  ;;  %v440_v49 = vmul.f32 %v409_v46, %v409_v46  ;;  %v443_v52 = vsel %vm420_vm0, %v439_v45, 0.0  ;;  %v2309_v54 = vpop.f32.mrb[4].mxu1  ;;  %v2282_v55 = vpop.f32.mrb[5].mxu0 }
 0x100   :  { %v427_v50 = vadd.f32 %v426_v48, %v425_v47  ;;  %v2283_v57 = vadd.f32 %v2282_v55, %v2281_v51  ;;  %v2310_v58 = vpop.f32.mrb[5].mxu1  ;;  %v2284_v59 = vpop.f32.mrb[6].mxu0 }
 0x101   :  { %v444_v53 = vsel %vm420_vm0, %v440_v49, 0.0  ;;  %v2311_v60 = vadd.f32 %v2310_v58, %v2309_v54  ;;  %v2312_v61 = vpop.f32.mrb[6].mxu1  ;;  %v2285_v62 = vpop.f32.mrb[7].mxu0 }
 0x102   :  { %v445_v56 = vadd.f32 %v444_v53, %v443_v52  ;;  %v2286_v63 = vadd.f32 %v2285_v62, %v2284_v59  ;;  %v2313_v0 = vpop.f32.mrb[7].mxu1 }
 0x103   :  { %v414_v1 = vadd.f32 %v2311_v60, %v2283_v57  ;;  %v2314_v2 = vadd.f32 %v2313_v0, %v2312_v61 }
 0x105   :  { %423 = vst.msk [vmem:[%s3394_s4 + $0x10] sm:$0xff] %vm420_vm0, %v414_v1  ;;  %v428_v3 = vsel %vm420_vm0, %v414_v1, 0.0  ;;  %v441_v4 = vmul.f32 %v414_v1, %v414_v1  ;;  %v417_v5 = vadd.f32 %v2314_v2, %v2286_v63 }
 0x106   :  { %v429_v6 = vadd.f32 %v428_v3, %v427_v50 }
 0x107   :  { %v446_v7 = vsel %vm420_vm0, %v441_v4, 0.0  ;;  %424 = vst.msk [vmem:[%s3394_s4 + $0x18] sm:$0xff] %vm420_vm0, %v417_v5  ;;  %v430_v8 = vsel %vm420_vm0, %v417_v5, 0.0  ;;  %v442_v9 = vmul.f32 %v417_v5, %v417_v5 }
 0x108   :  { %v447_v10 = vadd.f32 %v446_v7, %v445_v56  ;;  %v431_v11 = vadd.f32 %v430_v8, %v429_v6 }
 0x109   :  { %v448_v12 = vsel %vm420_vm0, %v442_v9, 0.0 }
 0x10a   :  { %v449_v13 = vadd.f32 %v448_v12, %v447_v10  ;;  %v432_v37 = vrot.slane %v431_v11, 4 }
 0x10c   :  { %v450_v45 = vrot.slane %v449_v13, 4  ;;  %v433_v51 = vadd.f32 %v432_v37, %v431_v11 }
 0x10e   :  { %v451_v55 = vadd.f32 %v450_v45, %v449_v13  ;;  %v434_v60 = vrot.slane %v433_v51, 2 }
 0x110   :  { %v452_v0 = vrot.slane %v451_v55, 2  ;;  %v435_v3 = vadd.f32 %v434_v60, %v433_v51 }
 0x112   :  { %v453_v6 = vadd.f32 %v452_v0, %v451_v55  ;;  %v436_v9 = vrot.slane %v435_v3, 1 }
 0x114   :  { %v454_v12 = vrot.slane %v453_v6, 1 }
 0x116   :  { %v2331_v14 = vpop.f32.mrb[8].mxu0 }
 0x117   :  { %v2359_v15 = vpop.f32.mrb[8].mxu1  ;;  %v2332_v16 = vpop.f32.mrb[9].mxu0 }
 0x118   :  { %v2333_v17 = vadd.f32 %v2332_v16, %v2331_v14  ;;  %v2360_v18 = vpop.f32.mrb[9].mxu1  ;;  %v2334_v19 = vpop.f32.mrb[10].mxu0 }
 0x119   :  { %v2361_v20 = vadd.f32 %v2360_v18, %v2359_v15  ;;  %v2362_v21 = vpop.f32.mrb[10].mxu1  ;;  %v2335_v22 = vpop.f32.mrb[11].mxu0  ;;  %v437_v15 = vadd.f32 %v436_v9, %v435_v3  ;;  %v455_v18 = vadd.f32 %v454_v12, %v453_v6 }
 0x11a   :  { %v2336_v23 = vadd.f32 %v2335_v22, %v2334_v19  ;;  %v2363_v24 = vpop.f32.mrb[11].mxu1 }
 0x11b   :  { %v847_v25 = vadd.f32 %v2361_v20, %v2333_v17  ;;  %v2364_v26 = vadd.f32 %v2363_v24, %v2362_v21 }
 0x11d   :  { %861 = vst.msk [vmem:[%s3394_s4 + $0x20] sm:$0xff] %vm420_vm0, %v847_v25  ;;  %v879_v27 = vmul.f32 %v847_v25, %v847_v25  ;;  %v850_v28 = vadd.f32 %v2364_v26, %v2336_v23  ;;  %v865_v29 = vsel %vm420_vm0, %v847_v25, 0.0 }
 0x11e   :  { %v2337_v35 = vpop.f32.mrb[12].mxu0 }
 0x11f   :  { %862 = vst.msk [vmem:[%s3394_s4 + $0x28] sm:$0xff] %vm420_vm0, %v850_v28  ;;  %v866_v30 = vsel %vm420_vm0, %v850_v28, 0.0  ;;  %v880_v31 = vmul.f32 %v850_v28, %v850_v28  ;;  %v883_v33 = vsel %vm420_vm0, %v879_v27, 0.0  ;;  %v2365_v36 = vpop.f32.mrb[12].mxu1  ;;  %v2338_v39 = vpop.f32.mrb[13].mxu0 }
 0x120   :  { %v867_v32 = vadd.f32 %v866_v30, %v865_v29  ;;  %v2366_v40 = vpop.f32.mrb[13].mxu1  ;;  %v2339_v41 = vadd.f32 %v2338_v39, %v2337_v35  ;;  %v2340_v43 = vpop.f32.mrb[14].mxu0 }
 0x121   :  { %v884_v34 = vsel %vm420_vm0, %v880_v31, 0.0  ;;  %v2367_v42 = vadd.f32 %v2366_v40, %v2365_v36  ;;  %v2368_v44 = vpop.f32.mrb[14].mxu1  ;;  %v2341_v46 = vpop.f32.mrb[15].mxu0 }
 0x122   :  { %v885_v38 = vadd.f32 %v884_v34, %v883_v33  ;;  %v2369_v47 = vpop.f32.mrb[15].mxu1  ;;  %v2342_v49 = vadd.f32 %v2341_v46, %v2340_v43 }
 0x123   :  { %v855_v48 = vadd.f32 %v2367_v42, %v2339_v41  ;;  %v2370_v50 = vadd.f32 %v2369_v47, %v2368_v44 }
 0x125   :  { %863 = vst.msk [vmem:[%s3394_s4 + $0x30] sm:$0xff] %vm420_vm0, %v855_v48  ;;  %v868_v52 = vsel %vm420_vm0, %v855_v48, 0.0  ;;  %v881_v53 = vmul.f32 %v855_v48, %v855_v48  ;;  %v858_v54 = vadd.f32 %v2370_v50, %v2342_v49 }
 0x126   :  { %v869_v56 = vadd.f32 %v868_v52, %v867_v32 }
 0x127   :  { %v886_v57 = vsel %vm420_vm0, %v881_v53, 0.0  ;;  %864 = vst.msk [vmem:[%s3394_s4 + $0x38] sm:$0xff] %vm420_vm0, %v858_v54  ;;  %v870_v58 = vsel %vm420_vm0, %v858_v54, 0.0  ;;  %v882_v59 = vmul.f32 %v858_v54, %v858_v54 }
 0x128   :  { %v887_v61 = vadd.f32 %v886_v57, %v885_v38  ;;  %v871_v62 = vadd.f32 %v870_v58, %v869_v56 }
 0x129   :  { %v888_v63 = vsel %vm420_vm0, %v882_v59, 0.0 }
 0x12a   :  { %v872_v1 = vrot.slane %v871_v62, 4  ;;  %v889_v2 = vadd.f32 %v888_v63, %v887_v61 }
 0x12c   :  { %v873_v4 = vadd.f32 %v872_v1, %v871_v62  ;;  %v890_v5 = vrot.slane %v889_v2, 4 }
 0x12e   :  { %v874_v7 = vrot.slane %v873_v4, 2  ;;  %v891_v8 = vadd.f32 %v890_v5, %v889_v2 }
 0x130   :  { %v875_v10 = vadd.f32 %v874_v7, %v873_v4  ;;  %v892_v11 = vrot.slane %v891_v8, 2 }
 0x132   :  { %v876_v13 = vrot.slane %v875_v10, 1  ;;  %v893_v14 = vadd.f32 %v892_v11, %v891_v8 }
 0x134   :  { %v877_v16 = vadd.f32 %v876_v13, %v875_v10  ;;  %v894_v17 = vrot.slane %v893_v14, 1 }
 0x136   :  { %v3214_v19 = vadd.f32 %v877_v16, %v437_v15  ;;  %v895_v20 = vadd.f32 %v894_v17, %v893_v14  ;;  %v2387_v22 = vpop.f32.mrb[16].mxu0 }
 0x137   :  { %v2388_v23 = vpop.f32.mrb[17].mxu0  ;;  %v2415_v24 = vpop.f32.mrb[16].mxu1 }
 0x138   :  { %v3216_v21 = vadd.f32 %v895_v20, %v455_v18  ;;  %v2389_v25 = vadd.f32 %v2388_v23, %v2387_v22  ;;  %v2390_v26 = vpop.f32.mrb[18].mxu0  ;;  %v2416_v27 = vpop.f32.mrb[17].mxu1 }
 0x139   :  { %v2391_v28 = vpop.f32.mrb[19].mxu0  ;;  %v2417_v29 = vadd.f32 %v2416_v27, %v2415_v24  ;;  %v2418_v30 = vpop.f32.mrb[18].mxu1 }
 0x13a   :  { %v2392_v31 = vadd.f32 %v2391_v28, %v2390_v26  ;;  %v2419_v32 = vpop.f32.mrb[19].mxu1 }
 0x13b   :  { %v1287_v33 = vadd.f32 %v2417_v29, %v2389_v25  ;;  %v2420_v34 = vadd.f32 %v2419_v32, %v2418_v30 }
 0x13d   :  { %1301 = vst.msk [vmem:[%s3394_s4 + $0x40] sm:$0xff] %vm420_vm0, %v1287_v33  ;;  %v1319_v35 = vmul.f32 %v1287_v33, %v1287_v33  ;;  %v1290_v36 = vadd.f32 %v2420_v34, %v2392_v31  ;;  %v1305_v37 = vsel %vm420_vm0, %v1287_v33, 0.0 }
 0x13e   :  { %v2393_v41 = vpop.f32.mrb[20].mxu0 }
 0x13f   :  { %1302 = vst.msk [vmem:[%s3394_s4 + $0x48] sm:$0xff] %vm420_vm0, %v1290_v36  ;;  %v1306_v38 = vsel %vm420_vm0, %v1290_v36, 0.0  ;;  %v1320_v39 = vmul.f32 %v1290_v36, %v1290_v36  ;;  %v1323_v42 = vsel %vm420_vm0, %v1319_v35, 0.0  ;;  %v2421_v44 = vpop.f32.mrb[20].mxu1  ;;  %v2394_v45 = vpop.f32.mrb[21].mxu0 }
 0x140   :  { %v1307_v40 = vadd.f32 %v1306_v38, %v1305_v37  ;;  %v2395_v47 = vadd.f32 %v2394_v45, %v2393_v41  ;;  %v2422_v48 = vpop.f32.mrb[21].mxu1  ;;  %v2396_v49 = vpop.f32.mrb[22].mxu0 }
 0x141   :  { %v1324_v43 = vsel %vm420_vm0, %v1320_v39, 0.0  ;;  %v2423_v50 = vadd.f32 %v2422_v48, %v2421_v44  ;;  %v2424_v51 = vpop.f32.mrb[22].mxu1  ;;  %v2397_v52 = vpop.f32.mrb[23].mxu0 }
 0x142   :  { %v1325_v46 = vadd.f32 %v1324_v43, %v1323_v42  ;;  %v2398_v53 = vadd.f32 %v2397_v52, %v2396_v49  ;;  %v2425_v54 = vpop.f32.mrb[23].mxu1 }
 0x143   :  { %v1295_v55 = vadd.f32 %v2423_v50, %v2395_v47  ;;  %v2426_v56 = vadd.f32 %v2425_v54, %v2424_v51 }
 0x145   :  { %1303 = vst.msk [vmem:[%s3394_s4 + $0x50] sm:$0xff] %vm420_vm0, %v1295_v55  ;;  %v1308_v57 = vsel %vm420_vm0, %v1295_v55, 0.0  ;;  %v1321_v58 = vmul.f32 %v1295_v55, %v1295_v55  ;;  %v1298_v59 = vadd.f32 %v2426_v56, %v2398_v53 }
 0x146   :  { %v1309_v60 = vadd.f32 %v1308_v57, %v1307_v40 }
 0x147   :  { %v1326_v61 = vsel %vm420_vm0, %v1321_v58, 0.0  ;;  %1304 = vst.msk [vmem:[%s3394_s4 + $0x58] sm:$0xff] %vm420_vm0, %v1298_v59  ;;  %v1310_v62 = vsel %vm420_vm0, %v1298_v59, 0.0  ;;  %v1322_v63 = vmul.f32 %v1298_v59, %v1298_v59 }
 0x148   :  { %v1327_v0 = vadd.f32 %v1326_v61, %v1325_v46  ;;  %v1311_v1 = vadd.f32 %v1310_v62, %v1309_v60 }
 0x149   :  { %v1328_v2 = vsel %vm420_vm0, %v1322_v63, 0.0 }
 0x14a   :  { %v1312_v3 = vrot.slane %v1311_v1, 4  ;;  %v1329_v4 = vadd.f32 %v1328_v2, %v1327_v0 }
 0x14c   :  { %v1313_v5 = vadd.f32 %v1312_v3, %v1311_v1  ;;  %v1330_v6 = vrot.slane %v1329_v4, 4 }
 0x14e   :  { %v1314_v7 = vrot.slane %v1313_v5, 2  ;;  %v1331_v8 = vadd.f32 %v1330_v6, %v1329_v4 }
 0x150   :  { %v1315_v9 = vadd.f32 %v1314_v7, %v1313_v5  ;;  %v1332_v10 = vrot.slane %v1331_v8, 2 }
 0x152   :  { %v1316_v11 = vrot.slane %v1315_v9, 1  ;;  %v1333_v12 = vadd.f32 %v1332_v10, %v1331_v8 }
 0x154   :  { %v1317_v13 = vadd.f32 %v1316_v11, %v1315_v9  ;;  %v1334_v14 = vrot.slane %v1333_v12, 1 }
 0x156   :  { %v3243_v15 = vadd.f32 %v1317_v13, %v3214_v19  ;;  %v1335_v16 = vadd.f32 %v1334_v14, %v1333_v12  ;;  %v2443_v18 = vpop.f32.mrb[24].mxu0 }
 0x157   :  { %v2471_v20 = vpop.f32.mrb[24].mxu1  ;;  %v2444_v22 = vpop.f32.mrb[25].mxu0 }
 0x158   :  { %v3246_v17 = vadd.f32 %v1335_v16, %v3216_v21  ;;  %v2445_v23 = vadd.f32 %v2444_v22, %v2443_v18  ;;  %v2472_v24 = vpop.f32.mrb[25].mxu1  ;;  %v2446_v25 = vpop.f32.mrb[26].mxu0 }
 0x159   :  { %v2473_v26 = vadd.f32 %v2472_v24, %v2471_v20  ;;  %v2474_v27 = vpop.f32.mrb[26].mxu1  ;;  %v2447_v28 = vpop.f32.mrb[27].mxu0 }
 0x15a   :  { %v2448_v29 = vadd.f32 %v2447_v28, %v2446_v25  ;;  %v2475_v30 = vpop.f32.mrb[27].mxu1  ;;  %v1784_v25 = vld [vmem:[%s3395_s2] sm:$0x1] }
 0x15b   :  { %v1727_v31 = vadd.f32 %v2473_v26, %v2445_v23  ;;  %v2476_v32 = vadd.f32 %v2475_v30, %v2474_v27  ;;  %v1805_v23 = vlaneseq  ;;  %v1789_v30 = vld [vmem:[%s3394_s4] sm:$0xff] }
 0x15d   :  { %1741 = vst.msk [vmem:[%s3394_s4 + $0x60] sm:$0xff] %vm420_vm0, %v1727_v31  ;;  %v1759_v19 = vmul.f32 %v1727_v31, %v1727_v31  ;;  %v1730_v21 = vadd.f32 %v2476_v32, %v2448_v29  ;;  %v1745_v34 = vsel %vm420_vm0, %v1727_v31, 0.0  ;;  %v1806_v24 = vshrl.u32 %v1805_v23, 7  ;;  %v1790_v31 = vld [vmem:[%s3394_s4 + $0x8] sm:$0xff]  ;;  %v1791_v32 = vld [vmem:[%s3394_s4 + $0x10] sm:$0xff] }
 0x15e   :  { %v2449_v33 = vpop.f32.mrb[28].mxu0 }
 0x15f   :  { %1742 = vst.msk [vmem:[%s3394_s4 + $0x68] sm:$0xff] %vm420_vm0, %v1730_v21  ;;  %v1746_v35 = vsel %vm420_vm0, %v1730_v21, 0.0  ;;  %v1760_v36 = vmul.f32 %v1730_v21, %v1730_v21  ;;  %v2477_v37 = vpop.f32.mrb[28].mxu1  ;;  %v2450_v38 = vpop.f32.mrb[29].mxu0  ;;  %v1763_v43 = vsel %vm420_vm0, %v1759_v19, 0.0  ;;  %v1807_v26 = vsub.s32 0, %v1806_v24 }
 0x160   :  { %v1747_v39 = vadd.f32 %v1746_v35, %v1745_v34  ;;  %v2451_v40 = vadd.f32 %v2450_v38, %v2449_v33  ;;  %v2478_v41 = vpop.f32.mrb[29].mxu1  ;;  %v2452_v42 = vpop.f32.mrb[30].mxu0  ;;  %v1792_v19 = vld [vmem:[%s3394_s4 + $0x18] sm:$0xff]  ;;  %v1793_v33 = vld [vmem:[%s3394_s4 + $0x20] sm:$0xff]  ;;  %v1794_v34 = vld [vmem:[%s3394_s4 + $0x28] sm:$0xff] }
 0x161   :  { %v1764_v44 = vsel %vm420_vm0, %v1760_v36, 0.0  ;;  %v2479_v45 = vadd.f32 %v2478_v41, %v2477_v37  ;;  %v2480_v46 = vpop.f32.mrb[30].mxu1  ;;  %v2453_v47 = vpop.f32.mrb[31].mxu0  ;;  %v1795_v35 = vld [vmem:[%s3394_s4 + $0x30] sm:$0xff]  ;;  %v1796_v37 = vld [vmem:[%s3394_s4 + $0x38] sm:$0xff]  ;;  %v1797_v38 = vld [vmem:[%s3394_s4 + $0x40] sm:$0xff] }
 0x162   :  { %v1765_v48 = vadd.f32 %v1764_v44, %v1763_v43  ;;  %v2454_v49 = vadd.f32 %v2453_v47, %v2452_v42  ;;  %v2481_v50 = vpop.f32.mrb[31].mxu1  ;;  %v1799_v44 = vld [vmem:[%s3394_s4 + $0x50] sm:$0xff] }
 0x163   :  { %v1735_v51 = vadd.f32 %v2479_v45, %v2451_v40  ;;  %v2482_v52 = vadd.f32 %v2481_v50, %v2480_v46  ;;  %v1800_v45 = vld [vmem:[%s3394_s4 + $0x58] sm:$0xff] }
 0x164   :  { %v1801_v46 = vld [vmem:[%s3394_s4 + $0x60] sm:$0xff] }
 0x165   :  { %1743 = vst.msk [vmem:[%s3394_s4 + $0x70] sm:$0xff] %vm420_vm0, %v1735_v51  ;;  %v1748_v53 = vsel %vm420_vm0, %v1735_v51, 0.0  ;;  %v1761_v54 = vmul.f32 %v1735_v51, %v1735_v51  ;;  %v1738_v55 = vadd.f32 %v2482_v52, %v2454_v49 }
 0x166   :  { %v1749_v56 = vadd.f32 %v1748_v53, %v1747_v39  ;;  %v1798_v39 = vld [vmem:[%s3394_s4 + $0x48] sm:$0xff] }
 0x167   :  { %v1766_v57 = vsel %vm420_vm0, %v1761_v54, 0.0  ;;  %1744 = vst.msk [vmem:[%s3394_s4 + $0x78] sm:$0xff] %vm420_vm0, %v1738_v55  ;;  %v1750_v58 = vsel %vm420_vm0, %v1738_v55, 0.0  ;;  %v1762_v59 = vmul.f32 %v1738_v55, %v1738_v55  ;;  %v1802_v51 = vld [vmem:[%s3394_s4 + $0x68] sm:$0xff] }
 0x168   :  { %v1767_v60 = vadd.f32 %v1766_v57, %v1765_v48  ;;  %v1751_v61 = vadd.f32 %v1750_v58, %v1749_v56 }
 0x169   :  { %v1768_v62 = vsel %vm420_vm0, %v1762_v59, 0.0 }
 0x16a   :  { %v1752_v63 = vrot.slane %v1751_v61, 4  ;;  %v1769_v0 = vadd.f32 %v1768_v62, %v1767_v60 }
 0x16c   :  { %v1753_v1 = vadd.f32 %v1752_v63, %v1751_v61  ;;  %v1770_v2 = vrot.slane %v1769_v0, 4  ;;  %v1803_v52 = vld [vmem:[%s3394_s4 + $0x70] sm:$0xff] }
 0x16e   :  { %v1754_v3 = vrot.slane %v1753_v1, 2  ;;  %v1771_v4 = vadd.f32 %v1770_v2, %v1769_v0  ;;  %v1804_v53 = vld [vmem:[%s3394_s4 + $0x78] sm:$0xff] }
 0x170   :  { %v1755_v5 = vadd.f32 %v1754_v3, %v1753_v1  ;;  %v1772_v6 = vrot.slane %v1771_v4, 2 }
 0x172   :  { %v1756_v7 = vrot.slane %v1755_v5, 1  ;;  %v1773_v8 = vadd.f32 %v1772_v6, %v1771_v4 }
 0x174   :  { %v1757_v9 = vadd.f32 %v1756_v7, %v1755_v5  ;;  %v1774_v10 = vrot.slane %v1773_v8, 1 }
 0x176   :  { %v1758_v11 = vadd.f32 %v1757_v9, %v3243_v15  ;;  %v1775_v12 = vadd.f32 %v1774_v10, %v1773_v8  ;;  %v1786_v15 = vld [vmem:[%s3396_s3] sm:$0x1] }
 0x178   :  { %v1776_v13 = vadd.f32 %v1775_v12, %v3246_v17  ;;  %v1778_v14 = vmul.f32 0.0078125, %v1758_v11 }
 0x17a   :  { %v1779_v16 = vmul.f32 0.0078125, %v1776_v13  ;;  %v1780_v18 = vmul.f32 %v1778_v14, %v1778_v14 }
 0x17c   :  { %v1781_v20 = vsub.f32 %v1779_v16, %v1780_v18 }
 0x17e   :  { %v1782_v22 = vadd.f32 1e-05, %v1781_v20 }
 0x180   :  { %2659 = vrsqrt.f32 %v1782_v22 }
 0x18a   :  { %v2660_v27 = vpop.eup %2659 }
 0x18b   :  { %v1785_v28 = vmul.f32 %v2660_v27, %v1784_v25 }
 0x18d   :  { %v1787_v17 = vmul.f32 %v1785_v28, %v1778_v14  ;;  %v1808_v29 = vrot.slane %v1785_v28, %v1807_v26 }
 0x18f   :  { %v1788_v21 = vsub.f32 %v1786_v15, %v1787_v17  ;;  %v1809_v36 = vmul.f32 %v1808_v29, %v1789_v30  ;;  %v1810_v40 = vmul.f32 %v1808_v29, %v1790_v31  ;;  %v1811_v41 = vmul.f32 %v1808_v29, %v1791_v32 }
 0x190   :  { %v1812_v42 = vmul.f32 %v1808_v29, %v1792_v19  ;;  %v1813_v43 = vmul.f32 %v1808_v29, %v1793_v33  ;;  %v1814_v47 = vmul.f32 %v1808_v29, %v1794_v34  ;;  %v1815_v48 = vmul.f32 %v1808_v29, %v1795_v35 }
 0x191   :  { %v1816_v49 = vmul.f32 %v1808_v29, %v1796_v37  ;;  %v1817_v50 = vmul.f32 %v1808_v29, %v1797_v38  ;;  %v1818_v54 = vmul.f32 %v1808_v29, %v1798_v39  ;;  %v1819_v55 = vmul.f32 %v1808_v29, %v1799_v44 }
 0x192   :  { %v1820_v56 = vmul.f32 %v1808_v29, %v1800_v45  ;;  %v1829_v57 = vrot.slane %v1788_v21, %v1807_v26  ;;  %v1821_v58 = vmul.f32 %v1808_v29, %v1801_v46  ;;  %v1822_v59 = vmul.f32 %v1808_v29, %v1802_v51 }
 0x193   :  { %v1823_v60 = vmul.f32 %v1808_v29, %v1803_v52  ;;  %v1824_v61 = vmul.f32 %v1808_v29, %v1804_v53 }
 0x194   :  { %v1831_v62 = vadd.f32 %v1829_v57, %v1809_v36  ;;  %v1832_v63 = vadd.f32 %v1829_v57, %v1810_v40  ;;  %v1833_v0 = vadd.f32 %v1829_v57, %v1811_v41  ;;  %v1834_v1 = vadd.f32 %v1829_v57, %v1812_v42 }
 0x195   :  { %v1835_v2 = vadd.f32 %v1829_v57, %v1813_v43  ;;  %v1836_v3 = vadd.f32 %v1829_v57, %v1814_v47  ;;  %v1837_v4 = vadd.f32 %v1829_v57, %v1815_v48  ;;  %v1838_v5 = vadd.f32 %v1829_v57, %v1816_v49 }
 0x196   :  { %v1839_v6 = vadd.f32 %v1829_v57, %v1817_v50  ;;  %v1840_v7 = vadd.f32 %v1829_v57, %v1818_v54  ;;  %v1841_v8 = vadd.f32 %v1829_v57, %v1819_v55  ;;  %v1842_v9 = vadd.f32 %v1829_v57, %v1820_v56 }
 0x197   :  { %v1843_v10 = vadd.f32 %v1829_v57, %v1821_v58  ;;  %v1844_v11 = vadd.f32 %v1829_v57, %v1822_v59  ;;  %v1845_v12 = vadd.f32 %v1829_v57, %v1823_v60  ;;  %v1846_v13 = vadd.f32 %v1829_v57, %v1824_v61 }
 0x198   :  { %v1847_v14 = vmax.f32 %v1831_v62, 0.0  ;;  %v1848_v16 = vmax.f32 %v1832_v63, 0.0  ;;  %v1849_v18 = vmax.f32 %v1833_v0, 0.0  ;;  %v1850_v20 = vmax.f32 %v1834_v1, 0.0 }
 0x199   :  { %v1851_v22 = vmax.f32 %v1835_v2, 0.0  ;;  %v1852_v23 = vmax.f32 %v1836_v3, 0.0  ;;  %v1853_v24 = vmax.f32 %v1837_v4, 0.0  ;;  %v1854_v25 = vmax.f32 %v1838_v5, 0.0 }
 0x19a   :  { %v1855_v26 = vmax.f32 %v1839_v6, 0.0  ;;  %v1856_v27 = vmax.f32 %v1840_v7, 0.0  ;;  %v1857_v28 = vmax.f32 %v1841_v8, 0.0  ;;  %v1858_v15 = vmax.f32 %v1842_v9, 0.0  ;;  %1863 = vst.msk [vmem:[%s3394_s4] sm:$0xff] %vm420_vm0, %v1847_v14  ;;  %1864 = vst.msk [vmem:[%s3394_s4 + $0x8] sm:$0xff] %vm420_vm0, %v1848_v16 }
 0x19b   :  { %1865 = vst.msk [vmem:[%s3394_s4 + $0x10] sm:$0xff] %vm420_vm0, %v1849_v18  ;;  %1866 = vst.msk [vmem:[%s3394_s4 + $0x18] sm:$0xff] %vm420_vm0, %v1850_v20  ;;  %v1859_v17 = vmax.f32 %v1843_v10, 0.0  ;;  %v1860_v29 = vmax.f32 %v1844_v11, 0.0  ;;  %v1861_v30 = vmax.f32 %v1845_v12, 0.0  ;;  %v1862_v31 = vmax.f32 %v1846_v13, 0.0 }
 0x19c   :  { %1867 = vst.msk [vmem:[%s3394_s4 + $0x20] sm:$0xff] %vm420_vm0, %v1851_v22  ;;  %1868 = vst.msk [vmem:[%s3394_s4 + $0x28] sm:$0xff] %vm420_vm0, %v1852_v23 }
 0x19d   :  { %1869 = vst.msk [vmem:[%s3394_s4 + $0x30] sm:$0xff] %vm420_vm0, %v1853_v24  ;;  %1870 = vst.msk [vmem:[%s3394_s4 + $0x38] sm:$0xff] %vm420_vm0, %v1854_v25 }
 0x19e   :  { %1871 = vst.msk [vmem:[%s3394_s4 + $0x40] sm:$0xff] %vm420_vm0, %v1855_v26  ;;  %1872 = vst.msk [vmem:[%s3394_s4 + $0x48] sm:$0xff] %vm420_vm0, %v1856_v27 }
 0x19f   :  { %1873 = vst.msk [vmem:[%s3394_s4 + $0x50] sm:$0xff] %vm420_vm0, %v1857_v28  ;;  %1874 = vst.msk [vmem:[%s3394_s4 + $0x58] sm:$0xff] %vm420_vm0, %v1858_v15 }
 0x1a0   :  { %1875 = vst.msk [vmem:[%s3394_s4 + $0x60] sm:$0xff] %vm420_vm0, %v1859_v17  ;;  %1876 = vst.msk [vmem:[%s3394_s4 + $0x68] sm:$0xff] %vm420_vm0, %v1860_v29 }
 0x1a1   :  { %1877 = vst.msk [vmem:[%s3394_s4 + $0x70] sm:$0xff] %vm420_vm0, %v1861_v30  ;;  %1878 = vst.msk [vmem:[%s3394_s4 + $0x78] sm:$0xff] %vm420_vm0, %v1862_v31 }

// kernel: generator_forward.9
= control target key start
LH: loop header
LB: loop body
LE: loop exit
PB: predicated region body
PF: predicated region fallthrough
CT: control target
= control target key end

     0   :  { %s1958_s0 = inlined_call_operand.vmem [shape: bf16[4,256,128], index: 0, kind: input, shape index: {}]   ;;  %s1959_s1 = inlined_call_operand.vmem [shape: bf16[4,32,256], index: 1, kind: input, shape index: {}]   ;;  %s1960_s2 = inlined_call_operand.vmem [shape: f32[32,1], index: 2, kind: input, shape index: {}]   ;;  %s1961_s3 = inlined_call_operand.vmem [shape: f32[32,1], index: 3, kind: input, shape index: {}]   ;;  %s1962_s4 = inlined_call_operand.vmem [shape: f32[32,512], index: 4, kind: output, shape index: {}]  }
   0x1   :  { %v1428_v0 = vld [vmem:[%s1958_s0 + $0x40] sm:$0xff]   ;;  %v1432_v4 = vld [vmem:[%s1958_s0 + $0x48] sm:$0xff]   ;;  %v1436_v8 = vld [vmem:[%s1958_s0 + $0x50] sm:$0xff]  }
   0x2   :  { %v1429_v1 = vld [vmem:[%s1958_s0 + $0xc0] sm:$0xff]   ;;  %1313 = vmatprep.subr.bf16.mxu0 %v1428_v0  ;;  %v1433_v5 = vld [vmem:[%s1958_s0 + $0xc8] sm:$0xff]   ;;  %v1437_v9 = vld [vmem:[%s1958_s0 + $0xd0] sm:$0xff]  }
   0x3   :  { %v1430_v2 = vld [vmem:[%s1958_s0] sm:$0xff]   ;;  %1341 = vmatprep.subr.bf16.mxu1 %v1429_v1  ;;  %v1434_v6 = vld [vmem:[%s1958_s0 + $0x8] sm:$0xff]   ;;  %v1438_v10 = vld [vmem:[%s1958_s0 + $0x10] sm:$0xff]  }
   0x4   :  { %v1431_v3 = vld [vmem:[%s1958_s0 + $0x80] sm:$0xff]   ;;  %1314 = vmatpush3.bf16.msra.mxu0 %v1430_v2  ;;  %v1435_v7 = vld [vmem:[%s1958_s0 + $0x88] sm:$0xff]   ;;  %v1439_v11 = vld [vmem:[%s1958_s0 + $0x90] sm:$0xff]  }
   0x5   :  { %1342 = vmatpush3.bf16.msra.mxu1 %v1431_v3  ;;  %1315 = vmatprep.subr.bf16.mxu0 %v1432_v4  ;;  %v1440_v12 = vld [vmem:[%s1958_s0 + $0x58] sm:$0xff]   ;;  %v1444_v16 = vld [vmem:[%s1958_s0 + $0x60] sm:$0xff]   ;;  %v1448_v20 = vld [vmem:[%s1958_s0 + $0x68] sm:$0xff]  }
   0x6   :  { %1343 = vmatprep.subr.bf16.mxu1 %v1433_v5  ;;  %v1441_v13 = vld [vmem:[%s1958_s0 + $0xd8] sm:$0xff]   ;;  %v1445_v17 = vld [vmem:[%s1958_s0 + $0xe0] sm:$0xff]   ;;  %v1449_v21 = vld [vmem:[%s1958_s0 + $0xe8] sm:$0xff]  }
   0x7   :  { %v1442_v14 = vld [vmem:[%s1958_s0 + $0x18] sm:$0xff]   ;;  %v1446_v18 = vld [vmem:[%s1958_s0 + $0x20] sm:$0xff]   ;;  %v1450_v22 = vld [vmem:[%s1958_s0 + $0x28] sm:$0xff]  }
   0x8   :  { %1316 = vmatpush3.bf16.msra.mxu0 %v1434_v6  ;;  %v1443_v15 = vld [vmem:[%s1958_s0 + $0x98] sm:$0xff]   ;;  %v1447_v19 = vld [vmem:[%s1958_s0 + $0xa0] sm:$0xff]   ;;  %v1451_v23 = vld [vmem:[%s1958_s0 + $0xa8] sm:$0xff]  }
   0x9   :  { %1344 = vmatpush3.bf16.msra.mxu1 %v1435_v7  ;;  %1317 = vmatprep.subr.bf16.mxu0 %v1436_v8  ;;  %v1452_v24 = vld [vmem:[%s1958_s0 + $0x70] sm:$0xff]   ;;  %v1456_v28 = vld [vmem:[%s1958_s0 + $0x78] sm:$0xff]   ;;  %v1460_v32 = vld [vmem:[%s1959_s1] ss:$8 sps:$4 sm:$0xff]  }
   0xa   :  { %1345 = vmatprep.subr.bf16.mxu1 %v1437_v9  ;;  %v1453_v25 = vld [vmem:[%s1958_s0 + $0xf0] sm:$0xff]   ;;  %v1457_v29 = vld [vmem:[%s1958_s0 + $0xf8] sm:$0xff]   ;;  %v1462_v33 = vld [vmem:[%s1959_s1 + $0x4] ss:$8 sps:$4 sm:$0xff]  }
   0xb   :  { %v1454_v26 = vld [vmem:[%s1958_s0 + $0x30] sm:$0xff]   ;;  %v1458_v30 = vld [vmem:[%s1958_s0 + $0x38] sm:$0xff]   ;;  %v1463_v34 = vld [vmem:[%s1959_s1 + $0x20] ss:$8 sps:$4 sm:$0xff]   ;;  %202 = vmatprep.mubr.bf16.mxu0 %v1462_v33 }
   0xc   :  { %1318 = vmatpush3.bf16.msra.mxu0 %v1438_v10  ;;  %v1455_v27 = vld [vmem:[%s1958_s0 + $0xb0] sm:$0xff]   ;;  %v1459_v31 = vld [vmem:[%s1958_s0 + $0xb8] sm:$0xff]   ;;  %v1465_v35 = vld [vmem:[%s1959_s1 + $0x24] ss:$8 sps:$4 sm:$0xff]  }
   0xd   :  { %1346 = vmatpush3.bf16.msra.mxu1 %v1439_v11  ;;  %1319 = vmatprep.subr.bf16.mxu0 %v1440_v12  ;;  %v1466_v36 = vld [vmem:[%s1958_s0 + $0x140] sm:$0xff]   ;;  %v1470_v40 = vld [vmem:[%s1958_s0 + $0x148] sm:$0xff]   ;;  %v1474_v44 = vld [vmem:[%s1958_s0 + $0x150] sm:$0xff]  }
   0xe   :  { %1347 = vmatprep.subr.bf16.mxu1 %v1441_v13  ;;  %437 = vmatprep.mubr.bf16.mxu1 %v1465_v35  ;;  %v1467_v37 = vld [vmem:[%s1958_s0 + $0x100] sm:$0xff]   ;;  %v1471_v41 = vld [vmem:[%s1958_s0 + $0x108] sm:$0xff]   ;;  %v1475_v45 = vld [vmem:[%s1958_s0 + $0x110] sm:$0xff]  }
   0xf   :  { %v1468_v38 = vld [vmem:[%s1958_s0 + $0x1c0] sm:$0xff]   ;;  %v1472_v42 = vld [vmem:[%s1958_s0 + $0x1c8] sm:$0xff]   ;;  %v1476_v46 = vld [vmem:[%s1958_s0 + $0x1d0] sm:$0xff]  }
  0x10   :  { %1320 = vmatpush3.bf16.msra.mxu0 %v1442_v14  ;;  %v1469_v39 = vld [vmem:[%s1958_s0 + $0x180] sm:$0xff]   ;;  %v1473_v43 = vld [vmem:[%s1958_s0 + $0x188] sm:$0xff]   ;;  %v1477_v47 = vld [vmem:[%s1958_s0 + $0x190] sm:$0xff]  }
  0x11   :  { %1348 = vmatpush3.bf16.msra.mxu1 %v1443_v15  ;;  %1321 = vmatprep.subr.bf16.mxu0 %v1444_v16  ;;  %v1478_v48 = vld [vmem:[%s1959_s1 + $0x14] ss:$8 sps:$4 sm:$0xff]   ;;  %v1481_v50 = vld [vmem:[%s1959_s1 + $0x10] ss:$8 sps:$4 sm:$0xff]   ;;  %v1487_v55 = vld [vmem:[%s1958_s0 + $0x160] sm:$0xff]  }
  0x12   :  { %1349 = vmatprep.subr.bf16.mxu1 %v1445_v17  ;;  %v1480_v49 = vld [vmem:[%s1958_s0 + $0x158] sm:$0xff]   ;;  %v1489_v57 = vld [vmem:[%s1958_s0 + $0x120] sm:$0xff]   ;;  %v1492_v60 = vld [vmem:[%s1958_s0 + $0x168] sm:$0xff]  }
  0x13   :  { %v1482_v51 = vld [vmem:[%s1958_s0 + $0x118] sm:$0xff]   ;;  %v1490_v58 = vld [vmem:[%s1958_s0 + $0x1e0] sm:$0xff]   ;;  %v1493_v61 = vld [vmem:[%s1958_s0 + $0x128] sm:$0xff]  }
  0x14   :  { %1322 = vmatpush3.bf16.msra.mxu0 %v1446_v18  ;;  %v1483_v52 = vld [vmem:[%s1958_s0 + $0x1d8] sm:$0xff]   ;;  %v1491_v59 = vld [vmem:[%s1958_s0 + $0x1a0] sm:$0xff]   ;;  %v1494_v62 = vld [vmem:[%s1958_s0 + $0x1e8] sm:$0xff]  }
  0x15   :  { %1350 = vmatpush3.bf16.msra.mxu1 %v1447_v19  ;;  %1323 = vmatprep.subr.bf16.mxu0 %v1448_v20  ;;  %v1484_v53 = vld [vmem:[%s1958_s0 + $0x198] sm:$0xff]   ;;  %v1495_v63 = vld [vmem:[%s1958_s0 + $0x1a8] sm:$0xff]   ;;  %v1496_v0 = vld [vmem:[%s1958_s0 + $0x170] sm:$0xff]  }
  0x16   :  { %1351 = vmatprep.subr.bf16.mxu1 %v1449_v21  ;;  %v1485_v54 = vld [vmem:[%s1959_s1 + $0x34] ss:$8 sps:$4 sm:$0xff]   ;;  %v1488_v56 = vld [vmem:[%s1959_s1 + $0x30] ss:$8 sps:$4 sm:$0xff]   ;;  %v1504_v8 = vld [vmem:[%s1959_s1 + $0x40] ss:$8 sps:$4 sm:$0xff]  }
  0x17   :  { %v1497_v1 = vld [vmem:[%s1958_s0 + $0x130] sm:$0xff]   ;;  %v1500_v4 = vld [vmem:[%s1958_s0 + $0x178] sm:$0xff]   ;;  %v1506_v9 = vld [vmem:[%s1959_s1 + $0x44] ss:$8 sps:$4 sm:$0xff]  }
  0x18   :  { %1324 = vmatpush3.bf16.msra.mxu0 %v1450_v22  ;;  %v1498_v2 = vld [vmem:[%s1958_s0 + $0x1f0] sm:$0xff]   ;;  %v1501_v5 = vld [vmem:[%s1958_s0 + $0x138] sm:$0xff]   ;;  %v1507_v10 = vld [vmem:[%s1959_s1 + $0x60] ss:$8 sps:$4 sm:$0xff]  }
  0x19   :  { %1352 = vmatpush3.bf16.msra.mxu1 %v1451_v23  ;;  %1325 = vmatprep.subr.bf16.mxu0 %v1452_v24  ;;  %v1499_v3 = vld [vmem:[%s1958_s0 + $0x1b0] sm:$0xff]   ;;  %v1502_v6 = vld [vmem:[%s1958_s0 + $0x1f8] sm:$0xff]   ;;  %v1509_v11 = vld [vmem:[%s1959_s1 + $0x64] ss:$8 sps:$4 sm:$0xff]  }
  0x1a   :  { %1353 = vmatprep.subr.bf16.mxu1 %v1453_v25  ;;  %v1503_v7 = vld [vmem:[%s1958_s0 + $0x1b8] sm:$0xff]  }
  0x1b   :  { %v1510_v12 = vld [vmem:[%s1959_s1 + $0x54] ss:$8 sps:$4 sm:$0xff]   ;;  %v1512_v14 = vld [vmem:[%s1959_s1 + $0x50] ss:$8 sps:$4 sm:$0xff]  }
  0x1c   :  { %1326 = vmatpush3.bf16.msra.mxu0 %v1454_v26  ;;  %v1513_v13 = vld [vmem:[%s1959_s1 + $0x74] ss:$8 sps:$4 sm:$0xff]   ;;  %v1515_v15 = vld [vmem:[%s1959_s1 + $0x70] ss:$8 sps:$4 sm:$0xff]  }
  0x1d   :  { %1354 = vmatpush3.bf16.msra.mxu1 %v1455_v27  ;;  %1327 = vmatprep.subr.bf16.mxu0 %v1456_v28 }
  0x1e   :  { %1355 = vmatprep.subr.bf16.mxu1 %v1457_v29 }
  0x20   :  { %1328 = vmatpush3.bf16.msra.mxu0 %v1458_v30 }
  0x21   :  { %1356 = vmatpush3.bf16.msra.mxu1 %v1459_v31  ;;  %1369 = vmatprep.subr.bf16.mxu0 %v1466_v36 }
  0x22   :  { %1397 = vmatprep.subr.bf16.mxu1 %v1468_v38 }
  0x23   :  { %203 = vmatmul.mubr.bf16.vlgmr.msra.gmra.mrb[0].mxu0 %v1460_v32 }
  0x24   :  { %438 = vmatmul.mubr.bf16.vlgmr.msra.gmra.mrb[0].mxu1 %v1463_v34  ;;  %1370 = vmatpush3.bf16.msra.mxu0 %v1467_v37 }
  0x25   :  { %1398 = vmatpush3.bf16.msra.mxu1 %v1469_v39  ;;  %1371 = vmatprep.subr.bf16.mxu0 %v1470_v40 }
  0x26   :  { %1399 = vmatprep.subr.bf16.mxu1 %v1472_v42  ;;  %210 = vmatprep.mubr.bf16.mxu0 %v1478_v48 }
  0x27   :  { %445 = vmatprep.mubr.bf16.mxu1 %v1485_v54 }
  0x28   :  { %1372 = vmatpush3.bf16.msra.mxu0 %v1471_v41 }
  0x29   :  { %1400 = vmatpush3.bf16.msra.mxu1 %v1473_v43  ;;  %1373 = vmatprep.subr.bf16.mxu0 %v1474_v44 }
  0x2a   :  { %1401 = vmatprep.subr.bf16.mxu1 %v1476_v46 }
  0x2b   :  { %211 = vmatmul.mubr.bf16.gmra.mrb[4].mxu0 %v1481_v50 }
  0x2c   :  { %1374 = vmatpush3.bf16.msra.mxu0 %v1475_v45  ;;  %446 = vmatmul.mubr.bf16.gmra.mrb[4].mxu1 %v1488_v56 }
  0x2d   :  { %1402 = vmatpush3.bf16.msra.mxu1 %v1477_v47  ;;  %1375 = vmatprep.subr.bf16.mxu0 %v1480_v49 }
  0x2e   :  { %1403 = vmatprep.subr.bf16.mxu1 %v1483_v52  ;;  %672 = vmatprep.mubr.bf16.mxu0 %v1506_v9 }
  0x2f   :  { %907 = vmatprep.mubr.bf16.mxu1 %v1509_v11 }
  0x30   :  { %1376 = vmatpush3.bf16.msra.mxu0 %v1482_v51 }
  0x31   :  { %1404 = vmatpush3.bf16.msra.mxu1 %v1484_v53  ;;  %1377 = vmatprep.subr.bf16.mxu0 %v1487_v55 }
  0x32   :  { %1405 = vmatprep.subr.bf16.mxu1 %v1490_v58 }
  0x34   :  { %1378 = vmatpush3.bf16.msra.mxu0 %v1489_v57 }
  0x35   :  { %1406 = vmatpush3.bf16.msra.mxu1 %v1491_v59  ;;  %1379 = vmatprep.subr.bf16.mxu0 %v1492_v60 }
  0x36   :  { %1407 = vmatprep.subr.bf16.mxu1 %v1494_v62 }
  0x38   :  { %1380 = vmatpush3.bf16.msra.mxu0 %v1493_v61 }
  0x39   :  { %1408 = vmatpush3.bf16.msra.mxu1 %v1495_v63  ;;  %1381 = vmatprep.subr.bf16.mxu0 %v1496_v0 }
  0x3a   :  { %1409 = vmatprep.subr.bf16.mxu1 %v1498_v2 }
  0x3c   :  { %1382 = vmatpush3.bf16.msra.mxu0 %v1497_v1 }
  0x3d   :  { %1410 = vmatpush3.bf16.msra.mxu1 %v1499_v3  ;;  %1383 = vmatprep.subr.bf16.mxu0 %v1500_v4 }
  0x3e   :  { %1411 = vmatprep.subr.bf16.mxu1 %v1502_v6 }
  0x40   :  { %1384 = vmatpush3.bf16.msra.mxu0 %v1501_v5 }
  0x41   :  { %1412 = vmatpush3.bf16.msra.mxu1 %v1503_v7 }
  0x43   :  { %673 = vmatmul.mubr.bf16.vlgmr.msra.gmra.mrb[8].mxu0 %v1504_v8 }
  0x44   :  { %908 = vmatmul.mubr.bf16.vlgmr.msra.gmra.mrb[8].mxu1 %v1507_v10  ;;  %680 = vmatprep.mubr.bf16.mxu0 %v1510_v12 }
  0x45   :  { %915 = vmatprep.mubr.bf16.mxu1 %v1513_v13 }
  0x4b   :  { %681 = vmatmul.mubr.bf16.gmra.mrb[12].mxu0 %v1512_v14 }
  0x4c   :  { %916 = vmatmul.mubr.bf16.gmra.mrb[12].mxu1 %v1515_v15 }
  0xf6   :  { %v1329_v16 = vpop.f32.mrb[0].mxu0 }
  0xf7   :  { %v1357_v17 = vpop.f32.mrb[0].mxu1  ;;  %v1330_v18 = vpop.f32.mrb[1].mxu0 }
  0xf8   :  { %v1790_v19 = vadd.f32 %v1330_v18, %v1329_v16  ;;  %v1358_v20 = vpop.f32.mrb[1].mxu1  ;;  %v1332_v21 = vpop.f32.mrb[2].mxu0  ;;  %v1524_v16 = vmov 0  }
  0xf9   :  { %v1792_v22 = vadd.f32 %v1358_v20, %v1357_v17  ;;  %v1360_v23 = vpop.f32.mrb[2].mxu1  ;;  %v1333_v24 = vpop.f32.mrb[3].mxu0  ;;  %1426 = vset.pattern.permute.xlu0 %v1524_v16  ;;  %1427 = vset.pattern.permute.xlu1 %v1524_v16 }
  0xfa   :  { %v1794_v25 = vadd.f32 %v1333_v24, %v1332_v21  ;;  %v1361_v26 = vpop.f32.mrb[3].mxu1  ;;  %223 = vadd.xlane.f32.xlu0 %v1790_v19  ;;  %v235_v31 = vmul.f32 %v1790_v19, %v1790_v19 }
  0xfb   :  { %v1797_v27 = vadd.f32 %v1361_v26, %v1360_v23  ;;  %v470_v37 = vmul.f32 %v1792_v22, %v1792_v22 }
  0xfc   :  { %v236_v28 = vmul.f32 %v1794_v25, %v1794_v25 }
  0xfd   :  { %460 = vadd.xlane.f32.xlu1 %v1797_v27  ;;  %v471_v29 = vmul.f32 %v1797_v27, %v1797_v27 }
  0xfe   :  { %458 = vadd.xlane.f32.xlu0 %v1792_v22  ;;  %v1335_v30 = vpop.f32.mrb[4].mxu0 }
  0xff   :  { %v1336_v32 = vpop.f32.mrb[5].mxu0  ;;  %v1363_v38 = vpop.f32.mrb[4].mxu1 }
 0x100   :  { %v1808_v33 = vadd.f32 %v1336_v32, %v1335_v30  ;;  %v1338_v34 = vpop.f32.mrb[6].mxu0  ;;  %v1364_v39 = vpop.f32.mrb[5].mxu1 }
 0x101   :  { %241 = vadd.xlane.f32.xlu1 %v236_v28  ;;  %v1339_v35 = vpop.f32.mrb[7].mxu0  ;;  %v1815_v40 = vadd.f32 %v1364_v39, %v1363_v38  ;;  %v1366_v41 = vpop.f32.mrb[6].mxu1 }
 0x102   :  { %225 = vadd.xlane.f32.xlu0 %v1794_v25  ;;  %v1810_v36 = vadd.f32 %v1339_v35, %v1338_v34  ;;  %v1367_v42 = vpop.f32.mrb[7].mxu1  ;;  %v237_v44 = vmul.f32 %v1808_v33, %v1808_v33 }
 0x103   :  { %v1818_v43 = vadd.f32 %v1367_v42, %v1366_v41  ;;  %v472_v46 = vmul.f32 %v1815_v40, %v1815_v40 }
 0x104   :  { %v238_v45 = vmul.f32 %v1810_v36, %v1810_v36 }
 0x105   :  { %476 = vadd.xlane.f32.xlu1 %v471_v29  ;;  %v473_v47 = vmul.f32 %v1818_v43, %v1818_v43 }
 0x106   :  { %239 = vadd.xlane.f32.xlu0 %v235_v31 }
 0x109   :  { %227 = vadd.xlane.f32.xlu1 %v1808_v33 }
 0x10a   :  { %474 = vadd.xlane.f32.xlu0 %v470_v37 }
 0x10d   :  { %229 = vadd.xlane.f32.xlu1 %v1810_v36 }
 0x10e   :  { %462 = vadd.xlane.f32.xlu0 %v1815_v40 }
 0x111   :  { %464 = vadd.xlane.f32.xlu1 %v1818_v43 }
 0x112   :  { %243 = vadd.xlane.f32.xlu0 %v237_v44 }
 0x115   :  { %245 = vadd.xlane.f32.xlu1 %v238_v45 }
 0x116   :  { %478 = vadd.xlane.f32.xlu0 %v472_v46  ;;  %v1385_v48 = vpop.f32.mrb[8].mxu0 }
 0x117   :  { %v1386_v49 = vpop.f32.mrb[9].mxu0  ;;  %v1413_v50 = vpop.f32.mrb[8].mxu1 }
 0x118   :  { %v1830_v51 = vadd.f32 %v1386_v49, %v1385_v48  ;;  %v1388_v52 = vpop.f32.mrb[10].mxu0  ;;  %v1414_v53 = vpop.f32.mrb[9].mxu1 }
 0x119   :  { %480 = vadd.xlane.f32.xlu1 %v473_v47  ;;  %v1832_v54 = vadd.f32 %v1414_v53, %v1413_v50  ;;  %v1389_v55 = vpop.f32.mrb[11].mxu0  ;;  %v1416_v56 = vpop.f32.mrb[10].mxu1 }
 0x11a   :  { %v1834_v57 = vadd.f32 %v1389_v55, %v1388_v52  ;;  %v1417_v58 = vpop.f32.mrb[11].mxu1  ;;  %693 = vadd.xlane.f32.xlu0 %v1830_v51  ;;  %v705_v63 = vmul.f32 %v1830_v51, %v1830_v51 }
 0x11b   :  { %v1837_v59 = vadd.f32 %v1417_v58, %v1416_v56  ;;  %v940_v10 = vmul.f32 %v1832_v54, %v1832_v54 }
 0x11c   :  { %v706_v6 = vmul.f32 %v1834_v57, %v1834_v57 }
 0x11d   :  { %695 = vadd.xlane.f32.xlu1 %v1834_v57  ;;  %v941_v11 = vmul.f32 %v1837_v59, %v1837_v59 }
 0x11e   :  { %928 = vadd.xlane.f32.xlu0 %v1832_v54  ;;  %v1391_v60 = vpop.f32.mrb[12].mxu0 }
 0x11f   :  { %v1392_v61 = vpop.f32.mrb[13].mxu0  ;;  %v1419_v62 = vpop.f32.mrb[12].mxu1 }
 0x120   :  { %v1844_v0 = vadd.f32 %v1392_v61, %v1391_v60  ;;  %v1394_v1 = vpop.f32.mrb[14].mxu0  ;;  %v1420_v2 = vpop.f32.mrb[13].mxu1 }
 0x121   :  { %930 = vadd.xlane.f32.xlu1 %v1837_v59  ;;  %v1395_v3 = vpop.f32.mrb[15].mxu0  ;;  %v1846_v4 = vadd.f32 %v1420_v2, %v1419_v62  ;;  %v1422_v5 = vpop.f32.mrb[14].mxu1 }
 0x122   :  { %709 = vadd.xlane.f32.xlu0 %v705_v63  ;;  %v1850_v7 = vadd.f32 %v1395_v3, %v1394_v1  ;;  %v1423_v8 = vpop.f32.mrb[15].mxu1  ;;  %v707_v12 = vmul.f32 %v1844_v0, %v1844_v0 }
 0x123   :  { %v1852_v9 = vadd.f32 %v1423_v8, %v1422_v5  ;;  %v942_v14 = vmul.f32 %v1846_v4, %v1846_v4 }
 0x124   :  { %v708_v13 = vmul.f32 %v1850_v7, %v1850_v7 }
 0x125   :  { %711 = vadd.xlane.f32.xlu1 %v706_v6  ;;  %v943_v15 = vmul.f32 %v1852_v9, %v1852_v9 }
 0x126   :  { %944 = vadd.xlane.f32.xlu0 %v940_v10 }
 0x129   :  { %946 = vadd.xlane.f32.xlu1 %v941_v11 }
 0x12a   :  { %697 = vadd.xlane.f32.xlu0 %v1844_v0 }
 0x12d   :  { %699 = vadd.xlane.f32.xlu1 %v1850_v7 }
 0x12e   :  { %932 = vadd.xlane.f32.xlu0 %v1846_v4 }
 0x131   :  { %934 = vadd.xlane.f32.xlu1 %v1852_v9 }
 0x132   :  { %713 = vadd.xlane.f32.xlu0 %v707_v12 }
 0x135   :  { %715 = vadd.xlane.f32.xlu1 %v708_v13 }
 0x136   :  { %948 = vadd.xlane.f32.xlu0 %v942_v14 }
 0x139   :  { %950 = vadd.xlane.f32.xlu1 %v943_v15 }
 0x187   :  { %v224_v17 = vpop.xlane.xlu0 %223 }
 0x18a   :  { %v461_v18 = vpop.xlane.xlu1 %460 }
 0x18b   :  { %v459_v20 = vpop.xlane.xlu0 %458 }
 0x18c   :  { %v466_v42 = vadd.f32 %v459_v20, %v224_v17 }
 0x18e   :  { %v242_v21 = vpop.xlane.xlu1 %241 }
 0x18f   :  { %v226_v23 = vpop.xlane.xlu0 %225 }
 0x190   :  { %v467_v45 = vadd.f32 %v461_v18, %v226_v23 }
 0x192   :  { %v477_v24 = vpop.xlane.xlu1 %476 }
 0x193   :  { %v240_v26 = vpop.xlane.xlu0 %239  ;;  %v483_v56 = vadd.f32 %v477_v24, %v242_v21 }
 0x196   :  { %v228_v28 = vpop.xlane.xlu1 %227 }
 0x197   :  { %v475_v29 = vpop.xlane.xlu0 %474 }
 0x198   :  { %v482_v52 = vadd.f32 %v475_v29, %v240_v26 }
 0x19a   :  { %v230_v30 = vpop.xlane.xlu1 %229 }
 0x19b   :  { %v463_v31 = vpop.xlane.xlu0 %462 }
 0x19c   :  { %v468_v14 = vadd.f32 %v463_v31, %v228_v28 }
 0x19e   :  { %v465_v32 = vpop.xlane.xlu1 %464 }
 0x19f   :  { %v244_v34 = vpop.xlane.xlu0 %243  ;;  %v469_v18 = vadd.f32 %v465_v32, %v230_v30  ;;  %v981_v30 = vld [vmem:[%s1960_s2] sm:$0xff] }
 0x1a2   :  { %v246_v35 = vpop.xlane.xlu1 %245 }
 0x1a3   :  { %v479_v37 = vpop.xlane.xlu0 %478 }
 0x1a6   :  { %v481_v38 = vpop.xlane.xlu1 %480 }
 0x1a7   :  { %v694_v39 = vpop.xlane.xlu0 %693 }
 0x1a8   :  { %v701_v46 = vadd.f32 %v694_v39, %v466_v42  ;;  %v484_v39 = vadd.f32 %v479_v37, %v244_v34  ;;  %v982_v34 = vld [vmem:[%s1960_s2 + $0x8] sm:$0xff] }
 0x1aa   :  { %v696_v41 = vpop.xlane.xlu1 %695 }
 0x1ab   :  { %v929_v44 = vpop.xlane.xlu0 %928  ;;  %v702_v48 = vadd.f32 %v696_v41, %v467_v45 }
 0x1ac   :  { %v936_v49 = vadd.f32 %v929_v44, %v701_v46  ;;  %v485_v44 = vadd.f32 %v481_v38, %v246_v35 }
 0x1ae   :  { %v931_v47 = vpop.xlane.xlu1 %930  ;;  %v957_v58 = vmul.f32 0.001953125, %v936_v49 }
 0x1af   :  { %v710_v50 = vpop.xlane.xlu0 %709  ;;  %v937_v53 = vadd.f32 %v931_v47, %v702_v48 }
 0x1b0   :  { %v717_v60 = vadd.f32 %v710_v50, %v482_v52  ;;  %v965_v3 = vmul.f32 %v957_v58, %v957_v58 }
 0x1b1   :  { %v958_v62 = vmul.f32 0.001953125, %v937_v53 }
 0x1b2   :  { %v712_v55 = vpop.xlane.xlu1 %711 }
 0x1b3   :  { %v945_v61 = vpop.xlane.xlu0 %944  ;;  %v718_v63 = vadd.f32 %v712_v55, %v483_v56  ;;  %v966_v10 = vmul.f32 %v958_v62, %v958_v62 }
 0x1b4   :  { %v952_v1 = vadd.f32 %v945_v61, %v717_v60 }
 0x1b6   :  { %v947_v2 = vpop.xlane.xlu1 %946  ;;  %v961_v5 = vmul.f32 0.001953125, %v952_v1 }
 0x1b7   :  { %v953_v6 = vadd.f32 %v947_v2, %v718_v63  ;;  %v698_v8 = vpop.xlane.xlu0 %697  ;;  %v989_v2 = vld [vmem:[%s1961_s3] sm:$0xff] }
 0x1b8   :  { %v969_v11 = vsub.f32 %v961_v5, %v965_v3  ;;  %v703_v21 = vadd.f32 %v698_v8, %v468_v14  ;;  %v990_v8 = vld [vmem:[%s1961_s3 + $0x8] sm:$0xff]  ;;  %v984_v14 = vld [vmem:[%s1960_s2 + $0x18] sm:$0xff] }
 0x1b9   :  { %v962_v12 = vmul.f32 0.001953125, %v953_v6 }
 0x1ba   :  { %v700_v13 = vpop.xlane.xlu1 %699  ;;  %v973_v15 = vadd.f32 1e-05, %v969_v11 }
 0x1bb   :  { %v970_v16 = vsub.f32 %v962_v12, %v966_v10  ;;  %v933_v17 = vpop.xlane.xlu0 %932  ;;  %v704_v24 = vadd.f32 %v700_v13, %v469_v18 }
 0x1bc   :  { %1516 = vrsqrt.f32 %v973_v15  ;;  %v938_v26 = vadd.f32 %v933_v17, %v703_v21 }
 0x1bd   :  { %v974_v20 = vadd.f32 1e-05, %v970_v16  ;;  %v991_v16 = vld [vmem:[%s1961_s3 + $0x10] sm:$0xff] }
 0x1be   :  { %v935_v23 = vpop.xlane.xlu1 %934  ;;  %v959_v45 = vmul.f32 0.001953125, %v938_v26 }
 0x1bf   :  { %1518 = vrsqrt.f32 %v974_v20  ;;  %v714_v29 = vpop.xlane.xlu0 %713  ;;  %v939_v41 = vadd.f32 %v935_v23, %v704_v24  ;;  %v992_v20 = vld [vmem:[%s1961_s3 + $0x18] sm:$0xff] }
 0x1c0   :  { %v719_v46 = vadd.f32 %v714_v29, %v484_v39  ;;  %v967_v50 = vmul.f32 %v959_v45, %v959_v45 }
 0x1c1   :  { %v960_v28 = vmul.f32 0.001953125, %v939_v41 }
 0x1c2   :  { %v716_v42 = vpop.xlane.xlu1 %715 }
 0x1c3   :  { %v949_v47 = vpop.xlane.xlu0 %948  ;;  %v720_v31 = vadd.f32 %v716_v42, %v485_v44  ;;  %v968_v38 = vmul.f32 %v960_v28, %v960_v28 }
 0x1c4   :  { %v954_v48 = vadd.f32 %v949_v47, %v719_v46 }
 0x1c6   :  { %v951_v32 = vpop.xlane.xlu1 %950  ;;  %v1517_v49 = vpop.eup %1516  ;;  %v963_v52 = vmul.f32 0.001953125, %v954_v48 }
 0x1c7   :  { %v955_v53 = vadd.f32 %v951_v32, %v720_v31  ;;  %v985_v35 = vmul.f32 %v1517_v49, %v981_v30 }
 0x1c8   :  { %v971_v55 = vsub.f32 %v963_v52, %v967_v50 }
 0x1c9   :  { %v1519_v37 = vpop.eup %1518  ;;  %v964_v56 = vmul.f32 0.001953125, %v955_v53  ;;  %1019 = vperm.xlu0 %1426, %v985_v35   ;;  %v993_v61 = vmul.f32 %v985_v35, %v957_v58  ;;  %v983_v58 = vld [vmem:[%s1960_s2 + $0x10] sm:$0xff] }
 0x1ca   :  { %v986_v60 = vmul.f32 %v1519_v37, %v982_v34  ;;  %v975_v63 = vadd.f32 1e-05, %v971_v55 }
 0x1cb   :  { %v972_v1 = vsub.f32 %v964_v56, %v968_v38  ;;  %v997_v5 = vsub.f32 %v989_v2, %v993_v61 }
 0x1cc   :  { %1024 = vperm.xlu1 %1427, %v986_v60   ;;  %1520 = vrsqrt.f32 %v975_v63  ;;  %v994_v6 = vmul.f32 %v986_v60, %v958_v62 }
 0x1cd   :  { %v976_v3 = vadd.f32 1e-05, %v972_v1 }
 0x1ce   :  { %v998_v10 = vsub.f32 %v990_v8, %v994_v6 }
 0x1cf   :  { %1522 = vrsqrt.f32 %v976_v3 }
 0x1d0   :  { %1055 = vperm.xlu1 %1427, %v997_v5  }
 0x1d4   :  { %1060 = vperm.xlu1 %1427, %v998_v10  }
 0x1d6   :  { %v1521_v11 = vpop.eup %1520 }
 0x1d7   :  { %v987_v12 = vmul.f32 %v1521_v11, %v983_v58 }
 0x1d9   :  { %v1523_v13 = vpop.eup %1522  ;;  %1029 = vperm.xlu1 %1427, %v987_v12   ;;  %v995_v15 = vmul.f32 %v987_v12, %v959_v45 }
 0x1da   :  { %v988_v62 = vmul.f32 %v1523_v13, %v984_v14 }
 0x1db   :  { %v999_v17 = vsub.f32 %v991_v16, %v995_v15 }
 0x1dc   :  { %v996_v18 = vmul.f32 %v988_v62, %v960_v28 }
 0x1dd   :  { %1034 = vperm.xlu1 %1427, %v988_v62  }
 0x1de   :  { %v1000_v21 = vsub.f32 %v992_v20, %v996_v18 }
 0x1e1   :  { %1065 = vperm.xlu1 %1427, %v999_v17  }
 0x1e5   :  { %1070 = vperm.xlu1 %1427, %v1000_v21  }
 0x248   :  { %v1020_v23 = vpop.permute.xlu0 %1019 }
 0x249   :  { %v1037_v26 = vmul.f32 %v1790_v19, %v1020_v23  ;;  %v1038_v29 = vmul.f32 %v1792_v22, %v1020_v23  ;;  %v1039_v39 = vmul.f32 %v1830_v51, %v1020_v23  ;;  %v1040_v41 = vmul.f32 %v1832_v54, %v1020_v23 }
 0x24b   :  { %v1025_v24 = vpop.permute.xlu1 %1024 }
 0x24c   :  { %v1041_v28 = vmul.f32 %v1794_v25, %v1025_v24  ;;  %v1042_v31 = vmul.f32 %v1797_v27, %v1025_v24  ;;  %v1043_v48 = vmul.f32 %v1834_v57, %v1025_v24  ;;  %v1044_v30 = vmul.f32 %v1837_v59, %v1025_v24 }
 0x24f   :  { %v1056_v42 = vpop.permute.xlu1 %1055 }
 0x250   :  { %v1073_v44 = vadd.f32 %v1056_v42, %v1037_v26  ;;  %v1074_v45 = vadd.f32 %v1056_v42, %v1038_v29  ;;  %v1075_v46 = vadd.f32 %v1056_v42, %v1039_v39  ;;  %v1076_v47 = vadd.f32 %v1056_v42, %v1040_v41 }
 0x252   :  { %v1089_v19 = vmax.f32 %v1073_v44, 0.0  ;;  %v1090_v32 = vmax.f32 %v1074_v45, 0.0  ;;  %v1091_v22 = vmax.f32 %v1075_v46, 0.0  ;;  %v1092_v49 = vmax.f32 %v1076_v47, 0.0 }
 0x253   :  { %v1061_v51 = vpop.permute.xlu1 %1060 }
 0x254   :  { %1105 = vst [vmem:[%s1962_s4] sm:$0xff] %v1089_v19  ;;  %1106 = vst [vmem:[%s1962_s4 + $0x8] sm:$0xff] %v1090_v32  ;;  %v1077_v25 = vadd.f32 %v1061_v51, %v1041_v28  ;;  %v1078_v27 = vadd.f32 %v1061_v51, %v1042_v31  ;;  %v1079_v54 = vadd.f32 %v1061_v51, %v1043_v48 }
 0x255   :  { %1107 = vst [vmem:[%s1962_s4 + $0x10] sm:$0xff] %v1091_v22  ;;  %1108 = vst [vmem:[%s1962_s4 + $0x18] sm:$0xff] %v1092_v49  ;;  %v1080_v57 = vadd.f32 %v1061_v51, %v1044_v30 }
 0x256   :  { %v1093_v59 = vmax.f32 %v1077_v25, 0.0  ;;  %v1094_v50 = vmax.f32 %v1078_v27, 0.0  ;;  %v1095_v52 = vmax.f32 %v1079_v54, 0.0 }
 0x257   :  { %v1096_v53 = vmax.f32 %v1080_v57, 0.0 }
 0x258   :  { %1109 = vst [vmem:[%s1962_s4 + $0x20] sm:$0xff] %v1093_v59  ;;  %1110 = vst [vmem:[%s1962_s4 + $0x28] sm:$0xff] %v1094_v50  ;;  %v1030_v34 = vpop.permute.xlu1 %1029 }
 0x259   :  { %1111 = vst [vmem:[%s1962_s4 + $0x30] sm:$0xff] %v1095_v52  ;;  %1112 = vst [vmem:[%s1962_s4 + $0x38] sm:$0xff] %v1096_v53  ;;  %v1045_v37 = vmul.f32 %v1808_v33, %v1030_v34  ;;  %v1046_v38 = vmul.f32 %v1815_v40, %v1030_v34  ;;  %v1047_v55 = vmul.f32 %v1844_v0, %v1030_v34 }
 0x25a   :  { %v1048_v56 = vmul.f32 %v1846_v4, %v1030_v34 }
 0x25c   :  { %v1035_v35 = vpop.permute.xlu1 %1034 }
 0x25d   :  { %v1049_v3 = vmul.f32 %v1810_v36, %v1035_v35  ;;  %v1050_v5 = vmul.f32 %v1818_v43, %v1035_v35  ;;  %v1051_v6 = vmul.f32 %v1850_v7, %v1035_v35  ;;  %v1052_v8 = vmul.f32 %v1852_v9, %v1035_v35 }
 0x260   :  { %v1066_v60 = vpop.permute.xlu1 %1065 }
 0x261   :  { %v1081_v61 = vadd.f32 %v1066_v60, %v1045_v37  ;;  %v1082_v63 = vadd.f32 %v1066_v60, %v1046_v38  ;;  %v1083_v1 = vadd.f32 %v1066_v60, %v1047_v55  ;;  %v1084_v2 = vadd.f32 %v1066_v60, %v1048_v56 }
 0x263   :  { %v1097_v33 = vmax.f32 %v1081_v61, 0.0  ;;  %v1098_v10 = vmax.f32 %v1082_v63, 0.0  ;;  %v1099_v40 = vmax.f32 %v1083_v1, 0.0  ;;  %v1100_v58 = vmax.f32 %v1084_v2, 0.0 }
 0x264   :  { %v1071_v0 = vpop.permute.xlu1 %1070 }
 0x265   :  { %1113 = vst [vmem:[%s1962_s4 + $0x40] sm:$0xff] %v1097_v33  ;;  %1114 = vst [vmem:[%s1962_s4 + $0x48] sm:$0xff] %v1098_v10  ;;  %v1085_v36 = vadd.f32 %v1071_v0, %v1049_v3  ;;  %v1086_v43 = vadd.f32 %v1071_v0, %v1050_v5  ;;  %v1087_v4 = vadd.f32 %v1071_v0, %v1051_v6 }
 0x266   :  { %1115 = vst [vmem:[%s1962_s4 + $0x50] sm:$0xff] %v1099_v40  ;;  %1116 = vst [vmem:[%s1962_s4 + $0x58] sm:$0xff] %v1100_v58  ;;  %v1088_v7 = vadd.f32 %v1071_v0, %v1052_v8 }
 0x267   :  { %v1101_v9 = vmax.f32 %v1085_v36, 0.0  ;;  %v1102_v11 = vmax.f32 %v1086_v43, 0.0  ;;  %v1103_v12 = vmax.f32 %v1087_v4, 0.0 }
 0x268   :  { %v1104_v13 = vmax.f32 %v1088_v7, 0.0 }
 0x269   :  { %1117 = vst [vmem:[%s1962_s4 + $0x60] sm:$0xff] %v1101_v9  ;;  %1118 = vst [vmem:[%s1962_s4 + $0x68] sm:$0xff] %v1102_v11 }
 0x26a   :  { %1119 = vst [vmem:[%s1962_s4 + $0x70] sm:$0xff] %v1103_v12  ;;  %1120 = vst [vmem:[%s1962_s4 + $0x78] sm:$0xff] %v1104_v13 }

// kernel: generator_forward.10
= control target key start
LH: loop header
LB: loop body
LE: loop exit
PB: predicated region body
PF: predicated region fallthrough
CT: control target
= control target key end

     0   :  { %v1972_v1 = vmov 0   ;;  %s2746_s0 = inlined_call_operand.vmem [shape: bf16[4,128,512], index: 0, kind: input, shape index: {}]   ;;  %s2747_s1 = inlined_call_operand.vmem [shape: bf16[4,16,128], index: 1, kind: input, shape index: {}]   ;;  %s2748_s2 = inlined_call_operand.vmem [shape: f32[16,1], index: 2, kind: input, shape index: {}]   ;;  %s2749_s3 = inlined_call_operand.vmem [shape: f32[16,1], index: 3, kind: input, shape index: {}]   ;;  %s2750_s4 = inlined_call_operand.vmem [shape: f32[16,2048], index: 4, kind: output, shape index: {}]  }
   0x1   :  { %v1772_v0 = vld [vmem:[%s2746_s0 + $0x4] ss:$16 sps:$4 sm:$0xff]   ;;  %250 = vmatprep.mubr.bf16.mxu0 %v1972_v1  ;;  %293 = vmatprep.mubr.bf16.mxu1 %v1972_v1  ;;  %v1774_v2 = vld [vmem:[%s2746_s0 + $0xc] ss:$16 sps:$4 sm:$0xff]   ;;  %v1776_v3 = vld [vmem:[%s2746_s0] ss:$16 sps:$4 sm:$0xff]  }
   0x2   :  { %1770 = vset.pattern.permute.xlu0 %v1972_v1  ;;  %1771 = vset.pattern.permute.xlu1 %v1972_v1  ;;  %v1777_v4 = vld [vmem:[%s2746_s0 + $0x8] ss:$16 sps:$4 sm:$0xff]   ;;  %v1778_v5 = vld [vmem:[%s2746_s0 + $0x24] ss:$16 sps:$4 sm:$0xff]   ;;  %v1780_v6 = vld [vmem:[%s2746_s0 + $0x2c] ss:$16 sps:$4 sm:$0xff]  }
   0x3   :  { %218 = vmatprep.subr.bf16.mxu0 %v1772_v0  ;;  %261 = vmatprep.subr.bf16.mxu1 %v1774_v2  ;;  %v1782_v7 = vld [vmem:[%s2746_s0 + $0x20] ss:$16 sps:$4 sm:$0xff]   ;;  %v1783_v8 = vld [vmem:[%s2746_s0 + $0x28] ss:$16 sps:$4 sm:$0xff]   ;;  %v1784_v9 = vld [vmem:[%s2746_s0 + $0x44] ss:$16 sps:$4 sm:$0xff]  }
   0x4   :  { %219 = vmatpush1.bf16.msra.mxu0 %v1776_v3  ;;  %262 = vmatpush1.bf16.msra.mxu1 %v1777_v4  ;;  %v1786_v10 = vld [vmem:[%s2746_s0 + $0x4c] ss:$16 sps:$4 sm:$0xff]   ;;  %v1788_v11 = vld [vmem:[%s2746_s0 + $0x40] ss:$16 sps:$4 sm:$0xff]   ;;  %v1789_v12 = vld [vmem:[%s2746_s0 + $0x48] ss:$16 sps:$4 sm:$0xff]  }
   0x5   :  { %220 = vmatprep.subr.bf16.mxu0 %v1778_v5  ;;  %263 = vmatprep.subr.bf16.mxu1 %v1780_v6  ;;  %v1790_v13 = vld [vmem:[%s2746_s0 + $0x64] ss:$16 sps:$4 sm:$0xff]   ;;  %v1792_v14 = vld [vmem:[%s2746_s0 + $0x6c] ss:$16 sps:$4 sm:$0xff]   ;;  %v1794_v15 = vld [vmem:[%s2746_s0 + $0x60] ss:$16 sps:$4 sm:$0xff]  }
   0x6   :  { %v1795_v16 = vld [vmem:[%s2746_s0 + $0x68] ss:$16 sps:$4 sm:$0xff]   ;;  %v1796_v17 = vld [vmem:[%s2746_s0 + $0x84] ss:$16 sps:$4 sm:$0xff]   ;;  %v1798_v18 = vld [vmem:[%s2746_s0 + $0x8c] ss:$16 sps:$4 sm:$0xff]  }
   0x7   :  { %v1800_v19 = vld [vmem:[%s2746_s0 + $0x80] ss:$16 sps:$4 sm:$0xff]   ;;  %v1801_v20 = vld [vmem:[%s2746_s0 + $0x88] ss:$16 sps:$4 sm:$0xff]   ;;  %v1802_v21 = vld [vmem:[%s2746_s0 + $0xa4] ss:$16 sps:$4 sm:$0xff]  }
   0x8   :  { %221 = vmatpush1.bf16.msra.mxu0 %v1782_v7  ;;  %264 = vmatpush1.bf16.msra.mxu1 %v1783_v8  ;;  %v1804_v22 = vld [vmem:[%s2746_s0 + $0xac] ss:$16 sps:$4 sm:$0xff]   ;;  %v1806_v23 = vld [vmem:[%s2746_s0 + $0xa0] ss:$16 sps:$4 sm:$0xff]   ;;  %v1807_v24 = vld [vmem:[%s2746_s0 + $0xa8] ss:$16 sps:$4 sm:$0xff]  }
   0x9   :  { %222 = vmatprep.subr.bf16.mxu0 %v1784_v9  ;;  %265 = vmatprep.subr.bf16.mxu1 %v1786_v10  ;;  %v1808_v25 = vld [vmem:[%s2746_s0 + $0xc4] ss:$16 sps:$4 sm:$0xff]   ;;  %v1810_v26 = vld [vmem:[%s2746_s0 + $0xcc] ss:$16 sps:$4 sm:$0xff]   ;;  %v1812_v27 = vld [vmem:[%s2746_s0 + $0xc0] ss:$16 sps:$4 sm:$0xff]  }
   0xa   :  { %v1813_v28 = vld [vmem:[%s2746_s0 + $0xc8] ss:$16 sps:$4 sm:$0xff]   ;;  %v1814_v29 = vld [vmem:[%s2746_s0 + $0xe4] ss:$16 sps:$4 sm:$0xff]   ;;  %v1816_v30 = vld [vmem:[%s2746_s0 + $0xec] ss:$16 sps:$4 sm:$0xff]  }
   0xb   :  { %v1818_v31 = vld [vmem:[%s2746_s0 + $0xe0] ss:$16 sps:$4 sm:$0xff]   ;;  %v1819_v32 = vld [vmem:[%s2746_s0 + $0xe8] ss:$16 sps:$4 sm:$0xff]   ;;  %v1823_v33 = vld [vmem:[%s2746_s0 + $0x104] ss:$16 sps:$4 sm:$0xff]  }
   0xc   :  { %223 = vmatpush1.bf16.msra.mxu0 %v1788_v11  ;;  %266 = vmatpush1.bf16.msra.mxu1 %v1789_v12  ;;  %v1826_v34 = vld [vmem:[%s2746_s0 + $0x10c] ss:$16 sps:$4 sm:$0xff]   ;;  %v1820_v35 = vld [vmem:[%s2747_s1] sm:$0xff]   ;;  %v1824_v37 = vld [vmem:[%s2746_s0 + $0x108] ss:$16 sps:$4 sm:$0xff]  }
   0xd   :  { %224 = vmatprep.subr.bf16.mxu0 %v1790_v13  ;;  %267 = vmatprep.subr.bf16.mxu1 %v1792_v14  ;;  %v1821_v36 = vld [vmem:[%s2746_s0 + $0x100] ss:$16 sps:$4 sm:$0xff]   ;;  %v1829_v38 = vld [vmem:[%s2746_s0 + $0x124] ss:$16 sps:$4 sm:$0xff]   ;;  %v1832_v39 = vld [vmem:[%s2746_s0 + $0x12c] ss:$16 sps:$4 sm:$0xff]  }
   0xe   :  { %v1827_v40 = vld [vmem:[%s2746_s0 + $0x120] ss:$16 sps:$4 sm:$0xff]   ;;  %v1830_v41 = vld [vmem:[%s2746_s0 + $0x128] ss:$16 sps:$4 sm:$0xff]   ;;  %v1835_v42 = vld [vmem:[%s2746_s0 + $0x144] ss:$16 sps:$4 sm:$0xff]  }
   0xf   :  { %v1838_v43 = vld [vmem:[%s2746_s0 + $0x14c] ss:$16 sps:$4 sm:$0xff]   ;;  %v1833_v44 = vld [vmem:[%s2746_s0 + $0x140] ss:$16 sps:$4 sm:$0xff]   ;;  %v1836_v45 = vld [vmem:[%s2746_s0 + $0x148] ss:$16 sps:$4 sm:$0xff]  }
  0x10   :  { %225 = vmatpush1.bf16.msra.mxu0 %v1794_v15  ;;  %268 = vmatpush1.bf16.msra.mxu1 %v1795_v16  ;;  %v1841_v46 = vld [vmem:[%s2746_s0 + $0x164] ss:$16 sps:$4 sm:$0xff]   ;;  %v1844_v47 = vld [vmem:[%s2746_s0 + $0x16c] ss:$16 sps:$4 sm:$0xff]   ;;  %v1839_v48 = vld [vmem:[%s2746_s0 + $0x160] ss:$16 sps:$4 sm:$0xff]  }
  0x11   :  { %226 = vmatprep.subr.bf16.mxu0 %v1796_v17  ;;  %269 = vmatprep.subr.bf16.mxu1 %v1798_v18  ;;  %v1842_v49 = vld [vmem:[%s2746_s0 + $0x168] ss:$16 sps:$4 sm:$0xff]   ;;  %v1847_v50 = vld [vmem:[%s2746_s0 + $0x184] ss:$16 sps:$4 sm:$0xff]   ;;  %v1850_v51 = vld [vmem:[%s2746_s0 + $0x18c] ss:$16 sps:$4 sm:$0xff]  }
  0x12   :  { %v1845_v52 = vld [vmem:[%s2746_s0 + $0x180] ss:$16 sps:$4 sm:$0xff]   ;;  %v1848_v53 = vld [vmem:[%s2746_s0 + $0x188] ss:$16 sps:$4 sm:$0xff]   ;;  %v1853_v54 = vld [vmem:[%s2746_s0 + $0x1a4] ss:$16 sps:$4 sm:$0xff]  }
  0x13   :  { %v1856_v55 = vld [vmem:[%s2746_s0 + $0x1ac] ss:$16 sps:$4 sm:$0xff]   ;;  %v1851_v56 = vld [vmem:[%s2746_s0 + $0x1a0] ss:$16 sps:$4 sm:$0xff]   ;;  %v1854_v57 = vld [vmem:[%s2746_s0 + $0x1a8] ss:$16 sps:$4 sm:$0xff]  }
  0x14   :  { %227 = vmatpush1.bf16.msra.mxu0 %v1800_v19  ;;  %270 = vmatpush1.bf16.msra.mxu1 %v1801_v20  ;;  %v1859_v58 = vld [vmem:[%s2746_s0 + $0x1c4] ss:$16 sps:$4 sm:$0xff]   ;;  %v1862_v59 = vld [vmem:[%s2746_s0 + $0x1cc] ss:$16 sps:$4 sm:$0xff]   ;;  %v1857_v60 = vld [vmem:[%s2746_s0 + $0x1c0] ss:$16 sps:$4 sm:$0xff]  }
  0x15   :  { %228 = vmatprep.subr.bf16.mxu0 %v1802_v21  ;;  %271 = vmatprep.subr.bf16.mxu1 %v1804_v22  ;;  %v1860_v61 = vld [vmem:[%s2746_s0 + $0x1c8] ss:$16 sps:$4 sm:$0xff]   ;;  %v1865_v62 = vld [vmem:[%s2746_s0 + $0x1e4] ss:$16 sps:$4 sm:$0xff]   ;;  %v1868_v63 = vld [vmem:[%s2746_s0 + $0x1ec] ss:$16 sps:$4 sm:$0xff]  }
  0x16   :  { %v1863_v0 = vld [vmem:[%s2746_s0 + $0x1e0] ss:$16 sps:$4 sm:$0xff]   ;;  %v1866_v2 = vld [vmem:[%s2746_s0 + $0x1e8] ss:$16 sps:$4 sm:$0xff]   ;;  %v1872_v3 = vld [vmem:[%s2746_s0 + $0x204] ss:$16 sps:$4 sm:$0xff]  }
  0x17   :  { %v1875_v4 = vld [vmem:[%s2746_s0 + $0x20c] ss:$16 sps:$4 sm:$0xff]   ;;  %v1870_v6 = vld [vmem:[%s2746_s0 + $0x200] ss:$16 sps:$4 sm:$0xff]   ;;  %v1873_v7 = vld [vmem:[%s2746_s0 + $0x208] ss:$16 sps:$4 sm:$0xff]  }
  0x18   :  { %229 = vmatpush1.bf16.msra.mxu0 %v1806_v23  ;;  %272 = vmatpush1.bf16.msra.mxu1 %v1807_v24  ;;  %v1869_v5 = vld [vmem:[%s2747_s1 + $0x8] sm:$0xff]   ;;  %v1878_v8 = vld [vmem:[%s2746_s0 + $0x224] ss:$16 sps:$4 sm:$0xff]   ;;  %v1876_v10 = vld [vmem:[%s2746_s0 + $0x220] ss:$16 sps:$4 sm:$0xff]  }
  0x19   :  { %230 = vmatprep.subr.bf16.mxu0 %v1808_v25  ;;  %273 = vmatprep.subr.bf16.mxu1 %v1810_v26  ;;  %v1881_v9 = vld [vmem:[%s2746_s0 + $0x22c] ss:$16 sps:$4 sm:$0xff]   ;;  %v1879_v11 = vld [vmem:[%s2746_s0 + $0x228] ss:$16 sps:$4 sm:$0xff]   ;;  %v1884_v12 = vld [vmem:[%s2746_s0 + $0x244] ss:$16 sps:$4 sm:$0xff]  }
  0x1a   :  { %v1887_v13 = vld [vmem:[%s2746_s0 + $0x24c] ss:$16 sps:$4 sm:$0xff]   ;;  %v1882_v14 = vld [vmem:[%s2746_s0 + $0x240] ss:$16 sps:$4 sm:$0xff]   ;;  %v1885_v15 = vld [vmem:[%s2746_s0 + $0x248] ss:$16 sps:$4 sm:$0xff]  }
  0x1b   :  { %v1890_v16 = vld [vmem:[%s2746_s0 + $0x264] ss:$16 sps:$4 sm:$0xff]   ;;  %v1893_v17 = vld [vmem:[%s2746_s0 + $0x26c] ss:$16 sps:$4 sm:$0xff]   ;;  %v1888_v18 = vld [vmem:[%s2746_s0 + $0x260] ss:$16 sps:$4 sm:$0xff]  }
  0x1c   :  { %231 = vmatpush1.bf16.msra.mxu0 %v1812_v27  ;;  %274 = vmatpush1.bf16.msra.mxu1 %v1813_v28  ;;  %v1891_v19 = vld [vmem:[%s2746_s0 + $0x268] ss:$16 sps:$4 sm:$0xff]   ;;  %v1896_v20 = vld [vmem:[%s2746_s0 + $0x284] ss:$16 sps:$4 sm:$0xff]   ;;  %v1899_v21 = vld [vmem:[%s2746_s0 + $0x28c] ss:$16 sps:$4 sm:$0xff]  }
  0x1d   :  { %232 = vmatprep.subr.bf16.mxu0 %v1814_v29  ;;  %275 = vmatprep.subr.bf16.mxu1 %v1816_v30  ;;  %v1894_v22 = vld [vmem:[%s2746_s0 + $0x280] ss:$16 sps:$4 sm:$0xff]   ;;  %v1897_v23 = vld [vmem:[%s2746_s0 + $0x288] ss:$16 sps:$4 sm:$0xff]   ;;  %v1902_v24 = vld [vmem:[%s2746_s0 + $0x2a4] ss:$16 sps:$4 sm:$0xff]  }
  0x1e   :  { %v1905_v25 = vld [vmem:[%s2746_s0 + $0x2ac] ss:$16 sps:$4 sm:$0xff]   ;;  %v1900_v26 = vld [vmem:[%s2746_s0 + $0x2a0] ss:$16 sps:$4 sm:$0xff]   ;;  %v1903_v27 = vld [vmem:[%s2746_s0 + $0x2a8] ss:$16 sps:$4 sm:$0xff]  }
  0x1f   :  { %v1908_v28 = vld [vmem:[%s2746_s0 + $0x2c4] ss:$16 sps:$4 sm:$0xff]   ;;  %v1911_v29 = vld [vmem:[%s2746_s0 + $0x2cc] ss:$16 sps:$4 sm:$0xff]   ;;  %v1906_v30 = vld [vmem:[%s2746_s0 + $0x2c0] ss:$16 sps:$4 sm:$0xff]  }
  0x20   :  { %233 = vmatpush1.bf16.msra.mxu0 %v1818_v31  ;;  %276 = vmatpush1.bf16.msra.mxu1 %v1819_v32  ;;  %v1909_v31 = vld [vmem:[%s2746_s0 + $0x2c8] ss:$16 sps:$4 sm:$0xff]   ;;  %v1914_v32 = vld [vmem:[%s2746_s0 + $0x2e4] ss:$16 sps:$4 sm:$0xff]  }
  0x21   :  { %546 = vmatprep.subr.bf16.mxu0 %v1823_v33  ;;  %589 = vmatprep.subr.bf16.mxu1 %v1826_v34  ;;  %v1917_v33 = vld [vmem:[%s2746_s0 + $0x2ec] ss:$16 sps:$4 sm:$0xff]   ;;  %v1912_v34 = vld [vmem:[%s2746_s0 + $0x2e0] ss:$16 sps:$4 sm:$0xff]  }
  0x23   :  { %251 = vmatmul.mubr.bf16.vlgmr.msra.gmra.mrb[0].mxu0 %v1820_v35  ;;  %294 = vmatmul.mubr.bf16.vlgmr.msra.gmra.mrb[0].mxu1 %v1820_v35  ;;  %v1915_v35 = vld [vmem:[%s2746_s0 + $0x2e8] ss:$16 sps:$4 sm:$0xff]  }
  0x24   :  { %547 = vmatpush1.bf16.msra.mxu0 %v1821_v36  ;;  %590 = vmatpush1.bf16.msra.mxu1 %v1824_v37  ;;  %v1921_v36 = vld [vmem:[%s2746_s0 + $0x304] ss:$16 sps:$4 sm:$0xff]   ;;  %v1924_v37 = vld [vmem:[%s2746_s0 + $0x30c] ss:$16 sps:$4 sm:$0xff]  }
  0x25   :  { %548 = vmatprep.subr.bf16.mxu0 %v1829_v38  ;;  %591 = vmatprep.subr.bf16.mxu1 %v1832_v39  ;;  %v1918_v38 = vld [vmem:[%s2747_s1 + $0x10] sm:$0xff]  }
  0x26   :  { %578 = vmatprep.mubr.bf16.mxu0 %v1972_v1  ;;  %621 = vmatprep.mubr.bf16.mxu1 %v1972_v1  ;;  %v1919_v39 = vld [vmem:[%s2746_s0 + $0x300] ss:$16 sps:$4 sm:$0xff]  }
  0x28   :  { %549 = vmatpush1.bf16.msra.mxu0 %v1827_v40  ;;  %592 = vmatpush1.bf16.msra.mxu1 %v1830_v41  ;;  %v1922_v40 = vld [vmem:[%s2746_s0 + $0x308] ss:$16 sps:$4 sm:$0xff]   ;;  %v1927_v41 = vld [vmem:[%s2746_s0 + $0x324] ss:$16 sps:$4 sm:$0xff]  }
  0x29   :  { %550 = vmatprep.subr.bf16.mxu0 %v1835_v42  ;;  %593 = vmatprep.subr.bf16.mxu1 %v1838_v43  ;;  %v1930_v42 = vld [vmem:[%s2746_s0 + $0x32c] ss:$16 sps:$4 sm:$0xff]   ;;  %v1925_v43 = vld [vmem:[%s2746_s0 + $0x320] ss:$16 sps:$4 sm:$0xff]  }
  0x2c   :  { %551 = vmatpush1.bf16.msra.mxu0 %v1833_v44  ;;  %594 = vmatpush1.bf16.msra.mxu1 %v1836_v45  ;;  %v1928_v44 = vld [vmem:[%s2746_s0 + $0x328] ss:$16 sps:$4 sm:$0xff]   ;;  %v1933_v45 = vld [vmem:[%s2746_s0 + $0x344] ss:$16 sps:$4 sm:$0xff]  }
  0x2d   :  { %552 = vmatprep.subr.bf16.mxu0 %v1841_v46  ;;  %595 = vmatprep.subr.bf16.mxu1 %v1844_v47  ;;  %v1936_v46 = vld [vmem:[%s2746_s0 + $0x34c] ss:$16 sps:$4 sm:$0xff]   ;;  %v1931_v47 = vld [vmem:[%s2746_s0 + $0x340] ss:$16 sps:$4 sm:$0xff]  }
  0x30   :  { %553 = vmatpush1.bf16.msra.mxu0 %v1839_v48  ;;  %596 = vmatpush1.bf16.msra.mxu1 %v1842_v49  ;;  %v1934_v48 = vld [vmem:[%s2746_s0 + $0x348] ss:$16 sps:$4 sm:$0xff]   ;;  %v1939_v49 = vld [vmem:[%s2746_s0 + $0x364] ss:$16 sps:$4 sm:$0xff]  }
  0x31   :  { %554 = vmatprep.subr.bf16.mxu0 %v1847_v50  ;;  %597 = vmatprep.subr.bf16.mxu1 %v1850_v51  ;;  %v1937_v50 = vld [vmem:[%s2746_s0 + $0x360] ss:$16 sps:$4 sm:$0xff]   ;;  %v1940_v51 = vld [vmem:[%s2746_s0 + $0x368] ss:$16 sps:$4 sm:$0xff]  }
  0x34   :  { %555 = vmatpush1.bf16.msra.mxu0 %v1845_v52  ;;  %598 = vmatpush1.bf16.msra.mxu1 %v1848_v53  ;;  %v1945_v52 = vld [vmem:[%s2746_s0 + $0x384] ss:$16 sps:$4 sm:$0xff]   ;;  %v1948_v53 = vld [vmem:[%s2746_s0 + $0x38c] ss:$16 sps:$4 sm:$0xff]  }
  0x35   :  { %556 = vmatprep.subr.bf16.mxu0 %v1853_v54  ;;  %599 = vmatprep.subr.bf16.mxu1 %v1856_v55  ;;  %v1943_v54 = vld [vmem:[%s2746_s0 + $0x380] ss:$16 sps:$4 sm:$0xff]   ;;  %v1946_v55 = vld [vmem:[%s2746_s0 + $0x388] ss:$16 sps:$4 sm:$0xff]  }
  0x38   :  { %557 = vmatpush1.bf16.msra.mxu0 %v1851_v56  ;;  %600 = vmatpush1.bf16.msra.mxu1 %v1854_v57  ;;  %v1951_v56 = vld [vmem:[%s2746_s0 + $0x3a4] ss:$16 sps:$4 sm:$0xff]   ;;  %v1954_v57 = vld [vmem:[%s2746_s0 + $0x3ac] ss:$16 sps:$4 sm:$0xff]  }
  0x39   :  { %558 = vmatprep.subr.bf16.mxu0 %v1859_v58  ;;  %601 = vmatprep.subr.bf16.mxu1 %v1862_v59  ;;  %v1949_v58 = vld [vmem:[%s2746_s0 + $0x3a0] ss:$16 sps:$4 sm:$0xff]   ;;  %v1952_v59 = vld [vmem:[%s2746_s0 + $0x3a8] ss:$16 sps:$4 sm:$0xff]  }
  0x3c   :  { %559 = vmatpush1.bf16.msra.mxu0 %v1857_v60  ;;  %602 = vmatpush1.bf16.msra.mxu1 %v1860_v61  ;;  %v1957_v60 = vld [vmem:[%s2746_s0 + $0x3c4] ss:$16 sps:$4 sm:$0xff]   ;;  %v1960_v61 = vld [vmem:[%s2746_s0 + $0x3cc] ss:$16 sps:$4 sm:$0xff]  }
  0x3d   :  { %560 = vmatprep.subr.bf16.mxu0 %v1865_v62  ;;  %603 = vmatprep.subr.bf16.mxu1 %v1868_v63  ;;  %v1955_v62 = vld [vmem:[%s2746_s0 + $0x3c0] ss:$16 sps:$4 sm:$0xff]   ;;  %v1958_v63 = vld [vmem:[%s2746_s0 + $0x3c8] ss:$16 sps:$4 sm:$0xff]  }
  0x40   :  { %561 = vmatpush1.bf16.msra.mxu0 %v1863_v0  ;;  %604 = vmatpush1.bf16.msra.mxu1 %v1866_v2  ;;  %v1963_v0 = vld [vmem:[%s2746_s0 + $0x3e4] ss:$16 sps:$4 sm:$0xff]   ;;  %v1966_v2 = vld [vmem:[%s2746_s0 + $0x3ec] ss:$16 sps:$4 sm:$0xff]  }
  0x41   :  { %874 = vmatprep.subr.bf16.mxu0 %v1872_v3  ;;  %917 = vmatprep.subr.bf16.mxu1 %v1875_v4  ;;  %v1961_v3 = vld [vmem:[%s2746_s0 + $0x3e0] ss:$16 sps:$4 sm:$0xff]   ;;  %v1964_v4 = vld [vmem:[%s2746_s0 + $0x3e8] ss:$16 sps:$4 sm:$0xff]  }
  0x43   :  { %579 = vmatmul.mubr.bf16.vlgmr.msra.gmra.mrb[4].mxu0 %v1869_v5  ;;  %622 = vmatmul.mubr.bf16.vlgmr.msra.gmra.mrb[4].mxu1 %v1869_v5  ;;  %v1967_v5 = vld [vmem:[%s2747_s1 + $0x18] sm:$0xff]  }
  0x44   :  { %875 = vmatpush1.bf16.msra.mxu0 %v1870_v6  ;;  %918 = vmatpush1.bf16.msra.mxu1 %v1873_v7 }
  0x45   :  { %876 = vmatprep.subr.bf16.mxu0 %v1878_v8  ;;  %919 = vmatprep.subr.bf16.mxu1 %v1881_v9 }
  0x46   :  { %906 = vmatprep.mubr.bf16.mxu0 %v1972_v1  ;;  %949 = vmatprep.mubr.bf16.mxu1 %v1972_v1 }
  0x48   :  { %877 = vmatpush1.bf16.msra.mxu0 %v1876_v10  ;;  %920 = vmatpush1.bf16.msra.mxu1 %v1879_v11 }
  0x49   :  { %878 = vmatprep.subr.bf16.mxu0 %v1884_v12  ;;  %921 = vmatprep.subr.bf16.mxu1 %v1887_v13 }
  0x4c   :  { %879 = vmatpush1.bf16.msra.mxu0 %v1882_v14  ;;  %922 = vmatpush1.bf16.msra.mxu1 %v1885_v15 }
  0x4d   :  { %880 = vmatprep.subr.bf16.mxu0 %v1890_v16  ;;  %923 = vmatprep.subr.bf16.mxu1 %v1893_v17 }
  0x50   :  { %881 = vmatpush1.bf16.msra.mxu0 %v1888_v18  ;;  %924 = vmatpush1.bf16.msra.mxu1 %v1891_v19 }
  0x51   :  { %882 = vmatprep.subr.bf16.mxu0 %v1896_v20  ;;  %925 = vmatprep.subr.bf16.mxu1 %v1899_v21 }
  0x54   :  { %883 = vmatpush1.bf16.msra.mxu0 %v1894_v22  ;;  %926 = vmatpush1.bf16.msra.mxu1 %v1897_v23 }
  0x55   :  { %884 = vmatprep.subr.bf16.mxu0 %v1902_v24  ;;  %927 = vmatprep.subr.bf16.mxu1 %v1905_v25 }
  0x58   :  { %885 = vmatpush1.bf16.msra.mxu0 %v1900_v26  ;;  %928 = vmatpush1.bf16.msra.mxu1 %v1903_v27 }
  0x59   :  { %886 = vmatprep.subr.bf16.mxu0 %v1908_v28  ;;  %929 = vmatprep.subr.bf16.mxu1 %v1911_v29 }
  0x5c   :  { %887 = vmatpush1.bf16.msra.mxu0 %v1906_v30  ;;  %930 = vmatpush1.bf16.msra.mxu1 %v1909_v31 }
  0x5d   :  { %888 = vmatprep.subr.bf16.mxu0 %v1914_v32  ;;  %931 = vmatprep.subr.bf16.mxu1 %v1917_v33 }
  0x60   :  { %889 = vmatpush1.bf16.msra.mxu0 %v1912_v34  ;;  %932 = vmatpush1.bf16.msra.mxu1 %v1915_v35 }
  0x61   :  { %1202 = vmatprep.subr.bf16.mxu0 %v1921_v36  ;;  %1245 = vmatprep.subr.bf16.mxu1 %v1924_v37 }
  0x63   :  { %907 = vmatmul.mubr.bf16.vlgmr.msra.gmra.mrb[8].mxu0 %v1918_v38  ;;  %950 = vmatmul.mubr.bf16.vlgmr.msra.gmra.mrb[8].mxu1 %v1918_v38 }
  0x64   :  { %1203 = vmatpush1.bf16.msra.mxu0 %v1919_v39  ;;  %1246 = vmatpush1.bf16.msra.mxu1 %v1922_v40 }
  0x65   :  { %1204 = vmatprep.subr.bf16.mxu0 %v1927_v41  ;;  %1247 = vmatprep.subr.bf16.mxu1 %v1930_v42 }
  0x66   :  { %1234 = vmatprep.mubr.bf16.mxu0 %v1972_v1  ;;  %1277 = vmatprep.mubr.bf16.mxu1 %v1972_v1  ;;  %v1942_v1 = vld [vmem:[%s2746_s0 + $0x36c] ss:$16 sps:$4 sm:$0xff]  }
  0x68   :  { %1205 = vmatpush1.bf16.msra.mxu0 %v1925_v43  ;;  %1248 = vmatpush1.bf16.msra.mxu1 %v1928_v44 }
  0x69   :  { %1206 = vmatprep.subr.bf16.mxu0 %v1933_v45  ;;  %1249 = vmatprep.subr.bf16.mxu1 %v1936_v46 }
  0x6c   :  { %1207 = vmatpush1.bf16.msra.mxu0 %v1931_v47  ;;  %1250 = vmatpush1.bf16.msra.mxu1 %v1934_v48 }
  0x6d   :  { %1208 = vmatprep.subr.bf16.mxu0 %v1939_v49  ;;  %1251 = vmatprep.subr.bf16.mxu1 %v1942_v1 }
  0x70   :  { %1209 = vmatpush1.bf16.msra.mxu0 %v1937_v50  ;;  %1252 = vmatpush1.bf16.msra.mxu1 %v1940_v51 }
  0x71   :  { %1210 = vmatprep.subr.bf16.mxu0 %v1945_v52  ;;  %1253 = vmatprep.subr.bf16.mxu1 %v1948_v53 }
  0x74   :  { %1211 = vmatpush1.bf16.msra.mxu0 %v1943_v54  ;;  %1254 = vmatpush1.bf16.msra.mxu1 %v1946_v55 }
  0x75   :  { %1212 = vmatprep.subr.bf16.mxu0 %v1951_v56  ;;  %1255 = vmatprep.subr.bf16.mxu1 %v1954_v57 }
  0x78   :  { %1213 = vmatpush1.bf16.msra.mxu0 %v1949_v58  ;;  %1256 = vmatpush1.bf16.msra.mxu1 %v1952_v59 }
  0x79   :  { %1214 = vmatprep.subr.bf16.mxu0 %v1957_v60  ;;  %1257 = vmatprep.subr.bf16.mxu1 %v1960_v61 }
  0x7c   :  { %1215 = vmatpush1.bf16.msra.mxu0 %v1955_v62  ;;  %1258 = vmatpush1.bf16.msra.mxu1 %v1958_v63 }
  0x7d   :  { %1216 = vmatprep.subr.bf16.mxu0 %v1963_v0  ;;  %1259 = vmatprep.subr.bf16.mxu1 %v1966_v2 }
  0x80   :  { %1217 = vmatpush1.bf16.msra.mxu0 %v1961_v3  ;;  %1260 = vmatpush1.bf16.msra.mxu1 %v1964_v4 }
  0x83   :  { %1235 = vmatmul.mubr.bf16.vlgmr.msra.gmra.mrb[12].mxu0 %v1967_v5  ;;  %1278 = vmatmul.mubr.bf16.vlgmr.msra.gmra.mrb[12].mxu1 %v1967_v5 }
  0xf6   :  { %v2404_v6 = vpop.f32.mrb[0].mxu0  ;;  %v2406_v7 = vpop.f32.mrb[0].mxu1 }
  0xf7   :  { %v324_v8 = vmul.f32 %v2404_v6, %v2404_v6  ;;  %v2410_v9 = vpop.f32.mrb[1].mxu0  ;;  %v2412_v10 = vpop.f32.mrb[1].mxu1  ;;  %v326_v15 = vmul.f32 %v2406_v7, %v2406_v7 }
  0xf8   :  { %v312_v11 = vadd.f32 %v2410_v9, %v2404_v6  ;;  %v325_v12 = vmul.f32 %v2410_v9, %v2410_v9  ;;  %v2418_v13 = vpop.f32.mrb[2].mxu0  ;;  %v2420_v14 = vpop.f32.mrb[2].mxu1  ;;  %v327_v23 = vmul.f32 %v2412_v10, %v2412_v10 }
  0xf9   :  { %v328_v16 = vmul.f32 %v2418_v13, %v2418_v13  ;;  %v2426_v17 = vpop.f32.mrb[3].mxu0  ;;  %v2428_v18 = vpop.f32.mrb[3].mxu1  ;;  %v330_v21 = vmul.f32 %v2420_v14, %v2420_v14 }
  0xfa   :  { %v317_v19 = vadd.f32 %v2426_v17, %v2418_v13  ;;  %v329_v20 = vmul.f32 %v2426_v17, %v2426_v17  ;;  %v313_v22 = vadd.f32 %v312_v11, %v2406_v7  ;;  %v332_v24 = vadd.f32 %v325_v12, %v324_v8 }
  0xfb   :  { %v331_v29 = vmul.f32 %v2428_v18, %v2428_v18 }
  0xfc   :  { %v314_v25 = vadd.f32 %v313_v22, %v2412_v10  ;;  %v337_v26 = vadd.f32 %v329_v20, %v328_v16  ;;  %v318_v27 = vadd.f32 %v317_v19, %v2420_v14  ;;  %v333_v28 = vadd.f32 %v332_v24, %v326_v15 }
  0xfe   :  { %315 = vadd.xlane.f32.xlu0 %v314_v25  ;;  %v338_v30 = vadd.f32 %v337_v26, %v330_v21  ;;  %v319_v31 = vadd.f32 %v318_v27, %v2428_v18  ;;  %v334_v32 = vadd.f32 %v333_v28, %v327_v23 }
 0x100   :  { %v339_v33 = vadd.f32 %v338_v30, %v331_v29 }
 0x102   :  { %340 = vadd.xlane.f32.xlu1 %v339_v33  ;;  %320 = vadd.xlane.f32.xlu0 %v319_v31 }
 0x106   :  { %335 = vadd.xlane.f32.xlu0 %v334_v32 }
 0x116   :  { %v2444_v34 = vpop.f32.mrb[4].mxu0  ;;  %v2446_v35 = vpop.f32.mrb[4].mxu1 }
 0x117   :  { %v652_v36 = vmul.f32 %v2444_v34, %v2444_v34  ;;  %v2450_v37 = vpop.f32.mrb[5].mxu0  ;;  %v2452_v38 = vpop.f32.mrb[5].mxu1  ;;  %v654_v41 = vmul.f32 %v2446_v35, %v2446_v35 }
 0x118   :  { %v640_v39 = vadd.f32 %v2450_v37, %v2444_v34  ;;  %v653_v40 = vmul.f32 %v2450_v37, %v2450_v37  ;;  %v2460_v42 = vpop.f32.mrb[6].mxu0  ;;  %v2462_v43 = vpop.f32.mrb[6].mxu1  ;;  %v655_v48 = vmul.f32 %v2452_v38, %v2452_v38 }
 0x119   :  { %v656_v44 = vmul.f32 %v2460_v42, %v2460_v42  ;;  %v2466_v45 = vpop.f32.mrb[7].mxu0  ;;  %v658_v46 = vmul.f32 %v2462_v43, %v2462_v43  ;;  %v2470_v47 = vpop.f32.mrb[7].mxu1 }
 0x11a   :  { %v645_v49 = vadd.f32 %v2466_v45, %v2460_v42  ;;  %v657_v1 = vmul.f32 %v2466_v45, %v2466_v45  ;;  %v641_v50 = vadd.f32 %v640_v39, %v2446_v35  ;;  %v660_v51 = vadd.f32 %v653_v40, %v652_v36 }
 0x11b   :  { %v659_v58 = vmul.f32 %v2470_v47, %v2470_v47 }
 0x11c   :  { %v642_v52 = vadd.f32 %v641_v50, %v2452_v38  ;;  %v661_v53 = vadd.f32 %v660_v51, %v654_v41  ;;  %v646_v54 = vadd.f32 %v645_v49, %v2462_v43  ;;  %v665_v55 = vadd.f32 %v657_v1, %v656_v44 }
 0x11e   :  { %643 = vadd.xlane.f32.xlu1 %v642_v52  ;;  %v662_v56 = vadd.f32 %v661_v53, %v655_v48  ;;  %v647_v57 = vadd.f32 %v646_v54, %v2470_v47  ;;  %v666_v59 = vadd.f32 %v665_v55, %v658_v46 }
 0x120   :  { %663 = vadd.xlane.f32.xlu0 %v662_v56  ;;  %v667_v60 = vadd.f32 %v666_v59, %v659_v58 }
 0x122   :  { %648 = vadd.xlane.f32.xlu1 %v647_v57 }
 0x126   :  { %668 = vadd.xlane.f32.xlu1 %v667_v60 }
 0x136   :  { %v2484_v61 = vpop.f32.mrb[8].mxu0  ;;  %v2486_v62 = vpop.f32.mrb[8].mxu1 }
 0x137   :  { %v980_v63 = vmul.f32 %v2484_v61, %v2484_v61  ;;  %v2490_v0 = vpop.f32.mrb[9].mxu0  ;;  %v2492_v2 = vpop.f32.mrb[9].mxu1  ;;  %v982_v5 = vmul.f32 %v2486_v62, %v2486_v62 }
 0x138   :  { %v968_v3 = vadd.f32 %v2490_v0, %v2484_v61  ;;  %v981_v4 = vmul.f32 %v2490_v0, %v2490_v0  ;;  %v2500_v8 = vpop.f32.mrb[10].mxu0  ;;  %v2502_v11 = vpop.f32.mrb[10].mxu1  ;;  %v983_v20 = vmul.f32 %v2492_v2, %v2492_v2 }
 0x139   :  { %v984_v12 = vmul.f32 %v2500_v8, %v2500_v8  ;;  %v2506_v15 = vpop.f32.mrb[11].mxu0  ;;  %v986_v16 = vmul.f32 %v2502_v11, %v2502_v11  ;;  %v2510_v19 = vpop.f32.mrb[11].mxu1 }
 0x13a   :  { %v973_v21 = vadd.f32 %v2506_v15, %v2500_v8  ;;  %v985_v22 = vmul.f32 %v2506_v15, %v2506_v15  ;;  %v969_v23 = vadd.f32 %v968_v3, %v2486_v62  ;;  %v988_v24 = vadd.f32 %v981_v4, %v980_v63 }
 0x13b   :  { %v987_v31 = vmul.f32 %v2510_v19, %v2510_v19 }
 0x13c   :  { %v970_v25 = vadd.f32 %v969_v23, %v2492_v2  ;;  %v974_v26 = vadd.f32 %v973_v21, %v2502_v11  ;;  %v989_v27 = vadd.f32 %v988_v24, %v982_v5  ;;  %v993_v28 = vadd.f32 %v985_v22, %v984_v12 }
 0x13e   :  { %971 = vadd.xlane.f32.xlu0 %v970_v25  ;;  %v975_v29 = vadd.f32 %v974_v26, %v2510_v19  ;;  %v990_v30 = vadd.f32 %v989_v27, %v983_v20  ;;  %v994_v32 = vadd.f32 %v993_v28, %v986_v16 }
 0x140   :  { %976 = vadd.xlane.f32.xlu1 %v975_v29  ;;  %v995_v33 = vadd.f32 %v994_v32, %v987_v31 }
 0x142   :  { %991 = vadd.xlane.f32.xlu0 %v990_v30 }
 0x144   :  { %996 = vadd.xlane.f32.xlu1 %v995_v33 }
 0x156   :  { %v2524_v36 = vpop.f32.mrb[12].mxu0  ;;  %v2526_v39 = vpop.f32.mrb[12].mxu1 }
 0x157   :  { %v1308_v40 = vmul.f32 %v2524_v36, %v2524_v36  ;;  %v2530_v41 = vpop.f32.mrb[13].mxu0  ;;  %v2532_v44 = vpop.f32.mrb[13].mxu1  ;;  %v1310_v50 = vmul.f32 %v2526_v39, %v2526_v39 }
 0x158   :  { %v1296_v46 = vadd.f32 %v2530_v41, %v2524_v36  ;;  %v1309_v48 = vmul.f32 %v2530_v41, %v2530_v41  ;;  %v2538_v49 = vpop.f32.mrb[14].mxu0  ;;  %v2540_v1 = vpop.f32.mrb[14].mxu1  ;;  %v1311_v3 = vmul.f32 %v2532_v44, %v2532_v44 }
 0x159   :  { %v1312_v51 = vmul.f32 %v2538_v49, %v2538_v49  ;;  %v2546_v52 = vpop.f32.mrb[15].mxu0  ;;  %v2548_v53 = vpop.f32.mrb[15].mxu1  ;;  %v1314_v58 = vmul.f32 %v2540_v1, %v2540_v1 }
 0x15a   :  { %v1301_v54 = vadd.f32 %v2546_v52, %v2538_v49  ;;  %v1313_v55 = vmul.f32 %v2546_v52, %v2546_v52  ;;  %v1297_v56 = vadd.f32 %v1296_v46, %v2526_v39  ;;  %v1316_v57 = vadd.f32 %v1309_v48, %v1308_v40 }
 0x15b   :  { %v1315_v5 = vmul.f32 %v2548_v53, %v2548_v53 }
 0x15c   :  { %v1321_v59 = vadd.f32 %v1313_v55, %v1312_v51  ;;  %v1298_v60 = vadd.f32 %v1297_v56, %v2532_v44  ;;  %v1302_v63 = vadd.f32 %v1301_v54, %v2540_v1  ;;  %v1317_v4 = vadd.f32 %v1316_v57, %v1310_v50 }
 0x15e   :  { %1299 = vadd.xlane.f32.xlu0 %v1298_v60  ;;  %v1303_v12 = vadd.f32 %v1302_v63, %v2548_v53  ;;  %v1322_v16 = vadd.f32 %v1321_v59, %v1314_v58  ;;  %v1318_v20 = vadd.f32 %v1317_v4, %v1311_v3 }
 0x160   :  { %1304 = vadd.xlane.f32.xlu1 %v1303_v12  ;;  %v1323_v21 = vadd.f32 %v1322_v16, %v1315_v5 }
 0x162   :  { %1319 = vadd.xlane.f32.xlu0 %v1318_v20 }
 0x164   :  { %1324 = vadd.xlane.f32.xlu1 %v1323_v21 }
 0x18b   :  { %v316_v22 = vpop.xlane.xlu0 %315 }
 0x18f   :  { %v341_v23 = vpop.xlane.xlu1 %340  ;;  %v321_v24 = vpop.xlane.xlu0 %320 }
 0x193   :  { %v336_v26 = vpop.xlane.xlu0 %335 }
 0x1ab   :  { %v644_v25 = vpop.xlane.xlu1 %643 }
 0x1ac   :  { %v650_v33 = vadd.f32 %v644_v25, %v316_v22 }
 0x1ad   :  { %v664_v28 = vpop.xlane.xlu0 %663 }
 0x1ae   :  { %v670_v51 = vadd.f32 %v664_v28, %v336_v26 }
 0x1af   :  { %v649_v27 = vpop.xlane.xlu1 %648 }
 0x1b0   :  { %v651_v46 = vadd.f32 %v649_v27, %v321_v24 }
 0x1b3   :  { %v669_v29 = vpop.xlane.xlu1 %668 }
 0x1b4   :  { %v671_v57 = vadd.f32 %v669_v29, %v341_v23  ;;  %v1341_v23 = vld [vmem:[%s2748_s2] sm:$0xff] }
 0x1cb   :  { %v972_v30 = vpop.xlane.xlu0 %971 }
 0x1cc   :  { %v978_v48 = vadd.f32 %v972_v30, %v650_v33  ;;  %v1342_v30 = vld [vmem:[%s2748_s2 + $0x8] sm:$0xff] }
 0x1cd   :  { %v977_v31 = vpop.xlane.xlu1 %976 }
 0x1ce   :  { %v979_v54 = vadd.f32 %v977_v31, %v651_v46  ;;  %v1345_v46 = vld [vmem:[%s2749_s3] sm:$0xff] }
 0x1cf   :  { %v992_v32 = vpop.xlane.xlu0 %991 }
 0x1d0   :  { %v998_v58 = vadd.f32 %v992_v32, %v670_v51  ;;  %v1346_v51 = vld [vmem:[%s2749_s3 + $0x8] sm:$0xff] }
 0x1d1   :  { %v997_v40 = vpop.xlane.xlu1 %996 }
 0x1d2   :  { %v999_v3 = vadd.f32 %v997_v40, %v671_v57 }
 0x1eb   :  { %v1300_v50 = vpop.xlane.xlu0 %1299 }
 0x1ec   :  { %v1306_v55 = vadd.f32 %v1300_v50, %v978_v48 }
 0x1ed   :  { %v1305_v56 = vpop.xlane.xlu1 %1304 }
 0x1ee   :  { %v1329_v59 = vmul.f32 0.00048828125, %v1306_v55  ;;  %v1307_v60 = vadd.f32 %v1305_v56, %v979_v54 }
 0x1ef   :  { %v1320_v63 = vpop.xlane.xlu0 %1319 }
 0x1f0   :  { %v1330_v4 = vmul.f32 0.00048828125, %v1307_v60  ;;  %v1326_v5 = vadd.f32 %v1320_v63, %v998_v58  ;;  %v1333_v16 = vmul.f32 %v1329_v59, %v1329_v59 }
 0x1f1   :  { %v1325_v12 = vpop.xlane.xlu1 %1324 }
 0x1f2   :  { %v1331_v20 = vmul.f32 0.00048828125, %v1326_v5  ;;  %v1327_v21 = vadd.f32 %v1325_v12, %v999_v3  ;;  %v1334_v22 = vmul.f32 %v1330_v4, %v1330_v4 }
 0x1f4   :  { %v1335_v24 = vsub.f32 %v1331_v20, %v1333_v16  ;;  %v1332_v25 = vmul.f32 0.00048828125, %v1327_v21 }
 0x1f6   :  { %v1337_v27 = vadd.f32 1e-05, %v1335_v24  ;;  %v1336_v26 = vsub.f32 %v1332_v25, %v1334_v22 }
 0x1f8   :  { %1968 = vrsqrt.f32 %v1337_v27  ;;  %v1338_v28 = vadd.f32 1e-05, %v1336_v26 }
 0x1fa   :  { %1970 = vrsqrt.f32 %v1338_v28 }
 0x202   :  { %v1969_v29 = vpop.eup %1968 }
 0x203   :  { %v1343_v31 = vmul.f32 %v1969_v29, %v1341_v23 }
 0x204   :  { %v1971_v32 = vpop.eup %1970 }
 0x205   :  { %1385 = vperm.xlu0 %1770, %v1343_v31   ;;  %v1344_v33 = vmul.f32 %v1971_v32, %v1342_v30  ;;  %v1347_v40 = vmul.f32 %v1343_v31, %v1329_v59 }
 0x207   :  { %1390 = vperm.xlu1 %1771, %v1344_v33   ;;  %v1349_v48 = vsub.f32 %v1345_v46, %v1347_v40  ;;  %v1348_v50 = vmul.f32 %v1344_v33, %v1330_v4 }
 0x209   :  { %v1350_v54 = vsub.f32 %v1346_v51, %v1348_v50 }
 0x20b   :  { %1427 = vperm.xlu1 %1771, %v1349_v48  }
 0x20f   :  { %1432 = vperm.xlu1 %1771, %v1350_v54  }
 0x284   :  { %v1386_v55 = vpop.permute.xlu0 %1385 }
 0x285   :  { %v1393_v56 = vmul.f32 %v1386_v55, %v2404_v6  ;;  %v1394_v57 = vmul.f32 %v1386_v55, %v2410_v9  ;;  %v1395_v58 = vmul.f32 %v1386_v55, %v2406_v7  ;;  %v1396_v59 = vmul.f32 %v1386_v55, %v2412_v10 }
 0x286   :  { %v1397_v60 = vmul.f32 %v1386_v55, %v2444_v34  ;;  %v1398_v63 = vmul.f32 %v1386_v55, %v2450_v37  ;;  %v1399_v3 = vmul.f32 %v1386_v55, %v2446_v35  ;;  %v1400_v4 = vmul.f32 %v1386_v55, %v2452_v38  ;;  %v2584_v5 = vpop.permute.xlu1 %1390 }
 0x287   :  { %v1401_v12 = vmul.f32 %v1386_v55, %v2484_v61  ;;  %v1402_v6 = vmul.f32 %v1386_v55, %v2490_v0  ;;  %v1403_v9 = vmul.f32 %v1386_v55, %v2486_v62  ;;  %v1404_v7 = vmul.f32 %v1386_v55, %v2492_v2 }
 0x288   :  { %v1405_v10 = vmul.f32 %v1386_v55, %v2524_v36  ;;  %v1406_v34 = vmul.f32 %v1386_v55, %v2530_v41  ;;  %v1407_v37 = vmul.f32 %v1386_v55, %v2526_v39  ;;  %v1408_v35 = vmul.f32 %v1386_v55, %v2532_v44 }
 0x289   :  { %v2596_v38 = vmul.f32 %v2584_v5, %v2418_v13  ;;  %v2600_v61 = vmul.f32 %v2584_v5, %v2420_v14  ;;  %v2604_v62 = vmul.f32 %v2584_v5, %v2428_v18  ;;  %v2608_v0 = vmul.f32 %v2584_v5, %v2460_v42 }
 0x28a   :  { %v1428_v2 = vpop.permute.xlu1 %1427  ;;  %v2612_v36 = vmul.f32 %v2584_v5, %v2466_v45  ;;  %v2616_v13 = vmul.f32 %v2584_v5, %v2462_v43  ;;  %v2620_v14 = vmul.f32 %v2584_v5, %v2470_v47  ;;  %v2624_v18 = vmul.f32 %v2584_v5, %v2500_v8 }
 0x28b   :  { %v1435_v39 = vadd.f32 %v1428_v2, %v1393_v56  ;;  %v1436_v42 = vadd.f32 %v1428_v2, %v1394_v57  ;;  %v1437_v41 = vadd.f32 %v1428_v2, %v1395_v58  ;;  %v1438_v44 = vadd.f32 %v1428_v2, %v1396_v59 }
 0x28c   :  { %v1439_v16 = vadd.f32 %v1428_v2, %v1397_v60  ;;  %v1440_v20 = vadd.f32 %v1428_v2, %v1398_v63  ;;  %v1441_v45 = vadd.f32 %v1428_v2, %v1399_v3  ;;  %v1442_v21 = vadd.f32 %v1428_v2, %v1400_v4 }
 0x28d   :  { %v1443_v22 = vadd.f32 %v1428_v2, %v1401_v12  ;;  %v1444_v24 = vadd.f32 %v1428_v2, %v1402_v6  ;;  %v1445_v43 = vadd.f32 %v1428_v2, %v1403_v9  ;;  %v1446_v25 = vadd.f32 %v1428_v2, %v1404_v7 }
 0x28e   :  { %v1447_v27 = vadd.f32 %v1428_v2, %v1405_v10  ;;  %v1448_v26 = vadd.f32 %v1428_v2, %v1406_v34  ;;  %v1449_v47 = vadd.f32 %v1428_v2, %v1407_v37  ;;  %v1450_v28 = vadd.f32 %v1428_v2, %v1408_v35  ;;  %v1433_v58 = vpop.permute.xlu1 %1432 }
 0x28f   :  { %v1467_v23 = vmax.f32 %v1435_v39, 0.0  ;;  %v1468_v29 = vmax.f32 %v1436_v42, 0.0  ;;  %v1469_v8 = vmax.f32 %v1437_v41, 0.0  ;;  %v1470_v30 = vmax.f32 %v1438_v44, 0.0 }
 0x290   :  { %v1471_v31 = vmax.f32 %v1439_v16, 0.0  ;;  %v1472_v32 = vmax.f32 %v1440_v20, 0.0  ;;  %v1473_v33 = vmax.f32 %v1441_v45, 0.0  ;;  %v1474_v40 = vmax.f32 %v1442_v21, 0.0 }
 0x291   :  { %v1475_v46 = vmax.f32 %v1443_v22, 0.0  ;;  %v1476_v48 = vmax.f32 %v1444_v24, 0.0  ;;  %v1477_v50 = vmax.f32 %v1445_v43, 0.0  ;;  %v1478_v51 = vmax.f32 %v1446_v25, 0.0  ;;  %1499 = vst [vmem:[%s2750_s4] sm:$0xff] %v1467_v23  ;;  %1500 = vst [vmem:[%s2750_s4 + $0x8] sm:$0xff] %v1468_v29 }
 0x292   :  { %1501 = vst [vmem:[%s2750_s4 + $0x10] sm:$0xff] %v1469_v8  ;;  %1502 = vst [vmem:[%s2750_s4 + $0x18] sm:$0xff] %v1470_v30  ;;  %v1479_v54 = vmax.f32 %v1447_v27, 0.0  ;;  %v1480_v55 = vmax.f32 %v1448_v26, 0.0  ;;  %v1481_v56 = vmax.f32 %v1449_v47, 0.0  ;;  %v1482_v57 = vmax.f32 %v1450_v28, 0.0 }
 0x293   :  { %1503 = vst [vmem:[%s2750_s4 + $0x20] sm:$0xff] %v1471_v31  ;;  %1504 = vst [vmem:[%s2750_s4 + $0x28] sm:$0xff] %v1472_v32  ;;  %v1418_v59 = vmul.f32 %v2584_v5, %v2506_v15  ;;  %v1419_v60 = vmul.f32 %v2584_v5, %v2502_v11  ;;  %v1420_v63 = vmul.f32 %v2584_v5, %v2510_v19 }
 0x294   :  { %1505 = vst [vmem:[%s2750_s4 + $0x30] sm:$0xff] %v1473_v33  ;;  %1506 = vst [vmem:[%s2750_s4 + $0x38] sm:$0xff] %v1474_v40  ;;  %v1421_v3 = vmul.f32 %v2584_v5, %v2538_v49  ;;  %v1422_v11 = vmul.f32 %v2584_v5, %v2546_v52  ;;  %v1423_v15 = vmul.f32 %v2584_v5, %v2540_v1 }
 0x295   :  { %1507 = vst [vmem:[%s2750_s4 + $0x40] sm:$0xff] %v1475_v46  ;;  %1508 = vst [vmem:[%s2750_s4 + $0x48] sm:$0xff] %v1476_v48  ;;  %v1424_v19 = vmul.f32 %v2584_v5, %v2548_v53  ;;  %v1410_v49 = vmul.f32 %v2584_v5, %v2426_v17  ;;  %v1451_v4 = vadd.f32 %v1433_v58, %v2596_v38 }
 0x296   :  { %1509 = vst [vmem:[%s2750_s4 + $0x50] sm:$0xff] %v1477_v50  ;;  %1510 = vst [vmem:[%s2750_s4 + $0x58] sm:$0xff] %v1478_v51  ;;  %v1453_v12 = vadd.f32 %v1433_v58, %v2600_v61  ;;  %v1454_v6 = vadd.f32 %v1433_v58, %v2604_v62  ;;  %v1455_v9 = vadd.f32 %v1433_v58, %v2608_v0 }
 0x297   :  { %1511 = vst [vmem:[%s2750_s4 + $0x60] sm:$0xff] %v1479_v54  ;;  %1512 = vst [vmem:[%s2750_s4 + $0x68] sm:$0xff] %v1480_v55  ;;  %v1452_v7 = vadd.f32 %v1433_v58, %v1410_v49  ;;  %v1456_v52 = vadd.f32 %v1433_v58, %v2612_v36  ;;  %v1457_v10 = vadd.f32 %v1433_v58, %v2616_v13  ;;  %v1483_v2 = vmax.f32 %v1451_v4, 0.0 }
 0x298   :  { %1513 = vst [vmem:[%s2750_s4 + $0x70] sm:$0xff] %v1481_v56  ;;  %1514 = vst [vmem:[%s2750_s4 + $0x78] sm:$0xff] %v1482_v57  ;;  %v1458_v1 = vadd.f32 %v1433_v58, %v2620_v14  ;;  %v1459_v53 = vadd.f32 %v1433_v58, %v2624_v18  ;;  %v1460_v34 = vadd.f32 %v1433_v58, %v1418_v59  ;;  %v1485_v39 = vmax.f32 %v1453_v12, 0.0 }
 0x299   :  { %v1461_v37 = vadd.f32 %v1433_v58, %v1419_v60  ;;  %v1462_v17 = vadd.f32 %v1433_v58, %v1420_v63  ;;  %v1463_v5 = vadd.f32 %v1433_v58, %v1421_v3  ;;  %v1464_v35 = vadd.f32 %v1433_v58, %v1422_v11  ;;  %1515 = vst [vmem:[%s2750_s4 + $0x80] sm:$0xff] %v1483_v2 }
 0x29a   :  { %v1465_v38 = vadd.f32 %v1433_v58, %v1423_v15  ;;  %v1466_v61 = vadd.f32 %v1433_v58, %v1424_v19  ;;  %v1484_v62 = vmax.f32 %v1452_v7, 0.0  ;;  %v1486_v0 = vmax.f32 %v1454_v6, 0.0  ;;  %1517 = vst [vmem:[%s2750_s4 + $0x90] sm:$0xff] %v1485_v39 }
 0x29b   :  { %v1487_v42 = vmax.f32 %v1455_v9, 0.0  ;;  %v1488_v41 = vmax.f32 %v1456_v52, 0.0  ;;  %v1489_v36 = vmax.f32 %v1457_v10, 0.0  ;;  %v1490_v44 = vmax.f32 %v1458_v1, 0.0 }
 0x29c   :  { %v1491_v13 = vmax.f32 %v1459_v53, 0.0  ;;  %v1492_v16 = vmax.f32 %v1460_v34, 0.0  ;;  %v1493_v14 = vmax.f32 %v1461_v37, 0.0  ;;  %v1494_v20 = vmax.f32 %v1462_v17, 0.0  ;;  %1516 = vst [vmem:[%s2750_s4 + $0x88] sm:$0xff] %v1484_v62  ;;  %1518 = vst [vmem:[%s2750_s4 + $0x98] sm:$0xff] %v1486_v0 }
 0x29d   :  { %v1495_v18 = vmax.f32 %v1463_v5, 0.0  ;;  %v1496_v45 = vmax.f32 %v1464_v35, 0.0  ;;  %v1497_v21 = vmax.f32 %v1465_v38, 0.0  ;;  %v1498_v22 = vmax.f32 %v1466_v61, 0.0  ;;  %1519 = vst [vmem:[%s2750_s4 + $0xa0] sm:$0xff] %v1487_v42  ;;  %1520 = vst [vmem:[%s2750_s4 + $0xa8] sm:$0xff] %v1488_v41 }
 0x29e   :  { %1521 = vst [vmem:[%s2750_s4 + $0xb0] sm:$0xff] %v1489_v36  ;;  %1522 = vst [vmem:[%s2750_s4 + $0xb8] sm:$0xff] %v1490_v44 }
 0x29f   :  { %1523 = vst [vmem:[%s2750_s4 + $0xc0] sm:$0xff] %v1491_v13  ;;  %1524 = vst [vmem:[%s2750_s4 + $0xc8] sm:$0xff] %v1492_v16 }
 0x2a0   :  { %1525 = vst [vmem:[%s2750_s4 + $0xd0] sm:$0xff] %v1493_v14  ;;  %1526 = vst [vmem:[%s2750_s4 + $0xd8] sm:$0xff] %v1494_v20 }
 0x2a1   :  { %1527 = vst [vmem:[%s2750_s4 + $0xe0] sm:$0xff] %v1495_v18  ;;  %1528 = vst [vmem:[%s2750_s4 + $0xe8] sm:$0xff] %v1496_v45 }
 0x2a2   :  { %1529 = vst [vmem:[%s2750_s4 + $0xf0] sm:$0xff] %v1497_v21  ;;  %1530 = vst [vmem:[%s2750_s4 + $0xf8] sm:$0xff] %v1498_v22 }

// kernel: generator_forward.11
= control target key start
LH: loop header
LB: loop body
LE: loop exit
PB: predicated region body
PF: predicated region fallthrough
CT: control target
= control target key end

     0   :  { %v1868_v3 = vmov 0   ;;  %v1869_v19 = vmov 1966171168   ;;  %v178_v21 = vlaneseq  ;;  %vm910_vm0 = vcmask 130048   ;;  %s2434_s0 = inlined_call_operand.vmem [shape: bf16[144,2048], index: 0, kind: input, shape index: {}]   ;;  %s2435_s1 = inlined_call_operand.vmem [shape: bf16[2,144], index: 1, kind: input, shape index: {}]   ;;  %s2436_s2 = inlined_call_operand.vmem [shape: f32[2,1], index: 2, kind: input, shape index: {}]   ;;  %s2437_s3 = inlined_call_operand.vmem [shape: f32[2,2048], index: 3, kind: output, shape index: {}]  }
   0x1   :  { %v16_v0 = vld [vmem:[%s2434_s0] sm:$0xff]  ;;  %v17_v2 = vld [vmem:[%s2434_s0 + $0x8] sm:$0xff]  ;;  %1771 = vset.pattern.permute.xlu0 %v1868_v3  ;;  %v176_v20 = vunpack.c.l.s4 %v1869_v19  ;;  %v27_v19 = vld [vmem:[%s2434_s0 + $0x58] sm:$0xff] }
   0x2   :  { %v24_v1 = vld [vmem:[%s2434_s0 + $0x40] sm:$0xff]  ;;  %v25_v5 = vld [vmem:[%s2434_s0 + $0x48] sm:$0xff]  ;;  %v179_v31 = vshrl.u32 %v178_v21, 7 }
   0x3   :  { %v1599_v4 = vcombine.high %v16_v0, %v24_v1  ;;  %v1598_v6 = vcombine.low %v16_v0, %v24_v1  ;;  %v32_v7 = vld [vmem:[%s2434_s0 + $0x80] sm:$0xff]  ;;  %v1601_v9 = vcombine.high %v17_v2, %v25_v5  ;;  %v1600_v10 = vcombine.low %v17_v2, %v25_v5  ;;  %v33_v12 = vld [vmem:[%s2434_s0 + $0x88] sm:$0xff] }
   0x4   :  { %v40_v8 = vld [vmem:[%s2434_s0 + $0xc0] sm:$0xff]  ;;  %v41_v13 = vld [vmem:[%s2434_s0 + $0xc8] sm:$0xff]  ;;  %v177_v30 = vunpack.c.0.s8 %v176_v20 }
   0x5   :  { %v1615_v11 = vcombine.high %v32_v7, %v40_v8  ;;  %v48_v14 = vld [vmem:[%s2434_s0 + $0x100] sm:$0xff]  ;;  %914 = vmatprep.subr.bf16.mxu0 %v1599_v4  ;;  %v1617_v15 = vcombine.high %v33_v12, %v41_v13  ;;  %v49_v17 = vld [vmem:[%s2434_s0 + $0x108] sm:$0xff]  ;;  %955 = vmatprep.subr.bf16.mxu1 %v1601_v9  ;;  %v1614_v22 = vcombine.low %v32_v7, %v40_v8 }
   0x6   :  { %v56_v16 = vld [vmem:[%s2434_s0 + $0x140] sm:$0xff]  ;;  %v57_v18 = vld [vmem:[%s2434_s0 + $0x148] sm:$0xff]  ;;  %915 = vmatpush1.bf16.msra.mxu0 %v1598_v6  ;;  %956 = vmatpush1.bf16.msra.mxu1 %v1600_v10  ;;  %v1616_v23 = vcombine.low %v33_v12, %v41_v13  ;;  %v1950_v40 = vsub.s32 %v177_v30, %v179_v31 }
   0x7   :  { %916 = vmatprep.subr.bf16.mxu0 %v1615_v11  ;;  %v1631_v24 = vcombine.high %v48_v14, %v56_v16  ;;  %957 = vmatprep.subr.bf16.mxu1 %v1617_v15  ;;  %v1633_v25 = vcombine.high %v49_v17, %v57_v18  ;;  %v64_v26 = vld [vmem:[%s2434_s0 + $0x180] sm:$0xff]  ;;  %v65_v28 = vld [vmem:[%s2434_s0 + $0x188] sm:$0xff]  ;;  %v1630_v32 = vcombine.low %v48_v14, %v56_v16  ;;  %v18_v16 = vld [vmem:[%s2434_s0 + $0x10] sm:$0xff] }
   0x8   :  { %v72_v27 = vld [vmem:[%s2434_s0 + $0x1c0] sm:$0xff]  ;;  %v73_v29 = vld [vmem:[%s2434_s0 + $0x1c8] sm:$0xff]  ;;  %v1632_v33 = vcombine.low %v49_v17, %v57_v18  ;;  %v26_v17 = vld [vmem:[%s2434_s0 + $0x50] sm:$0xff] }
   0x9   :  { %v1647_v34 = vcombine.high %v64_v26, %v72_v27  ;;  %v1649_v35 = vcombine.high %v65_v28, %v73_v29  ;;  %v80_v36 = vld [vmem:[%s2434_s0 + $0x200] sm:$0xff]  ;;  %v81_v38 = vld [vmem:[%s2434_s0 + $0x208] sm:$0xff]  ;;  %v1646_v41 = vcombine.low %v64_v26, %v72_v27  ;;  %v1648_v43 = vcombine.low %v65_v28, %v73_v29  ;;  %v19_v18 = vld [vmem:[%s2434_s0 + $0x18] sm:$0xff] }
   0xa   :  { %917 = vmatpush1.bf16.msra.mxu0 %v1614_v22  ;;  %958 = vmatpush1.bf16.msra.mxu1 %v1616_v23  ;;  %v88_v37 = vld [vmem:[%s2434_s0 + $0x240] sm:$0xff]  ;;  %v89_v39 = vld [vmem:[%s2434_s0 + $0x248] sm:$0xff]  ;;  %v1603_v22 = vcombine.high %v18_v16, %v26_v17  ;;  %v1605_v23 = vcombine.high %v19_v18, %v27_v19  ;;  %v35_v27 = vld [vmem:[%s2434_s0 + $0x98] sm:$0xff]  ;;  %v1602_v29 = vcombine.low %v18_v16, %v26_v17 }
   0xb   :  { %918 = vmatprep.subr.bf16.mxu0 %v1631_v24  ;;  %959 = vmatprep.subr.bf16.mxu1 %v1633_v25  ;;  %v1955_v42 = vld.sshfl [vmem:[%s2435_s1] sm:$0x11 pattern:$0x75316420]  ;;  %v1663_v44 = vcombine.high %v80_v36, %v88_v37  ;;  %v1665_v46 = vcombine.high %v81_v38, %v89_v39  ;;  %v97_v49 = vld [vmem:[%s2434_s0 + $0x288] sm:$0xff]  ;;  %v1662_v52 = vcombine.low %v80_v36, %v88_v37  ;;  %v34_v24 = vld [vmem:[%s2434_s0 + $0x90] sm:$0xff] }
   0xc   :  { %v174_v45 = vcombine.high %v1955_v42, %v1955_v42  ;;  %v96_v47 = vld [vmem:[%s2434_s0 + $0x280] sm:$0xff]  ;;  %v105_v50 = vld [vmem:[%s2434_s0 + $0x2c8] sm:$0xff]  ;;  %v1664_v53 = vcombine.low %v81_v38, %v89_v39  ;;  %v42_v25 = vld [vmem:[%s2434_s0 + $0xd0] sm:$0xff]  ;;  %v2034_v26 = vrot.slane %v1955_v42, %v1950_v40  ;;  %v1604_v30 = vcombine.low %v19_v18, %v27_v19 }
   0xd   :  { %v104_v48 = vld [vmem:[%s2434_s0 + $0x2c0] sm:$0xff]  ;;  %v1681_v55 = vcombine.high %v97_v49, %v105_v50  ;;  %v113_v58 = vld [vmem:[%s2434_s0 + $0x308] sm:$0xff]  ;;  %v1680_v61 = vcombine.low %v97_v49, %v105_v50  ;;  %v43_v28 = vld [vmem:[%s2434_s0 + $0xd8] sm:$0xff]  ;;  %v1619_v31 = vcombine.high %v34_v24, %v42_v25  ;;  %v1618_v37 = vcombine.low %v34_v24, %v42_v25 }
   0xe   :  { %919 = vmatpush1.bf16.msra.mxu0 %v1630_v32  ;;  %960 = vmatpush1.bf16.msra.mxu1 %v1632_v33  ;;  %v1972_v51 = vrot.slane %v174_v45, %v1950_v40  ;;  %v1679_v54 = vcombine.high %v96_v47, %v104_v48  ;;  %v112_v56 = vld [vmem:[%s2434_s0 + $0x300] sm:$0xff]  ;;  %v121_v59 = vld [vmem:[%s2434_s0 + $0x348] sm:$0xff]  ;;  %v1678_v60 = vcombine.low %v96_v47, %v104_v48  ;;  %v50_v33 = vld [vmem:[%s2434_s0 + $0x110] sm:$0xff] }
   0xf   :  { %920 = vmatprep.subr.bf16.mxu0 %v1647_v34  ;;  %961 = vmatprep.subr.bf16.mxu1 %v1649_v35  ;;  %v120_v57 = vld [vmem:[%s2434_s0 + $0x340] sm:$0xff]  ;;  %v1697_v63 = vcombine.high %v113_v58, %v121_v59  ;;  %v129_v2 = vld [vmem:[%s2434_s0 + $0x388] sm:$0xff]  ;;  %v1696_v5 = vcombine.low %v113_v58, %v121_v59  ;;  %v1621_v32 = vcombine.high %v35_v27, %v43_v28  ;;  %v58_v34 = vld [vmem:[%s2434_s0 + $0x150] sm:$0xff] }
  0x10   :  { %1742 = vmatprep.mubr.msk.bf16.mxu0 %vm910_vm0, %v1972_v51  ;;  %1743 = vmatprep.mubr.msk.bf16.mxu1 %vm910_vm0, %v1972_v51  ;;  %v1695_v62 = vcombine.high %v112_v56, %v120_v57  ;;  %v128_v0 = vld [vmem:[%s2434_s0 + $0x380] sm:$0xff]  ;;  %v137_v3 = vld [vmem:[%s2434_s0 + $0x3c8] sm:$0xff]  ;;  %v1694_v4 = vcombine.low %v112_v56, %v120_v57  ;;  %v51_v35 = vld [vmem:[%s2434_s0 + $0x118] sm:$0xff]  ;;  %v1620_v38 = vcombine.low %v35_v27, %v43_v28 }
  0x11   :  { %v136_v1 = vld [vmem:[%s2434_s0 + $0x3c0] sm:$0xff]  ;;  %v1713_v7 = vcombine.high %v129_v2, %v137_v3  ;;  %v145_v10 = vld [vmem:[%s2434_s0 + $0x408] sm:$0xff]  ;;  %v1712_v13 = vcombine.low %v129_v2, %v137_v3  ;;  %v59_v36 = vld [vmem:[%s2434_s0 + $0x158] sm:$0xff]  ;;  %v1635_v39 = vcombine.high %v50_v33, %v58_v34  ;;  %v1634_v47 = vcombine.low %v50_v33, %v58_v34 }
  0x12   :  { %921 = vmatpush1.bf16.msra.mxu0 %v1646_v41  ;;  %962 = vmatpush1.bf16.msra.mxu1 %v1648_v43  ;;  %v1711_v6 = vcombine.high %v128_v0, %v136_v1  ;;  %v144_v8 = vld [vmem:[%s2434_s0 + $0x400] sm:$0xff]  ;;  %v153_v11 = vld [vmem:[%s2434_s0 + $0x448] sm:$0xff]  ;;  %v1710_v12 = vcombine.low %v128_v0, %v136_v1  ;;  %v1637_v42 = vcombine.high %v51_v35, %v59_v36  ;;  %v66_v43 = vld [vmem:[%s2434_s0 + $0x190] sm:$0xff] }
  0x13   :  { %922 = vmatprep.subr.bf16.mxu0 %v1663_v44  ;;  %963 = vmatprep.subr.bf16.mxu1 %v1665_v46  ;;  %v152_v9 = vld [vmem:[%s2434_s0 + $0x440] sm:$0xff]  ;;  %v1729_v15 = vcombine.high %v145_v10, %v153_v11  ;;  %v1728_v21 = vcombine.low %v145_v10, %v153_v11  ;;  %v74_v44 = vld [vmem:[%s2434_s0 + $0x1d0] sm:$0xff]  ;;  %v67_v45 = vld [vmem:[%s2434_s0 + $0x198] sm:$0xff]  ;;  %v1636_v48 = vcombine.low %v51_v35, %v59_v36 }
  0x14   :  { %v1727_v14 = vcombine.high %v144_v8, %v152_v9  ;;  %v1726_v20 = vcombine.low %v144_v8, %v152_v9  ;;  %v160_v41 = vld [vmem:[%s2436_s2] sm:$0x3]  ;;  %v75_v46 = vld [vmem:[%s2434_s0 + $0x1d8] sm:$0xff]  ;;  %v1651_v49 = vcombine.high %v66_v43, %v74_v44  ;;  %v1650_v56 = vcombine.low %v66_v43, %v74_v44 }
  0x15   :  { %163 = vperm.xlu0 %1771, %v160_v41   ;;  %v1653_v50 = vcombine.high %v67_v45, %v75_v46  ;;  %v1652_v57 = vcombine.low %v67_v45, %v75_v46  ;;  %v45_v41 = vld [vmem:[%s2434_s0 + $0xe8] sm:$0xff]  ;;  %v52_v46 = vld [vmem:[%s2434_s0 + $0x120] sm:$0xff] }
  0x16   :  { %923 = vmatpush1.bf16.msra.mxu0 %v1662_v52  ;;  %964 = vmatpush1.bf16.msra.mxu1 %v1664_v53  ;;  %v82_v52 = vld [vmem:[%s2434_s0 + $0x210] sm:$0xff] }
  0x17   :  { %924 = vmatprep.subr.bf16.mxu0 %v1679_v54  ;;  %965 = vmatprep.subr.bf16.mxu1 %v1681_v55  ;;  %v90_v53 = vld [vmem:[%s2434_s0 + $0x250] sm:$0xff]  ;;  %v83_v54 = vld [vmem:[%s2434_s0 + $0x218] sm:$0xff] }
  0x18   :  { %v91_v55 = vld [vmem:[%s2434_s0 + $0x258] sm:$0xff]  ;;  %v1667_v58 = vcombine.high %v82_v52, %v90_v53  ;;  %v1666_v0 = vcombine.low %v82_v52, %v90_v53 }
  0x19   :  { %v1669_v59 = vcombine.high %v83_v54, %v91_v55  ;;  %v1668_v1 = vcombine.low %v83_v54, %v91_v55  ;;  %v68_v55 = vld [vmem:[%s2434_s0 + $0x1a0] sm:$0xff] }
  0x1a   :  { %925 = vmatpush1.bf16.msra.mxu0 %v1678_v60  ;;  %966 = vmatpush1.bf16.msra.mxu1 %v1680_v61  ;;  %v98_v60 = vld [vmem:[%s2434_s0 + $0x290] sm:$0xff] }
  0x1b   :  { %926 = vmatprep.subr.bf16.mxu0 %v1695_v62  ;;  %967 = vmatprep.subr.bf16.mxu1 %v1697_v63  ;;  %v106_v61 = vld [vmem:[%s2434_s0 + $0x2d0] sm:$0xff]  ;;  %v99_v62 = vld [vmem:[%s2434_s0 + $0x298] sm:$0xff] }
  0x1c   :  { %v107_v63 = vld [vmem:[%s2434_s0 + $0x2d8] sm:$0xff]  ;;  %v1683_v2 = vcombine.high %v98_v60, %v106_v61  ;;  %v1682_v8 = vcombine.low %v98_v60, %v106_v61 }
  0x1d   :  { %v1685_v3 = vcombine.high %v99_v62, %v107_v63  ;;  %v1684_v9 = vcombine.low %v99_v62, %v107_v63  ;;  %v84_v63 = vld [vmem:[%s2434_s0 + $0x220] sm:$0xff] }
  0x1e   :  { %927 = vmatpush1.bf16.msra.mxu0 %v1694_v4  ;;  %968 = vmatpush1.bf16.msra.mxu1 %v1696_v5  ;;  %v114_v4 = vld [vmem:[%s2434_s0 + $0x310] sm:$0xff] }
  0x1f   :  { %928 = vmatprep.subr.bf16.mxu0 %v1711_v6  ;;  %969 = vmatprep.subr.bf16.mxu1 %v1713_v7  ;;  %v122_v5 = vld [vmem:[%s2434_s0 + $0x350] sm:$0xff]  ;;  %v115_v6 = vld [vmem:[%s2434_s0 + $0x318] sm:$0xff] }
  0x20   :  { %v123_v7 = vld [vmem:[%s2434_s0 + $0x358] sm:$0xff]  ;;  %v1699_v10 = vcombine.high %v114_v4, %v122_v5  ;;  %v1698_v16 = vcombine.low %v114_v4, %v122_v5 }
  0x21   :  { %v1701_v11 = vcombine.high %v115_v6, %v123_v7  ;;  %v1700_v17 = vcombine.low %v115_v6, %v123_v7  ;;  %v100_v7 = vld [vmem:[%s2434_s0 + $0x2a0] sm:$0xff] }
  0x22   :  { %929 = vmatpush1.bf16.msra.mxu0 %v1710_v12  ;;  %970 = vmatpush1.bf16.msra.mxu1 %v1712_v13  ;;  %v130_v12 = vld [vmem:[%s2434_s0 + $0x390] sm:$0xff] }
  0x23   :  { %930 = vmatprep.subr.bf16.mxu0 %v1727_v14  ;;  %971 = vmatprep.subr.bf16.mxu1 %v1729_v15  ;;  %v138_v13 = vld [vmem:[%s2434_s0 + $0x3d0] sm:$0xff]  ;;  %v131_v14 = vld [vmem:[%s2434_s0 + $0x398] sm:$0xff] }
  0x24   :  { %v139_v15 = vld [vmem:[%s2434_s0 + $0x3d8] sm:$0xff]  ;;  %v1715_v18 = vcombine.high %v130_v12, %v138_v13  ;;  %v1714_v24 = vcombine.low %v130_v12, %v138_v13 }
  0x25   :  { %v1717_v19 = vcombine.high %v131_v14, %v139_v15  ;;  %v1716_v25 = vcombine.low %v131_v14, %v139_v15  ;;  %v116_v15 = vld [vmem:[%s2434_s0 + $0x320] sm:$0xff] }
  0x26   :  { %931 = vmatpush1.bf16.msra.mxu0 %v1726_v20  ;;  %972 = vmatpush1.bf16.msra.mxu1 %v1728_v21  ;;  %v146_v20 = vld [vmem:[%s2434_s0 + $0x410] sm:$0xff] }
  0x27   :  { %996 = vmatprep.subr.bf16.mxu0 %v1603_v22  ;;  %1037 = vmatprep.subr.bf16.mxu1 %v1605_v23  ;;  %v154_v21 = vld [vmem:[%s2434_s0 + $0x450] sm:$0xff]  ;;  %v147_v22 = vld [vmem:[%s2434_s0 + $0x418] sm:$0xff] }
  0x28   :  { %v155_v23 = vld [vmem:[%s2434_s0 + $0x458] sm:$0xff]  ;;  %v1731_v27 = vcombine.high %v146_v20, %v154_v21  ;;  %v1730_v33 = vcombine.low %v146_v20, %v154_v21 }
  0x29   :  { %947 = vmatmul.mubr.bf16.vlgmr.msra.gmra.mrb[0].mxu0 %v2034_v26  ;;  %988 = vmatmul.mubr.bf16.vlgmr.msra.gmra.mrb[0].mxu1 %v2034_v26  ;;  %v1733_v28 = vcombine.high %v147_v22, %v155_v23  ;;  %v1732_v34 = vcombine.low %v147_v22, %v155_v23  ;;  %v132_v23 = vld [vmem:[%s2434_s0 + $0x3a0] sm:$0xff] }
  0x2a   :  { %997 = vmatpush1.bf16.msra.mxu0 %v1602_v29  ;;  %1038 = vmatpush1.bf16.msra.mxu1 %v1604_v30  ;;  %v20_v29 = vld [vmem:[%s2434_s0 + $0x20] sm:$0xff] }
  0x2b   :  { %998 = vmatprep.subr.bf16.mxu0 %v1619_v31  ;;  %1039 = vmatprep.subr.bf16.mxu1 %v1621_v32  ;;  %v28_v30 = vld [vmem:[%s2434_s0 + $0x60] sm:$0xff]  ;;  %v21_v31 = vld [vmem:[%s2434_s0 + $0x28] sm:$0xff] }
  0x2c   :  { %1744 = vmatprep.mubr.msk.bf16.mxu0 %vm910_vm0, %v1972_v51  ;;  %1745 = vmatprep.mubr.msk.bf16.mxu1 %vm910_vm0, %v1972_v51  ;;  %v29_v32 = vld [vmem:[%s2434_s0 + $0x68] sm:$0xff]  ;;  %v1607_v35 = vcombine.high %v20_v29, %v28_v30 }
  0x2d   :  { %v1609_v36 = vcombine.high %v21_v31, %v29_v32  ;;  %v1608_v43 = vcombine.low %v21_v31, %v29_v32  ;;  %v148_v32 = vld [vmem:[%s2434_s0 + $0x420] sm:$0xff] }
  0x2e   :  { %999 = vmatpush1.bf16.msra.mxu0 %v1618_v37  ;;  %1040 = vmatpush1.bf16.msra.mxu1 %v1620_v38  ;;  %v36_v37 = vld [vmem:[%s2434_s0 + $0xa0] sm:$0xff] }
  0x2f   :  { %1000 = vmatprep.subr.bf16.mxu0 %v1635_v39  ;;  %1041 = vmatprep.subr.bf16.mxu1 %v1637_v42  ;;  %v44_v38 = vld [vmem:[%s2434_s0 + $0xe0] sm:$0xff]  ;;  %v37_v39 = vld [vmem:[%s2434_s0 + $0xa8] sm:$0xff]  ;;  %v1606_v42 = vcombine.low %v20_v29, %v28_v30 }
  0x30   :  { %v1623_v44 = vcombine.high %v36_v37, %v44_v38  ;;  %v1625_v45 = vcombine.high %v37_v39, %v45_v41  ;;  %v1624_v52 = vcombine.low %v37_v39, %v45_v41  ;;  %v22_v41 = vld [vmem:[%s2434_s0 + $0x30] sm:$0xff] }
  0x32   :  { %1001 = vmatpush1.bf16.msra.mxu0 %v1634_v47  ;;  %1042 = vmatpush1.bf16.msra.mxu1 %v1636_v48  ;;  %v60_v47 = vld [vmem:[%s2434_s0 + $0x160] sm:$0xff]  ;;  %v53_v48 = vld [vmem:[%s2434_s0 + $0x128] sm:$0xff] }
  0x33   :  { %1002 = vmatprep.subr.bf16.mxu0 %v1651_v49  ;;  %1043 = vmatprep.subr.bf16.mxu1 %v1653_v50  ;;  %v61_v49 = vld [vmem:[%s2434_s0 + $0x168] sm:$0xff]  ;;  %v1622_v50 = vcombine.low %v36_v37, %v44_v38  ;;  %v1639_v53 = vcombine.high %v52_v46, %v60_v47 }
  0x34   :  { %v1641_v54 = vcombine.high %v53_v48, %v61_v49  ;;  %v1640_v60 = vcombine.low %v53_v48, %v61_v49  ;;  %v38_v49 = vld [vmem:[%s2434_s0 + $0xb0] sm:$0xff] }
  0x36   :  { %1003 = vmatpush1.bf16.msra.mxu0 %v1650_v56  ;;  %1044 = vmatpush1.bf16.msra.mxu1 %v1652_v57  ;;  %v76_v56 = vld [vmem:[%s2434_s0 + $0x1e0] sm:$0xff]  ;;  %v69_v57 = vld [vmem:[%s2434_s0 + $0x1a8] sm:$0xff] }
  0x37   :  { %1004 = vmatprep.subr.bf16.mxu0 %v1667_v58  ;;  %1045 = vmatprep.subr.bf16.mxu1 %v1669_v59  ;;  %v77_v58 = vld [vmem:[%s2434_s0 + $0x1e8] sm:$0xff]  ;;  %v1638_v59 = vcombine.low %v52_v46, %v60_v47  ;;  %v1655_v61 = vcombine.high %v68_v55, %v76_v56 }
  0x38   :  { %v1657_v62 = vcombine.high %v69_v57, %v77_v58  ;;  %v1656_v4 = vcombine.low %v69_v57, %v77_v58  ;;  %v54_v58 = vld [vmem:[%s2434_s0 + $0x130] sm:$0xff] }
  0x3a   :  { %1005 = vmatpush1.bf16.msra.mxu0 %v1666_v0  ;;  %1046 = vmatpush1.bf16.msra.mxu1 %v1668_v1  ;;  %v92_v0 = vld [vmem:[%s2434_s0 + $0x260] sm:$0xff]  ;;  %v85_v1 = vld [vmem:[%s2434_s0 + $0x228] sm:$0xff] }
  0x3b   :  { %1006 = vmatprep.subr.bf16.mxu0 %v1683_v2  ;;  %1047 = vmatprep.subr.bf16.mxu1 %v1685_v3  ;;  %v93_v2 = vld [vmem:[%s2434_s0 + $0x268] sm:$0xff]  ;;  %v1654_v3 = vcombine.low %v68_v55, %v76_v56  ;;  %v1671_v5 = vcombine.high %v84_v63, %v92_v0 }
  0x3c   :  { %v1673_v6 = vcombine.high %v85_v1, %v93_v2  ;;  %v1672_v12 = vcombine.low %v85_v1, %v93_v2  ;;  %v70_v2 = vld [vmem:[%s2434_s0 + $0x1b0] sm:$0xff] }
  0x3e   :  { %1007 = vmatpush1.bf16.msra.mxu0 %v1682_v8  ;;  %1048 = vmatpush1.bf16.msra.mxu1 %v1684_v9  ;;  %v108_v8 = vld [vmem:[%s2434_s0 + $0x2e0] sm:$0xff]  ;;  %v101_v9 = vld [vmem:[%s2434_s0 + $0x2a8] sm:$0xff] }
  0x3f   :  { %1008 = vmatprep.subr.bf16.mxu0 %v1699_v10  ;;  %1049 = vmatprep.subr.bf16.mxu1 %v1701_v11  ;;  %v109_v10 = vld [vmem:[%s2434_s0 + $0x2e8] sm:$0xff]  ;;  %v1670_v11 = vcombine.low %v84_v63, %v92_v0  ;;  %v1687_v13 = vcombine.high %v100_v7, %v108_v8 }
  0x40   :  { %v1689_v14 = vcombine.high %v101_v9, %v109_v10  ;;  %v1688_v20 = vcombine.low %v101_v9, %v109_v10  ;;  %v86_v10 = vld [vmem:[%s2434_s0 + $0x230] sm:$0xff] }
  0x42   :  { %1009 = vmatpush1.bf16.msra.mxu0 %v1698_v16  ;;  %1050 = vmatpush1.bf16.msra.mxu1 %v1700_v17  ;;  %v124_v16 = vld [vmem:[%s2434_s0 + $0x360] sm:$0xff]  ;;  %v117_v17 = vld [vmem:[%s2434_s0 + $0x328] sm:$0xff] }
  0x43   :  { %1010 = vmatprep.subr.bf16.mxu0 %v1715_v18  ;;  %1051 = vmatprep.subr.bf16.mxu1 %v1717_v19  ;;  %v125_v18 = vld [vmem:[%s2434_s0 + $0x368] sm:$0xff]  ;;  %v1686_v19 = vcombine.low %v100_v7, %v108_v8  ;;  %v1703_v21 = vcombine.high %v116_v15, %v124_v16 }
  0x44   :  { %v1705_v22 = vcombine.high %v117_v17, %v125_v18  ;;  %v1704_v29 = vcombine.low %v117_v17, %v125_v18  ;;  %v102_v17 = vld [vmem:[%s2434_s0 + $0x2b0] sm:$0xff] }
  0x45   :  { %v110_v18 = vld [vmem:[%s2434_s0 + $0x2f0] sm:$0xff] }
  0x46   :  { %1011 = vmatpush1.bf16.msra.mxu0 %v1714_v24  ;;  %1052 = vmatpush1.bf16.msra.mxu1 %v1716_v25  ;;  %v140_v24 = vld [vmem:[%s2434_s0 + $0x3e0] sm:$0xff]  ;;  %v133_v25 = vld [vmem:[%s2434_s0 + $0x3a8] sm:$0xff] }
  0x47   :  { %1012 = vmatprep.subr.bf16.mxu0 %v1731_v27  ;;  %1053 = vmatprep.subr.bf16.mxu1 %v1733_v28  ;;  %v141_v27 = vld [vmem:[%s2434_s0 + $0x3e8] sm:$0xff]  ;;  %v1702_v28 = vcombine.low %v116_v15, %v124_v16  ;;  %v1719_v30 = vcombine.high %v132_v23, %v140_v24 }
  0x48   :  { %v1721_v31 = vcombine.high %v133_v25, %v141_v27  ;;  %v1720_v37 = vcombine.low %v133_v25, %v141_v27  ;;  %v118_v25 = vld [vmem:[%s2434_s0 + $0x330] sm:$0xff] }
  0x49   :  { %v126_v27 = vld [vmem:[%s2434_s0 + $0x370] sm:$0xff] }
  0x4a   :  { %1013 = vmatpush1.bf16.msra.mxu0 %v1730_v33  ;;  %1054 = vmatpush1.bf16.msra.mxu1 %v1732_v34  ;;  %v156_v33 = vld [vmem:[%s2434_s0 + $0x460] sm:$0xff]  ;;  %v149_v34 = vld [vmem:[%s2434_s0 + $0x428] sm:$0xff] }
  0x4b   :  { %1078 = vmatprep.subr.bf16.mxu0 %v1607_v35  ;;  %1119 = vmatprep.subr.bf16.mxu1 %v1609_v36  ;;  %v157_v35 = vld [vmem:[%s2434_s0 + $0x468] sm:$0xff]  ;;  %v1718_v36 = vcombine.low %v132_v23, %v140_v24  ;;  %v1735_v38 = vcombine.high %v148_v32, %v156_v33  ;;  %v1691_v23 = vcombine.high %v102_v17, %v110_v18 }
  0x4c   :  { %v1737_v39 = vcombine.high %v149_v34, %v157_v35  ;;  %v1736_v46 = vcombine.low %v149_v34, %v157_v35  ;;  %v134_v34 = vld [vmem:[%s2434_s0 + $0x3b0] sm:$0xff] }
  0x4d   :  { %1029 = vmatmul.mubr.bf16.vlgmr.msra.gmra.mrb[4].mxu0 %v2034_v26  ;;  %1070 = vmatmul.mubr.bf16.vlgmr.msra.gmra.mrb[4].mxu1 %v2034_v26  ;;  %v142_v35 = vld [vmem:[%s2434_s0 + $0x3f0] sm:$0xff] }
  0x4e   :  { %1079 = vmatpush1.bf16.msra.mxu0 %v1606_v42  ;;  %1120 = vmatpush1.bf16.msra.mxu1 %v1608_v43  ;;  %v30_v42 = vld [vmem:[%s2434_s0 + $0x70] sm:$0xff]  ;;  %v23_v43 = vld [vmem:[%s2434_s0 + $0x38] sm:$0xff] }
  0x4f   :  { %1080 = vmatprep.subr.bf16.mxu0 %v1623_v44  ;;  %1121 = vmatprep.subr.bf16.mxu1 %v1625_v45  ;;  %v31_v44 = vld [vmem:[%s2434_s0 + $0x78] sm:$0xff]  ;;  %v1734_v45 = vcombine.low %v148_v32, %v156_v33  ;;  %v1611_v47 = vcombine.high %v22_v41, %v30_v42  ;;  %v1707_v32 = vcombine.high %v118_v25, %v126_v27 }
  0x50   :  { %1746 = vmatprep.mubr.msk.bf16.mxu0 %vm910_vm0, %v1972_v51  ;;  %1747 = vmatprep.mubr.msk.bf16.mxu1 %vm910_vm0, %v1972_v51  ;;  %v1613_v48 = vcombine.high %v23_v43, %v31_v44  ;;  %v1612_v55 = vcombine.low %v23_v43, %v31_v44  ;;  %v150_v43 = vld [vmem:[%s2434_s0 + $0x430] sm:$0xff] }
  0x51   :  { %v158_v44 = vld [vmem:[%s2434_s0 + $0x470] sm:$0xff] }
  0x52   :  { %1081 = vmatpush1.bf16.msra.mxu0 %v1622_v50  ;;  %1122 = vmatpush1.bf16.msra.mxu1 %v1624_v52  ;;  %v46_v50 = vld [vmem:[%s2434_s0 + $0xf0] sm:$0xff]  ;;  %v39_v52 = vld [vmem:[%s2434_s0 + $0xb8] sm:$0xff] }
  0x53   :  { %1082 = vmatprep.subr.bf16.mxu0 %v1639_v53  ;;  %1123 = vmatprep.subr.bf16.mxu1 %v1641_v54  ;;  %v47_v53 = vld [vmem:[%s2434_s0 + $0xf8] sm:$0xff]  ;;  %v1610_v54 = vcombine.low %v22_v41, %v30_v42  ;;  %v1627_v56 = vcombine.high %v38_v49, %v46_v50  ;;  %v1723_v41 = vcombine.high %v134_v34, %v142_v35 }
  0x54   :  { %v1629_v57 = vcombine.high %v39_v52, %v47_v53  ;;  %v1628_v63 = vcombine.low %v39_v52, %v47_v53  ;;  %v1738_v52 = vcombine.low %v150_v43, %v158_v44 }
  0x56   :  { %1083 = vmatpush1.bf16.msra.mxu0 %v1638_v59  ;;  %1124 = vmatpush1.bf16.msra.mxu1 %v1640_v60  ;;  %v62_v59 = vld [vmem:[%s2434_s0 + $0x170] sm:$0xff]  ;;  %v55_v60 = vld [vmem:[%s2434_s0 + $0x138] sm:$0xff] }
  0x57   :  { %1084 = vmatprep.subr.bf16.mxu0 %v1655_v61  ;;  %1125 = vmatprep.subr.bf16.mxu1 %v1657_v62  ;;  %v63_v61 = vld [vmem:[%s2434_s0 + $0x178] sm:$0xff]  ;;  %v1626_v62 = vcombine.low %v38_v49, %v46_v50  ;;  %v1643_v0 = vcombine.high %v54_v58, %v62_v59  ;;  %v1739_v49 = vcombine.high %v150_v43, %v158_v44 }
  0x58   :  { %v1645_v1 = vcombine.high %v55_v60, %v63_v61  ;;  %v1644_v7 = vcombine.low %v55_v60, %v63_v61 }
  0x5a   :  { %1085 = vmatpush1.bf16.msra.mxu0 %v1654_v3  ;;  %1126 = vmatpush1.bf16.msra.mxu1 %v1656_v4  ;;  %v78_v3 = vld [vmem:[%s2434_s0 + $0x1f0] sm:$0xff]  ;;  %v71_v4 = vld [vmem:[%s2434_s0 + $0x1b8] sm:$0xff] }
  0x5b   :  { %1086 = vmatprep.subr.bf16.mxu0 %v1671_v5  ;;  %1127 = vmatprep.subr.bf16.mxu1 %v1673_v6  ;;  %v79_v5 = vld [vmem:[%s2434_s0 + $0x1f8] sm:$0xff]  ;;  %v1642_v6 = vcombine.low %v54_v58, %v62_v59  ;;  %v1659_v8 = vcombine.high %v70_v2, %v78_v3 }
  0x5c   :  { %v1661_v9 = vcombine.high %v71_v4, %v79_v5 }
  0x5e   :  { %1087 = vmatpush1.bf16.msra.mxu0 %v1670_v11  ;;  %1128 = vmatpush1.bf16.msra.mxu1 %v1672_v12  ;;  %v94_v11 = vld [vmem:[%s2434_s0 + $0x270] sm:$0xff]  ;;  %v95_v12 = vld [vmem:[%s2434_s0 + $0x278] sm:$0xff] }
  0x5f   :  { %1088 = vmatprep.subr.bf16.mxu0 %v1687_v13  ;;  %1129 = vmatprep.subr.bf16.mxu1 %v1689_v14  ;;  %v1658_v13 = vcombine.low %v70_v2, %v78_v3  ;;  %v1660_v14 = vcombine.low %v71_v4, %v79_v5  ;;  %v1675_v15 = vcombine.high %v86_v10, %v94_v11 }
  0x62   :  { %1089 = vmatpush1.bf16.msra.mxu0 %v1686_v19  ;;  %1130 = vmatpush1.bf16.msra.mxu1 %v1688_v20  ;;  %v103_v19 = vld [vmem:[%s2434_s0 + $0x2b8] sm:$0xff] }
  0x63   :  { %1090 = vmatprep.subr.bf16.mxu0 %v1703_v21  ;;  %1131 = vmatprep.subr.bf16.mxu1 %v1705_v22  ;;  %v111_v20 = vld [vmem:[%s2434_s0 + $0x2f8] sm:$0xff]  ;;  %v1674_v21 = vcombine.low %v86_v10, %v94_v11 }
  0x64   :  { %v1693_v24 = vcombine.high %v103_v19, %v111_v20 }
  0x66   :  { %1091 = vmatpush1.bf16.msra.mxu0 %v1702_v28  ;;  %1132 = vmatpush1.bf16.msra.mxu1 %v1704_v29  ;;  %v119_v28 = vld [vmem:[%s2434_s0 + $0x338] sm:$0xff] }
  0x67   :  { %1092 = vmatprep.subr.bf16.mxu0 %v1719_v30  ;;  %1133 = vmatprep.subr.bf16.mxu1 %v1721_v31  ;;  %v127_v29 = vld [vmem:[%s2434_s0 + $0x378] sm:$0xff]  ;;  %v1690_v30 = vcombine.low %v102_v17, %v110_v18  ;;  %v1692_v31 = vcombine.low %v103_v19, %v111_v20 }
  0x68   :  { %v1709_v33 = vcombine.high %v119_v28, %v127_v29 }
  0x6a   :  { %1093 = vmatpush1.bf16.msra.mxu0 %v1718_v36  ;;  %1134 = vmatpush1.bf16.msra.mxu1 %v1720_v37  ;;  %v135_v36 = vld [vmem:[%s2434_s0 + $0x3b8] sm:$0xff] }
  0x6b   :  { %1094 = vmatprep.subr.bf16.mxu0 %v1735_v38  ;;  %1135 = vmatprep.subr.bf16.mxu1 %v1737_v39  ;;  %v143_v37 = vld [vmem:[%s2434_s0 + $0x3f8] sm:$0xff]  ;;  %v1706_v38 = vcombine.low %v118_v25, %v126_v27  ;;  %v1708_v39 = vcombine.low %v119_v28, %v127_v29 }
  0x6c   :  { %v1725_v42 = vcombine.high %v135_v36, %v143_v37 }
  0x6e   :  { %1095 = vmatpush1.bf16.msra.mxu0 %v1734_v45  ;;  %1136 = vmatpush1.bf16.msra.mxu1 %v1736_v46  ;;  %v151_v45 = vld [vmem:[%s2434_s0 + $0x438] sm:$0xff] }
  0x6f   :  { %1160 = vmatprep.subr.bf16.mxu0 %v1611_v47  ;;  %1201 = vmatprep.subr.bf16.mxu1 %v1613_v48  ;;  %v159_v46 = vld [vmem:[%s2434_s0 + $0x478] sm:$0xff]  ;;  %v1722_v47 = vcombine.low %v134_v34, %v142_v35  ;;  %v1724_v48 = vcombine.low %v135_v36, %v143_v37 }
  0x70   :  { %v1741_v50 = vcombine.high %v151_v45, %v159_v46  ;;  %v1740_v53 = vcombine.low %v151_v45, %v159_v46 }
  0x71   :  { %1111 = vmatmul.mubr.bf16.vlgmr.msra.gmra.mrb[8].mxu0 %v2034_v26  ;;  %1152 = vmatmul.mubr.bf16.vlgmr.msra.gmra.mrb[8].mxu1 %v2034_v26 }
  0x72   :  { %1161 = vmatpush1.bf16.msra.mxu0 %v1610_v54  ;;  %1202 = vmatpush1.bf16.msra.mxu1 %v1612_v55 }
  0x73   :  { %1162 = vmatprep.subr.bf16.mxu0 %v1627_v56  ;;  %1203 = vmatprep.subr.bf16.mxu1 %v1629_v57 }
  0x74   :  { %1748 = vmatprep.mubr.msk.bf16.mxu0 %vm910_vm0, %v1972_v51  ;;  %1749 = vmatprep.mubr.msk.bf16.mxu1 %vm910_vm0, %v1972_v51  ;;  %v87_v51 = vld [vmem:[%s2434_s0 + $0x238] sm:$0xff] }
  0x75   :  { %v1677_v16 = vcombine.high %v87_v51, %v95_v12  ;;  %v1676_v22 = vcombine.low %v87_v51, %v95_v12 }
  0x76   :  { %1163 = vmatpush1.bf16.msra.mxu0 %v1626_v62  ;;  %1204 = vmatpush1.bf16.msra.mxu1 %v1628_v63 }
  0x77   :  { %1164 = vmatprep.subr.bf16.mxu0 %v1643_v0  ;;  %1205 = vmatprep.subr.bf16.mxu1 %v1645_v1 }
  0x7a   :  { %1165 = vmatpush1.bf16.msra.mxu0 %v1642_v6  ;;  %1206 = vmatpush1.bf16.msra.mxu1 %v1644_v7 }
  0x7b   :  { %1166 = vmatprep.subr.bf16.mxu0 %v1659_v8  ;;  %1207 = vmatprep.subr.bf16.mxu1 %v1661_v9 }
  0x7e   :  { %1167 = vmatpush1.bf16.msra.mxu0 %v1658_v13  ;;  %1208 = vmatpush1.bf16.msra.mxu1 %v1660_v14 }
  0x7f   :  { %1168 = vmatprep.subr.bf16.mxu0 %v1675_v15  ;;  %1209 = vmatprep.subr.bf16.mxu1 %v1677_v16 }
  0x82   :  { %1169 = vmatpush1.bf16.msra.mxu0 %v1674_v21  ;;  %1210 = vmatpush1.bf16.msra.mxu1 %v1676_v22 }
  0x83   :  { %1170 = vmatprep.subr.bf16.mxu0 %v1691_v23  ;;  %1211 = vmatprep.subr.bf16.mxu1 %v1693_v24 }
  0x86   :  { %1171 = vmatpush1.bf16.msra.mxu0 %v1690_v30  ;;  %1212 = vmatpush1.bf16.msra.mxu1 %v1692_v31 }
  0x87   :  { %1172 = vmatprep.subr.bf16.mxu0 %v1707_v32  ;;  %1213 = vmatprep.subr.bf16.mxu1 %v1709_v33 }
  0x8a   :  { %1173 = vmatpush1.bf16.msra.mxu0 %v1706_v38  ;;  %1214 = vmatpush1.bf16.msra.mxu1 %v1708_v39 }
  0x8b   :  { %1174 = vmatprep.subr.bf16.mxu0 %v1723_v41  ;;  %1215 = vmatprep.subr.bf16.mxu1 %v1725_v42 }
  0x8e   :  { %1175 = vmatpush1.bf16.msra.mxu0 %v1722_v47  ;;  %1216 = vmatpush1.bf16.msra.mxu1 %v1724_v48 }
  0x8f   :  { %1176 = vmatprep.subr.bf16.mxu0 %v1739_v49  ;;  %1217 = vmatprep.subr.bf16.mxu1 %v1741_v50 }
  0x92   :  { %1177 = vmatpush1.bf16.msra.mxu0 %v1738_v52  ;;  %1218 = vmatpush1.bf16.msra.mxu1 %v1740_v53 }
  0x94   :  { %v2365_v54 = vpop.permute.xlu0 %163 }
  0x95   :  { %1193 = vmatmul.mubr.bf16.vlgmr.msra.gmra.mrb[12].mxu0 %v2034_v26  ;;  %1234 = vmatmul.mubr.bf16.vlgmr.msra.gmra.mrb[12].mxu1 %v2034_v26 }
  0xfc   :  { %v948_v55 = vpop.f32.mrb[0].mxu0  ;;  %v989_v56 = vpop.f32.mrb[0].mxu1 }
  0xfd   :  { %v949_v57 = vadd.f32 %v948_v55, %v2365_v54  ;;  %v950_v58 = vpop.f32.mrb[1].mxu0  ;;  %v990_v60 = vadd.f32 %v989_v56, %v2365_v54  ;;  %v991_v61 = vpop.f32.mrb[1].mxu1 }
  0xfe   :  { %v951_v59 = vadd.f32 %v950_v58, %v2365_v54  ;;  %v952_v62 = vpop.f32.mrb[2].mxu0  ;;  %v992_v0 = vadd.f32 %v991_v61, %v2365_v54  ;;  %v993_v1 = vpop.f32.mrb[2].mxu1 }
  0xff   :  { %1772 = vtanh.f32 %v949_v57  ;;  %v1751_v63 = vmul.f32 -1.442695, %v949_v57  ;;  %v953_v2 = vpop.f32.mrb[3].mxu0  ;;  %v994_v3 = vpop.f32.mrb[3].mxu1  ;;  %v1753_v4 = vmul.f32 -1.442695, %v990_v60 }
 0x100   :  { %1774 = vtanh.f32 %v951_v59  ;;  %v1752_v26 = vmul.f32 -1.442695, %v951_v59  ;;  %v1754_v5 = vmul.f32 -1.442695, %v992_v0 }
 0x101   :  { %1776 = vpow2.f32 %v1751_v63 }
 0x102   :  { %1778 = vpow2.f32 %v1752_v26 }
 0x103   :  { %1780 = vtanh.f32 %v990_v60 }
 0x104   :  { %1782 = vtanh.f32 %v992_v0 }
 0x105   :  { %1784 = vpow2.f32 %v1753_v4 }
 0x106   :  { %1786 = vpow2.f32 %v1754_v5 }
 0x109   :  { %v1773_v6 = vpop.eup %1772 }
 0x10a   :  { %v1775_v7 = vpop.eup %1774 }
 0x10b   :  { %v1777_v8 = vpop.eup %1776  ;;  %v1274_v9 = vcombine.low %v1773_v6, %v1775_v7 }
 0x10c   :  { %v1779_v10 = vpop.eup %1778  ;;  %v1425_v11 = vadd.f32 1.0, %v1777_v8 }
 0x10d   :  { %v1781_v51 = vpop.eup %1780  ;;  %v1426_v12 = vadd.f32 1.0, %v1779_v10  ;;  %v2372_v15 = vrot.slane %v1274_v9, %v1950_v40 }
 0x10e   :  { %v1783_v13 = vpop.eup %1782  ;;  %1788 = vrcp.f32 %v1425_v11 }
 0x10f   :  { %v1785_v14 = vpop.eup %1784  ;;  %1790 = vrcp.f32 %v1426_v12  ;;  %v1275_v16 = vcombine.low %v1781_v51, %v1783_v13 }
 0x110   :  { %v1787_v17 = vpop.eup %1786  ;;  %v1427_v18 = vadd.f32 1.0, %v1785_v14 }
 0x111   :  { %v1291_v19 = vrot.slane %v1275_v16, %v1950_v40  ;;  %v1428_v20 = vadd.f32 1.0, %v1787_v17 }
 0x112   :  { %1792 = vrcp.f32 %v1427_v18 }
 0x113   :  { %v1306_v21 = vcombine.low %v2372_v15, %v1291_v19  ;;  %1794 = vrcp.f32 %v1428_v20 }
 0x115   :  { %v1314_v3 = vrot.slane %v1306_v21, %v1950_v40 }
 0x118   :  { %v1789_v22 = vpop.eup %1788 }
 0x119   :  { %v1791_v23 = vpop.eup %1790 }
 0x11a   :  { %v1489_v24 = vcombine.low %v1789_v22, %v1791_v23 }
 0x11c   :  { %v1793_v25 = vpop.eup %1792  ;;  %v2377_v28 = vrot.slane %v1489_v24, %v1950_v40 }
 0x11d   :  { %v1795_v27 = vpop.eup %1794 }
 0x11e   :  { %v1490_v29 = vcombine.low %v1793_v25, %v1795_v27 }
 0x120   :  { %v2380_v30 = vrot.slane %v1490_v29, %v1950_v40  ;;  %v1030_v31 = vpop.f32.mrb[4].mxu0  ;;  %v1071_v33 = vpop.f32.mrb[4].mxu1 }
 0x121   :  { %v1031_v32 = vadd.f32 %v1030_v31, %v2365_v54  ;;  %v1032_v34 = vpop.f32.mrb[5].mxu0  ;;  %v1072_v36 = vadd.f32 %v1071_v33, %v2365_v54  ;;  %v1073_v38 = vpop.f32.mrb[5].mxu1 }
 0x122   :  { %v1521_v35 = vcombine.high %v2377_v28, %v2380_v30  ;;  %v1033_v37 = vadd.f32 %v1032_v34, %v2365_v54  ;;  %v1034_v39 = vpop.f32.mrb[6].mxu0  ;;  %v1074_v42 = vadd.f32 %v1073_v38, %v2365_v54  ;;  %v1075_v43 = vpop.f32.mrb[6].mxu1 }
 0x123   :  { %1796 = vtanh.f32 %v1031_v32  ;;  %v1755_v41 = vmul.f32 -1.442695, %v1031_v32  ;;  %v1035_v44 = vpop.f32.mrb[7].mxu0  ;;  %v1757_v45 = vmul.f32 -1.442695, %v1072_v36  ;;  %v1076_v47 = vpop.f32.mrb[7].mxu1 }
 0x124   :  { %1798 = vtanh.f32 %v1072_v36  ;;  %v1756_v46 = vmul.f32 -1.442695, %v1033_v37  ;;  %v1758_v48 = vmul.f32 -1.442695, %v1074_v42  ;;  %v1529_v22 = vrot.slane %v1521_v35, %v1950_v40 }
 0x125   :  { %1800 = vpow2.f32 %v1755_v41 }
 0x126   :  { %1802 = vpow2.f32 %v1757_v45 }
 0x127   :  { %1804 = vtanh.f32 %v1033_v37 }
 0x128   :  { %1806 = vpow2.f32 %v1756_v46 }
 0x129   :  { %1808 = vtanh.f32 %v1074_v42 }
 0x12a   :  { %1810 = vpow2.f32 %v1758_v48 }
 0x12d   :  { %v1797_v49 = vpop.eup %1796 }
 0x12e   :  { %v1799_v50 = vpop.eup %1798 }
 0x12f   :  { %v1801_v52 = vpop.eup %1800 }
 0x130   :  { %v1803_v53 = vpop.eup %1802  ;;  %v1429_v55 = vadd.f32 1.0, %v1801_v52 }
 0x131   :  { %v1805_v56 = vpop.eup %1804  ;;  %v1431_v57 = vadd.f32 1.0, %v1803_v53 }
 0x132   :  { %v1807_v58 = vpop.eup %1806  ;;  %v1276_v59 = vcombine.low %v1797_v49, %v1805_v56  ;;  %1812 = vrcp.f32 %v1429_v55 }
 0x133   :  { %v1809_v60 = vpop.eup %1808  ;;  %v1430_v61 = vadd.f32 1.0, %v1807_v58  ;;  %1814 = vrcp.f32 %v1431_v57 }
 0x134   :  { %v1811_v62 = vpop.eup %1810  ;;  %v1298_v63 = vrot.slane %v1276_v59, %v1950_v40  ;;  %v1277_v0 = vcombine.low %v1799_v50, %v1809_v60 }
 0x135   :  { %1816 = vrcp.f32 %v1430_v61  ;;  %v1432_v1 = vadd.f32 1.0, %v1811_v62 }
 0x136   :  { %v1305_v2 = vrot.slane %v1277_v0, %v1950_v40 }
 0x137   :  { %1818 = vrcp.f32 %v1432_v1 }
 0x138   :  { %v1307_v26 = vcombine.low %v1298_v63, %v1305_v2 }
 0x13a   :  { %v1321_v4 = vrot.slane %v1307_v26, %v1950_v40 }
 0x13c   :  { %v1322_v5 = vcombine.low %v1314_v3, %v1321_v4  ;;  %v1813_v6 = vpop.eup %1812 }
 0x13d   :  { %v1815_v7 = vpop.eup %1814 }
 0x13e   :  { %1374 = vst [vmem:[%s2437_s3] ss:$2 sm:$0xff] %v1322_v5 }
 0x13f   :  { %v1817_v8 = vpop.eup %1816 }
 0x140   :  { %v1491_v9 = vcombine.low %v1813_v6, %v1817_v8 }
 0x141   :  { %v1819_v10 = vpop.eup %1818 }
 0x142   :  { %v1513_v11 = vrot.slane %v1491_v9, %v1950_v40  ;;  %v1492_v51 = vcombine.low %v1815_v7, %v1819_v10 }
 0x144   :  { %v1520_v12 = vrot.slane %v1492_v51, %v1950_v40  ;;  %v1112_v13 = vpop.f32.mrb[8].mxu0  ;;  %v1153_v15 = vpop.f32.mrb[8].mxu1 }
 0x145   :  { %v1113_v14 = vadd.f32 %v1112_v13, %v2365_v54  ;;  %v1114_v16 = vpop.f32.mrb[9].mxu0  ;;  %v1154_v18 = vadd.f32 %v1153_v15, %v2365_v54  ;;  %v1155_v20 = vpop.f32.mrb[9].mxu1 }
 0x146   :  { %v1522_v17 = vcombine.high %v1513_v11, %v1520_v12  ;;  %v1115_v19 = vadd.f32 %v1114_v16, %v2365_v54  ;;  %v1116_v21 = vpop.f32.mrb[10].mxu0  ;;  %v1156_v24 = vadd.f32 %v1155_v20, %v2365_v54  ;;  %v1157_v25 = vpop.f32.mrb[10].mxu1 }
 0x147   :  { %1820 = vtanh.f32 %v1113_v14  ;;  %v1759_v23 = vmul.f32 -1.442695, %v1113_v14  ;;  %v1117_v27 = vpop.f32.mrb[11].mxu0  ;;  %v1761_v31 = vmul.f32 -1.442695, %v1154_v18  ;;  %v1158_v33 = vpop.f32.mrb[11].mxu1 }
 0x148   :  { %v1536_v29 = vrot.slane %v1522_v17, %v1950_v40  ;;  %1822 = vtanh.f32 %v1154_v18  ;;  %v1760_v32 = vmul.f32 -1.442695, %v1115_v19  ;;  %v1762_v36 = vmul.f32 -1.442695, %v1156_v24 }
 0x149   :  { %1824 = vpow2.f32 %v1759_v23 }
 0x14a   :  { %v1537_v34 = vcombine.low %v1529_v22, %v1536_v29  ;;  %1826 = vpow2.f32 %v1761_v31 }
 0x14b   :  { %1828 = vtanh.f32 %v1115_v19 }
 0x14c   :  { %1767 = vst [vmem:[%s2437_s3 + $0x1] ss:$2 sm:$0xff] %v1537_v34  ;;  %1830 = vpow2.f32 %v1760_v32 }
 0x14d   :  { %1832 = vtanh.f32 %v1156_v24 }
 0x14e   :  { %1834 = vpow2.f32 %v1762_v36 }
 0x151   :  { %v1821_v28 = vpop.eup %1820 }
 0x152   :  { %v1823_v30 = vpop.eup %1822 }
 0x153   :  { %v1825_v35 = vpop.eup %1824 }
 0x154   :  { %v1827_v37 = vpop.eup %1826  ;;  %v1433_v38 = vadd.f32 1.0, %v1825_v35 }
 0x155   :  { %v1829_v39 = vpop.eup %1828  ;;  %v1435_v41 = vadd.f32 1.0, %v1827_v37 }
 0x156   :  { %v1831_v42 = vpop.eup %1830  ;;  %v1323_v43 = vcombine.low %v1821_v28, %v1829_v39  ;;  %1836 = vrcp.f32 %v1433_v38 }
 0x157   :  { %v1833_v44 = vpop.eup %1832  ;;  %v1434_v45 = vadd.f32 1.0, %v1831_v42  ;;  %1838 = vrcp.f32 %v1435_v41 }
 0x158   :  { %v1835_v46 = vpop.eup %1834  ;;  %v1333_v47 = vrot.slane %v1323_v43, %v1950_v40  ;;  %v1324_v48 = vcombine.low %v1823_v30, %v1833_v44 }
 0x159   :  { %1840 = vrcp.f32 %v1434_v45  ;;  %v1436_v49 = vadd.f32 1.0, %v1835_v46 }
 0x15a   :  { %v1340_v50 = vrot.slane %v1324_v48, %v1950_v40 }
 0x15b   :  { %1842 = vrcp.f32 %v1436_v49 }
 0x15c   :  { %v1355_v52 = vcombine.low %v1333_v47, %v1340_v50 }
 0x15e   :  { %v1363_v32 = vrot.slane %v1355_v52, %v1950_v40 }
 0x160   :  { %v1837_v53 = vpop.eup %1836 }
 0x161   :  { %v1839_v55 = vpop.eup %1838 }
 0x163   :  { %v1841_v56 = vpop.eup %1840 }
 0x164   :  { %v1538_v57 = vcombine.low %v1837_v53, %v1841_v56 }
 0x165   :  { %v1843_v58 = vpop.eup %1842 }
 0x166   :  { %v2412_v59 = vrot.slane %v1538_v57, %v1950_v40  ;;  %v1539_v60 = vcombine.low %v1839_v55, %v1843_v58 }
 0x168   :  { %v1555_v61 = vrot.slane %v1539_v60, %v1950_v40  ;;  %v1194_v62 = vpop.f32.mrb[12].mxu0  ;;  %v1235_v0 = vpop.f32.mrb[12].mxu1 }
 0x169   :  { %v1195_v63 = vadd.f32 %v1194_v62, %v2365_v54  ;;  %v1196_v1 = vpop.f32.mrb[13].mxu0  ;;  %v1236_v26 = vadd.f32 %v1235_v0, %v2365_v54  ;;  %v1237_v4 = vpop.f32.mrb[13].mxu1 }
 0x16a   :  { %v1570_v2 = vcombine.high %v2412_v59, %v1555_v61  ;;  %v1197_v3 = vadd.f32 %v1196_v1, %v2365_v54  ;;  %v1198_v5 = vpop.f32.mrb[14].mxu0  ;;  %v1238_v7 = vadd.f32 %v1237_v4, %v2365_v54  ;;  %v1239_v8 = vpop.f32.mrb[14].mxu1 }
 0x16b   :  { %1844 = vtanh.f32 %v1195_v63  ;;  %v1763_v6 = vmul.f32 -1.442695, %v1195_v63  ;;  %v1199_v9 = vpop.f32.mrb[15].mxu0  ;;  %v1765_v10 = vmul.f32 -1.442695, %v1236_v26  ;;  %v1240_v51 = vpop.f32.mrb[15].mxu1 }
 0x16c   :  { %1846 = vtanh.f32 %v1236_v26  ;;  %v1764_v11 = vmul.f32 -1.442695, %v1197_v3  ;;  %v1766_v12 = vmul.f32 -1.442695, %v1238_v7  ;;  %v1578_v43 = vrot.slane %v1570_v2, %v1950_v40 }
 0x16d   :  { %1848 = vpow2.f32 %v1763_v6 }
 0x16e   :  { %1850 = vpow2.f32 %v1765_v10 }
 0x16f   :  { %1852 = vtanh.f32 %v1197_v3 }
 0x170   :  { %1854 = vpow2.f32 %v1764_v11 }
 0x171   :  { %1856 = vtanh.f32 %v1238_v7 }
 0x172   :  { %1858 = vpow2.f32 %v1766_v12 }
 0x175   :  { %v1845_v13 = vpop.eup %1844 }
 0x176   :  { %v1847_v14 = vpop.eup %1846 }
 0x177   :  { %v1849_v15 = vpop.eup %1848 }
 0x178   :  { %v1851_v16 = vpop.eup %1850  ;;  %v1437_v17 = vadd.f32 1.0, %v1849_v15 }
 0x179   :  { %v1853_v18 = vpop.eup %1852  ;;  %v1439_v54 = vadd.f32 1.0, %v1851_v16 }
 0x17a   :  { %v1855_v19 = vpop.eup %1854  ;;  %v1325_v20 = vcombine.low %v1845_v13, %v1853_v18  ;;  %1860 = vrcp.f32 %v1437_v17 }
 0x17b   :  { %v1857_v21 = vpop.eup %1856  ;;  %v1438_v22 = vadd.f32 1.0, %v1855_v19  ;;  %1862 = vrcp.f32 %v1439_v54 }
 0x17c   :  { %v1859_v23 = vpop.eup %1858  ;;  %v1347_v24 = vrot.slane %v1325_v20, %v1950_v40  ;;  %v1326_v25 = vcombine.low %v1847_v14, %v1857_v21 }
 0x17d   :  { %1864 = vrcp.f32 %v1438_v22  ;;  %v1440_v27 = vadd.f32 1.0, %v1859_v23 }
 0x17e   :  { %v1354_v29 = vrot.slane %v1326_v25, %v1950_v40 }
 0x17f   :  { %1866 = vrcp.f32 %v1440_v27 }
 0x180   :  { %v1356_v31 = vcombine.low %v1347_v24, %v1354_v29 }
 0x182   :  { %v1370_v33 = vrot.slane %v1356_v31, %v1950_v40 }
 0x184   :  { %v1371_v34 = vcombine.low %v1363_v32, %v1370_v33  ;;  %v1861_v36 = vpop.eup %1860 }
 0x185   :  { %v1863_v28 = vpop.eup %1862 }
 0x186   :  { %1750 = vst [vmem:[%s2437_s3 + $0x10] ss:$2 sm:$0xff] %v1371_v34 }
 0x187   :  { %v1865_v30 = vpop.eup %1864 }
 0x188   :  { %v1540_v35 = vcombine.low %v1861_v36, %v1865_v30 }
 0x189   :  { %v1867_v37 = vpop.eup %1866 }
 0x18a   :  { %v1562_v38 = vrot.slane %v1540_v35, %v1950_v40  ;;  %v1541_v39 = vcombine.low %v1863_v28, %v1867_v37 }
 0x18c   :  { %v1569_v41 = vrot.slane %v1541_v39, %v1950_v40 }
 0x18e   :  { %v1571_v42 = vcombine.high %v1562_v38, %v1569_v41 }
 0x190   :  { %v1585_v44 = vrot.slane %v1571_v42, %v1950_v40 }
 0x192   :  { %v1586_v45 = vcombine.low %v1578_v43, %v1585_v44 }
 0x194   :  { %1768 = vst [vmem:[%s2437_s3 + $0x11] ss:$2 sm:$0xff] %v1586_v45 }

// kernel: squeeze.2
= control target key start
LH: loop header
LB: loop body
LE: loop exit
PB: predicated region body
PF: predicated region fallthrough
CT: control target
= control target key end

     0   :  { %vm4_vm0 = vcmask 261120   ;;  %s93_s10 = smov 96   ;;  %s132_s0 = inlined_call_operand.vmem [shape: f32[2048], index: 0, kind: input, shape index: {}]   ;;  %s133_s1 = inlined_call_operand.hbm [shape: f32[2,1,32,32], index: 1, kind: output, shape index: {}]  }
   0x1   :  { %v24_v0 = vld [vmem:[%s132_s0] sm:$0xff]   ;;  %v62_v1 = vld [vmem:[%s132_s0 + $0x8] sm:$0xff]   ;;  %s92_s0 = smov 64  }
   0x2   :  { %25 = vrot.lane.b32.xlu1 %v24_v0, %s92_s0  ;;  %12 = vrot.lane.b32.xlu0 %v24_v0, %s93_s10 }
   0x3   :  { %2 = vsyncpa [#allocation1], 0  ;;  %5 = vst.msk [vmem:[#allocation0] ss:$4 sm:$0xff] %vm4_vm0, %v24_v0   ;;  %s94_s11 = smov 32   ;;  %s95_s12 = smov [#allocation0]  }
   0x4   :  { %10 = vst.msk [vmem:[#allocation0 + $0x20] ss:$4 sm:$0xff] %vm4_vm0, %v62_v1   ;;  %s54_s13 = sshll.u32 %s95_s12, 4  ;;  %s55_s13 = int_to_ptr.vmem [resolvable:$true] %s54_s13 }
   0x5   :  { %s68_s14 = scalar_lea.vmem %s55_s13, 1024  ;;  %p73_p1 = scmp.lt.s32.totalorder %s55_s13, %s55_s13 }
   0x6   :  { %32 = vrot.lane.b32.xlu1 %v62_v1, %s92_s0  ;;  %19 = vrot.lane.b32.xlu0 %v62_v1, %s93_s10  ;;  %p69_p0 = scmp.ne.s32.totalorder %s55_s13, %s68_s14  ;;  %p74_p2 = scmp.lt.s32.totalorder %s68_s14, %s68_s14 }
   0x8   :  { %p75_p3 = por %p74_p2, %p73_p1 }
   0xa   :  { %45 = vrot.lane.b32.xlu1 %v62_v1, %s94_s11  ;;  %38 = vrot.lane.b32.xlu0 %v24_v0, %s94_s11  ;;  %p76_p4 = pnand %p75_p3, %p69_p0 }
  0x74   :  { %v26_v2 = vpop.permute.xlu1 %25   ;;  %v13_v3 = vpop.permute.xlu0 %12  }
  0x75   :  { %29 = vst.msk [vmem:[#allocation0 + $0x2] ss:$4 sm:$0xff] %vm4_vm0, %v26_v2   ;;  %16 = vst.msk [vmem:[#allocation0 + $0x1] ss:$4 sm:$0xff] %vm4_vm0, %v13_v3  }
  0x78   :  { %v33_v4 = vpop.permute.xlu1 %32   ;;  %v20_v5 = vpop.permute.xlu0 %19  }
  0x79   :  { %36 = vst.msk [vmem:[#allocation0 + $0x22] ss:$4 sm:$0xff] %vm4_vm0, %v33_v4   ;;  %23 = vst.msk [vmem:[#allocation0 + $0x21] ss:$4 sm:$0xff] %vm4_vm0, %v20_v5  }
  0x7c   :  { %v46_v6 = vpop.permute.xlu1 %45   ;;  %v39_v7 = vpop.permute.xlu0 %38  }
  0x7d   :  { %49 = vst.msk [vmem:[#allocation0 + $0x23] ss:$4 sm:$0xff] %vm4_vm0, %v46_v6   ;;  %42 = vst.msk [vmem:[#allocation0 + $0x3] ss:$4 sm:$0xff] %vm4_vm0, %v39_v7  }
  0x7e   :  { %79 = shalt.err (!%p76_p4)
}
  0x7f   :  { %s80_s17 = scalar_lea.hbm %s133_s1, 1024 }
  0x80   :  { %p81_p5 = scmp.ne.s32.totalorder %s133_s1, %s80_s17  ;;  %p84_p6 = scmp.lt.u32.totalorder %s80_s17, %s133_s1 }
  0x82   :  { %p86_p7 = pnand %p84_p6, %p81_p5 }
  0x84   :  { %89 = shalt.err (!%p86_p7)
}
  0x85   :  { %57 = dma.vmem_to_hbm [thread:$0]  %s55_s13, 1024, %s133_s1, [#allocation1]  }
  0x86   :  { %90 = dma.done.wait [#allocation1], 1024  }
  0x87   :  { %91 = vsyncadd [#allocation1], 4294966272 }
  0x88   :  { %59 = vsyncpa [#allocation1], 1 }

</bundles_post_ra>
